<compile_context>
chip_gen: v7x
topology: tpu7x:2x2x1
jax: 0.10.0
libtpu: 0.0.40
codegen_flags: <defaults>
</compile_context>

<pallas_src>
import functools
from math import sqrt

import jax
import jax.numpy as jnp
from jax import lax
from jax.experimental import pallas as pl
from jax.experimental.pallas import tpu as pltpu

FEAT = 64        # VDSR feature width
N_BLOCKS = 18    # number of Conv_ReLU_Blocks


def _vdsr_kernel(xpad_ref, w_in_ref, w_res_ref, w_out_ref, o_ref,
                 buf_a, buf_b, *, H, W, n_layers):
    """Whole VDSR forward for one image (one grid step).

    xpad_ref : (1, H+2, W+2)          f32   zero-padded single-channel input
    w_in_ref : (3, 3, 64)             f32   input conv  (1 -> 64)
    w_res_ref: (n_layers*3, 192, 64)  bf16  residual convs; row = 3*layer + dy,
                                            K axis = (dx, cin) flattened
    w_out_ref: (3, 3, 64)             f32   output conv (64 -> 1)
    o_ref    : (1, H, W)              f32   conv-stack output + residual
    buf_a/b  : (H+2, W+2, 64)         bf16  ping-pong padded activation scratch
    """
    C = w_in_ref.shape[-1]

    # Zero both padded buffers: interiors are overwritten every layer, the 1-pixel
    # halo stays 0 forever => implements padding=1 for all 20 convs, no jnp.pad.
    buf_a[...] = jnp.zeros_like(buf_a)
    buf_b[...] = jnp.zeros_like(buf_b)

    xpad = xpad_ref[0]                                       # (H+2, W+2) f32

    # ---- input conv (Cin=1) + ReLU: VPU broadcast-FMA (K=1 matmul wastes MXU) ---
    w_in = w_in_ref[...]                                     # (3, 3, 64) f32
    acc0 = jnp.zeros((H, W, C), jnp.float32)
    for dy in range(3):
        for dx in range(3):
            patch = xpad[dy:dy + H, dx:dx + W]               # (H, W)
            acc0 = acc0 + patch[:, :, None] * w_in[dy, dx][None, None, :]
    buf_a[1:H + 1, 1:W + 1, :] = jnp.maximum(acc0, 0.0).astype(buf_a.dtype)

    # ---- one 64->64 conv + ReLU between two padded VMEM buffers -----------------
    def conv_relu(src_ref, dst_ref, li):
        x_l = src_ref[...]                                   # (H+2, W+2, 64) bf16
        acc = jnp.zeros((H * W, C), jnp.float32)
        for dy in range(3):
            # concat the 3 dx taps along channels -> one K=192 MXU push per dy
            cat = jnp.concatenate(
                [x_l[dy:dy + H, 0:W, :],
                 x_l[dy:dy + H, 1:W + 1, :],
                 x_l[dy:dy + H, 2:W + 2, :]], axis=-1)       # (H, W, 192) bf16
            acc = acc + jnp.dot(cat.reshape(H * W, 3 * C),
                                w_res_ref[3 * li + dy],      # (192, 64) bf16
                                preferred_element_type=jnp.float32)
        dst_ref[1:H + 1, 1:W + 1, :] = (
            jnp.maximum(acc, 0.0).reshape(H, W, C).astype(dst_ref.dtype))

    # ---- 18 residual Conv+ReLU layers; weights stay VMEM-resident, activations
    #      ping-pong between the two scratch buffers (zero HBM traffic) -----------
    @pl.loop(0, n_layers // 2)
    def _(k):
        conv_relu(buf_a, buf_b, 2 * k)
        conv_relu(buf_b, buf_a, 2 * k + 1)
    # n_layers is even -> final activation ends up back in buf_a.

    # ---- output conv (Cout=1, no ReLU): VPU FMA + one lane reduction ------------
    w_out = w_out_ref[...]                                   # (3, 3, 64) f32
    xf = buf_a[...].astype(jnp.float32)                      # (H+2, W+2, 64)
    acc_c = jnp.zeros((H, W, C), jnp.float32)
    for dy in range(3):
        for dx in range(3):
            acc_c = acc_c + xf[dy:dy + H, dx:dx + W, :] * w_out[dy, dx][None, None, :]
    out2d = jnp.sum(acc_c, axis=-1)                          # (H, W)

    # ---- fused residual add; lane-dense (1, H, W) store (no trailing C=1) -------
    o_ref[0] = (out2d + xpad[1:H + 1, 1:W + 1]).astype(o_ref.dtype)


def _vdsr_pallas(xpad, w_in, w_res_flat, w_out, *, H, W, n_layers):
    N = xpad.shape[0]
    C = FEAT
    kernel = functools.partial(_vdsr_kernel, H=H, W=W, n_layers=n_layers)
    return pl.pallas_call(
        kernel,
        out_shape=jax.ShapeDtypeStruct((N, H, W), jnp.float32),
        grid=(N,),
        in_specs=[
            pl.BlockSpec((1, H + 2, W + 2), lambda n: (n, 0, 0)),
            pl.BlockSpec((3, 3, C), lambda n: (0, 0, 0)),
            pl.BlockSpec((n_layers * 3, 3 * C, C), lambda n: (0, 0, 0)),
            pl.BlockSpec((3, 3, C), lambda n: (0, 0, 0)),
        ],
        out_specs=pl.BlockSpec((1, H, W), lambda n: (n, 0, 0)),
        scratch_shapes=[
            pltpu.VMEM((H + 2, W + 2, C), jnp.bfloat16),     # ping
            pltpu.VMEM((H + 2, W + 2, C), jnp.bfloat16),     # pong
        ],
        compiler_params=pltpu.CompilerParams(
            dimension_semantics=("parallel",),
            vmem_limit_bytes=32 * 1024 * 1024),
    )(xpad, w_in, w_res_flat, w_out)


def init_vdsr_params(key, n_blocks=N_BLOCKS, feat=FEAT):
    """Deterministic He-style init (VDSR paper: N(0, sqrt(2/n)))."""
    k_in, k_res, k_out = jax.random.split(key, 3)
    params = {
        "input": jax.random.normal(k_in, (3, 3, 1, feat), jnp.float32)
                 * sqrt(2.0 / (3 * 3 * 1)),
        "res": jax.random.normal(k_res, (n_blocks, 3, 3, feat, feat), jnp.float32)
               * sqrt(2.0 / (3 * 3 * feat)),
        "output": jax.random.normal(k_out, (3, 3, feat, 1), jnp.float32)
                  * sqrt(2.0 / (3 * 3 * feat)),
    }
    return params


def vdsr_forward(params, x_nchw):
    """Forward pass matching the PyTorch VDSR module. x_nchw: (N, 1, H, W) f32."""
    N, Cin, H, W = x_nchw.shape
    assert Cin == 1, "VDSR(rgb=False): single input channel"
    n_layers = params["res"].shape[0]
    assert n_layers % 2 == 0

    x = x_nchw[:, 0, :, :]                                   # (N, H, W)
    # Pad the single-channel input ONCE (tiny); all 64-channel padding is done in
    # the kernel's VMEM scratch halo.
    xpad = jnp.pad(x, ((0, 0), (1, 1), (1, 1)))

    w_in = params["input"].reshape(3, 3, FEAT)               # f32, VPU path
    # (L,3,3,C,C) -> (L*3, 3*C, C): rows = (layer, dy), K = (dx, cin); bf16 for MXU.
    w_res = params["res"].reshape(n_layers * 3, 3 * FEAT, FEAT).astype(jnp.bfloat16)
    w_out = params["output"].reshape(3, 3, FEAT)             # f32, VPU path

    out = _vdsr_pallas(xpad, w_in, w_res, w_out, H=H, W=W, n_layers=n_layers)
    return out[:, None, :, :]                                # (N, 1, H, W)


# ---------------- pure-JAX reference (f32) for a sanity check --------------------
def _conv_ref(x, w):
    return lax.conv_general_dilated(
        x, w, window_strides=(1, 1), padding=((1, 1), (1, 1)),
        dimension_numbers=("NCHW", "HWIO", "NCHW"))


def vdsr_reference(params, x_nchw):
    out = jax.nn.relu(_conv_ref(x_nchw, params["input"]))
    for i in range(params["res"].shape[0]):
        out = jax.nn.relu(_conv_ref(out, params["res"][i]))
    out = _conv_ref(out, params["output"])
    return out + x_nchw


if __name__ == "__main__":
    key = jax.random.PRNGKey(0)
    k_params, k_x = jax.random.split(key)
    params = init_vdsr_params(k_params)

    # Grayscale input (rgb=False): small shape N=2, C=1, H=W=16.
    x = jax.random.normal(k_x, (2, 1, 16, 16), jnp.float32)

    fwd = jax.jit(vdsr_forward)
    out = fwd(params, x)
    jax.block_until_ready(out)

    assert out.shape == x.shape, (out.shape, x.shape)
    assert out.dtype == jnp.float32

    # Loose tolerance: kernel uses bf16 weights/activations in the 18 residual
    # layers (f32 accumulation), reference is full f32.
    ref = jax.jit(vdsr_reference)(params, x)
    err = float(jnp.max(jnp.abs(out - ref)))
    scale = float(jnp.max(jnp.abs(ref)))
    assert err <= 0.05 * scale + 0.05, (err, scale)

    print("KERNEL_OK")
</pallas_src>

<mosaic_0001>
module attributes {stable_mosaic.version = 11 : i64} {
  func.func @_vdsr_kernel(%arg0: i32, %arg1: memref<1x18x18xf32, #tpu.memory_space<vmem>>, %arg2: memref<3x3x64xf32, #tpu.memory_space<vmem>>, %arg3: memref<54x192x64xbf16, #tpu.memory_space<vmem>>, %arg4: memref<3x3x64xf32, #tpu.memory_space<vmem>>, %arg5: memref<1x16x16xf32, #tpu.memory_space<vmem>>, %arg6: memref<18x18x64xbf16, #tpu.memory_space<vmem>>, %arg7: memref<18x18x64xbf16, #tpu.memory_space<vmem>>) attributes {dimension_semantics = [#tpu.dimension_semantics<parallel>], iteration_bounds = array<i64: 2>, scalar_prefetch = 0 : i64, scratch_operands = 2 : i64, tpu.core_type = #tpu.core_type<tc>, window_params = [{transform_indices = @transform_0, window_bounds = array<i64: 1, 18, 18>}, {pipeline_mode = #tpu.pipeline_mode<synchronous>, transform_indices = @transform_1, window_bounds = array<i64: 3, 3, 64>}, {pipeline_mode = #tpu.pipeline_mode<synchronous>, transform_indices = @transform_2, window_bounds = array<i64: 54, 192, 64>}, {pipeline_mode = #tpu.pipeline_mode<synchronous>, transform_indices = @transform_3, window_bounds = array<i64: 3, 3, 64>}, {transform_indices = @transform_4, window_bounds = array<i64: 1, 16, 16>}]} {
    %cst = arith.constant 0.000000e+00 : bf16
    %0 = vector.broadcast %cst : bf16 to vector<18x18x64xbf16>
    %c0 = arith.constant 0 : index
    %c0_0 = arith.constant 0 : index
    %c0_1 = arith.constant 0 : index
    %1 = vector.load %arg6[%c0, %c0_0, %c0_1] : memref<18x18x64xbf16, #tpu.memory_space<vmem>>, vector<18x18x64xbf16>
    tpu.vector_store %arg6[%c0, %c0_0, %c0_1], %0 {strides = array<i32>} : memref<18x18x64xbf16, #tpu.memory_space<vmem>>, vector<18x18x64xbf16>,
    %cst_2 = arith.constant 0.000000e+00 : bf16
    %2 = vector.broadcast %cst_2 : bf16 to vector<18x18x64xbf16>
    %c0_3 = arith.constant 0 : index
    %c0_4 = arith.constant 0 : index
    %c0_5 = arith.constant 0 : index
    %3 = vector.load %arg7[%c0_3, %c0_4, %c0_5] : memref<18x18x64xbf16, #tpu.memory_space<vmem>>, vector<18x18x64xbf16>
    tpu.vector_store %arg7[%c0_3, %c0_4, %c0_5], %2 {strides = array<i32>} : memref<18x18x64xbf16, #tpu.memory_space<vmem>>, vector<18x18x64xbf16>,
    %c0_6 = arith.constant 0 : index
    %c0_7 = arith.constant 0 : index
    %c0_8 = arith.constant 0 : index
    %4 = vector.load %arg1[%c0_6, %c0_7, %c0_8] : memref<1x18x18xf32, #tpu.memory_space<vmem>>, vector<1x18x18xf32>
    %5 = vector.shape_cast %4 : vector<1x18x18xf32> to vector<18x18xf32>
    %c0_9 = arith.constant 0 : index
    %c0_10 = arith.constant 0 : index
    %c0_11 = arith.constant 0 : index
    %6 = vector.load %arg2[%c0_9, %c0_10, %c0_11] : memref<3x3x64xf32, #tpu.memory_space<vmem>>, vector<3x3x64xf32>
    %cst_12 = arith.constant 0.000000e+00 : f32
    %7 = vector.broadcast %cst_12 : f32 to vector<16x16x64xf32>
    %8 = vector.extract_strided_slice %5 {offsets = [0, 0], sizes = [16, 16], strides = [1, 1]} : vector<18x18xf32> to vector<16x16xf32>
    %9 = vector.shape_cast %8 : vector<16x16xf32> to vector<16x16x1xf32>
    %10 = vector.extract_strided_slice %6 {offsets = [0, 0, 0], sizes = [1, 1, 64], strides = [1, 1, 1]} : vector<3x3x64xf32> to vector<1x1x64xf32>
    %11 = vector.shape_cast %10 : vector<1x1x64xf32> to vector<64xf32>
    %12 = vector.shape_cast %11 : vector<64xf32> to vector<1x1x64xf32>
    %13 = vector.broadcast %9 : vector<16x16x1xf32> to vector<16x16x64xf32>
    %14 = vector.broadcast %12 : vector<1x1x64xf32> to vector<16x16x64xf32>
    %15 = arith.mulf %13, %14 : vector<16x16x64xf32>
    %16 = arith.addf %7, %15 : vector<16x16x64xf32>
    %17 = vector.extract_strided_slice %5 {offsets = [0, 1], sizes = [16, 16], strides = [1, 1]} : vector<18x18xf32> to vector<16x16xf32>
    %18 = vector.shape_cast %17 : vector<16x16xf32> to vector<16x16x1xf32>
    %19 = vector.extract_strided_slice %6 {offsets = [0, 1, 0], sizes = [1, 1, 64], strides = [1, 1, 1]} : vector<3x3x64xf32> to vector<1x1x64xf32>
    %20 = vector.shape_cast %19 : vector<1x1x64xf32> to vector<64xf32>
    %21 = vector.shape_cast %20 : vector<64xf32> to vector<1x1x64xf32>
    %22 = vector.broadcast %18 : vector<16x16x1xf32> to vector<16x16x64xf32>
    %23 = vector.broadcast %21 : vector<1x1x64xf32> to vector<16x16x64xf32>
    %24 = arith.mulf %22, %23 : vector<16x16x64xf32>
    %25 = arith.addf %16, %24 : vector<16x16x64xf32>
    %26 = vector.extract_strided_slice %5 {offsets = [0, 2], sizes = [16, 16], strides = [1, 1]} : vector<18x18xf32> to vector<16x16xf32>
    %27 = vector.shape_cast %26 : vector<16x16xf32> to vector<16x16x1xf32>
    %28 = vector.extract_strided_slice %6 {offsets = [0, 2, 0], sizes = [1, 1, 64], strides = [1, 1, 1]} : vector<3x3x64xf32> to vector<1x1x64xf32>
    %29 = vector.shape_cast %28 : vector<1x1x64xf32> to vector<64xf32>
    %30 = vector.shape_cast %29 : vector<64xf32> to vector<1x1x64xf32>
    %31 = vector.broadcast %27 : vector<16x16x1xf32> to vector<16x16x64xf32>
    %32 = vector.broadcast %30 : vector<1x1x64xf32> to vector<16x16x64xf32>
    %33 = arith.mulf %31, %32 : vector<16x16x64xf32>
    %34 = arith.addf %25, %33 : vector<16x16x64xf32>
    %35 = vector.extract_strided_slice %5 {offsets = [1, 0], sizes = [16, 16], strides = [1, 1]} : vector<18x18xf32> to vector<16x16xf32>
    %36 = vector.shape_cast %35 : vector<16x16xf32> to vector<16x16x1xf32>
    %37 = vector.extract_strided_slice %6 {offsets = [1, 0, 0], sizes = [1, 1, 64], strides = [1, 1, 1]} : vector<3x3x64xf32> to vector<1x1x64xf32>
    %38 = vector.shape_cast %37 : vector<1x1x64xf32> to vector<64xf32>
    %39 = vector.shape_cast %38 : vector<64xf32> to vector<1x1x64xf32>
    %40 = vector.broadcast %36 : vector<16x16x1xf32> to vector<16x16x64xf32>
    %41 = vector.broadcast %39 : vector<1x1x64xf32> to vector<16x16x64xf32>
    %42 = arith.mulf %40, %41 : vector<16x16x64xf32>
    %43 = arith.addf %34, %42 : vector<16x16x64xf32>
    %44 = vector.extract_strided_slice %5 {offsets = [1, 1], sizes = [16, 16], strides = [1, 1]} : vector<18x18xf32> to vector<16x16xf32>
    %45 = vector.shape_cast %44 : vector<16x16xf32> to vector<16x16x1xf32>
    %46 = vector.extract_strided_slice %6 {offsets = [1, 1, 0], sizes = [1, 1, 64], strides = [1, 1, 1]} : vector<3x3x64xf32> to vector<1x1x64xf32>
    %47 = vector.shape_cast %46 : vector<1x1x64xf32> to vector<64xf32>
    %48 = vector.shape_cast %47 : vector<64xf32> to vector<1x1x64xf32>
    %49 = vector.broadcast %45 : vector<16x16x1xf32> to vector<16x16x64xf32>
    %50 = vector.broadcast %48 : vector<1x1x64xf32> to vector<16x16x64xf32>
    %51 = arith.mulf %49, %50 : vector<16x16x64xf32>
    %52 = arith.addf %43, %51 : vector<16x16x64xf32>
    %53 = vector.extract_strided_slice %5 {offsets = [1, 2], sizes = [16, 16], strides = [1, 1]} : vector<18x18xf32> to vector<16x16xf32>
    %54 = vector.shape_cast %53 : vector<16x16xf32> to vector<16x16x1xf32>
    %55 = vector.extract_strided_slice %6 {offsets = [1, 2, 0], sizes = [1, 1, 64], strides = [1, 1, 1]} : vector<3x3x64xf32> to vector<1x1x64xf32>
    %56 = vector.shape_cast %55 : vector<1x1x64xf32> to vector<64xf32>
    %57 = vector.shape_cast %56 : vector<64xf32> to vector<1x1x64xf32>
    %58 = vector.broadcast %54 : vector<16x16x1xf32> to vector<16x16x64xf32>
    %59 = vector.broadcast %57 : vector<1x1x64xf32> to vector<16x16x64xf32>
    %60 = arith.mulf %58, %59 : vector<16x16x64xf32>
    %61 = arith.addf %52, %60 : vector<16x16x64xf32>
    %62 = vector.extract_strided_slice %5 {offsets = [2, 0], sizes = [16, 16], strides = [1, 1]} : vector<18x18xf32> to vector<16x16xf32>
    %63 = vector.shape_cast %62 : vector<16x16xf32> to vector<16x16x1xf32>
    %64 = vector.extract_strided_slice %6 {offsets = [2, 0, 0], sizes = [1, 1, 64], strides = [1, 1, 1]} : vector<3x3x64xf32> to vector<1x1x64xf32>
    %65 = vector.shape_cast %64 : vector<1x1x64xf32> to vector<64xf32>
    %66 = vector.shape_cast %65 : vector<64xf32> to vector<1x1x64xf32>
    %67 = vector.broadcast %63 : vector<16x16x1xf32> to vector<16x16x64xf32>
    %68 = vector.broadcast %66 : vector<1x1x64xf32> to vector<16x16x64xf32>
    %69 = arith.mulf %67, %68 : vector<16x16x64xf32>
    %70 = arith.addf %61, %69 : vector<16x16x64xf32>
    %71 = vector.extract_strided_slice %5 {offsets = [2, 1], sizes = [16, 16], strides = [1, 1]} : vector<18x18xf32> to vector<16x16xf32>
    %72 = vector.shape_cast %71 : vector<16x16xf32> to vector<16x16x1xf32>
    %73 = vector.extract_strided_slice %6 {offsets = [2, 1, 0], sizes = [1, 1, 64], strides = [1, 1, 1]} : vector<3x3x64xf32> to vector<1x1x64xf32>
    %74 = vector.shape_cast %73 : vector<1x1x64xf32> to vector<64xf32>
    %75 = vector.shape_cast %74 : vector<64xf32> to vector<1x1x64xf32>
    %76 = vector.broadcast %72 : vector<16x16x1xf32> to vector<16x16x64xf32>
    %77 = vector.broadcast %75 : vector<1x1x64xf32> to vector<16x16x64xf32>
    %78 = arith.mulf %76, %77 : vector<16x16x64xf32>
    %79 = arith.addf %70, %78 : vector<16x16x64xf32>
    %80 = vector.extract_strided_slice %5 {offsets = [2, 2], sizes = [16, 16], strides = [1, 1]} : vector<18x18xf32> to vector<16x16xf32>
    %81 = vector.shape_cast %80 : vector<16x16xf32> to vector<16x16x1xf32>
    %82 = vector.extract_strided_slice %6 {offsets = [2, 2, 0], sizes = [1, 1, 64], strides = [1, 1, 1]} : vector<3x3x64xf32> to vector<1x1x64xf32>
    %83 = vector.shape_cast %82 : vector<1x1x64xf32> to vector<64xf32>
    %84 = vector.shape_cast %83 : vector<64xf32> to vector<1x1x64xf32>
    %85 = vector.broadcast %81 : vector<16x16x1xf32> to vector<16x16x64xf32>
    %86 = vector.broadcast %84 : vector<1x1x64xf32> to vector<16x16x64xf32>
    %87 = arith.mulf %85, %86 : vector<16x16x64xf32>
    %88 = arith.addf %79, %87 : vector<16x16x64xf32>
    %cst_13 = arith.constant 0.000000e+00 : f32
    %89 = vector.broadcast %cst_13 : f32 to vector<16x16x64xf32>
    %90 = arith.maximumf %88, %89 : vector<16x16x64xf32>
    %91 = arith.truncf %90 : vector<16x16x64xf32> to vector<16x16x64xbf16>
    %c1 = arith.constant 1 : index
    %c1_14 = arith.constant 1 : index
    %c0_15 = arith.constant 0 : index
    %92 = vector.load %arg6[%c1, %c1_14, %c0_15] : memref<18x18x64xbf16, #tpu.memory_space<vmem>>, vector<16x16x64xbf16>
    tpu.vector_store %arg6[%c1, %c1_14, %c0_15], %91 {strides = array<i32>} : memref<18x18x64xbf16, #tpu.memory_space<vmem>>, vector<16x16x64xbf16>,
    %c0_i32 = arith.constant 0 : i32
    %c9_i32 = arith.constant 9 : i32
    %93 = arith.addi %c0_i32, %c9_i32 : i32
    %c1_i32 = arith.constant 1 : i32
    scf.for %arg8 = %c0_i32 to %93 step %c1_i32  : i32 {
      %c1_i32_28 = arith.constant 1 : i32
      %167 = arith.muli %arg8, %c1_i32_28 : i32
      %c0_i32_29 = arith.constant 0 : i32
      %168 = arith.addi %c0_i32_29, %167 : i32
      %c2_i32 = arith.constant 2 : i32
      %169 = arith.muli %c2_i32, %168 : i32
      %c0_30 = arith.constant 0 : index
      %c0_31 = arith.constant 0 : index
      %c0_32 = arith.constant 0 : index
      %170 = vector.load %arg6[%c0_30, %c0_31, %c0_32] : memref<18x18x64xbf16, #tpu.memory_space<vmem>>, vector<18x18x64xbf16>
      %cst_33 = arith.constant 0.000000e+00 : f32
      %171 = vector.broadcast %cst_33 : f32 to vector<256x64xf32>
      %172 = vector.extract_strided_slice %170 {offsets = [0, 0, 0], sizes = [16, 16, 64], strides = [1, 1, 1]} : vector<18x18x64xbf16> to vector<16x16x64xbf16>
      %173 = vector.extract_strided_slice %170 {offsets = [0, 1, 0], sizes = [16, 16, 64], strides = [1, 1, 1]} : vector<18x18x64xbf16> to vector<16x16x64xbf16>
      %174 = vector.extract_strided_slice %170 {offsets = [0, 2, 0], sizes = [16, 16, 64], strides = [1, 1, 1]} : vector<18x18x64xbf16> to vector<16x16x64xbf16>
      %175 = tpu.concatenate %172, %173, %174 in 2 : vector<16x16x64xbf16>, vector<16x16x64xbf16>, vector<16x16x64xbf16> -> vector<16x16x192xbf16>
      %176 = vector.shape_cast %175 : vector<16x16x192xbf16> to vector<256x192xbf16>
      %c3_i32 = arith.constant 3 : i32
      %177 = arith.muli %c3_i32, %169 : i32
      %c0_i32_34 = arith.constant 0 : i32
      %178 = arith.addi %177, %c0_i32_34 : i32
      %179 = arith.index_cast %178 : i32 to index
      %c0_35 = arith.constant 0 : index
      %c0_36 = arith.constant 0 : index
      %180 = vector.load %arg3[%179, %c0_35, %c0_36] : memref<54x192x64xbf16, #tpu.memory_space<vmem>>, vector<1x192x64xbf16>
      %181 = vector.shape_cast %180 : vector<1x192x64xbf16> to vector<192x64xbf16>
      %cst_37 = arith.constant dense<0.000000e+00> : vector<256x64xf32>
      %182 = tpu.matmul %176, %181, %cst_37 {dimension_numbers = #tpu.dot_dimension_numbers<[1], [0], [0], [1], [0, 0, 1, 1], [], []>} : vector<256x192xbf16>, vector<192x64xbf16>, vector<256x64xf32> -> vector<256x64xf32>
      %183 = arith.addf %171, %182 : vector<256x64xf32>
      %184 = vector.extract_strided_slice %170 {offsets = [1, 0, 0], sizes = [16, 16, 64], strides = [1, 1, 1]} : vector<18x18x64xbf16> to vector<16x16x64xbf16>
      %185 = vector.extract_strided_slice %170 {offsets = [1, 1, 0], sizes = [16, 16, 64], strides = [1, 1, 1]} : vector<18x18x64xbf16> to vector<16x16x64xbf16>
      %186 = vector.extract_strided_slice %170 {offsets = [1, 2, 0], sizes = [16, 16, 64], strides = [1, 1, 1]} : vector<18x18x64xbf16> to vector<16x16x64xbf16>
      %187 = tpu.concatenate %184, %185, %186 in 2 : vector<16x16x64xbf16>, vector<16x16x64xbf16>, vector<16x16x64xbf16> -> vector<16x16x192xbf16>
      %188 = vector.shape_cast %187 : vector<16x16x192xbf16> to vector<256x192xbf16>
      %c3_i32_38 = arith.constant 3 : i32
      %189 = arith.muli %c3_i32_38, %169 : i32
      %c1_i32_39 = arith.constant 1 : i32
      %190 = arith.addi %189, %c1_i32_39 : i32
      %191 = arith.index_cast %190 : i32 to index
      %c0_40 = arith.constant 0 : index
      %c0_41 = arith.constant 0 : index
      %192 = vector.load %arg3[%191, %c0_40, %c0_41] : memref<54x192x64xbf16, #tpu.memory_space<vmem>>, vector<1x192x64xbf16>
      %193 = vector.shape_cast %192 : vector<1x192x64xbf16> to vector<192x64xbf16>
      %cst_42 = arith.constant dense<0.000000e+00> : vector<256x64xf32>
      %194 = tpu.matmul %188, %193, %cst_42 {dimension_numbers = #tpu.dot_dimension_numbers<[1], [0], [0], [1], [0, 0, 1, 1], [], []>} : vector<256x192xbf16>, vector<192x64xbf16>, vector<256x64xf32> -> vector<256x64xf32>
      %195 = arith.addf %183, %194 : vector<256x64xf32>
      %196 = vector.extract_strided_slice %170 {offsets = [2, 0, 0], sizes = [16, 16, 64], strides = [1, 1, 1]} : vector<18x18x64xbf16> to vector<16x16x64xbf16>
      %197 = vector.extract_strided_slice %170 {offsets = [2, 1, 0], sizes = [16, 16, 64], strides = [1, 1, 1]} : vector<18x18x64xbf16> to vector<16x16x64xbf16>
      %198 = vector.extract_strided_slice %170 {offsets = [2, 2, 0], sizes = [16, 16, 64], strides = [1, 1, 1]} : vector<18x18x64xbf16> to vector<16x16x64xbf16>
      %199 = tpu.concatenate %196, %197, %198 in 2 : vector<16x16x64xbf16>, vector<16x16x64xbf16>, vector<16x16x64xbf16> -> vector<16x16x192xbf16>
      %200 = vector.shape_cast %199 : vector<16x16x192xbf16> to vector<256x192xbf16>
      %c3_i32_43 = arith.constant 3 : i32
      %201 = arith.muli %c3_i32_43, %169 : i32
      %c2_i32_44 = arith.constant 2 : i32
      %202 = arith.addi %201, %c2_i32_44 : i32
      %203 = arith.index_cast %202 : i32 to index
      %c0_45 = arith.constant 0 : index
      %c0_46 = arith.constant 0 : index
      %204 = vector.load %arg3[%203, %c0_45, %c0_46] : memref<54x192x64xbf16, #tpu.memory_space<vmem>>, vector<1x192x64xbf16>
      %205 = vector.shape_cast %204 : vector<1x192x64xbf16> to vector<192x64xbf16>
      %cst_47 = arith.constant dense<0.000000e+00> : vector<256x64xf32>
      %206 = tpu.matmul %200, %205, %cst_47 {dimension_numbers = #tpu.dot_dimension_numbers<[1], [0], [0], [1], [0, 0, 1, 1], [], []>} : vector<256x192xbf16>, vector<192x64xbf16>, vector<256x64xf32> -> vector<256x64xf32>
      %207 = arith.addf %195, %206 : vector<256x64xf32>
      %cst_48 = arith.constant 0.000000e+00 : f32
      %208 = vector.broadcast %cst_48 : f32 to vector<256x64xf32>
      %209 = arith.maximumf %207, %208 : vector<256x64xf32>
      %210 = vector.shape_cast %209 : vector<256x64xf32> to vector<16x16x64xf32>
      %211 = arith.truncf %210 : vector<16x16x64xf32> to vector<16x16x64xbf16>
      %c1_49 = arith.constant 1 : index
      %c1_50 = arith.constant 1 : index
      %c0_51 = arith.constant 0 : index
      %212 = vector.load %arg7[%c1_49, %c1_50, %c0_51] : memref<18x18x64xbf16, #tpu.memory_space<vmem>>, vector<16x16x64xbf16>
      tpu.vector_store %arg7[%c1_49, %c1_50, %c0_51], %211 {strides = array<i32>} : memref<18x18x64xbf16, #tpu.memory_space<vmem>>, vector<16x16x64xbf16>,
      %c2_i32_52 = arith.constant 2 : i32
      %213 = arith.muli %c2_i32_52, %168 : i32
      %c1_i32_53 = arith.constant 1 : i32
      %214 = arith.addi %213, %c1_i32_53 : i32
      %c0_54 = arith.constant 0 : index
      %c0_55 = arith.constant 0 : index
      %c0_56 = arith.constant 0 : index
      %215 = vector.load %arg7[%c0_54, %c0_55, %c0_56] : memref<18x18x64xbf16, #tpu.memory_space<vmem>>, vector<18x18x64xbf16>
      %cst_57 = arith.constant 0.000000e+00 : f32
      %216 = vector.broadcast %cst_57 : f32 to vector<256x64xf32>
      %217 = vector.extract_strided_slice %215 {offsets = [0, 0, 0], sizes = [16, 16, 64], strides = [1, 1, 1]} : vector<18x18x64xbf16> to vector<16x16x64xbf16>
      %218 = vector.extract_strided_slice %215 {offsets = [0, 1, 0], sizes = [16, 16, 64], strides = [1, 1, 1]} : vector<18x18x64xbf16> to vector<16x16x64xbf16>
      %219 = vector.extract_strided_slice %215 {offsets = [0, 2, 0], sizes = [16, 16, 64], strides = [1, 1, 1]} : vector<18x18x64xbf16> to vector<16x16x64xbf16>
      %220 = tpu.concatenate %217, %218, %219 in 2 : vector<16x16x64xbf16>, vector<16x16x64xbf16>, vector<16x16x64xbf16> -> vector<16x16x192xbf16>
      %221 = vector.shape_cast %220 : vector<16x16x192xbf16> to vector<256x192xbf16>
      %c3_i32_58 = arith.constant 3 : i32
      %222 = arith.muli %c3_i32_58, %214 : i32
      %c0_i32_59 = arith.constant 0 : i32
      %223 = arith.addi %222, %c0_i32_59 : i32
      %224 = arith.index_cast %223 : i32 to index
      %c0_60 = arith.constant 0 : index
      %c0_61 = arith.constant 0 : index
      %225 = vector.load %arg3[%224, %c0_60, %c0_61] : memref<54x192x64xbf16, #tpu.memory_space<vmem>>, vector<1x192x64xbf16>
      %226 = vector.shape_cast %225 : vector<1x192x64xbf16> to vector<192x64xbf16>
      %cst_62 = arith.constant dense<0.000000e+00> : vector<256x64xf32>
      %227 = tpu.matmul %221, %226, %cst_62 {dimension_numbers = #tpu.dot_dimension_numbers<[1], [0], [0], [1], [0, 0, 1, 1], [], []>} : vector<256x192xbf16>, vector<192x64xbf16>, vector<256x64xf32> -> vector<256x64xf32>
      %228 = arith.addf %216, %227 : vector<256x64xf32>
      %229 = vector.extract_strided_slice %215 {offsets = [1, 0, 0], sizes = [16, 16, 64], strides = [1, 1, 1]} : vector<18x18x64xbf16> to vector<16x16x64xbf16>
      %230 = vector.extract_strided_slice %215 {offsets = [1, 1, 0], sizes = [16, 16, 64], strides = [1, 1, 1]} : vector<18x18x64xbf16> to vector<16x16x64xbf16>
      %231 = vector.extract_strided_slice %215 {offsets = [1, 2, 0], sizes = [16, 16, 64], strides = [1, 1, 1]} : vector<18x18x64xbf16> to vector<16x16x64xbf16>
      %232 = tpu.concatenate %229, %230, %231 in 2 : vector<16x16x64xbf16>, vector<16x16x64xbf16>, vector<16x16x64xbf16> -> vector<16x16x192xbf16>
      %233 = vector.shape_cast %232 : vector<16x16x192xbf16> to vector<256x192xbf16>
      %c3_i32_63 = arith.constant 3 : i32
      %234 = arith.muli %c3_i32_63, %214 : i32
      %c1_i32_64 = arith.constant 1 : i32
      %235 = arith.addi %234, %c1_i32_64 : i32
      %236 = arith.index_cast %235 : i32 to index
      %c0_65 = arith.constant 0 : index
      %c0_66 = arith.constant 0 : index
      %237 = vector.load %arg3[%236, %c0_65, %c0_66] : memref<54x192x64xbf16, #tpu.memory_space<vmem>>, vector<1x192x64xbf16>
      %238 = vector.shape_cast %237 : vector<1x192x64xbf16> to vector<192x64xbf16>
      %cst_67 = arith.constant dense<0.000000e+00> : vector<256x64xf32>
      %239 = tpu.matmul %233, %238, %cst_67 {dimension_numbers = #tpu.dot_dimension_numbers<[1], [0], [0], [1], [0, 0, 1, 1], [], []>} : vector<256x192xbf16>, vector<192x64xbf16>, vector<256x64xf32> -> vector<256x64xf32>
      %240 = arith.addf %228, %239 : vector<256x64xf32>
      %241 = vector.extract_strided_slice %215 {offsets = [2, 0, 0], sizes = [16, 16, 64], strides = [1, 1, 1]} : vector<18x18x64xbf16> to vector<16x16x64xbf16>
      %242 = vector.extract_strided_slice %215 {offsets = [2, 1, 0], sizes = [16, 16, 64], strides = [1, 1, 1]} : vector<18x18x64xbf16> to vector<16x16x64xbf16>
      %243 = vector.extract_strided_slice %215 {offsets = [2, 2, 0], sizes = [16, 16, 64], strides = [1, 1, 1]} : vector<18x18x64xbf16> to vector<16x16x64xbf16>
      %244 = tpu.concatenate %241, %242, %243 in 2 : vector<16x16x64xbf16>, vector<16x16x64xbf16>, vector<16x16x64xbf16> -> vector<16x16x192xbf16>
      %245 = vector.shape_cast %244 : vector<16x16x192xbf16> to vector<256x192xbf16>
      %c3_i32_68 = arith.constant 3 : i32
      %246 = arith.muli %c3_i32_68, %214 : i32
      %c2_i32_69 = arith.constant 2 : i32
      %247 = arith.addi %246, %c2_i32_69 : i32
      %248 = arith.index_cast %247 : i32 to index
      %c0_70 = arith.constant 0 : index
      %c0_71 = arith.constant 0 : index
      %249 = vector.load %arg3[%248, %c0_70, %c0_71] : memref<54x192x64xbf16, #tpu.memory_space<vmem>>, vector<1x192x64xbf16>
      %250 = vector.shape_cast %249 : vector<1x192x64xbf16> to vector<192x64xbf16>
      %cst_72 = arith.constant dense<0.000000e+00> : vector<256x64xf32>
      %251 = tpu.matmul %245, %250, %cst_72 {dimension_numbers = #tpu.dot_dimension_numbers<[1], [0], [0], [1], [0, 0, 1, 1], [], []>} : vector<256x192xbf16>, vector<192x64xbf16>, vector<256x64xf32> -> vector<256x64xf32>
      %252 = arith.addf %240, %251 : vector<256x64xf32>
      %cst_73 = arith.constant 0.000000e+00 : f32
      %253 = vector.broadcast %cst_73 : f32 to vector<256x64xf32>
      %254 = arith.maximumf %252, %253 : vector<256x64xf32>
      %255 = vector.shape_cast %254 : vector<256x64xf32> to vector<16x16x64xf32>
      %256 = arith.truncf %255 : vector<16x16x64xf32> to vector<16x16x64xbf16>
      %c1_74 = arith.constant 1 : index
      %c1_75 = arith.constant 1 : index
      %c0_76 = arith.constant 0 : index
      %257 = vector.load %arg6[%c1_74, %c1_75, %c0_76] : memref<18x18x64xbf16, #tpu.memory_space<vmem>>, vector<16x16x64xbf16>
      tpu.vector_store %arg6[%c1_74, %c1_75, %c0_76], %256 {strides = array<i32>} : memref<18x18x64xbf16, #tpu.memory_space<vmem>>, vector<16x16x64xbf16>,
    }
    %c9_i32_16 = arith.constant 9 : i32
    %c0_17 = arith.constant 0 : index
    %c0_18 = arith.constant 0 : index
    %c0_19 = arith.constant 0 : index
    %94 = vector.load %arg4[%c0_17, %c0_18, %c0_19] : memref<3x3x64xf32, #tpu.memory_space<vmem>>, vector<3x3x64xf32>
    %c0_20 = arith.constant 0 : index
    %c0_21 = arith.constant 0 : index
    %c0_22 = arith.constant 0 : index
    %95 = vector.load %arg6[%c0_20, %c0_21, %c0_22] : memref<18x18x64xbf16, #tpu.memory_space<vmem>>, vector<18x18x64xbf16>
    %96 = arith.extf %95 : vector<18x18x64xbf16> to vector<18x18x64xf32>
    %cst_23 = arith.constant 0.000000e+00 : f32
    %97 = vector.broadcast %cst_23 : f32 to vector<16x16x64xf32>
    %98 = vector.extract_strided_slice %96 {offsets = [0, 0, 0], sizes = [16, 16, 64], strides = [1, 1, 1]} : vector<18x18x64xf32> to vector<16x16x64xf32>
    %99 = vector.extract_strided_slice %94 {offsets = [0, 0, 0], sizes = [1, 1, 64], strides = [1, 1, 1]} : vector<3x3x64xf32> to vector<1x1x64xf32>
    %100 = vector.shape_cast %99 : vector<1x1x64xf32> to vector<64xf32>
    %101 = vector.shape_cast %100 : vector<64xf32> to vector<1x1x64xf32>
    %102 = vector.broadcast %101 : vector<1x1x64xf32> to vector<16x16x64xf32>
    %103 = arith.mulf %98, %102 : vector<16x16x64xf32>
    %104 = arith.addf %97, %103 : vector<16x16x64xf32>
    %105 = vector.extract_strided_slice %96 {offsets = [0, 1, 0], sizes = [16, 16, 64], strides = [1, 1, 1]} : vector<18x18x64xf32> to vector<16x16x64xf32>
    %106 = vector.extract_strided_slice %94 {offsets = [0, 1, 0], sizes = [1, 1, 64], strides = [1, 1, 1]} : vector<3x3x64xf32> to vector<1x1x64xf32>
    %107 = vector.shape_cast %106 : vector<1x1x64xf32> to vector<64xf32>
    %108 = vector.shape_cast %107 : vector<64xf32> to vector<1x1x64xf32>
    %109 = vector.broadcast %108 : vector<1x1x64xf32> to vector<16x16x64xf32>
    %110 = arith.mulf %105, %109 : vector<16x16x64xf32>
    %111 = arith.addf %104, %110 : vector<16x16x64xf32>
    %112 = vector.extract_strided_slice %96 {offsets = [0, 2, 0], sizes = [16, 16, 64], strides = [1, 1, 1]} : vector<18x18x64xf32> to vector<16x16x64xf32>
    %113 = vector.extract_strided_slice %94 {offsets = [0, 2, 0], sizes = [1, 1, 64], strides = [1, 1, 1]} : vector<3x3x64xf32> to vector<1x1x64xf32>
    %114 = vector.shape_cast %113 : vector<1x1x64xf32> to vector<64xf32>
    %115 = vector.shape_cast %114 : vector<64xf32> to vector<1x1x64xf32>
    %116 = vector.broadcast %115 : vector<1x1x64xf32> to vector<16x16x64xf32>
    %117 = arith.mulf %112, %116 : vector<16x16x64xf32>
    %118 = arith.addf %111, %117 : vector<16x16x64xf32>
    %119 = vector.extract_strided_slice %96 {offsets = [1, 0, 0], sizes = [16, 16, 64], strides = [1, 1, 1]} : vector<18x18x64xf32> to vector<16x16x64xf32>
    %120 = vector.extract_strided_slice %94 {offsets = [1, 0, 0], sizes = [1, 1, 64], strides = [1, 1, 1]} : vector<3x3x64xf32> to vector<1x1x64xf32>
    %121 = vector.shape_cast %120 : vector<1x1x64xf32> to vector<64xf32>
    %122 = vector.shape_cast %121 : vector<64xf32> to vector<1x1x64xf32>
    %123 = vector.broadcast %122 : vector<1x1x64xf32> to vector<16x16x64xf32>
    %124 = arith.mulf %119, %123 : vector<16x16x64xf32>
    %125 = arith.addf %118, %124 : vector<16x16x64xf32>
    %126 = vector.extract_strided_slice %96 {offsets = [1, 1, 0], sizes = [16, 16, 64], strides = [1, 1, 1]} : vector<18x18x64xf32> to vector<16x16x64xf32>
    %127 = vector.extract_strided_slice %94 {offsets = [1, 1, 0], sizes = [1, 1, 64], strides = [1, 1, 1]} : vector<3x3x64xf32> to vector<1x1x64xf32>
    %128 = vector.shape_cast %127 : vector<1x1x64xf32> to vector<64xf32>
    %129 = vector.shape_cast %128 : vector<64xf32> to vector<1x1x64xf32>
    %130 = vector.broadcast %129 : vector<1x1x64xf32> to vector<16x16x64xf32>
    %131 = arith.mulf %126, %130 : vector<16x16x64xf32>
    %132 = arith.addf %125, %131 : vector<16x16x64xf32>
    %133 = vector.extract_strided_slice %96 {offsets = [1, 2, 0], sizes = [16, 16, 64], strides = [1, 1, 1]} : vector<18x18x64xf32> to vector<16x16x64xf32>
    %134 = vector.extract_strided_slice %94 {offsets = [1, 2, 0], sizes = [1, 1, 64], strides = [1, 1, 1]} : vector<3x3x64xf32> to vector<1x1x64xf32>
    %135 = vector.shape_cast %134 : vector<1x1x64xf32> to vector<64xf32>
    %136 = vector.shape_cast %135 : vector<64xf32> to vector<1x1x64xf32>
    %137 = vector.broadcast %136 : vector<1x1x64xf32> to vector<16x16x64xf32>
    %138 = arith.mulf %133, %137 : vector<16x16x64xf32>
    %139 = arith.addf %132, %138 : vector<16x16x64xf32>
    %140 = vector.extract_strided_slice %96 {offsets = [2, 0, 0], sizes = [16, 16, 64], strides = [1, 1, 1]} : vector<18x18x64xf32> to vector<16x16x64xf32>
    %141 = vector.extract_strided_slice %94 {offsets = [2, 0, 0], sizes = [1, 1, 64], strides = [1, 1, 1]} : vector<3x3x64xf32> to vector<1x1x64xf32>
    %142 = vector.shape_cast %141 : vector<1x1x64xf32> to vector<64xf32>
    %143 = vector.shape_cast %142 : vector<64xf32> to vector<1x1x64xf32>
    %144 = vector.broadcast %143 : vector<1x1x64xf32> to vector<16x16x64xf32>
    %145 = arith.mulf %140, %144 : vector<16x16x64xf32>
    %146 = arith.addf %139, %145 : vector<16x16x64xf32>
    %147 = vector.extract_strided_slice %96 {offsets = [2, 1, 0], sizes = [16, 16, 64], strides = [1, 1, 1]} : vector<18x18x64xf32> to vector<16x16x64xf32>
    %148 = vector.extract_strided_slice %94 {offsets = [2, 1, 0], sizes = [1, 1, 64], strides = [1, 1, 1]} : vector<3x3x64xf32> to vector<1x1x64xf32>
    %149 = vector.shape_cast %148 : vector<1x1x64xf32> to vector<64xf32>
    %150 = vector.shape_cast %149 : vector<64xf32> to vector<1x1x64xf32>
    %151 = vector.broadcast %150 : vector<1x1x64xf32> to vector<16x16x64xf32>
    %152 = arith.mulf %147, %151 : vector<16x16x64xf32>
    %153 = arith.addf %146, %152 : vector<16x16x64xf32>
    %154 = vector.extract_strided_slice %96 {offsets = [2, 2, 0], sizes = [16, 16, 64], strides = [1, 1, 1]} : vector<18x18x64xf32> to vector<16x16x64xf32>
    %155 = vector.extract_strided_slice %94 {offsets = [2, 2, 0], sizes = [1, 1, 64], strides = [1, 1, 1]} : vector<3x3x64xf32> to vector<1x1x64xf32>
    %156 = vector.shape_cast %155 : vector<1x1x64xf32> to vector<64xf32>
    %157 = vector.shape_cast %156 : vector<64xf32> to vector<1x1x64xf32>
    %158 = vector.broadcast %157 : vector<1x1x64xf32> to vector<16x16x64xf32>
    %159 = arith.mulf %154, %158 : vector<16x16x64xf32>
    %160 = arith.addf %153, %159 : vector<16x16x64xf32>
    %cst_24 = arith.constant dense<0.000000e+00> : vector<16x16xf32>
    %161 = vector.multi_reduction <add>, %160, %cst_24 [2] : vector<16x16x64xf32> to vector<16x16xf32>
    %162 = vector.extract_strided_slice %5 {offsets = [1, 1], sizes = [16, 16], strides = [1, 1]} : vector<18x18xf32> to vector<16x16xf32>
    %163 = arith.addf %161, %162 : vector<16x16xf32>
    %c0_25 = arith.constant 0 : index
    %c0_26 = arith.constant 0 : index
    %c0_27 = arith.constant 0 : index
    %164 = vector.load %arg5[%c0_25, %c0_26, %c0_27] : memref<1x16x16xf32, #tpu.memory_space<vmem>>, vector<1x16x16xf32>
    %165 = vector.shape_cast %164 : vector<1x16x16xf32> to vector<16x16xf32>
    %166 = vector.shape_cast %163 : vector<16x16xf32> to vector<1x16x16xf32>
    tpu.vector_store %arg5[%c0_25, %c0_26, %c0_27], %166 {strides = array<i32>} : memref<1x16x16xf32, #tpu.memory_space<vmem>>, vector<1x16x16xf32>,
    return
  }
  func.func @transform_0(%arg0: i32) -> (i32, i32, i32) {
    %c0_i32 = arith.constant 0 : i32
    %c0_i32_0 = arith.constant 0 : i32
    %c0_i32_1 = arith.constant 0 : i32
    return %arg0, %c0_i32, %c0_i32_0 : i32, i32, i32
  }
  func.func @transform_1(%arg0: i32) -> (i32, i32, i32) {
    %c0_i32 = arith.constant 0 : i32
    %c0_i32_0 = arith.constant 0 : i32
    %c0_i32_1 = arith.constant 0 : i32
    %c0_i32_2 = arith.constant 0 : i32
    return %c0_i32, %c0_i32_0, %c0_i32_1 : i32, i32, i32
  }
  func.func @transform_2(%arg0: i32) -> (i32, i32, i32) {
    %c0_i32 = arith.constant 0 : i32
    %c0_i32_0 = arith.constant 0 : i32
    %c0_i32_1 = arith.constant 0 : i32
    %c0_i32_2 = arith.constant 0 : i32
    return %c0_i32, %c0_i32_0, %c0_i32_1 : i32, i32, i32
  }
  func.func @transform_3(%arg0: i32) -> (i32, i32, i32) {
    %c0_i32 = arith.constant 0 : i32
    %c0_i32_0 = arith.constant 0 : i32
    %c0_i32_1 = arith.constant 0 : i32
    %c0_i32_2 = arith.constant 0 : i32
    return %c0_i32, %c0_i32_0, %c0_i32_1 : i32, i32, i32
  }
  func.func @transform_4(%arg0: i32) -> (i32, i32, i32) {
    %c0_i32 = arith.constant 0 : i32
    %c0_i32_0 = arith.constant 0 : i32
    %c0_i32_1 = arith.constant 0 : i32
    return %arg0, %c0_i32, %c0_i32_0 : i32, i32, i32
  }
}

</mosaic_0001>

<bundles_post_ra>
// kernel: vdsr_forward.1
= control target key start
LH: loop header
LB: loop body
LE: loop exit
PB: predicated region body
PF: predicated region fallthrough
CT: control target
= control target key end

     0   :  { %9 = vsyncpa [#allocation5], 0  ;;  %s14295_s0 = inlined_call_operand.vmem [shape: f32[2,18,18], index: 0, kind: input, shape index: {}]   ;;  %s14296_s1 = inlined_call_operand.vmem [shape: f32[3,3,64], index: 1, kind: input, shape index: {}]   ;;  %s14297_s2 = inlined_call_operand.vmem [shape: bf16[54,192,64], index: 2, kind: input, shape index: {}]   ;;  %s14298_s3 = inlined_call_operand.vmem [shape: f32[3,3,64], index: 3, kind: input, shape index: {}]   ;;  %s14299_s4 = inlined_call_operand.hbm [shape: f32[2,16,16], index: 4, kind: output, shape index: {}]  }
   0x1   :  { %11 = vsyncpa [#allocation5 + $0x1], 0  ;;  %s9693_s15 = smov 0   ;;  %s9695_s16 = smov 0  }
   0x2   :  { %s9697_s17 = smov 0   ;;  %s9699_s18 = smov 0  }
   0x3 LB: > { %s9714_s19 = sadd.s32 4294967295, %s9656_s18   ;;  %s8510_s20 = sadd.s32 4294967294, %s9656_s18   ;;  %s9656_s18 = sphi %s9699_s18, %s14676_s18   ;;  %s9652_s17 = sphi %s9697_s17, %s14675_s17   ;;  %s9648_s16 = sphi %s9695_s16, %s14674_s16   ;;  %s9644_s15 = sphi %s9693_s15, %s14673_s15  }
   0x4   : > { %s9718_s21 = sadd.s32 1, %s9656_s18   ;;  %s113_s22 = sadd.s32 1, %s9652_s17 }
   0x5   : > { %s110_s23 = ssub.s32 %s9656_s18, %s9718_s21  ;;  %p123_p0 = scmp.ne.s32.totalorder %s9652_s17, %s9648_s16 }
   0x6   : > { %p111_p1 = scmp.eq.s32.totalorder %s110_s23, 0  ;;  %p124_p2 = scmp.eq.s32.totalorder %s9714_s19, 1 }
   0x7   : > { %p129_p3 = scmp.ne.s32.totalorder %s9648_s16, %s9644_s15  ;;  %p130_p4 = scmp.eq.s32.totalorder %s8510_s20, 1 }
   0x8   : > { %s9729_s24 = scalar_select %p111_p1, %s9652_s17, %s113_s22  }
   0x9   : > { %p9731_p5 = por %p124_p2, %p123_p0  ;;  %p9735_p6 = por %p130_p4, %p129_p3 }
   0xa   : > { %p8513_p7 = scmp.ge.s32.totalorder %s9656_s18, 1  ;;  %p165_p8 = scmp.lt.s32.totalorder %s9656_s18, 3 }
   0xc   : > { %p166_p9 = pnand %p8513_p7, %p165_p8 }
   0xe   : > { %169 = sbr.rel (%p166_p9) target bundleno = 2453 (0x995), region = 36 }
  0x15   : > { %p191_p10 = scmp.lt.s32.totalorder %s9714_s19, 1  ;;  %v14300_v0 = vlaneseq  ;;  %vm200_vm0 = vcmask 516096   ;;  %v14301_v36 = vmov 0   ;;  %vm197_vm1 = vcmask 519168   ;;  %v10118_v41 = vld [vmem:[%s14296_s1] sm:$0x7] }
  0x16   : > { %204 = vst.msk [vmem:[#allocation2 + $0x14] sm:$0x1] %vm200_vm0, %v14301_v36  ;;  %201 = vst.msk [vmem:[#allocation2 + $0x8] sm:$0x1] %vm200_vm0, %v14301_v36  ;;  %vm1539_vm2 = vsmask.f32 256 }
  0x17   : > { %s192_s27 = scalar_select %p191_p10, %s9714_s19, 1  ;;  %v9744_v1 = vshrl.u32 %v14300_v0, 7  ;;  %207 = vst.msk [vmem:[#allocation2 + $0x20] sm:$0x1] %vm200_vm0, %v14301_v36  ;;  %210 = vst.msk [vmem:[#allocation2 + $0x2c] sm:$0x1] %vm200_vm0, %v14301_v36 }
  0x18   : > { %213 = vst.msk [vmem:[#allocation2 + $0x38] sm:$0x1] %vm200_vm0, %v14301_v36  ;;  %216 = vst.msk [vmem:[#allocation2 + $0x44] sm:$0x1] %vm200_vm0, %v14301_v36  ;;  %vm1540_vm3 = vsmask.f32 4368 }
  0x19   : > { %14368 = vst [vmem:[#allocation7_spill] sm:$0xff] %v9744_v1  ;;  %s9387_s28 = smul.u32 24, %s192_s27  ;;  %v9747_v2 = vsub.s32 1, %v9744_v1  ;;  %v9750_v3 = vsub.s32 0, %v9744_v1  ;;  %v9767_v7 = vsub.s32 2, %v9744_v1  ;;  %v348_v9 = vsub.s32 3, %v9744_v1  ;;  %vm11073_vm5 = vmand %vm200_vm0, %vm1539_vm2 }
  0x1a   : > { %v359_v11 = vsub.s32 4, %v9744_v1  ;;  %v370_v13 = vsub.s32 5, %v9744_v1  ;;  %v381_v15 = vsub.s32 6, %v9744_v1  ;;  %v392_v17 = vsub.s32 7, %v9744_v1  ;;  %219 = vst.msk [vmem:[#allocation2 + $0x50] sm:$0x1] %vm200_vm0, %v14301_v36  ;;  %vm11081_vm6 = vmor %vm1539_vm2, %vm1540_vm3 }
  0x1b   : > { %14369 = vst [vmem:[#allocation8_spill] sm:$0xff] %v9747_v2  ;;  %14370 = vst [vmem:[#allocation9_spill] sm:$0xff] %v9750_v3  ;;  %s9755_s5 = scalar_lea.vmem %s14295_s0, %s9387_s28  ;;  %v10128_v44 = vrot.slane %v10118_v41, %v9750_v3  ;;  %vm1864_vm4 = vsmask.f32 7938  ;;  %s188_s12 = sand.u32 1, %s9648_s16  }
  0x1c   : > { %v307_v4 = vld [vmem:[%s9755_s5] sm:$0xff]  ;;  %14372 = vst [vmem:[#allocation11_spill] sm:$0xff] %v9767_v7  ;;  %v308_v19 = vld [vmem:[%s9755_s5 + $0x8] sm:$0xff]  ;;  %222 = vst.msk [vmem:[#allocation2 + $0x5c] sm:$0x1] %vm200_vm0, %v14301_v36  ;;  %s11130_s13 = sshll.u32 %s188_s12, 4 }
  0x1d   : > { %v9759_v5 = vrot.slane %v307_v4, %v9747_v2  ;;  %v9762_v6 = vrot.slane %v307_v4, %v9750_v3  ;;  %v9772_v8 = vrot.slane %v307_v4, %v9767_v7  ;;  %v9777_v10 = vrot.slane %v307_v4, %v348_v9  ;;  %225 = vst.msk [vmem:[#allocation2 + $0x68] sm:$0x1] %vm200_vm0, %v14301_v36  ;;  %vm11089_vm7 = vmand %vm197_vm1, %vm1864_vm4  ;;  %s11473_s14 = scalar_lea.vmem [#allocation4], %s11130_s13  ;;  %s11475_s20 = smov 0  }
  0x1e   : > { %v9782_v12 = vrot.slane %v307_v4, %v359_v11  ;;  %v9787_v14 = vrot.slane %v307_v4, %v370_v13  ;;  %v9792_v16 = vrot.slane %v307_v4, %v381_v15  ;;  %v9797_v18 = vrot.slane %v307_v4, %v392_v17  ;;  %228 = vst.msk [vmem:[#allocation2 + $0x74] sm:$0x1] %vm200_vm0, %v14301_v36 }
  0x1f   : > { %14371 = vst [vmem:[#allocation10_spill] sm:$0xff] %v9759_v5  ;;  %329 = vbcast.lane.b32.xlu1 %v9759_v5, 256  ;;  %318 = vbcast.lane.b32.xlu0 %v9762_v6, 256  ;;  %14373 = vst [vmem:[#allocation12_spill] sm:$0xff] %v9772_v8  ;;  %v9803_v20 = vrot.slane %v308_v19, %v9750_v3  ;;  %v9808_v21 = vrot.slane %v308_v19, %v9747_v2 }
  0x20   : > { %14374 = vst [vmem:[#allocation13_spill] sm:$0xff] %v9777_v10  ;;  %14375 = vst [vmem:[#allocation14_spill] sm:$0xff] %v9782_v12  ;;  %v9813_v22 = vrot.slane %v308_v19, %v9767_v7  ;;  %v9817_v23 = vrot.slane %v308_v19, %v348_v9  ;;  %v9821_v24 = vrot.slane %v308_v19, %v359_v11 }
  0x21   : > { %14376 = vst [vmem:[#allocation15_spill] sm:$0xff] %v9787_v14  ;;  %14377 = vst [vmem:[#allocation16_spill] sm:$0xff] %v9792_v16  ;;  %v9825_v25 = vrot.slane %v308_v19, %v370_v13  ;;  %v9829_v26 = vrot.slane %v308_v19, %v381_v15  ;;  %v9833_v27 = vrot.slane %v308_v19, %v392_v17 }
  0x22   : > { %14378 = vst [vmem:[#allocation17_spill] sm:$0xff] %v9797_v18  ;;  %14379 = vst [vmem:[#allocation18_spill] sm:$0xff] %v9803_v20 }
  0x23   : > { %333 = vbcast.lane.b32.xlu1 %v9759_v5, 264  ;;  %322 = vbcast.lane.b32.xlu0 %v9762_v6, 264  ;;  %14380 = vst [vmem:[#allocation19_spill] sm:$0xff] %v9808_v21  ;;  %14381 = vst [vmem:[#allocation20_spill] sm:$0xff] %v9813_v22 }
  0x24   : > { %14382 = vst [vmem:[#allocation21_spill] sm:$0xff] %v9817_v23  ;;  %14383 = vst [vmem:[#allocation22_spill] sm:$0xff] %v9821_v24 }
  0x25   : > { %14384 = vst [vmem:[#allocation23_spill] sm:$0xff] %v9825_v25  ;;  %14385 = vst [vmem:[#allocation24_spill] sm:$0xff] %v9829_v26 }
  0x26   : > { %14386 = vst [vmem:[#allocation25_spill] sm:$0xff] %v9833_v27  ;;  %231 = vst.msk [vmem:[#allocation2 + $0x80] sm:$0x1] %vm200_vm0, %v14301_v36 }
  0x27   : > { %344 = vbcast.lane.b32.xlu1 %v9772_v8, 264  ;;  %340 = vbcast.lane.b32.xlu0 %v9772_v8, 256  ;;  %234 = vst.msk [vmem:[#allocation2 + $0x8c] sm:$0x1] %vm200_vm0, %v14301_v36  ;;  %237 = vst.msk [vmem:[#allocation2 + $0x98] sm:$0x1] %vm200_vm0, %v14301_v36 }
  0x28   : > { %240 = vst.msk [vmem:[#allocation2 + $0xa4] sm:$0x1] %vm200_vm0, %v14301_v36  ;;  %243 = vst.msk [vmem:[#allocation2 + $0xb0] sm:$0x1] %vm200_vm0, %v14301_v36 }
  0x29   : > { %246 = vst.msk [vmem:[#allocation2 + $0xbc] sm:$0x1] %vm200_vm0, %v14301_v36  ;;  %249 = vst.msk [vmem:[#allocation2 + $0xc8] sm:$0x1] %vm200_vm0, %v14301_v36 }
  0x2a   : > { %252 = vst.msk [vmem:[#allocation2 + $0xd4] sm:$0x1] %vm200_vm0, %v14301_v36  ;;  %255 = vst.msk [vmem:[#allocation3 + $0x8] sm:$0x1] %vm200_vm0, %v14301_v36 }
  0x2b   : > { %355 = vbcast.lane.b32.xlu1 %v9777_v10, 264  ;;  %351 = vbcast.lane.b32.xlu0 %v9777_v10, 256  ;;  %258 = vst.msk [vmem:[#allocation3 + $0x14] sm:$0x1] %vm200_vm0, %v14301_v36  ;;  %261 = vst.msk [vmem:[#allocation3 + $0x20] sm:$0x1] %vm200_vm0, %v14301_v36 }
  0x2c   : > { %264 = vst.msk [vmem:[#allocation3 + $0x2c] sm:$0x1] %vm200_vm0, %v14301_v36  ;;  %267 = vst.msk [vmem:[#allocation3 + $0x38] sm:$0x1] %vm200_vm0, %v14301_v36 }
  0x2d   : > { %270 = vst.msk [vmem:[#allocation3 + $0x44] sm:$0x1] %vm200_vm0, %v14301_v36  ;;  %273 = vst.msk [vmem:[#allocation3 + $0x50] sm:$0x1] %vm200_vm0, %v14301_v36 }
  0x2e   : > { %276 = vst.msk [vmem:[#allocation3 + $0x5c] sm:$0x1] %vm200_vm0, %v14301_v36  ;;  %279 = vst.msk [vmem:[#allocation3 + $0x68] sm:$0x1] %vm200_vm0, %v14301_v36 }
  0x2f   : > { %366 = vbcast.lane.b32.xlu1 %v9782_v12, 264  ;;  %362 = vbcast.lane.b32.xlu0 %v9782_v12, 256  ;;  %282 = vst.msk [vmem:[#allocation3 + $0x74] sm:$0x1] %vm200_vm0, %v14301_v36  ;;  %285 = vst.msk [vmem:[#allocation3 + $0x80] sm:$0x1] %vm200_vm0, %v14301_v36 }
  0x30   : > { %288 = vst.msk [vmem:[#allocation3 + $0x8c] sm:$0x1] %vm200_vm0, %v14301_v36  ;;  %291 = vst.msk [vmem:[#allocation3 + $0x98] sm:$0x1] %vm200_vm0, %v14301_v36 }
  0x31   : > { %294 = vst.msk [vmem:[#allocation3 + $0xa4] sm:$0x1] %vm200_vm0, %v14301_v36  ;;  %297 = vst.msk [vmem:[#allocation3 + $0xb0] sm:$0x1] %vm200_vm0, %v14301_v36 }
  0x32   : > { %300 = vst.msk [vmem:[#allocation3 + $0xbc] sm:$0x1] %vm200_vm0, %v14301_v36  ;;  %303 = vst.msk [vmem:[#allocation3 + $0xc8] sm:$0x1] %vm200_vm0, %v14301_v36 }
  0x33   : > { %377 = vbcast.lane.b32.xlu1 %v9787_v14, 264  ;;  %373 = vbcast.lane.b32.xlu0 %v9787_v14, 256  ;;  %306 = vst.msk [vmem:[#allocation3 + $0xd4] sm:$0x1] %vm200_vm0, %v14301_v36 }
  0x34   : > { %202 = vst.msk [vmem:[#allocation2 + $0xc] sm:$0xf] %vm197_vm1, %v14301_v36  ;;  %203 = vst.msk [vmem:[#allocation2 + $0x10] sm:$0xf] %vm197_vm1, %v14301_v36 }
  0x35   : > { %198 = vst.msk [vmem:[#allocation2] sm:$0xf] %vm197_vm1, %v14301_v36  ;;  %199 = vst.msk [vmem:[#allocation2 + $0x4] sm:$0xf] %vm197_vm1, %v14301_v36 }
  0x36   : > { %205 = vst.msk [vmem:[#allocation2 + $0x18] sm:$0xf] %vm197_vm1, %v14301_v36  ;;  %206 = vst.msk [vmem:[#allocation2 + $0x1c] sm:$0xf] %vm197_vm1, %v14301_v36 }
  0x37   : > { %388 = vbcast.lane.b32.xlu1 %v9792_v16, 264  ;;  %384 = vbcast.lane.b32.xlu0 %v9792_v16, 256  ;;  %208 = vst.msk [vmem:[#allocation2 + $0x24] sm:$0xf] %vm197_vm1, %v14301_v36  ;;  %209 = vst.msk [vmem:[#allocation2 + $0x28] sm:$0xf] %vm197_vm1, %v14301_v36 }
  0x38   : > { %211 = vst.msk [vmem:[#allocation2 + $0x30] sm:$0xf] %vm197_vm1, %v14301_v36  ;;  %212 = vst.msk [vmem:[#allocation2 + $0x34] sm:$0xf] %vm197_vm1, %v14301_v36 }
  0x39   : > { %214 = vst.msk [vmem:[#allocation2 + $0x3c] sm:$0xf] %vm197_vm1, %v14301_v36  ;;  %215 = vst.msk [vmem:[#allocation2 + $0x40] sm:$0xf] %vm197_vm1, %v14301_v36 }
  0x3a   : > { %217 = vst.msk [vmem:[#allocation2 + $0x48] sm:$0xf] %vm197_vm1, %v14301_v36  ;;  %218 = vst.msk [vmem:[#allocation2 + $0x4c] sm:$0xf] %vm197_vm1, %v14301_v36 }
  0x3b   : > { %399 = vbcast.lane.b32.xlu1 %v9797_v18, 264  ;;  %395 = vbcast.lane.b32.xlu0 %v9797_v18, 256  ;;  %220 = vst.msk [vmem:[#allocation2 + $0x54] sm:$0xf] %vm197_vm1, %v14301_v36  ;;  %221 = vst.msk [vmem:[#allocation2 + $0x58] sm:$0xf] %vm197_vm1, %v14301_v36 }
  0x3c   : > { %223 = vst.msk [vmem:[#allocation2 + $0x60] sm:$0xf] %vm197_vm1, %v14301_v36  ;;  %224 = vst.msk [vmem:[#allocation2 + $0x64] sm:$0xf] %vm197_vm1, %v14301_v36 }
  0x3d   : > { %226 = vst.msk [vmem:[#allocation2 + $0x6c] sm:$0xf] %vm197_vm1, %v14301_v36  ;;  %227 = vst.msk [vmem:[#allocation2 + $0x70] sm:$0xf] %vm197_vm1, %v14301_v36 }
  0x3e   : > { %229 = vst.msk [vmem:[#allocation2 + $0x78] sm:$0xf] %vm197_vm1, %v14301_v36  ;;  %230 = vst.msk [vmem:[#allocation2 + $0x7c] sm:$0xf] %vm197_vm1, %v14301_v36 }
  0x3f   : > { %410 = vbcast.lane.b32.xlu1 %v9803_v20, 264  ;;  %406 = vbcast.lane.b32.xlu0 %v9803_v20, 256  ;;  %232 = vst.msk [vmem:[#allocation2 + $0x84] sm:$0xf] %vm197_vm1, %v14301_v36  ;;  %233 = vst.msk [vmem:[#allocation2 + $0x88] sm:$0xf] %vm197_vm1, %v14301_v36 }
  0x40   : > { %235 = vst.msk [vmem:[#allocation2 + $0x90] sm:$0xf] %vm197_vm1, %v14301_v36  ;;  %236 = vst.msk [vmem:[#allocation2 + $0x94] sm:$0xf] %vm197_vm1, %v14301_v36 }
  0x41   : > { %238 = vst.msk [vmem:[#allocation2 + $0x9c] sm:$0xf] %vm197_vm1, %v14301_v36  ;;  %239 = vst.msk [vmem:[#allocation2 + $0xa0] sm:$0xf] %vm197_vm1, %v14301_v36 }
  0x42   : > { %241 = vst.msk [vmem:[#allocation2 + $0xa8] sm:$0xf] %vm197_vm1, %v14301_v36  ;;  %242 = vst.msk [vmem:[#allocation2 + $0xac] sm:$0xf] %vm197_vm1, %v14301_v36 }
  0x43   : > { %421 = vbcast.lane.b32.xlu1 %v9808_v21, 264  ;;  %417 = vbcast.lane.b32.xlu0 %v9808_v21, 256  ;;  %244 = vst.msk [vmem:[#allocation2 + $0xb4] sm:$0xf] %vm197_vm1, %v14301_v36  ;;  %245 = vst.msk [vmem:[#allocation2 + $0xb8] sm:$0xf] %vm197_vm1, %v14301_v36 }
  0x44   : > { %247 = vst.msk [vmem:[#allocation2 + $0xc0] sm:$0xf] %vm197_vm1, %v14301_v36  ;;  %248 = vst.msk [vmem:[#allocation2 + $0xc4] sm:$0xf] %vm197_vm1, %v14301_v36 }
  0x45   : > { %250 = vst.msk [vmem:[#allocation2 + $0xcc] sm:$0xf] %vm197_vm1, %v14301_v36  ;;  %251 = vst.msk [vmem:[#allocation2 + $0xd0] sm:$0xf] %vm197_vm1, %v14301_v36 }
  0x46   : > { %253 = vst.msk [vmem:[#allocation3] sm:$0xf] %vm197_vm1, %v14301_v36  ;;  %254 = vst.msk [vmem:[#allocation3 + $0x4] sm:$0xf] %vm197_vm1, %v14301_v36 }
  0x47   : > { %432 = vbcast.lane.b32.xlu1 %v9813_v22, 264  ;;  %428 = vbcast.lane.b32.xlu0 %v9813_v22, 256  ;;  %256 = vst.msk [vmem:[#allocation3 + $0xc] sm:$0xf] %vm197_vm1, %v14301_v36  ;;  %257 = vst.msk [vmem:[#allocation3 + $0x10] sm:$0xf] %vm197_vm1, %v14301_v36 }
  0x48   : > { %259 = vst.msk [vmem:[#allocation3 + $0x18] sm:$0xf] %vm197_vm1, %v14301_v36  ;;  %260 = vst.msk [vmem:[#allocation3 + $0x1c] sm:$0xf] %vm197_vm1, %v14301_v36 }
  0x49   : > { %262 = vst.msk [vmem:[#allocation3 + $0x24] sm:$0xf] %vm197_vm1, %v14301_v36  ;;  %263 = vst.msk [vmem:[#allocation3 + $0x28] sm:$0xf] %vm197_vm1, %v14301_v36 }
  0x4a   : > { %265 = vst.msk [vmem:[#allocation3 + $0x30] sm:$0xf] %vm197_vm1, %v14301_v36  ;;  %266 = vst.msk [vmem:[#allocation3 + $0x34] sm:$0xf] %vm197_vm1, %v14301_v36 }
  0x4b   : > { %443 = vbcast.lane.b32.xlu1 %v9817_v23, 264  ;;  %439 = vbcast.lane.b32.xlu0 %v9817_v23, 256  ;;  %268 = vst.msk [vmem:[#allocation3 + $0x3c] sm:$0xf] %vm197_vm1, %v14301_v36  ;;  %269 = vst.msk [vmem:[#allocation3 + $0x40] sm:$0xf] %vm197_vm1, %v14301_v36 }
  0x4c   : > { %271 = vst.msk [vmem:[#allocation3 + $0x48] sm:$0xf] %vm197_vm1, %v14301_v36  ;;  %272 = vst.msk [vmem:[#allocation3 + $0x4c] sm:$0xf] %vm197_vm1, %v14301_v36 }
  0x4d   : > { %274 = vst.msk [vmem:[#allocation3 + $0x54] sm:$0xf] %vm197_vm1, %v14301_v36  ;;  %275 = vst.msk [vmem:[#allocation3 + $0x58] sm:$0xf] %vm197_vm1, %v14301_v36 }
  0x4e   : > { %277 = vst.msk [vmem:[#allocation3 + $0x60] sm:$0xf] %vm197_vm1, %v14301_v36  ;;  %278 = vst.msk [vmem:[#allocation3 + $0x64] sm:$0xf] %vm197_vm1, %v14301_v36 }
  0x4f   : > { %454 = vbcast.lane.b32.xlu1 %v9821_v24, 264  ;;  %450 = vbcast.lane.b32.xlu0 %v9821_v24, 256  ;;  %280 = vst.msk [vmem:[#allocation3 + $0x6c] sm:$0xf] %vm197_vm1, %v14301_v36  ;;  %281 = vst.msk [vmem:[#allocation3 + $0x70] sm:$0xf] %vm197_vm1, %v14301_v36 }
  0x50   : > { %283 = vst.msk [vmem:[#allocation3 + $0x78] sm:$0xf] %vm197_vm1, %v14301_v36  ;;  %284 = vst.msk [vmem:[#allocation3 + $0x7c] sm:$0xf] %vm197_vm1, %v14301_v36 }
  0x51   : > { %286 = vst.msk [vmem:[#allocation3 + $0x84] sm:$0xf] %vm197_vm1, %v14301_v36  ;;  %287 = vst.msk [vmem:[#allocation3 + $0x88] sm:$0xf] %vm197_vm1, %v14301_v36 }
  0x52   : > { %289 = vst.msk [vmem:[#allocation3 + $0x90] sm:$0xf] %vm197_vm1, %v14301_v36  ;;  %290 = vst.msk [vmem:[#allocation3 + $0x94] sm:$0xf] %vm197_vm1, %v14301_v36 }
  0x53   : > { %465 = vbcast.lane.b32.xlu1 %v9825_v25, 264  ;;  %461 = vbcast.lane.b32.xlu0 %v9825_v25, 256  ;;  %292 = vst.msk [vmem:[#allocation3 + $0x9c] sm:$0xf] %vm197_vm1, %v14301_v36  ;;  %293 = vst.msk [vmem:[#allocation3 + $0xa0] sm:$0xf] %vm197_vm1, %v14301_v36 }
  0x54   : > { %295 = vst.msk [vmem:[#allocation3 + $0xa8] sm:$0xf] %vm197_vm1, %v14301_v36  ;;  %296 = vst.msk [vmem:[#allocation3 + $0xac] sm:$0xf] %vm197_vm1, %v14301_v36 }
  0x55   : > { %298 = vst.msk [vmem:[#allocation3 + $0xb4] sm:$0xf] %vm197_vm1, %v14301_v36  ;;  %299 = vst.msk [vmem:[#allocation3 + $0xb8] sm:$0xf] %vm197_vm1, %v14301_v36 }
  0x56   : > { %301 = vst.msk [vmem:[#allocation3 + $0xc0] sm:$0xf] %vm197_vm1, %v14301_v36  ;;  %302 = vst.msk [vmem:[#allocation3 + $0xc4] sm:$0xf] %vm197_vm1, %v14301_v36 }
  0x57   : > { %476 = vbcast.lane.b32.xlu1 %v9829_v26, 264  ;;  %472 = vbcast.lane.b32.xlu0 %v9829_v26, 256  ;;  %304 = vst.msk [vmem:[#allocation3 + $0xcc] sm:$0xf] %vm197_vm1, %v14301_v36  ;;  %305 = vst.msk [vmem:[#allocation3 + $0xd0] sm:$0xf] %vm197_vm1, %v14301_v36 }
  0x5b   : > { %487 = vbcast.lane.b32.xlu1 %v9833_v27, 264  ;;  %483 = vbcast.lane.b32.xlu0 %v9833_v27, 256 }
  0x5f   : > { %563 = vbcast.lane.b32.xlu1 %v9762_v6, 265  ;;  %559 = vbcast.lane.b32.xlu0 %v9762_v6, 257 }
  0x63   : > { %571 = vbcast.lane.b32.xlu1 %v9759_v5, 265  ;;  %567 = vbcast.lane.b32.xlu0 %v9759_v5, 257 }
  0x67   : > { %579 = vbcast.lane.b32.xlu1 %v9772_v8, 265  ;;  %575 = vbcast.lane.b32.xlu0 %v9772_v8, 257 }
  0x6b   : > { %587 = vbcast.lane.b32.xlu1 %v9777_v10, 265  ;;  %583 = vbcast.lane.b32.xlu0 %v9777_v10, 257 }
  0x6f   : > { %595 = vbcast.lane.b32.xlu1 %v9782_v12, 265  ;;  %591 = vbcast.lane.b32.xlu0 %v9782_v12, 257 }
  0x73   : > { %603 = vbcast.lane.b32.xlu1 %v9787_v14, 265  ;;  %599 = vbcast.lane.b32.xlu0 %v9787_v14, 257 }
  0x77   : > { %611 = vbcast.lane.b32.xlu1 %v9792_v16, 265  ;;  %607 = vbcast.lane.b32.xlu0 %v9792_v16, 257 }
  0x7b   : > { %619 = vbcast.lane.b32.xlu1 %v9797_v18, 265  ;;  %615 = vbcast.lane.b32.xlu0 %v9797_v18, 257 }
  0x7f   : > { %627 = vbcast.lane.b32.xlu1 %v9803_v20, 265  ;;  %623 = vbcast.lane.b32.xlu0 %v9803_v20, 257 }
  0x83   : > { %635 = vbcast.lane.b32.xlu1 %v9808_v21, 265  ;;  %631 = vbcast.lane.b32.xlu0 %v9808_v21, 257 }
  0x87   : > { %643 = vbcast.lane.b32.xlu1 %v9813_v22, 265  ;;  %639 = vbcast.lane.b32.xlu0 %v9813_v22, 257 }
  0x8b   : > { %651 = vbcast.lane.b32.xlu1 %v9817_v23, 265  ;;  %647 = vbcast.lane.b32.xlu0 %v9817_v23, 257 }
  0x8f   : > { %659 = vbcast.lane.b32.xlu1 %v9821_v24, 265  ;;  %655 = vbcast.lane.b32.xlu0 %v9821_v24, 257 }
  0x91   : > { %v9863_v28 = vpop.permute.xlu1 %329  ;;  %v9865_v29 = vpop.permute.xlu0 %318 }
  0x93   : > { %667 = vbcast.lane.b32.xlu1 %v9825_v25, 265  ;;  %663 = vbcast.lane.b32.xlu0 %v9825_v25, 257 }
  0x95   : > { %v9869_v30 = vpop.permute.xlu1 %333  ;;  %v9871_v31 = vpop.permute.xlu0 %322 }
  0x97   : > { %675 = vbcast.lane.b32.xlu1 %v9829_v26, 265  ;;  %671 = vbcast.lane.b32.xlu0 %v9829_v26, 257 }
  0x99   : > { %v9875_v32 = vpop.permute.xlu1 %344  ;;  %v9877_v33 = vpop.permute.xlu0 %340 }
  0x9b   : > { %683 = vbcast.lane.b32.xlu1 %v9833_v27, 265  ;;  %679 = vbcast.lane.b32.xlu0 %v9833_v27, 257 }
  0x9d   : > { %v9881_v34 = vpop.permute.xlu1 %355  ;;  %v9883_v35 = vpop.permute.xlu0 %351 }
  0x9f   : > { %759 = vbcast.lane.b32.xlu1 %v9762_v6, 266  ;;  %755 = vbcast.lane.b32.xlu0 %v9762_v6, 258 }
  0xa1   : > { %v9959_v37 = vpop.permute.xlu1 %366  ;;  %v9961_v38 = vpop.permute.xlu0 %362 }
  0xa3   : > { %767 = vbcast.lane.b32.xlu1 %v9759_v5, 266  ;;  %763 = vbcast.lane.b32.xlu0 %v9759_v5, 258 }
  0xa5   : > { %v9965_v39 = vpop.permute.xlu1 %377  ;;  %v9967_v40 = vpop.permute.xlu0 %373 }
  0xa7   : > { %775 = vbcast.lane.b32.xlu1 %v9772_v8, 266  ;;  %771 = vbcast.lane.b32.xlu0 %v9772_v8, 258  ;;  %v309_v8 = vld [vmem:[%s9755_s5 + $0x10] sm:$0x3] }
  0xa9   : > { %v10120_v42 = vpop.permute.xlu1 %388  ;;  %v10122_v43 = vpop.permute.xlu0 %384 }
  0xab   : > { %783 = vbcast.lane.b32.xlu1 %v9777_v10, 266  ;;  %779 = vbcast.lane.b32.xlu0 %v9777_v10, 258 }
  0xad   : > { %v10130_v45 = vpop.permute.xlu1 %399  ;;  %v10132_v46 = vpop.permute.xlu0 %395 }
  0xae   : > { %v10136_v47 = vmul.f32 %v10128_v44, %v10132_v46 }
  0xaf   : > { %791 = vbcast.lane.b32.xlu1 %v9782_v12, 266  ;;  %787 = vbcast.lane.b32.xlu0 %v9782_v12, 258 }
  0xb1   : > { %v10140_v48 = vpop.permute.xlu1 %410  ;;  %v10142_v49 = vpop.permute.xlu0 %406 }
  0xb2   : > { %v10146_v50 = vmul.f32 %v10128_v44, %v10140_v48  ;;  %v10150_v51 = vmul.f32 %v10128_v44, %v10142_v49 }
  0xb3   : > { %799 = vbcast.lane.b32.xlu1 %v9787_v14, 266  ;;  %795 = vbcast.lane.b32.xlu0 %v9787_v14, 258 }
  0xb5   : > { %v10154_v52 = vpop.permute.xlu1 %421  ;;  %v10156_v53 = vpop.permute.xlu0 %417 }
  0xb6   : > { %v10160_v54 = vmul.f32 %v10128_v44, %v10154_v52  ;;  %v10164_v55 = vmul.f32 %v10128_v44, %v10156_v53 }
  0xb7   : > { %807 = vbcast.lane.b32.xlu1 %v9792_v16, 266  ;;  %803 = vbcast.lane.b32.xlu0 %v9792_v16, 258 }
  0xb9   : > { %v10168_v56 = vpop.permute.xlu1 %432  ;;  %v10170_v57 = vpop.permute.xlu0 %428 }
  0xba   : > { %v10174_v58 = vmul.f32 %v10128_v44, %v10168_v56  ;;  %v10178_v59 = vmul.f32 %v10128_v44, %v10170_v57 }
  0xbb   : > { %815 = vbcast.lane.b32.xlu1 %v9797_v18, 266  ;;  %811 = vbcast.lane.b32.xlu0 %v9797_v18, 258 }
  0xbd   : > { %v10182_v60 = vpop.permute.xlu1 %443  ;;  %v10184_v61 = vpop.permute.xlu0 %439 }
  0xbe   : > { %v10188_v62 = vmul.f32 %v10128_v44, %v10182_v60  ;;  %v10192_v63 = vmul.f32 %v10128_v44, %v10184_v61 }
  0xbf   : > { %823 = vbcast.lane.b32.xlu1 %v9803_v20, 266  ;;  %819 = vbcast.lane.b32.xlu0 %v9803_v20, 258 }
  0xc1   : > { %v10196_v4 = vpop.permute.xlu1 %454  ;;  %v10198_v6 = vpop.permute.xlu0 %450 }
  0xc2   : > { %v10202_v9 = vmul.f32 %v10128_v44, %v10196_v4  ;;  %v10206_v11 = vmul.f32 %v10128_v44, %v10198_v6 }
  0xc3   : > { %831 = vbcast.lane.b32.xlu1 %v9808_v21, 266  ;;  %827 = vbcast.lane.b32.xlu0 %v9808_v21, 258 }
  0xc4   : > { %14387 = vst [vmem:[#allocation26_spill] sm:$0xff] %v10202_v9  ;;  %14388 = vst [vmem:[#allocation27_spill] sm:$0xff] %v10206_v11 }
  0xc5   : > { %v10210_v13 = vpop.permute.xlu1 %465  ;;  %v10212_v15 = vpop.permute.xlu0 %461 }
  0xc6   : > { %v10216_v17 = vmul.f32 %v10128_v44, %v10210_v13  ;;  %v10220_v19 = vmul.f32 %v10128_v44, %v10212_v15 }
  0xc7   : > { %839 = vbcast.lane.b32.xlu1 %v9813_v22, 266  ;;  %835 = vbcast.lane.b32.xlu0 %v9813_v22, 258 }
  0xc8   : > { %14389 = vst [vmem:[#allocation28_spill] sm:$0xff] %v10216_v17  ;;  %14390 = vst [vmem:[#allocation29_spill] sm:$0xff] %v10220_v19  ;;  %v10295_v17 = vrot.slane %v10118_v41, %v9747_v2 }
  0xc9   : > { %v10224_v0 = vpop.permute.xlu1 %476  ;;  %v10226_v36 = vpop.permute.xlu0 %472 }
  0xca   : > { %v10230_v1 = vmul.f32 %v10128_v44, %v10224_v0  ;;  %v10234_v21 = vmul.f32 %v10128_v44, %v10226_v36 }
  0xcb   : > { %847 = vbcast.lane.b32.xlu1 %v9817_v23, 266  ;;  %843 = vbcast.lane.b32.xlu0 %v9817_v23, 258 }
  0xcc   : > { %14391 = vst [vmem:[#allocation30_spill] sm:$0xff] %v10230_v1  ;;  %14392 = vst [vmem:[#allocation31_spill] sm:$0xff] %v10234_v21  ;;  %v312_v21 = vld [vmem:[%s14296_s1 + $0x8] sm:$0x7] }
  0xcd   : > { %v10238_v20 = vpop.permute.xlu1 %487  ;;  %v10240_v22 = vpop.permute.xlu0 %483  ;;  %v10301_v9 = vrot.slane %v312_v21, %v9747_v2 }
  0xce   : > { %v10244_v18 = vmul.f32 %v10128_v44, %v10238_v20  ;;  %v10248_v16 = vmul.f32 %v10128_v44, %v10240_v22 }
  0xcf   : > { %855 = vbcast.lane.b32.xlu1 %v9821_v24, 266  ;;  %851 = vbcast.lane.b32.xlu0 %v9821_v24, 258  ;;  %14402 = vst [vmem:[#allocation41_spill] sm:$0xff] %v10301_v9  ;;  %v10320_v9 = vrot.slane %v312_v21, %v9750_v3 }
  0xd0   : > { %14393 = vst [vmem:[#allocation32_spill] sm:$0xff] %v10244_v18  ;;  %14394 = vst [vmem:[#allocation33_spill] sm:$0xff] %v10248_v16  ;;  %v10272_v16 = vrot.slane %v309_v8, %v9750_v3 }
  0xd1   : > { %v10252_v14 = vpop.permute.xlu1 %563  ;;  %v10254_v12 = vpop.permute.xlu0 %559  ;;  %14406 = vst [vmem:[#allocation45_spill] sm:$0xff] %v10320_v9 }
  0xd2   : > { %14395 = vst [vmem:[#allocation34_spill] sm:$0xff] %v10272_v16 }
  0xd3   : > { %863 = vbcast.lane.b32.xlu1 %v9825_v25, 266  ;;  %859 = vbcast.lane.b32.xlu0 %v9825_v25, 258 }
  0xd5   : > { %v10258_v23 = vpop.permute.xlu1 %571  ;;  %v10260_v10 = vpop.permute.xlu0 %567 }
  0xd7   : > { %871 = vbcast.lane.b32.xlu1 %v9829_v26, 266  ;;  %867 = vbcast.lane.b32.xlu0 %v9829_v26, 258  ;;  %v311_v26 = vld [vmem:[%s14296_s1 + $0x4] sm:$0x7] }
  0xd8   : > { %v10298_v11 = vrot.slane %v311_v26, %v9747_v2 }
  0xd9   : > { %v10265_v5 = vpop.permute.xlu1 %579  ;;  %v10267_v24 = vpop.permute.xlu0 %575 }
  0xda   : > { %14401 = vst [vmem:[#allocation40_spill] sm:$0xff] %v10298_v11 }
  0xdb   : > { %879 = vbcast.lane.b32.xlu1 %v9833_v27, 266  ;;  %875 = vbcast.lane.b32.xlu0 %v9833_v27, 258  ;;  %v10287_v27 = vrot.slane %v311_v26, %v9750_v3 }
  0xdd   : > { %v10274_v25 = vpop.permute.xlu1 %587  ;;  %v10276_v18 = vpop.permute.xlu0 %583  ;;  %14398 = vst [vmem:[#allocation37_spill] sm:$0xff] %v10287_v27 }
  0xde   : > { %14396 = vst [vmem:[#allocation35_spill] sm:$0xff] %v10274_v25  ;;  %14397 = vst [vmem:[#allocation36_spill] sm:$0xff] %v10276_v18  ;;  %v10305_v18 = vrot.slane %v10118_v41, %v9767_v7  ;;  %v10308_v25 = vrot.slane %v311_v26, %v9767_v7  ;;  %v10323_v41 = vrot.slane %v309_v8, %v9747_v2 }
  0xdf   : > { %958 = vbcast.lane.b32.xlu1 %v10272_v16, 264  ;;  %954 = vbcast.lane.b32.xlu0 %v10272_v16, 256  ;;  %v10327_v26 = vmul.f32 %v10287_v27, %v9863_v28  ;;  %v503_v2 = vmul.f32 %v10128_v44, %v9967_v40 }
  0xe0   : > { %14403 = vst [vmem:[#allocation42_spill] sm:$0xff] %v10305_v18  ;;  %14404 = vst [vmem:[#allocation43_spill] sm:$0xff] %v10308_v25  ;;  %v10331_v25 = vmul.f32 %v10128_v44, %v9865_v29  ;;  %v10369_v18 = vmul.f32 %v10320_v9, %v9875_v32 }
  0xe1   : > { %v10289_v1 = vpop.permute.xlu1 %595  ;;  %v10291_v19 = vpop.permute.xlu0 %591  ;;  %14407 = vst [vmem:[#allocation46_spill] sm:$0xff] %v10327_v26  ;;  %v10359_v26 = vmul.f32 %v10128_v44, %v9875_v32 }
  0xe2   : > { %14399 = vst [vmem:[#allocation38_spill] sm:$0xff] %v10289_v1  ;;  %14400 = vst [vmem:[#allocation39_spill] sm:$0xff] %v10291_v19  ;;  %v10313_v19 = vrot.slane %v312_v21, %v9767_v7  ;;  %v10317_v1 = vmul.f32 %v10128_v44, %v9863_v28  ;;  %v10335_v7 = vmul.f32 %v10128_v44, %v9869_v30 }
  0xe3   : > { %1034 = vbcast.lane.b32.xlu1 %v10272_v16, 265  ;;  %1030 = vbcast.lane.b32.xlu0 %v10272_v16, 257  ;;  %v504_v28 = vmul.f32 %v10128_v44, %v9965_v39  ;;  %14411 = vst [vmem:[#allocation50_spill] sm:$0xff] %v10359_v26  ;;  %14413 = vst [vmem:[#allocation52_spill] sm:$0xff] %v10369_v18  ;;  %v10381_v26 = vmul.f32 %v10287_v27, %v9877_v33 }
  0xe4   : > { %14405 = vst [vmem:[#allocation44_spill] sm:$0xff] %v10313_v19  ;;  %v10339_v19 = vmul.f32 %v10287_v27, %v9869_v30  ;;  %v10355_v30 = vmul.f32 %v10128_v44, %v9871_v31  ;;  %v10373_v31 = vmul.f32 %v10128_v44, %v9877_v33  ;;  %v10423_v18 = vmul.f32 %v10320_v9, %v9883_v35 }
  0xe5   : > { %v10341_v21 = vpop.permute.xlu1 %603  ;;  %v10343_v8 = vpop.permute.xlu0 %599  ;;  %14416 = vst [vmem:[#allocation55_spill] sm:$0xff] %v10381_v26 }
  0xe6   : > { %14408 = vst [vmem:[#allocation47_spill] sm:$0xff] %v10339_v19  ;;  %14409 = vst [vmem:[#allocation48_spill] sm:$0xff] %v10341_v21  ;;  %v700_v29 = vmul.f32 %v10295_v17, %v10341_v21  ;;  %v699_v3 = vmul.f32 %v10295_v17, %v10343_v8  ;;  %v10363_v19 = vmul.f32 %v10287_v27, %v9875_v32 }
  0xe7   : > { %14410 = vst [vmem:[#allocation49_spill] sm:$0xff] %v10343_v8  ;;  %1110 = vbcast.lane.b32.xlu1 %v10272_v16, 266  ;;  %1106 = vbcast.lane.b32.xlu0 %v10272_v16, 258  ;;  %v10389_v32 = vmul.f32 %v10128_v44, %v9881_v34  ;;  %v10393_v16 = vmul.f32 %v10287_v27, %v9881_v34  ;;  %14422 = vst [vmem:[#allocation61_spill] sm:$0xff] %v10423_v18 }
  0xe8   : > { %14412 = vst [vmem:[#allocation51_spill] sm:$0xff] %v10363_v19  ;;  %v10375_v8 = vadd.f32 %v700_v29, %v504_v28  ;;  %v10377_v21 = vadd.f32 %v699_v3, %v503_v2  ;;  %v10385_v19 = vmul.f32 %v10320_v9, %v9877_v33  ;;  %v506_v3 = vmul.f32 %v10128_v44, %v10120_v42 }
  0xe9   : > { %14418 = vst [vmem:[#allocation57_spill] sm:$0xff] %v10393_v16  ;;  %v10395_v28 = vpop.permute.xlu1 %611  ;;  %v10397_v2 = vpop.permute.xlu0 %607  ;;  %v505_v29 = vmul.f32 %v10128_v44, %v10122_v43  ;;  %v10413_v16 = vmul.f32 %v10128_v44, %v9883_v35  ;;  %v10447_v18 = vmul.f32 %v10287_v27, %v9961_v38 }
  0xea   : > { %14414 = vst [vmem:[#allocation53_spill] sm:$0xff] %v10375_v8  ;;  %14415 = vst [vmem:[#allocation54_spill] sm:$0xff] %v10377_v21  ;;  %v702_v33 = vmul.f32 %v10295_v17, %v10395_v28  ;;  %v701_v21 = vmul.f32 %v10295_v17, %v10397_v2  ;;  %v10409_v8 = vmul.f32 %v10320_v9, %v9881_v34 }
  0xeb   : > { %14417 = vst [vmem:[#allocation56_spill] sm:$0xff] %v10385_v19  ;;  %14419 = vst [vmem:[#allocation58_spill] sm:$0xff] %v10397_v2  ;;  %v10417_v19 = vmul.f32 %v10287_v27, %v9883_v35  ;;  %1189 = vbcast.lane.b32.xlu1 %v10323_v41, 264  ;;  %1185 = vbcast.lane.b32.xlu0 %v10323_v41, 256  ;;  %v10427_v34 = vmul.f32 %v10128_v44, %v9959_v37 }
  0xec   : > { %14420 = vst [vmem:[#allocation59_spill] sm:$0xff] %v10409_v8  ;;  %v10429_v8 = vadd.f32 %v702_v33, %v506_v3  ;;  %v10431_v26 = vadd.f32 %v701_v21, %v505_v29  ;;  %v10435_v2 = vmul.f32 %v10287_v27, %v9959_v37  ;;  %v10443_v35 = vmul.f32 %v10128_v44, %v9961_v38 }
  0xed   : > { %14421 = vst [vmem:[#allocation60_spill] sm:$0xff] %v10417_v19  ;;  %v10439_v19 = vmul.f32 %v10320_v9, %v9959_v37  ;;  %14425 = vst [vmem:[#allocation64_spill] sm:$0xff] %v10447_v18  ;;  %v10449_v3 = vpop.permute.xlu1 %619  ;;  %v10451_v21 = vpop.permute.xlu0 %615  ;;  %v10455_v29 = vmul.f32 %v10320_v9, %v9961_v38  ;;  %v508_v37 = vmul.f32 %v10128_v44, %v10130_v45 }
  0xee   : > { %14423 = vst [vmem:[#allocation62_spill] sm:$0xff] %v10429_v8  ;;  %14424 = vst [vmem:[#allocation63_spill] sm:$0xff] %v10431_v26  ;;  %v704_v33 = vmul.f32 %v10295_v17, %v10449_v3  ;;  %v703_v26 = vmul.f32 %v10295_v17, %v10451_v21  ;;  %v10465_v8 = vmul.f32 %v10287_v27, %v9965_v39 }
  0xef   : > { %14426 = vst [vmem:[#allocation65_spill] sm:$0xff] %v10455_v29  ;;  %v10469_v18 = vmul.f32 %v10320_v9, %v9965_v39  ;;  %v10473_v38 = vmul.f32 %v10287_v27, %v9967_v40  ;;  %1265 = vbcast.lane.b32.xlu1 %v10323_v41, 265  ;;  %1261 = vbcast.lane.b32.xlu0 %v10323_v41, 257 }
  0xf0   : > { %14427 = vst [vmem:[#allocation66_spill] sm:$0xff] %v10465_v8  ;;  %v10479_v44 = vmul.f32 %v10320_v9, %v9967_v40  ;;  %v10483_v29 = vmul.f32 %v10287_v27, %v10120_v42  ;;  %v10485_v8 = vadd.f32 %v704_v33, %v508_v37  ;;  %v10488_v39 = vadd.f32 %v703_v26, %v10136_v47 }
  0xf1   : > { %14428 = vst [vmem:[#allocation67_spill] sm:$0xff] %v10469_v18  ;;  %14429 = vst [vmem:[#allocation68_spill] sm:$0xff] %v10473_v38  ;;  %v10492_v38 = vmul.f32 %v10320_v9, %v10120_v42  ;;  %v10496_v18 = vmul.f32 %v10287_v27, %v10122_v43  ;;  %v10500_v40 = vmul.f32 %v10320_v9, %v10122_v43  ;;  %v10506_v37 = vpop.permute.xlu1 %627  ;;  %v10508_v47 = vpop.permute.xlu0 %623 }
  0xf2   : > { %14430 = vst [vmem:[#allocation69_spill] sm:$0xff] %v10483_v29  ;;  %14431 = vst [vmem:[#allocation70_spill] sm:$0xff] %v10485_v8  ;;  %v10504_v29 = vmul.f32 %v10287_v27, %v10130_v45  ;;  %v10512_v42 = vmul.f32 %v10320_v9, %v10130_v45  ;;  %v10516_v26 = vmul.f32 %v10287_v27, %v10132_v46 }
  0xf3   : > { %14432 = vst [vmem:[#allocation71_spill] sm:$0xff] %v10488_v39  ;;  %14433 = vst [vmem:[#allocation72_spill] sm:$0xff] %v10500_v40  ;;  %v706_v43 = vmul.f32 %v10295_v17, %v10506_v37  ;;  %v705_v33 = vmul.f32 %v10295_v17, %v10508_v47  ;;  %v10524_v39 = vmul.f32 %v10320_v9, %v10132_v46  ;;  %1341 = vbcast.lane.b32.xlu1 %v10323_v41, 266 }
  0xf4   : > { %14434 = vst [vmem:[#allocation73_spill] sm:$0xff] %v10504_v29  ;;  %14435 = vst [vmem:[#allocation74_spill] sm:$0xff] %v10512_v42  ;;  %v10528_v8 = vmul.f32 %v10287_v27, %v10140_v48  ;;  %v10532_v45 = vmul.f32 %v10320_v9, %v10140_v48  ;;  %1337 = vbcast.lane.b32.xlu0 %v10323_v41, 258  ;;  %v10542_v46 = vmul.f32 %v10320_v9, %v10142_v49  ;;  %v14498_v29 = vld [vmem:[#allocation30_spill] sm:$0xff] }
  0xf5   : > { %14436 = vst [vmem:[#allocation75_spill] sm:$0xff] %v10516_v26  ;;  %14437 = vst [vmem:[#allocation76_spill] sm:$0xff] %v10524_v39  ;;  %v10538_v26 = vmul.f32 %v10287_v27, %v10142_v49  ;;  %v10545_v39 = vadd.f32 %v706_v43, %v10146_v50  ;;  %v10552_v48 = vmul.f32 %v10287_v27, %v10154_v52  ;;  %v10566_v50 = vpop.permute.xlu1 %635 }
  0xf6   : > { %14438 = vst [vmem:[#allocation77_spill] sm:$0xff] %v10528_v8  ;;  %14439 = vst [vmem:[#allocation78_spill] sm:$0xff] %v10532_v45  ;;  %v10548_v8 = vadd.f32 %v705_v33, %v10150_v51  ;;  %v10556_v41 = vmul.f32 %v10320_v9, %v10154_v52  ;;  %v10564_v49 = vmul.f32 %v10320_v9, %v10156_v53  ;;  %v10568_v51 = vpop.permute.xlu0 %631 }
  0xf7   : > { %14440 = vst [vmem:[#allocation79_spill] sm:$0xff] %v10538_v26  ;;  %14441 = vst [vmem:[#allocation80_spill] sm:$0xff] %v10542_v46  ;;  %v10560_v26 = vmul.f32 %v10287_v27, %v10156_v53  ;;  %v10572_v43 = vmul.f32 %v10287_v27, %v10168_v56  ;;  %v10576_v52 = vmul.f32 %v10320_v9, %v10168_v56 }
  0xf8   : > { %14442 = vst [vmem:[#allocation81_spill] sm:$0xff] %v10545_v39  ;;  %14443 = vst [vmem:[#allocation82_spill] sm:$0xff] %v10548_v8  ;;  %v708_v33 = vmul.f32 %v10295_v17, %v10566_v50  ;;  %v10584_v53 = vmul.f32 %v10287_v27, %v10170_v57  ;;  %v10596_v56 = vmul.f32 %v10320_v9, %v10182_v60  ;;  %v14492_v39 = vld [vmem:[#allocation48_spill] sm:$0xff] }
  0xf9   : > { %14444 = vst [vmem:[#allocation83_spill] sm:$0xff] %v10552_v48  ;;  %14445 = vst [vmem:[#allocation84_spill] sm:$0xff] %v10556_v41  ;;  %v10604_v8 = vmul.f32 %v10320_v9, %v10184_v61  ;;  %v10840_v46 = vmul.f32 %v10298_v11, %v14492_v39 }
  0xfa   : > { %14446 = vst [vmem:[#allocation85_spill] sm:$0xff] %v10560_v26  ;;  %14447 = vst [vmem:[#allocation86_spill] sm:$0xff] %v10564_v49  ;;  %v707_v26 = vmul.f32 %v10295_v17, %v10568_v51  ;;  %v10588_v49 = vmul.f32 %v10320_v9, %v10170_v57 }
  0xfb   : > { %14448 = vst [vmem:[#allocation87_spill] sm:$0xff] %v10572_v43  ;;  %14449 = vst [vmem:[#allocation88_spill] sm:$0xff] %v10576_v52  ;;  %v10592_v43 = vmul.f32 %v10287_v27, %v10182_v60  ;;  %v10600_v52 = vmul.f32 %v10287_v27, %v10184_v61  ;;  %v10618_v60 = vmul.f32 %v10320_v9, %v10196_v4 }
  0xfc   : > { %14450 = vst [vmem:[#allocation89_spill] sm:$0xff] %v10584_v53  ;;  %14451 = vst [vmem:[#allocation90_spill] sm:$0xff] %v10588_v49  ;;  %v10607_v53 = vadd.f32 %v708_v33, %v10160_v54  ;;  %v10610_v57 = vadd.f32 %v707_v26, %v10164_v55  ;;  %v10626_v61 = vmul.f32 %v10320_v9, %v10198_v6  ;;  %v10628_v54 = vpop.permute.xlu1 %643  ;;  %v10630_v55 = vpop.permute.xlu0 %639  ;;  %v14486_v49 = vld [vmem:[#allocation38_spill] sm:$0xff] }
  0xfd   : > { %14452 = vst [vmem:[#allocation91_spill] sm:$0xff] %v10592_v43  ;;  %14453 = vst [vmem:[#allocation92_spill] sm:$0xff] %v10596_v56  ;;  %v10614_v43 = vmul.f32 %v10287_v27, %v10196_v4  ;;  %v10634_v26 = vmul.f32 %v10287_v27, %v10210_v13  ;;  %v10638_v4 = vmul.f32 %v10320_v9, %v10210_v13 }
  0xfe   : > { %14454 = vst [vmem:[#allocation93_spill] sm:$0xff] %v10600_v52  ;;  %14455 = vst [vmem:[#allocation94_spill] sm:$0xff] %v10604_v8  ;;  %v10622_v52 = vmul.f32 %v10287_v27, %v10198_v6  ;;  %v710_v33 = vmul.f32 %v10295_v17, %v10628_v54  ;;  %v10646_v6 = vmul.f32 %v10287_v27, %v10212_v15 }
  0xff   : > { %14456 = vst [vmem:[#allocation95_spill] sm:$0xff] %v10607_v53  ;;  %14457 = vst [vmem:[#allocation96_spill] sm:$0xff] %v10610_v57  ;;  %v689_v13 = vmul.f32 %v10295_v17, %v10254_v12  ;;  %v10676_v12 = vmul.f32 %v10320_v9, %v10226_v36  ;;  %v10812_v57 = vmul.f32 %v10298_v11, %v14486_v49 }
 0x100   : > { %14458 = vst [vmem:[#allocation97_spill] sm:$0xff] %v10614_v43  ;;  %14459 = vst [vmem:[#allocation98_spill] sm:$0xff] %v10618_v60  ;;  %v10662_v60 = vmul.f32 %v10320_v9, %v10224_v0 }
 0x101   : > { %14460 = vst [vmem:[#allocation99_spill] sm:$0xff] %v10622_v52  ;;  %14461 = vst [vmem:[#allocation100_spill] sm:$0xff] %v10626_v61  ;;  %v709_v52 = vmul.f32 %v10295_v17, %v10630_v55  ;;  %v10650_v61 = vmul.f32 %v10320_v9, %v10212_v15 }
 0x102   : > { %14462 = vst [vmem:[#allocation101_spill] sm:$0xff] %v10634_v26  ;;  %14463 = vst [vmem:[#allocation102_spill] sm:$0xff] %v10638_v4  ;;  %v690_v26 = vmul.f32 %v10295_v17, %v10252_v14  ;;  %v10658_v4 = vmul.f32 %v10287_v27, %v10224_v0  ;;  %v10672_v14 = vmul.f32 %v10287_v27, %v10226_v36 }
 0x103   : > { %14464 = vst [vmem:[#allocation103_spill] sm:$0xff] %v10646_v6  ;;  %14465 = vst [vmem:[#allocation104_spill] sm:$0xff] %v10650_v61  ;;  %v10665_v6 = vadd.f32 %v710_v33, %v10174_v58  ;;  %v10668_v15 = vadd.f32 %v709_v52, %v10178_v59  ;;  %v691_v0 = vmul.f32 %v10295_v17, %v10260_v10  ;;  %v10684_v58 = vpop.permute.xlu0 %647 }
 0x104   : > { %14466 = vst [vmem:[#allocation105_spill] sm:$0xff] %v10658_v4  ;;  %14467 = vst [vmem:[#allocation106_spill] sm:$0xff] %v10662_v60  ;;  %v692_v4 = vmul.f32 %v10295_v17, %v10258_v23  ;;  %v10682_v60 = vpop.permute.xlu1 %651  ;;  %v10688_v59 = vmul.f32 %v10287_v27, %v10238_v20  ;;  %v10692_v52 = vmul.f32 %v10320_v9, %v10238_v20 }
 0x105   : > { %14468 = vst [vmem:[#allocation107_spill] sm:$0xff] %v10665_v6  ;;  %14469 = vst [vmem:[#allocation108_spill] sm:$0xff] %v10668_v15  ;;  %v712_v36 = vmul.f32 %v10295_v17, %v10682_v60  ;;  %v711_v33 = vmul.f32 %v10295_v17, %v10684_v58  ;;  %v10710_v20 = vadd.f32 %v689_v13, %v10331_v25  ;;  %v14484_v15 = vld [vmem:[#allocation27_spill] sm:$0xff] }
 0x106   : > { %14470 = vst [vmem:[#allocation109_spill] sm:$0xff] %v10672_v14  ;;  %14471 = vst [vmem:[#allocation110_spill] sm:$0xff] %v10676_v12  ;;  %v10700_v12 = vmul.f32 %v10287_v27, %v10240_v22  ;;  %v10704_v14 = vmul.f32 %v10320_v9, %v10240_v22  ;;  %v693_v61 = vmul.f32 %v10295_v17, %v10267_v24  ;;  %v14480_v9 = vld [vmem:[#allocation36_spill] sm:$0xff] }
 0x107   : > { %14472 = vst [vmem:[#allocation111_spill] sm:$0xff] %v10688_v59  ;;  %14473 = vst [vmem:[#allocation112_spill] sm:$0xff] %v10692_v52  ;;  %v10707_v59 = vadd.f32 %v690_v26, %v10355_v30  ;;  %v694_v52 = vmul.f32 %v10295_v17, %v10265_v5  ;;  %v10717_v43 = vadd.f32 %v712_v36, %v10188_v62  ;;  %v10738_v62 = vpop.permute.xlu0 %655  ;;  %v14479_v36 = vld [vmem:[#allocation35_spill] sm:$0xff] }
 0x108   : > { %14474 = vst [vmem:[#allocation113_spill] sm:$0xff] %v10700_v12  ;;  %14475 = vst [vmem:[#allocation114_spill] sm:$0xff] %v10704_v14  ;;  %v10720_v27 = vadd.f32 %v711_v33, %v10192_v63  ;;  %v10723_v22 = vadd.f32 %v692_v4, %v10335_v7  ;;  %v10727_v30 = vmul.f32 %v10298_v11, %v10258_v23  ;;  %v10736_v13 = vpop.permute.xlu1 %659  ;;  %v14478_v7 = vld [vmem:[#allocation41_spill] sm:$0xff]  ;;  %v14481_v14 = vld [vmem:[#allocation50_spill] sm:$0xff] }
 0x109   : > { %14476 = vst [vmem:[#allocation115_spill] sm:$0xff] %v10717_v43  ;;  %v10730_v25 = vadd.f32 %v691_v0, %v10317_v1  ;;  %v10734_v26 = vmul.f32 %v10298_v11, %v10260_v10  ;;  %v10742_v63 = vmul.f32 %v10298_v11, %v10265_v5  ;;  %v10746_v4 = vmul.f32 %v14478_v7, %v10265_v5  ;;  %v14482_v43 = vld [vmem:[#allocation26_spill] sm:$0xff] }
 0x10a   : > { %14477 = vst [vmem:[#allocation116_spill] sm:$0xff] %v10720_v27  ;;  %v714_v1 = vmul.f32 %v10295_v17, %v10736_v13  ;;  %v713_v23 = vmul.f32 %v10295_v17, %v10738_v62  ;;  %v10754_v10 = vmul.f32 %v10298_v11, %v10267_v24  ;;  %v10758_v0 = vmul.f32 %v14478_v7, %v10267_v24 }
 0x10b   : > { %v696_v33 = vmul.f32 %v10295_v17, %v14479_v36  ;;  %v695_v5 = vmul.f32 %v10295_v17, %v14480_v9  ;;  %v10765_v12 = vadd.f32 %v694_v52, %v14481_v14  ;;  %v10768_v27 = vadd.f32 %v693_v61, %v10373_v31  ;;  %v14487_v52 = vld [vmem:[#allocation39_spill] sm:$0xff] }
 0x10c   : > { %v10771_v8 = vadd.f32 %v714_v1, %v14482_v43  ;;  %v10774_v56 = vadd.f32 %v713_v23, %v14484_v15  ;;  %v10778_v24 = vmul.f32 %v10298_v11, %v14479_v36  ;;  %v10782_v6 = vmul.f32 %v14478_v7, %v14479_v36  ;;  %v10788_v61 = vpop.permute.xlu1 %667  ;;  %v10790_v43 = vpop.permute.xlu0 %663 }
 0x10d   : > { %v698_v14 = vmul.f32 %v10295_v17, %v14486_v49  ;;  %v697_v31 = vmul.f32 %v10295_v17, %v14487_v52  ;;  %v10794_v15 = vmul.f32 %v10298_v11, %v14480_v9  ;;  %v10798_v1 = vmul.f32 %v14478_v7, %v14480_v9 }
 0x10e   : > { %14483 = vst [vmem:[#allocation35_spill] sm:$0xff] %v10771_v8  ;;  %14485 = vst [vmem:[#allocation36_spill] sm:$0xff] %v10774_v56  ;;  %v716_v23 = vmul.f32 %v10295_v17, %v10788_v61  ;;  %v715_v36 = vmul.f32 %v10295_v17, %v10790_v43  ;;  %v10805_v56 = vadd.f32 %v696_v33, %v10389_v32  ;;  %v14488_v32 = vld [vmem:[#allocation28_spill] sm:$0xff] }
 0x10f   : > { %v10808_v8 = vadd.f32 %v695_v5, %v10413_v16  ;;  %v10816_v9 = vmul.f32 %v14478_v7, %v14486_v49  ;;  %v10820_v53 = vmul.f32 %v10298_v11, %v14487_v52  ;;  %v10824_v41 = vmul.f32 %v14478_v7, %v14487_v52  ;;  %v14490_v16 = vld [vmem:[#allocation29_spill] sm:$0xff] }
 0x110   : > { %v10827_v33 = vadd.f32 %v716_v23, %v14488_v32  ;;  %v10830_v5 = vadd.f32 %v715_v36, %v14490_v16  ;;  %v10833_v48 = vadd.f32 %v698_v14, %v10427_v34  ;;  %v10836_v49 = vadd.f32 %v697_v31, %v10443_v35  ;;  %v676_v45 = vpop.permute.xlu1 %675  ;;  %v672_v23 = vpop.permute.xlu0 %671  ;;  %v14493_v32 = vld [vmem:[#allocation49_spill] sm:$0xff]  ;;  %v14495_v16 = vld [vmem:[#allocation58_spill] sm:$0xff] }
 0x111   : > { %v10844_v52 = vmul.f32 %v14478_v7, %v14492_v39  ;;  %v10848_v36 = vmul.f32 %v10298_v11, %v14493_v32  ;;  %v10852_v34 = vmul.f32 %v14478_v7, %v14493_v32  ;;  %v718_v35 = vmul.f32 %v10295_v17, %v676_v45 }
 0x112   : > { %14489 = vst [vmem:[#allocation50_spill] sm:$0xff] %v10827_v33  ;;  %14491 = vst [vmem:[#allocation26_spill] sm:$0xff] %v10830_v5  ;;  %v717_v14 = vmul.f32 %v10295_v17, %v672_v23  ;;  %v10858_v31 = vmul.f32 %v10298_v11, %v10395_v28  ;;  %v10862_v39 = vmul.f32 %v14478_v7, %v10395_v28  ;;  %v14500_v28 = vld [vmem:[#allocation31_spill] sm:$0xff] }
 0x113   : > { %v10866_v5 = vmul.f32 %v10298_v11, %v14495_v16  ;;  %v10870_v32 = vmul.f32 %v14478_v7, %v14495_v16  ;;  %v10874_v33 = vmul.f32 %v10298_v11, %v10449_v3  ;;  %v10878_v42 = vmul.f32 %v14478_v7, %v10449_v3 }
 0x114   : > { %14494 = vst [vmem:[#allocation27_spill] sm:$0xff] %v10862_v39  ;;  %v10881_v40 = vadd.f32 %v718_v35, %v14498_v29  ;;  %v10884_v39 = vadd.f32 %v717_v14, %v14500_v28  ;;  %v10892_v16 = vmul.f32 %v14478_v7, %v10451_v21  ;;  %v10900_v3 = vmul.f32 %v14478_v7, %v10506_v37  ;;  %v684_v29 = vpop.permute.xlu1 %683  ;;  %v680_v35 = vpop.permute.xlu0 %679 }
 0x115   : > { %14496 = vst [vmem:[#allocation38_spill] sm:$0xff] %v10866_v5  ;;  %14497 = vst [vmem:[#allocation39_spill] sm:$0xff] %v10874_v33  ;;  %v10888_v5 = vmul.f32 %v10298_v11, %v10451_v21  ;;  %v10896_v33 = vmul.f32 %v10298_v11, %v10506_v37  ;;  %v10904_v14 = vmul.f32 %v10298_v11, %v10508_v47 }
 0x116   : > { %14499 = vst [vmem:[#allocation28_spill] sm:$0xff] %v10881_v40  ;;  %14501 = vst [vmem:[#allocation29_spill] sm:$0xff] %v10884_v39  ;;  %v10908_v28 = vmul.f32 %v14478_v7, %v10508_v47  ;;  %v720_v21 = vmul.f32 %v10295_v17, %v684_v29  ;;  %v719_v39 = vmul.f32 %v10295_v17, %v680_v35 }
 0x117   : > { %14502 = vst [vmem:[#allocation48_spill] sm:$0xff] %v10900_v3  ;;  %14503 = vst [vmem:[#allocation49_spill] sm:$0xff] %v10904_v14  ;;  %v10914_v40 = vmul.f32 %v10298_v11, %v10566_v50  ;;  %v10918_v37 = vmul.f32 %v14478_v7, %v10566_v50  ;;  %v10922_v3 = vmul.f32 %v10298_v11, %v10568_v51  ;;  %v14511_v50 = vld [vmem:[#allocation33_spill] sm:$0xff] }
 0x118   : > { %14504 = vst [vmem:[#allocation58_spill] sm:$0xff] %v10908_v28  ;;  %v10926_v47 = vmul.f32 %v14478_v7, %v10568_v51  ;;  %v10930_v28 = vmul.f32 %v10298_v11, %v10628_v54  ;;  %v10934_v17 = vmul.f32 %v14478_v7, %v10628_v54  ;;  %v10948_v51 = vmul.f32 %v14478_v7, %v10630_v55 }
 0x119   : > { %14505 = vst [vmem:[#allocation30_spill] sm:$0xff] %v10914_v40  ;;  %14506 = vst [vmem:[#allocation31_spill] sm:$0xff] %v10918_v37  ;;  %v14509_v40 = vld [vmem:[#allocation32_spill] sm:$0xff]  ;;  %v10940_v37 = vadd.f32 %v719_v39, %v14511_v50  ;;  %v10956_v54 = vmul.f32 %v14478_v7, %v10682_v60  ;;  %v10960_v39 = vmul.f32 %v10298_v11, %v10684_v58 }
 0x11a   : > { %14507 = vst [vmem:[#allocation117_spill] sm:$0xff] %v10922_v3  ;;  %14508 = vst [vmem:[#allocation118_spill] sm:$0xff] %v10930_v28  ;;  %v10937_v14 = vadd.f32 %v720_v21, %v14509_v40  ;;  %v10944_v3 = vmul.f32 %v10298_v11, %v10630_v55  ;;  %v10952_v28 = vmul.f32 %v10298_v11, %v10682_v60  ;;  %v760_v40 = vpop.permute.xlu1 %759  ;;  %v756_v21 = vpop.permute.xlu0 %755  ;;  %v14516_v55 = vld [vmem:[#allocation42_spill] sm:$0xff] }
 0x11b   : > { %14512 = vst [vmem:[#allocation33_spill] sm:$0xff] %v10940_v37  ;;  %14514 = vst [vmem:[#allocation120_spill] sm:$0xff] %v10956_v54  ;;  %v10964_v50 = vmul.f32 %v14478_v7, %v10684_v58  ;;  %v886_v37 = vmul.f32 %v14516_v55, %v760_v40  ;;  %v10974_v60 = vmul.f32 %v14478_v7, %v10736_v13 }
 0x11c   : > { %14510 = vst [vmem:[#allocation32_spill] sm:$0xff] %v10937_v14  ;;  %14513 = vst [vmem:[#allocation119_spill] sm:$0xff] %v10952_v28  ;;  %v885_v14 = vmul.f32 %v14516_v55, %v756_v21  ;;  %v10970_v28 = vmul.f32 %v10298_v11, %v10736_v13  ;;  %v10978_v54 = vmul.f32 %v10298_v11, %v10738_v62 }
 0x11d   : > { %14515 = vst [vmem:[#allocation121_spill] sm:$0xff] %v10964_v50  ;;  %14518 = vst [vmem:[#allocation122_spill] sm:$0xff] %v10974_v60  ;;  %v10982_v58 = vmul.f32 %v14478_v7, %v10738_v62  ;;  %v10986_v40 = vmul.f32 %v10298_v11, %v10788_v61  ;;  %v10990_v21 = vmul.f32 %v14478_v7, %v10788_v61 }
 0x11e   : > { %14517 = vst [vmem:[#allocation42_spill] sm:$0xff] %v10970_v28  ;;  %14519 = vst [vmem:[#allocation123_spill] sm:$0xff] %v10978_v54  ;;  %v918_v28 = vadd.f32 %v886_v37, %v10707_v59  ;;  %v917_v13 = vadd.f32 %v885_v14, %v10710_v20  ;;  %v10996_v60 = vmul.f32 %v10298_v11, %v10790_v43  ;;  %v768_v61 = vpop.permute.xlu1 %767  ;;  %v14528_v20 = vld [vmem:[#allocation47_spill] sm:$0xff]  ;;  %v14529_v37 = vld [vmem:[#allocation46_spill] sm:$0xff] }
 0x11f   : > { %14520 = vst [vmem:[#allocation124_spill] sm:$0xff] %v10982_v58  ;;  %14521 = vst [vmem:[#allocation125_spill] sm:$0xff] %v10986_v40  ;;  %v11000_v62 = vmul.f32 %v14478_v7, %v10790_v43  ;;  %v11003_v58 = vmul.f32 %v10298_v11, %v676_v45  ;;  %v11006_v40 = vmul.f32 %v14478_v7, %v676_v45 }
 0x120   : > { %14522 = vst [vmem:[#allocation126_spill] sm:$0xff] %v10990_v21  ;;  %14523 = vst [vmem:[#allocation127_spill] sm:$0xff] %v10996_v60  ;;  %v764_v21 = vpop.permute.xlu0 %763  ;;  %v11009_v59 = vmul.f32 %v10298_v11, %v672_v23  ;;  %v997_v14 = vadd.f32 %v14528_v20, %v918_v28  ;;  %v996_v54 = vadd.f32 %v14529_v37, %v917_v13 }
 0x121   : > { %14524 = vst [vmem:[#allocation128_spill] sm:$0xff] %v11000_v62  ;;  %14525 = vst [vmem:[#allocation129_spill] sm:$0xff] %v11003_v58  ;;  %v888_v60 = vmul.f32 %v14516_v55, %v768_v61  ;;  %v11015_v43 = vmul.f32 %v14478_v7, %v672_v23  ;;  %v11018_v62 = vmul.f32 %v10298_v11, %v684_v29  ;;  %v14532_v58 = vld [vmem:[#allocation43_spill] sm:$0xff] }
 0x122   : > { %14526 = vst [vmem:[#allocation130_spill] sm:$0xff] %v11006_v40  ;;  %14527 = vst [vmem:[#allocation131_spill] sm:$0xff] %v11009_v59  ;;  %v1117_v45 = vmul.f32 %v14532_v58, %v768_v61  ;;  %v887_v40 = vmul.f32 %v14516_v55, %v764_v21  ;;  %v1073_v59 = vadd.f32 %v10727_v30, %v997_v14 }
 0x123   : > { %14530 = vst [vmem:[#allocation47_spill] sm:$0xff] %v11015_v43  ;;  %14531 = vst [vmem:[#allocation46_spill] sm:$0xff] %v11018_v62  ;;  %v920_v50 = vadd.f32 %v888_v60, %v10723_v22  ;;  %v1072_v28 = vadd.f32 %v10734_v26, %v996_v54  ;;  %v1116_v13 = vmul.f32 %v14532_v58, %v764_v21  ;;  %v776_v62 = vpop.permute.xlu1 %775  ;;  %v14536_v22 = vld [vmem:[#allocation51_spill] sm:$0xff] }
 0x124   : > { %v11027_v20 = vmul.f32 %v14478_v7, %v684_v29  ;;  %v11030_v23 = vmul.f32 %v10298_v11, %v680_v35  ;;  %v11033_v37 = vmul.f32 %v14478_v7, %v680_v35  ;;  %v919_v61 = vadd.f32 %v887_v40, %v10730_v25  ;;  %v772_v43 = vpop.permute.xlu0 %771  ;;  %v14537_v54 = vld [vmem:[#allocation55_spill] sm:$0xff]  ;;  %v14539_v35 = vld [vmem:[#allocation52_spill] sm:$0xff] }
 0x125   : > { %v999_v60 = vadd.f32 %v14536_v22, %v920_v50  ;;  %v1149_v30 = vadd.f32 %v1117_v45, %v1073_v59  ;;  %v1148_v14 = vadd.f32 %v1116_v13, %v1072_v28  ;;  %v890_v26 = vmul.f32 %v14516_v55, %v776_v62 }
 0x126   : > { %14533 = vst [vmem:[#allocation43_spill] sm:$0xff] %v11027_v20  ;;  %14534 = vst [vmem:[#allocation132_spill] sm:$0xff] %v11030_v23  ;;  %v998_v21 = vadd.f32 %v14537_v54, %v919_v61  ;;  %v1119_v29 = vmul.f32 %v14532_v58, %v776_v62  ;;  %v14538_v20 = vld [vmem:[#allocation44_spill] sm:$0xff]  ;;  %v889_v23 = vmul.f32 %v14516_v55, %v772_v43  ;;  %v14541_v61 = vld [vmem:[#allocation57_spill] sm:$0xff] }
 0x127   : > { %14535 = vst [vmem:[#allocation133_spill] sm:$0xff] %v11033_v37  ;;  %v1348_v11 = vmul.f32 %v14538_v20, %v776_v62  ;;  %v1228_v7 = vadd.f32 %v14539_v35, %v1149_v30  ;;  %v14540_v37 = vld [vmem:[#allocation56_spill] sm:$0xff]  ;;  %v1075_v40 = vadd.f32 %v10742_v63, %v999_v60  ;;  %v922_v50 = vadd.f32 %v890_v26, %v10765_v12  ;;  %v784_v13 = vpop.permute.xlu1 %783 }
 0x128   : > { %v1227_v25 = vadd.f32 %v14540_v37, %v1148_v14  ;;  %v1074_v59 = vadd.f32 %v10754_v10, %v998_v21  ;;  %v921_v45 = vadd.f32 %v889_v23, %v10768_v27  ;;  %v1118_v28 = vmul.f32 %v14532_v58, %v772_v43  ;;  %v14542_v60 = vld [vmem:[#allocation60_spill] sm:$0xff]  ;;  %v14543_v23 = vld [vmem:[#allocation59_spill] sm:$0xff]  ;;  %v780_v35 = vpop.permute.xlu0 %779 }
 0x129   : > { %v1347_v62 = vmul.f32 %v14538_v20, %v772_v43  ;;  %v1001_v22 = vadd.f32 %v14541_v61, %v922_v50  ;;  %v1151_v30 = vadd.f32 %v1119_v29, %v1075_v40  ;;  %v1304_v37 = vadd.f32 %v10746_v4, %v1228_v7  ;;  %v14544_v29 = vld [vmem:[#allocation61_spill] sm:$0xff] }
 0x12a   : > { %v1303_v63 = vadd.f32 %v10758_v0, %v1227_v25  ;;  %v1000_v12 = vadd.f32 %v14542_v60, %v921_v45  ;;  %v1150_v14 = vadd.f32 %v1118_v28, %v1074_v59  ;;  %v892_v10 = vmul.f32 %v14516_v55, %v784_v13 }
 0x12b   : > { %v1121_v27 = vmul.f32 %v14532_v58, %v784_v13  ;;  %v1230_v26 = vadd.f32 %v14543_v23, %v1151_v30  ;;  %v1380_v54 = vadd.f32 %v1348_v11, %v1304_v37  ;;  %v1077_v21 = vadd.f32 %v10778_v24, %v1001_v22 }
 0x12c   : > { %v1379_v43 = vadd.f32 %v1347_v62, %v1303_v63  ;;  %v1229_v40 = vadd.f32 %v14544_v29, %v1150_v14  ;;  %v924_v7 = vadd.f32 %v892_v10, %v10805_v56  ;;  %v1350_v4 = vmul.f32 %v14538_v20, %v784_v13  ;;  %v792_v63 = vpop.permute.xlu1 %791  ;;  %v14547_v10 = vld [vmem:[#allocation64_spill] sm:$0xff]  ;;  %v1872_v29 = vld [vmem:[#allocation2 + $0x14] sm:$0x1] }
 0x12d   : > { %v1076_v0 = vadd.f32 %v10794_v15, %v1000_v12  ;;  %v1412_v25 = vmax.f32 %v1380_v54, 0.0  ;;  %v1306_v59 = vadd.f32 %v10782_v6, %v1230_v26  ;;  %v1153_v45 = vadd.f32 %v1121_v27, %v1077_v21 }
 0x12e   : > { %v1411_v50 = vmax.f32 %v1379_v43, 0.0  ;;  %v1003_v28 = vadd.f32 %v10435_v2, %v924_v7  ;;  %v1305_v11 = vadd.f32 %v10798_v1, %v1229_v40  ;;  %v891_v24 = vmul.f32 %v14516_v55, %v780_v35  ;;  %v1866_v7 = vld [vmem:[#allocation2 + $0xc] sm:$0xf] }
 0x12f   : > { %v1120_v62 = vmul.f32 %v14532_v58, %v780_v35  ;;  %v8990_v61 = vpack.c.bf16 %v1412_v25, %v1412_v25  ;;  %v1232_v56 = vadd.f32 %v10439_v19, %v1153_v45  ;;  %v1382_v13 = vadd.f32 %v1350_v4, %v1306_v59 }
 0x130   : > { %v8989_v22 = vpack.c.bf16 %v1411_v50, %v1411_v50  ;;  %v923_v15 = vadd.f32 %v891_v24, %v10808_v8  ;;  %v1349_v37 = vmul.f32 %v14538_v20, %v780_v35  ;;  %v1079_v6 = vadd.f32 %v10812_v57, %v1003_v28  ;;  %v14548_v8 = vld [vmem:[#allocation65_spill] sm:$0xff] }
 0x131   : > { %v1152_v30 = vadd.f32 %v1120_v62, %v1076_v0  ;;  %v1551_v2 = vshrl.u32 %v8990_v61, 16  ;;  %v1554_v60 = vshll.u32 %v8990_v61, 16  ;;  %v1414_v19 = vmax.f32 %v1382_v13, 0.0 }
 0x132   : > { %v1543_v1 = vshrl.u32 %v8989_v22, 16  ;;  %v1546_v12 = vshll.u32 %v8989_v22, 16  ;;  %v1002_v27 = vadd.f32 %v14547_v10, %v923_v15  ;;  %v1381_v26 = vadd.f32 %v1349_v37, %v1305_v11 }
 0x133   : > { %v1231_v23 = vadd.f32 %v14548_v8, %v1152_v30  ;;  %v1553_v54 = vrot.slane %v1551_v2, 7  ;;  %v1308_v21 = vadd.f32 %v10816_v9, %v1232_v56  ;;  %v894_v35 = vmul.f32 %v14516_v55, %v792_v63  ;;  %v788_v30 = vpop.permute.xlu0 %787 }
 0x134   : > { %v1545_v43 = vrot.slane %v1543_v1, 7  ;;  %v8992_v4 = vpack.c.bf16 %v1414_v19, %v1414_v19  ;;  %v1413_v0 = vmax.f32 %v1381_v26, 0.0  ;;  %v1123_v25 = vmul.f32 %v14532_v58, %v792_v63  ;;  %v1879_v1 = vld [vmem:[#allocation2 + $0x20] sm:$0x1] }
 0x135   : > { %v1352_v50 = vmul.f32 %v14538_v20, %v792_v63  ;;  %v1556_v59 = vor.u32 %v1554_v60, %v1553_v54  ;;  %v1558_v45 = vrot.slane %v1553_v54, 4  ;;  %v926_v61 = vadd.f32 %v894_v35, %v10833_v48  ;;  %v14553_v60 = vld [vmem:[#allocation66_spill] sm:$0xff] }
 0x136   : > { %v1548_v28 = vor.u32 %v1546_v12, %v1545_v43  ;;  %v1549_v9 = vrot.slane %v1545_v43, 4  ;;  %v1568_v11 = vshrl.u32 %v8992_v4, 16  ;;  %v1571_v24 = vshll.u32 %v8992_v4, 16  ;;  %v14554_v12 = vld [vmem:[#allocation67_spill] sm:$0xff] }
 0x137   : > { %v8991_v62 = vpack.c.bf16 %v1413_v0, %v1413_v0  ;;  %v1873_v22 = vsel %vm11073_vm5, %v1558_v45, %v1872_v29  ;;  %v1155_v15 = vadd.f32 %v1123_v25, %v1079_v6  ;;  %v1005_v48 = vadd.f32 %v14553_v60, %v926_v61  ;;  %v1875_v29 = vld [vmem:[#allocation2 + $0x18] sm:$0xf]  ;;  %v796_v61 = vpop.permute.xlu0 %795 }
 0x138   : > { %v1557_v56 = vsel %vm11081_vm6, %v1549_v9, %v1556_v59  ;;  %v1867_v13 = vsel %vm11089_vm7, %v1548_v28, %v1866_v7  ;;  %1874 = vst [vmem:[#allocation2 + $0x14] sm:$0x1] %v1873_v22  ;;  %v1570_v37 = vrot.slane %v1568_v11, 7  ;;  %v1384_v10 = vadd.f32 %v1352_v50, %v1308_v21  ;;  %v800_v59 = vpop.permute.xlu1 %799  ;;  %v14555_v11 = vld [vmem:[#allocation68_spill] sm:$0xff] }
 0x139   : > { %1868 = vst [vmem:[#allocation2 + $0xc] sm:$0xf] %v1867_v13  ;;  %1869 = vst.msk [vmem:[#allocation2 + $0x10] sm:$0xf] %vm197_vm1, %v1557_v56  ;;  %v1560_v63 = vshrl.u32 %v8991_v62, 16  ;;  %v1563_v2 = vshll.u32 %v8991_v62, 16  ;;  %v1234_v19 = vadd.f32 %v14554_v12, %v1155_v15  ;;  %v1078_v8 = vadd.f32 %v10820_v53, %v1002_v27 }
 0x13a   : > { %v1307_v26 = vadd.f32 %v10824_v41, %v1231_v23  ;;  %v1573_v54 = vor.u32 %v1571_v24, %v1570_v37  ;;  %v1575_v6 = vrot.slane %v1570_v37, 4  ;;  %v893_v35 = vmul.f32 %v14516_v55, %v788_v30  ;;  %v14556_v13 = vld [vmem:[#allocation53_spill] sm:$0xff] }
 0x13b   : > { %v1562_v43 = vrot.slane %v1560_v63, 7  ;;  %v1416_v7 = vmax.f32 %v1384_v10, 0.0  ;;  %v1122_v4 = vmul.f32 %v14532_v58, %v788_v30  ;;  %v1351_v0 = vmul.f32 %v14538_v20, %v788_v30  ;;  %v14557_v12 = vld [vmem:[#allocation69_spill] sm:$0xff] }
 0x13c   : > { %v1081_v25 = vadd.f32 %v10840_v46, %v1005_v48  ;;  %v1880_v21 = vsel %vm11073_vm5, %v1575_v6, %v1879_v1  ;;  %v925_v41 = vadd.f32 %v893_v35, %v10836_v49  ;;  %v1310_v28 = vadd.f32 %v10844_v52, %v1234_v19 }
 0x13d   : > { %v1565_v53 = vor.u32 %v1563_v2, %v1562_v43  ;;  %v1566_v27 = vrot.slane %v1562_v43, 4  ;;  %1881 = vst [vmem:[#allocation2 + $0x20] sm:$0x1] %v1880_v21  ;;  %v8994_v23 = vpack.c.bf16 %v1416_v7, %v1416_v7  ;;  %v1154_v50 = vadd.f32 %v1122_v4, %v1078_v8  ;;  %v14558_v7 = vld [vmem:[#allocation54_spill] sm:$0xff] }
 0x13e   : > { %v1383_v45 = vadd.f32 %v1351_v0, %v1307_v26  ;;  %v1004_v24 = vadd.f32 %v14555_v11, %v925_v41  ;;  %v896_v62 = vmul.f32 %v14516_v55, %v800_v59  ;;  %v1125_v30 = vmul.f32 %v14532_v58, %v800_v59 }
 0x13f   : > { %v1574_v9 = vsel %vm11081_vm6, %v1566_v27, %v1573_v54  ;;  %v1876_v46 = vsel %vm11089_vm7, %v1565_v53, %v1875_v29  ;;  %v1585_v49 = vshrl.u32 %v8994_v23, 16  ;;  %v1588_v22 = vshll.u32 %v8994_v23, 16  ;;  %v1882_v27 = vld [vmem:[#allocation2 + $0x24] sm:$0xf] }
 0x140   : > { %1877 = vst [vmem:[#allocation2 + $0x18] sm:$0xf] %v1876_v46  ;;  %1878 = vst.msk [vmem:[#allocation2 + $0x1c] sm:$0xf] %vm197_vm1, %v1574_v9  ;;  %v1233_v56 = vadd.f32 %v10479_v44, %v1154_v50  ;;  %v1415_v52 = vmax.f32 %v1383_v45, 0.0  ;;  %v928_v15 = vadd.f32 %v896_v62, %v14556_v13  ;;  %v1354_v37 = vmul.f32 %v14538_v20, %v800_v59  ;;  %v14559_v50 = vld [vmem:[#allocation72_spill] sm:$0xff] }
 0x141   : > { %v1080_v63 = vadd.f32 %v10848_v36, %v1004_v24  ;;  %v1587_v2 = vrot.slane %v1585_v49, 7  ;;  %v895_v1 = vmul.f32 %v14516_v55, %v796_v61  ;;  %v1886_v44 = vld [vmem:[#allocation2 + $0x2c] sm:$0x1]  ;;  %v1157_v10 = vadd.f32 %v1125_v30, %v1081_v25  ;;  %v14560_v45 = vld [vmem:[#allocation27_spill] sm:$0xff] }
 0x142   : > { %v8993_v60 = vpack.c.bf16 %v1415_v52, %v1415_v52  ;;  %v1309_v48 = vadd.f32 %v10852_v34, %v1233_v56  ;;  %v1007_v19 = vadd.f32 %v14557_v12, %v928_v15  ;;  %v1386_v8 = vadd.f32 %v1354_v37, %v1310_v28  ;;  %v808_v34 = vpop.permute.xlu1 %807  ;;  %v14561_v13 = vld [vmem:[#allocation62_spill] sm:$0xff] }
 0x143   : > { %v1124_v26 = vmul.f32 %v14532_v58, %v796_v61  ;;  %v1590_v54 = vor.u32 %v1588_v22, %v1587_v2  ;;  %v1592_v6 = vrot.slane %v1587_v2, 4  ;;  %v1236_v35 = vadd.f32 %v10492_v38, %v1157_v10  ;;  %v804_v22 = vpop.permute.xlu0 %803  ;;  %v14562_v2 = vld [vmem:[#allocation38_spill] sm:$0xff] }
 0x144   : > { %v1577_v43 = vshrl.u32 %v8993_v60, 16  ;;  %v1580_v36 = vshll.u32 %v8993_v60, 16  ;;  %v1418_v29 = vmax.f32 %v1386_v8, 0.0  ;;  %v927_v4 = vadd.f32 %v895_v1, %v14558_v7 }
 0x145   : > { %v1156_v0 = vadd.f32 %v1124_v26, %v1080_v63  ;;  %v1887_v59 = vsel %vm11073_vm5, %v1592_v6, %v1886_v44  ;;  %v1353_v25 = vmul.f32 %v14538_v20, %v796_v61  ;;  %v1083_v53 = vadd.f32 %v10858_v31, %v1007_v19  ;;  %v14563_v44 = vld [vmem:[#allocation73_spill] sm:$0xff] }
 0x146   : > { %v1579_v21 = vrot.slane %v1577_v43, 7  ;;  %1888 = vst [vmem:[#allocation2 + $0x2c] sm:$0x1] %v1887_v59  ;;  %v8996_v41 = vpack.c.bf16 %v1418_v29, %v1418_v29  ;;  %v1006_v23 = vadd.f32 %v10496_v18, %v927_v4  ;;  %v1312_v28 = vadd.f32 %v14560_v45, %v1236_v35  ;;  %v14565_v29 = vld [vmem:[#allocation63_spill] sm:$0xff] }
 0x147   : > { %v1235_v38 = vadd.f32 %v14559_v50, %v1156_v0  ;;  %v1385_v11 = vadd.f32 %v1353_v25, %v1309_v48  ;;  %v898_v24 = vmul.f32 %v14516_v55, %v808_v34  ;;  %v1127_v61 = vmul.f32 %v14532_v58, %v808_v34  ;;  %v1893_v48 = vld [vmem:[#allocation2 + $0x38] sm:$0x1]  ;;  %v816_v0 = vpop.permute.xlu1 %815 }
 0x148   : > { %v1582_v9 = vor.u32 %v1580_v36, %v1579_v21  ;;  %v1583_v46 = vrot.slane %v1579_v21, 4  ;;  %v1602_v62 = vshrl.u32 %v8996_v41, 16  ;;  %v1605_v49 = vshll.u32 %v8996_v41, 16  ;;  %v14566_v21 = vld [vmem:[#allocation39_spill] sm:$0xff] }
 0x149   : > { %v1356_v31 = vmul.f32 %v14538_v20, %v808_v34  ;;  %v1417_v52 = vmax.f32 %v1385_v11, 0.0  ;;  %v930_v15 = vadd.f32 %v898_v24, %v14561_v13  ;;  %v1159_v37 = vadd.f32 %v1127_v61, %v1083_v53  ;;  %v812_v13 = vpop.permute.xlu0 %811 }
 0x14a   : > { %v1591_v56 = vsel %vm11081_vm6, %v1583_v46, %v1590_v54  ;;  %v1883_v18 = vsel %vm11089_vm7, %v1582_v9, %v1882_v27  ;;  %v1604_v30 = vrot.slane %v1602_v62, 7  ;;  %v1082_v60 = vadd.f32 %v14562_v2, %v1006_v23  ;;  %v14564_v54 = vld [vmem:[#allocation74_spill] sm:$0xff]  ;;  %v14567_v27 = vld [vmem:[#allocation75_spill] sm:$0xff]  ;;  %v14568_v62 = vld [vmem:[#allocation76_spill] sm:$0xff] }
 0x14b   : > { %1884 = vst [vmem:[#allocation2 + $0x24] sm:$0xf] %v1883_v18  ;;  %1885 = vst.msk [vmem:[#allocation2 + $0x28] sm:$0xf] %vm197_vm1, %v1591_v56  ;;  %v1388_v63 = vadd.f32 %v1356_v31, %v1312_v28  ;;  %v8995_v1 = vpack.c.bf16 %v1417_v52, %v1417_v52  ;;  %v1009_v12 = vadd.f32 %v14563_v44, %v930_v15  ;;  %v14569_v56 = vld [vmem:[#allocation70_spill] sm:$0xff] }
 0x14c   : > { %v1311_v19 = vadd.f32 %v10870_v32, %v1235_v38  ;;  %v897_v10 = vmul.f32 %v14516_v55, %v804_v22  ;;  %v1607_v8 = vor.u32 %v1605_v49, %v1604_v30  ;;  %v1609_v26 = vrot.slane %v1604_v30, 4  ;;  %v1889_v38 = vld [vmem:[#allocation2 + $0x30] sm:$0xf]  ;;  %v1900_v30 = vld [vmem:[#allocation2 + $0x44] sm:$0x1] }
 0x14d   : > { %v1238_v6 = vadd.f32 %v14564_v54, %v1159_v37  ;;  %v1420_v43 = vmax.f32 %v1388_v63, 0.0  ;;  %v1594_v36 = vshrl.u32 %v8995_v1, 16  ;;  %v1597_v35 = vshll.u32 %v8995_v1, 16  ;;  %v14570_v1 = vld [vmem:[#allocation77_spill] sm:$0xff]  ;;  %v824_v54 = vpop.permute.xlu1 %823 }
 0x14e   : > { %v929_v7 = vadd.f32 %v897_v10, %v14565_v29  ;;  %v1126_v4 = vmul.f32 %v14532_v58, %v804_v22  ;;  %v1894_v34 = vsel %vm11073_vm5, %v1609_v26, %v1893_v48  ;;  %v1355_v32 = vmul.f32 %v14538_v20, %v804_v22  ;;  %v14572_v29 = vld [vmem:[#allocation71_spill] sm:$0xff] }
 0x14f   : > { %v8998_v59 = vpack.c.bf16 %v1420_v43, %v1420_v43  ;;  %v1085_v25 = vadd.f32 %v14566_v21, %v1009_v12  ;;  %1895 = vst [vmem:[#allocation2 + $0x38] sm:$0x1] %v1894_v34  ;;  %v1596_v53 = vrot.slane %v1594_v36, 7  ;;  %v1314_v50 = vadd.f32 %v10878_v42, %v1238_v6  ;;  %v14571_v12 = vld [vmem:[#allocation78_spill] sm:$0xff] }
 0x150   : > { %v1008_v41 = vadd.f32 %v14567_v27, %v929_v7  ;;  %v1158_v23 = vadd.f32 %v1126_v4, %v1082_v60  ;;  %v1387_v9 = vadd.f32 %v1355_v32, %v1311_v19  ;;  %v900_v46 = vmul.f32 %v14516_v55, %v816_v0  ;;  %v14574_v27 = vld [vmem:[#allocation79_spill] sm:$0xff] }
 0x151   : > { %v1619_v45 = vshrl.u32 %v8998_v59, 16  ;;  %v1622_v28 = vshll.u32 %v8998_v59, 16  ;;  %v1599_v11 = vor.u32 %v1597_v35, %v1596_v53  ;;  %v1600_v24 = vrot.slane %v1596_v53, 4  ;;  %v14573_v59 = vld [vmem:[#allocation48_spill] sm:$0xff] }
 0x152   : > { %v1237_v49 = vadd.f32 %v14568_v62, %v1158_v23  ;;  %v1129_v61 = vmul.f32 %v14532_v58, %v816_v0  ;;  %v1419_v22 = vmax.f32 %v1387_v9, 0.0  ;;  %v932_v18 = vadd.f32 %v900_v46, %v14569_v56  ;;  %v14576_v46 = vld [vmem:[#allocation81_spill] sm:$0xff]  ;;  %v14577_v56 = vld [vmem:[#allocation83_spill] sm:$0xff] }
 0x153   : > { %v1621_v31 = vrot.slane %v1619_v45, 7  ;;  %v1358_v52 = vmul.f32 %v14538_v20, %v816_v0  ;;  %v1608_v42 = vsel %vm11081_vm6, %v1600_v24, %v1607_v8  ;;  %v1890_v15 = vsel %vm11089_vm7, %v1599_v11, %v1889_v38 }
 0x154   : > { %v1161_v37 = vadd.f32 %v1129_v61, %v1085_v25  ;;  %v1084_v63 = vadd.f32 %v10888_v5, %v1008_v41  ;;  %1891 = vst [vmem:[#allocation2 + $0x30] sm:$0xf] %v1890_v15  ;;  %1892 = vst.msk [vmem:[#allocation2 + $0x34] sm:$0xf] %vm197_vm1, %v1608_v42  ;;  %v8997_v48 = vpack.c.bf16 %v1419_v22, %v1419_v22  ;;  %v1896_v25 = vld [vmem:[#allocation2 + $0x3c] sm:$0xf]  ;;  %v820_v61 = vpop.permute.xlu0 %819 }
 0x155   : > { %v1624_v2 = vor.u32 %v1622_v28, %v1621_v31  ;;  %v1626_v60 = vrot.slane %v1621_v31, 4  ;;  %v1011_v44 = vadd.f32 %v14570_v1, %v932_v18  ;;  %v1390_v10 = vadd.f32 %v1358_v52, %v1314_v50  ;;  %v14575_v28 = vld [vmem:[#allocation80_spill] sm:$0xff]  ;;  %v14580_v1 = vld [vmem:[#allocation58_spill] sm:$0xff] }
 0x156   : > { %v1240_v19 = vadd.f32 %v14571_v12, %v1161_v37  ;;  %v1313_v8 = vadd.f32 %v10892_v16, %v1237_v49  ;;  %v899_v26 = vmul.f32 %v14516_v55, %v812_v13  ;;  %v1611_v5 = vshrl.u32 %v8997_v48, 16  ;;  %v14578_v15 = vld [vmem:[#allocation84_spill] sm:$0xff]  ;;  %v14579_v37 = vld [vmem:[#allocation49_spill] sm:$0xff] }
 0x157   : > { %v1901_v6 = vsel %vm11073_vm5, %v1626_v60, %v1900_v30  ;;  %v1614_v43 = vshll.u32 %v8997_v48, 16  ;;  %v1128_v36 = vmul.f32 %v14532_v58, %v812_v13  ;;  %v1422_v35 = vmax.f32 %v1390_v10, 0.0  ;;  %v1907_v60 = vld [vmem:[#allocation2 + $0x50] sm:$0x1] }
 0x158   : > { %1902 = vst [vmem:[#allocation2 + $0x44] sm:$0x1] %v1901_v6  ;;  %v931_v7 = vadd.f32 %v899_v26, %v14572_v29  ;;  %v1357_v4 = vmul.f32 %v14538_v20, %v812_v13  ;;  %v1087_v0 = vadd.f32 %v10896_v33, %v1011_v44  ;;  %v1613_v34 = vrot.slane %v1611_v5, 7  ;;  %v14581_v6 = vld [vmem:[#allocation82_spill] sm:$0xff] }
 0x159   : > { %v1160_v16 = vadd.f32 %v1128_v36, %v1084_v63  ;;  %v1316_v32 = vadd.f32 %v14573_v59, %v1240_v19  ;;  %v902_v21 = vmul.f32 %v14516_v55, %v824_v54  ;;  %v9000_v53 = vpack.c.bf16 %v1422_v35, %v1422_v35  ;;  %v832_v35 = vpop.permute.xlu1 %831  ;;  %v1903_v59 = vld [vmem:[#allocation2 + $0x48] sm:$0xf] }
 0x15a   : > { %v1010_v41 = vadd.f32 %v14574_v27, %v931_v7  ;;  %v1389_v23 = vadd.f32 %v1357_v4, %v1313_v8  ;;  %v1131_v50 = vmul.f32 %v14532_v58, %v824_v54  ;;  %v1616_v38 = vor.u32 %v1614_v43, %v1613_v34  ;;  %v14582_v4 = vld [vmem:[#allocation30_spill] sm:$0xff] }
 0x15b   : > { %v1617_v45 = vrot.slane %v1613_v34, 4  ;;  %v1239_v9 = vadd.f32 %v14575_v28, %v1160_v16  ;;  %v934_v11 = vadd.f32 %v902_v21, %v14576_v46  ;;  %v1636_v33 = vshrl.u32 %v9000_v53, 16  ;;  %v14583_v34 = vld [vmem:[#allocation31_spill] sm:$0xff]  ;;  %v14584_v21 = vld [vmem:[#allocation85_spill] sm:$0xff] }
 0x15c   : > { %v1639_v24 = vshll.u32 %v9000_v53, 16  ;;  %v1421_v62 = vmax.f32 %v1389_v23, 0.0  ;;  %v1163_v49 = vadd.f32 %v1131_v50, %v1087_v0  ;;  %v1897_v22 = vsel %vm11089_vm7, %v1616_v38, %v1896_v25  ;;  %v14585_v53 = vld [vmem:[#allocation86_spill] sm:$0xff] }
 0x15d   : > { %v1625_v31 = vsel %vm11081_vm6, %v1617_v45, %v1624_v2  ;;  %v1013_v18 = vadd.f32 %v14577_v56, %v934_v11  ;;  %v1360_v52 = vmul.f32 %v14538_v20, %v824_v54  ;;  %1898 = vst [vmem:[#allocation2 + $0x3c] sm:$0xf] %v1897_v22  ;;  %v1638_v13 = vrot.slane %v1636_v33, 7  ;;  %v828_v33 = vpop.permute.xlu0 %827 }
 0x15e   : > { %1899 = vst.msk [vmem:[#allocation2 + $0x40] sm:$0xf] %vm197_vm1, %v1625_v31  ;;  %v8999_v42 = vpack.c.bf16 %v1421_v62, %v1421_v62  ;;  %v1242_v30 = vadd.f32 %v14578_v15, %v1163_v49  ;;  %v1086_v63 = vadd.f32 %v14579_v37, %v1010_v41  ;;  %v1315_v2 = vadd.f32 %v14580_v1, %v1239_v9  ;;  %v14586_v49 = vld [vmem:[#allocation95_spill] sm:$0xff]  ;;  %v14589_v37 = vld [vmem:[#allocation88_spill] sm:$0xff] }
 0x15f   : > { %v1392_v48 = vadd.f32 %v1360_v52, %v1316_v32  ;;  %v901_v44 = vmul.f32 %v14516_v55, %v820_v61  ;;  %v1130_v12 = vmul.f32 %v14532_v58, %v820_v61  ;;  %v1641_v19 = vor.u32 %v1639_v24, %v1638_v13  ;;  %v14587_v52 = vld [vmem:[#allocation117_spill] sm:$0xff]  ;;  %v14588_v15 = vld [vmem:[#allocation87_spill] sm:$0xff] }
 0x160   : > { %v1643_v10 = vrot.slane %v1638_v13, 4  ;;  %v1628_v8 = vshrl.u32 %v8999_v42, 16  ;;  %v1631_v26 = vshll.u32 %v8999_v42, 16  ;;  %v1359_v36 = vmul.f32 %v14538_v20, %v820_v61  ;;  %v1914_v42 = vld [vmem:[#allocation2 + $0x5c] sm:$0x1] }
 0x161   : > { %v1424_v54 = vmax.f32 %v1392_v48, 0.0  ;;  %v933_v5 = vadd.f32 %v901_v44, %v14581_v6  ;;  %v1162_v43 = vadd.f32 %v1130_v12, %v1086_v63  ;;  %v1089_v0 = vadd.f32 %v14582_v4, %v1013_v18  ;;  %v840_v6 = vpop.permute.xlu1 %839 }
 0x162   : > { %v1908_v29 = vsel %vm11073_vm5, %v1643_v10, %v1907_v60  ;;  %v1630_v7 = vrot.slane %v1628_v8, 7  ;;  %v1318_v16 = vadd.f32 %v14583_v34, %v1242_v30  ;;  %v1391_v41 = vadd.f32 %v1359_v36, %v1315_v2  ;;  %v14590_v10 = vld [vmem:[#allocation96_spill] sm:$0xff]  ;;  %v14591_v36 = vld [vmem:[#allocation118_spill] sm:$0xff] }
 0x163   : > { %1909 = vst [vmem:[#allocation2 + $0x50] sm:$0x1] %v1908_v29  ;;  %v9002_v32 = vpack.c.bf16 %v1424_v54, %v1424_v54  ;;  %v1012_v25 = vadd.f32 %v14584_v21, %v933_v5  ;;  %v1241_v27 = vadd.f32 %v14585_v53, %v1162_v43  ;;  %v904_v38 = vmul.f32 %v14516_v55, %v832_v35  ;;  %v836_v29 = vpop.permute.xlu0 %835 }
 0x164   : > { %v1633_v23 = vor.u32 %v1631_v26, %v1630_v7  ;;  %v1634_v50 = vrot.slane %v1630_v7, 4  ;;  %v1133_v45 = vmul.f32 %v14532_v58, %v832_v35  ;;  %v1423_v46 = vmax.f32 %v1391_v41, 0.0  ;;  %v1910_v7 = vld [vmem:[#allocation2 + $0x54] sm:$0xf] }
 0x165   : > { %v1653_v28 = vshrl.u32 %v9002_v32, 16  ;;  %v1656_v9 = vshll.u32 %v9002_v32, 16  ;;  %v1362_v11 = vmul.f32 %v14538_v20, %v832_v35  ;;  %v936_v61 = vadd.f32 %v904_v38, %v14586_v49  ;;  %v1921_v49 = vld [vmem:[#allocation2 + $0x68] sm:$0x1] }
 0x166   : > { %v1642_v24 = vsel %vm11081_vm6, %v1634_v50, %v1641_v19  ;;  %v1904_v62 = vsel %vm11089_vm7, %v1633_v23, %v1903_v59  ;;  %v1165_v31 = vadd.f32 %v1133_v45, %v1089_v0  ;;  %v9001_v56 = vpack.c.bf16 %v1423_v46, %v1423_v46  ;;  %v14592_v0 = vld [vmem:[#allocation89_spill] sm:$0xff]  ;;  %v14593_v23 = vld [vmem:[#allocation90_spill] sm:$0xff] }
 0x167   : > { %1905 = vst [vmem:[#allocation2 + $0x48] sm:$0xf] %v1904_v62  ;;  %1906 = vst.msk [vmem:[#allocation2 + $0x4c] sm:$0xf] %vm197_vm1, %v1642_v24  ;;  %v1655_v22 = vrot.slane %v1653_v28, 7  ;;  %v1394_v18 = vadd.f32 %v1362_v11, %v1318_v16  ;;  %v1088_v13 = vadd.f32 %v14587_v52, %v1012_v25  ;;  %v1015_v30 = vadd.f32 %v14588_v15, %v936_v61  ;;  %v14594_v28 = vld [vmem:[#allocation107_spill] sm:$0xff] }
 0x168   : > { %v1244_v63 = vadd.f32 %v14589_v37, %v1165_v31  ;;  %v1317_v60 = vadd.f32 %v10926_v47, %v1241_v27  ;;  %v903_v48 = vmul.f32 %v14516_v55, %v828_v33  ;;  %v1645_v44 = vshrl.u32 %v9001_v56, 16  ;;  %v14595_v61 = vld [vmem:[#allocation91_spill] sm:$0xff] }
 0x169   : > { %v1658_v1 = vor.u32 %v1656_v9, %v1655_v22  ;;  %v1660_v2 = vrot.slane %v1655_v22, 4  ;;  %v1648_v12 = vshll.u32 %v9001_v56, 16  ;;  %v1426_v19 = vmax.f32 %v1394_v18, 0.0  ;;  %v14596_v22 = vld [vmem:[#allocation92_spill] sm:$0xff] }
 0x16a   : > { %v935_v8 = vadd.f32 %v903_v48, %v14590_v10  ;;  %v1132_v26 = vmul.f32 %v14532_v58, %v828_v33  ;;  %v1361_v54 = vmul.f32 %v14538_v20, %v828_v33  ;;  %v1647_v43 = vrot.slane %v1645_v44, 7  ;;  %v14597_v48 = vld [vmem:[#allocation108_spill] sm:$0xff] }
 0x16b   : > { %v1915_v5 = vsel %vm11073_vm5, %v1660_v2, %v1914_v42  ;;  %v1091_v47 = vadd.f32 %v14591_v36, %v1015_v30  ;;  %v1320_v35 = vadd.f32 %v10934_v17, %v1244_v63  ;;  %v9004_v4 = vpack.c.bf16 %v1426_v19, %v1426_v19  ;;  %v844_v42 = vpop.permute.xlu0 %843  ;;  %v14599_v10 = vld [vmem:[#allocation120_spill] sm:$0xff] }
 0x16c   : > { %1916 = vst [vmem:[#allocation2 + $0x5c] sm:$0x1] %v1915_v5  ;;  %v1014_v34 = vadd.f32 %v14592_v0, %v935_v8  ;;  %v1164_v16 = vadd.f32 %v1132_v26, %v1088_v13  ;;  %v1393_v59 = vadd.f32 %v1361_v54, %v1317_v60  ;;  %v1650_v32 = vor.u32 %v1648_v12, %v1647_v43  ;;  %v848_v13 = vpop.permute.xlu1 %847  ;;  %v1917_v26 = vld [vmem:[#allocation2 + $0x60] sm:$0xf]  ;;  %v14601_v0 = vld [vmem:[#allocation94_spill] sm:$0xff] }
 0x16d   : > { %v1651_v21 = vrot.slane %v1647_v43, 4  ;;  %v906_v25 = vmul.f32 %v14516_v55, %v840_v6  ;;  %v1135_v53 = vmul.f32 %v14532_v58, %v840_v6  ;;  %v1670_v27 = vshrl.u32 %v9004_v4, 16 }
 0x16e   : > { %v1673_v41 = vshll.u32 %v9004_v4, 16  ;;  %v1243_v50 = vadd.f32 %v14593_v23, %v1164_v16  ;;  %v1425_v38 = vmax.f32 %v1393_v59, 0.0  ;;  %v1911_v45 = vsel %vm11089_vm7, %v1650_v32, %v1910_v7 }
 0x16f   : > { %v1659_v17 = vsel %vm11081_vm6, %v1651_v21, %v1658_v1  ;;  %v938_v9 = vadd.f32 %v906_v25, %v14594_v28  ;;  %v1167_v46 = vadd.f32 %v1135_v53, %v1091_v47  ;;  %1912 = vst [vmem:[#allocation2 + $0x54] sm:$0xf] %v1911_v45  ;;  %v1672_v11 = vrot.slane %v1670_v27, 7  ;;  %v11263_v21 = vpop.permute.xlu0 %851  ;;  %v14602_v27 = vld [vmem:[#allocation115_spill] sm:$0xff]  ;;  %v14603_v28 = vld [vmem:[#allocation97_spill] sm:$0xff] }
 0x170   : > { %1913 = vst.msk [vmem:[#allocation2 + $0x58] sm:$0xf] %vm197_vm1, %v1659_v17  ;;  %v9003_v33 = vpack.c.bf16 %v1425_v38, %v1425_v38  ;;  %v1364_v24 = vmul.f32 %v14538_v20, %v840_v6  ;;  %v1090_v62 = vadd.f32 %v10944_v3, %v1014_v34  ;;  %v1319_v18 = vadd.f32 %v10948_v51, %v1243_v50  ;;  %v14598_v51 = vld [vmem:[#allocation119_spill] sm:$0xff]  ;;  %v14600_v6 = vld [vmem:[#allocation93_spill] sm:$0xff]  ;;  %v856_v32 = vpop.permute.xlu1 %855 }
 0x171   : > { %v1017_v31 = vadd.f32 %v14595_v61, %v938_v9  ;;  %v1246_v56 = vadd.f32 %v14596_v22, %v1167_v46  ;;  %v905_v52 = vmul.f32 %v14516_v55, %v836_v29  ;;  %v1675_v15 = vor.u32 %v1673_v41, %v1672_v11  ;;  %v14604_v46 = vld [vmem:[#allocation98_spill] sm:$0xff] }
 0x172   : > { %v1677_v30 = vrot.slane %v1672_v11, 4  ;;  %v1662_v37 = vshrl.u32 %v9003_v33, 16  ;;  %v1665_v63 = vshll.u32 %v9003_v33, 16  ;;  %v1396_v60 = vadd.f32 %v1364_v24, %v1320_v35  ;;  %v14605_v24 = vld [vmem:[#allocation121_spill] sm:$0xff] }
 0x173   : > { %v937_v1 = vadd.f32 %v905_v52, %v14597_v48  ;;  %v1134_v3 = vmul.f32 %v14532_v58, %v836_v29  ;;  %v1363_v2 = vmul.f32 %v14538_v20, %v836_v29  ;;  %v1093_v19 = vadd.f32 %v14598_v51, %v1017_v31 }
 0x174   : > { %v1922_v44 = vsel %vm11073_vm5, %v1677_v30, %v1921_v49  ;;  %v1664_v12 = vrot.slane %v1662_v37, 7  ;;  %v1322_v8 = vadd.f32 %v14599_v10, %v1246_v56  ;;  %v1428_v54 = vmax.f32 %v1396_v60, 0.0  ;;  %v1928_v56 = vld [vmem:[#allocation2 + $0x74] sm:$0x1] }
 0x175   : > { %1923 = vst [vmem:[#allocation2 + $0x68] sm:$0x1] %v1922_v44  ;;  %v1016_v5 = vadd.f32 %v14600_v6, %v937_v1  ;;  %v1166_v43 = vadd.f32 %v1134_v3, %v1090_v62  ;;  %v1395_v36 = vadd.f32 %v1363_v2, %v1319_v18  ;;  %v908_v7 = vmul.f32 %v14516_v55, %v848_v13  ;;  %v11281_v1 = vpop.permute.xlu0 %859  ;;  %v1924_v3 = vld [vmem:[#allocation2 + $0x6c] sm:$0xf]  ;;  %v14607_v2 = vld [vmem:[#allocation116_spill] sm:$0xff] }
 0x176   : > { %v1667_v47 = vor.u32 %v1665_v63, %v1664_v12  ;;  %v1668_v35 = vrot.slane %v1664_v12, 4  ;;  %v1137_v29 = vmul.f32 %v14532_v58, %v848_v13  ;;  %v9006_v4 = vpack.c.bf16 %v1428_v54, %v1428_v54 }
 0x177   : > { %v1245_v34 = vadd.f32 %v14601_v0, %v1166_v43  ;;  %v1427_v16 = vmax.f32 %v1395_v36, 0.0  ;;  %v1366_v59 = vmul.f32 %v14538_v20, %v848_v13  ;;  %v940_v41 = vadd.f32 %v908_v7, %v14602_v27  ;;  %v14610_v36 = vld [vmem:[#allocation100_spill] sm:$0xff] }
 0x178   : > { %v1676_v25 = vsel %vm11081_vm6, %v1668_v35, %v1675_v15  ;;  %v1918_v53 = vsel %vm11089_vm7, %v1667_v47, %v1917_v26  ;;  %v1169_v23 = vadd.f32 %v1137_v29, %v1093_v19  ;;  %v1687_v50 = vshrl.u32 %v9006_v4, 16  ;;  %v14606_v15 = vld [vmem:[#allocation42_spill] sm:$0xff] }
 0x179   : > { %1919 = vst [vmem:[#allocation2 + $0x60] sm:$0xf] %v1918_v53  ;;  %1920 = vst.msk [vmem:[#allocation2 + $0x64] sm:$0xf] %vm197_vm1, %v1676_v25  ;;  %v1690_v38 = vshll.u32 %v9006_v4, 16  ;;  %v9005_v17 = vpack.c.bf16 %v1427_v16, %v1427_v16  ;;  %v1398_v45 = vadd.f32 %v1366_v59, %v1322_v8  ;;  %v1019_v9 = vadd.f32 %v14603_v28, %v940_v41  ;;  %v14608_v19 = vld [vmem:[#allocation122_spill] sm:$0xff] }
 0x17a   : > { %v1248_v11 = vadd.f32 %v14604_v46, %v1169_v23  ;;  %v1092_v33 = vadd.f32 %v10960_v39, %v1016_v5  ;;  %v1321_v62 = vadd.f32 %v14605_v24, %v1245_v34  ;;  %v1689_v49 = vrot.slane %v1687_v50, 7  ;;  %v11279_v39 = vpop.permute.xlu1 %863  ;;  %v14609_v5 = vld [vmem:[#allocation99_spill] sm:$0xff]  ;;  %v1935_v34 = vld [vmem:[#allocation2 + $0x80] sm:$0x1] }
 0x17b   : > { %v1679_v61 = vshrl.u32 %v9005_v17, 16  ;;  %v1682_v31 = vshll.u32 %v9005_v17, 16  ;;  %v1430_v22 = vmax.f32 %v1398_v45, 0.0  ;;  %v907_v18 = vmul.f32 %v14516_v55, %v844_v42  ;;  %v14611_v53 = vld [vmem:[#allocation123_spill] sm:$0xff]  ;;  %v14613_v17 = vld [vmem:[#allocation124_spill] sm:$0xff] }
 0x17c   : > { %v1136_v52 = vmul.f32 %v14532_v58, %v844_v42  ;;  %v1365_v13 = vmul.f32 %v14538_v20, %v844_v42  ;;  %v1095_v30 = vadd.f32 %v14606_v15, %v1019_v9  ;;  %v1692_v37 = vor.u32 %v1690_v38, %v1689_v49  ;;  %v14612_v50 = vld [vmem:[#allocation35_spill] sm:$0xff]  ;;  %v11302_v9 = vpop.permute.xlu0 %867  ;;  %v1931_v15 = vld [vmem:[#allocation2 + $0x78] sm:$0xf] }
 0x17d   : > { %v1694_v63 = vrot.slane %v1689_v49, 4  ;;  %v1681_v60 = vrot.slane %v1679_v61, 7  ;;  %v9008_v48 = vpack.c.bf16 %v1430_v22, %v1430_v22  ;;  %v939_v44 = vadd.f32 %v907_v18, %v14607_v2 }
 0x17e   : > { %v1168_v12 = vadd.f32 %v1136_v52, %v1092_v33  ;;  %v1397_v51 = vadd.f32 %v1365_v13, %v1321_v62  ;;  %v1324_v10 = vadd.f32 %v14608_v19, %v1248_v11  ;;  %v910_v0 = vmul.f32 %v14516_v55, %v856_v32  ;;  %v11300_v28 = vpop.permute.xlu1 %871  ;;  %v14618_v19 = vld [vmem:[#allocation103_spill] sm:$0xff] }
 0x17f   : > { %v1929_v42 = vsel %vm11073_vm5, %v1694_v63, %v1928_v56  ;;  %v1684_v8 = vor.u32 %v1682_v31, %v1681_v60  ;;  %v1685_v26 = vrot.slane %v1681_v60, 4  ;;  %v1704_v54 = vshrl.u32 %v9008_v48, 16  ;;  %v14615_v56 = vld [vmem:[#allocation102_spill] sm:$0xff]  ;;  %v14617_v60 = vld [vmem:[#allocation125_spill] sm:$0xff] }
 0x180   : > { %1930 = vst [vmem:[#allocation2 + $0x74] sm:$0x1] %v1929_v42  ;;  %v1707_v6 = vshll.u32 %v9008_v48, 16  ;;  %v1018_v43 = vadd.f32 %v14609_v5, %v939_v44  ;;  %v1247_v47 = vadd.f32 %v14610_v36, %v1168_v12  ;;  %v1429_v35 = vmax.f32 %v1397_v51, 0.0  ;;  %v14619_v42 = vld [vmem:[#allocation104_spill] sm:$0xff] }
 0x181   : > { %v1693_v7 = vsel %vm11081_vm6, %v1685_v26, %v1692_v37  ;;  %v1925_v29 = vsel %vm11089_vm7, %v1684_v8, %v1924_v3  ;;  %v1706_v4 = vrot.slane %v1704_v54, 7  ;;  %v1139_v59 = vmul.f32 %v14532_v58, %v856_v32  ;;  %v14620_v26 = vld [vmem:[#allocation126_spill] sm:$0xff] }
 0x182   : > { %1926 = vst [vmem:[#allocation2 + $0x6c] sm:$0xf] %v1925_v29  ;;  %1927 = vst.msk [vmem:[#allocation2 + $0x70] sm:$0xf] %vm197_vm1, %v1693_v7  ;;  %v9007_v16 = vpack.c.bf16 %v1429_v35, %v1429_v35  ;;  %v1368_v25 = vmul.f32 %v14538_v20, %v856_v32  ;;  %v1094_v27 = vadd.f32 %v14611_v53, %v1018_v43  ;;  %v14614_v32 = vld [vmem:[#allocation101_spill] sm:$0xff]  ;;  %v11322_v5 = vpop.permute.xlu1 %879  ;;  %v11324_v43 = vpop.permute.xlu0 %875 }
 0x183   : > { %v1709_v41 = vor.u32 %v1707_v6, %v1706_v4  ;;  %v1711_v23 = vrot.slane %v1706_v4, 4  ;;  %v942_v38 = vadd.f32 %v910_v0, %v14612_v50  ;;  %v1323_v45 = vadd.f32 %v14613_v17, %v1247_v47  ;;  %v14622_v4 = vld [vmem:[#allocation105_spill] sm:$0xff]  ;;  %v1942_v50 = vld [vmem:[#allocation2 + $0x8c] sm:$0x1] }
 0x184   : > { %v1696_v46 = vshrl.u32 %v9007_v16, 16  ;;  %v1699_v11 = vshll.u32 %v9007_v16, 16  ;;  %v1171_v33 = vadd.f32 %v1139_v59, %v1095_v30  ;;  %v1400_v24 = vadd.f32 %v1368_v25, %v1324_v10  ;;  %v14616_v30 = vld [vmem:[#allocation36_spill] sm:$0xff]  ;;  %v14623_v25 = vld [vmem:[#allocation127_spill] sm:$0xff] }
 0x185   : > { %v1936_v62 = vsel %vm11073_vm5, %v1711_v23, %v1935_v34  ;;  %v1021_v49 = vadd.f32 %v14614_v32, %v942_v38  ;;  %v909_v61 = vmul.f32 %v14516_v55, %v11263_v21  ;;  %v1138_v31 = vmul.f32 %v14532_v58, %v11263_v21 }
 0x186   : > { %1937 = vst [vmem:[#allocation2 + $0x80] sm:$0x1] %v1936_v62  ;;  %v1698_v22 = vrot.slane %v1696_v46, 7  ;;  %v1250_v18 = vadd.f32 %v14615_v56, %v1171_v33  ;;  %v1432_v52 = vmax.f32 %v1400_v24, 0.0  ;;  %v1367_v13 = vmul.f32 %v14538_v20, %v11263_v21  ;;  %v14621_v21 = vld [vmem:[#allocation50_spill] sm:$0xff]  ;;  %v11346_v56 = vpop.permute.xlu1 %958 }
 0x187   : > { %v941_v37 = vadd.f32 %v909_v61, %v14616_v30  ;;  %v1170_v63 = vadd.f32 %v1138_v31, %v1094_v27  ;;  %v1097_v48 = vadd.f32 %v14617_v60, %v1021_v49  ;;  %v912_v3 = vmul.f32 %v14516_v55, %v11279_v39  ;;  %v14624_v27 = vld [vmem:[#allocation128_spill] sm:$0xff]  ;;  %v14625_v24 = vld [vmem:[#allocation26_spill] sm:$0xff] }
 0x188   : > { %v1701_v2 = vor.u32 %v1699_v11, %v1698_v22  ;;  %v1702_v44 = vrot.slane %v1698_v22, 4  ;;  %v9010_v12 = vpack.c.bf16 %v1432_v52, %v1432_v52  ;;  %v1399_v51 = vadd.f32 %v1367_v13, %v1323_v45  ;;  %v14626_v61 = vld [vmem:[#allocation106_spill] sm:$0xff]  ;;  %v14627_v13 = vld [vmem:[#allocation109_spill] sm:$0xff] }
 0x189   : > { %v1020_v10 = vadd.f32 %v14618_v19, %v941_v37  ;;  %v1249_v8 = vadd.f32 %v14619_v42, %v1170_v63  ;;  %v1326_v54 = vadd.f32 %v14620_v26, %v1250_v18  ;;  %v944_v6 = vadd.f32 %v912_v3, %v14621_v21  ;;  %v11348_v18 = vpop.permute.xlu0 %954  ;;  %v14629_v3 = vld [vmem:[#allocation130_spill] sm:$0xff] }
 0x18a   : > { %v1710_v36 = vsel %vm11081_vm6, %v1702_v44, %v1709_v41  ;;  %v1932_v47 = vsel %vm11089_vm7, %v1701_v2, %v1931_v15  ;;  %v1721_v35 = vshrl.u32 %v9010_v12, 16  ;;  %v1724_v7 = vshll.u32 %v9010_v12, 16  ;;  %v1938_v44 = vld [vmem:[#allocation2 + $0x84] sm:$0xf]  ;;  %v14630_v12 = vld [vmem:[#allocation110_spill] sm:$0xff] }
 0x18b   : > { %1933 = vst [vmem:[#allocation2 + $0x78] sm:$0xf] %v1932_v47  ;;  %1934 = vst.msk [vmem:[#allocation2 + $0x7c] sm:$0xf] %vm197_vm1, %v1710_v36  ;;  %v1431_v29 = vmax.f32 %v1399_v51, 0.0  ;;  %v1023_v0 = vadd.f32 %v14622_v4, %v944_v6  ;;  %v1141_v34 = vmul.f32 %v14532_v58, %v11279_v39  ;;  %v1370_v16 = vmul.f32 %v14538_v20, %v11279_v39  ;;  %v14631_v36 = vld [vmem:[#allocation28_spill] sm:$0xff] }
 0x18c   : > { %v1723_v59 = vrot.slane %v1721_v35, 7  ;;  %v1096_v53 = vadd.f32 %v14623_v25, %v1020_v10  ;;  %v1325_v41 = vadd.f32 %v14624_v27, %v1249_v8  ;;  %v911_v23 = vmul.f32 %v14516_v55, %v11281_v1 }
 0x18d   : > { %v9009_v38 = vpack.c.bf16 %v1431_v29, %v1431_v29  ;;  %v1173_v17 = vadd.f32 %v1141_v34, %v1097_v48  ;;  %v1402_v45 = vadd.f32 %v1370_v16, %v1326_v54  ;;  %v1140_v46 = vmul.f32 %v14532_v58, %v11281_v1  ;;  %v14632_v34 = vld [vmem:[#allocation131_spill] sm:$0xff]  ;;  %v11370_v25 = vpop.permute.xlu0 %1030 }
 0x18e   : > { %v1726_v11 = vor.u32 %v1724_v7, %v1723_v59  ;;  %v1728_v33 = vrot.slane %v1723_v59, 4  ;;  %v943_v62 = vadd.f32 %v911_v23, %v14625_v24  ;;  %v1369_v39 = vmul.f32 %v14538_v20, %v11281_v1  ;;  %v14628_v1 = vld [vmem:[#allocation129_spill] sm:$0xff]  ;;  %v11368_v59 = vpop.permute.xlu1 %1034 }
 0x18f   : > { %v1713_v32 = vshrl.u32 %v9009_v38, 16  ;;  %v1716_v49 = vshll.u32 %v9009_v38, 16  ;;  %v1252_v31 = vadd.f32 %v14626_v61, %v1173_v17  ;;  %v1434_v22 = vmax.f32 %v1402_v45, 0.0  ;;  %v1945_v61 = vld [vmem:[#allocation2 + $0x90] sm:$0xf] }
 0x190   : > { %v1943_v52 = vsel %vm11073_vm5, %v1728_v33, %v1942_v50  ;;  %v1022_v15 = vadd.f32 %v14627_v13, %v943_v62  ;;  %v1172_v30 = vadd.f32 %v1140_v46, %v1096_v53  ;;  %v1401_v37 = vadd.f32 %v1369_v39, %v1325_v41  ;;  %v1949_v53 = vld [vmem:[#allocation2 + $0x98] sm:$0x1]  ;;  %v14637_v13 = vld [vmem:[#allocation43_spill] sm:$0xff] }
 0x191   : > { %1944 = vst [vmem:[#allocation2 + $0x8c] sm:$0x1] %v1943_v52  ;;  %v1715_v63 = vrot.slane %v1713_v32, 7  ;;  %v9012_v60 = vpack.c.bf16 %v1434_v22, %v1434_v22  ;;  %v1099_v48 = vadd.f32 %v14628_v1, %v1023_v0  ;;  %v1328_v2 = vadd.f32 %v14629_v3, %v1252_v31  ;;  %v14634_v50 = vld [vmem:[#allocation112_spill] sm:$0xff]  ;;  %v14636_v22 = vld [vmem:[#allocation46_spill] sm:$0xff] }
 0x192   : > { %v1251_v51 = vadd.f32 %v14630_v12, %v1172_v30  ;;  %v1433_v19 = vmax.f32 %v1401_v37, 0.0  ;;  %v914_v10 = vmul.f32 %v14516_v55, %v11300_v28  ;;  %v1143_v42 = vmul.f32 %v14532_v58, %v11300_v28  ;;  %v11393_v12 = vpop.permute.xlu0 %1106 }
 0x193   : > { %v1718_v8 = vor.u32 %v1716_v49, %v1715_v63  ;;  %v1719_v26 = vrot.slane %v1715_v63, 4  ;;  %v1738_v54 = vshrl.u32 %v9012_v60, 16  ;;  %v1741_v21 = vshll.u32 %v9012_v60, 16  ;;  %v14638_v63 = vld [vmem:[#allocation29_spill] sm:$0xff] }
 0x194   : > { %v9011_v6 = vpack.c.bf16 %v1433_v19, %v1433_v19  ;;  %v946_v47 = vadd.f32 %v914_v10, %v14631_v36  ;;  %v1175_v35 = vadd.f32 %v1143_v42, %v1099_v48  ;;  %v1372_v7 = vmul.f32 %v14538_v20, %v11300_v28  ;;  %v14633_v28 = vld [vmem:[#allocation111_spill] sm:$0xff]  ;;  %v14639_v10 = vld [vmem:[#allocation113_spill] sm:$0xff]  ;;  %v14641_v36 = vld [vmem:[#allocation32_spill] sm:$0xff] }
 0x195   : > { %v1727_v29 = vsel %vm11081_vm6, %v1719_v26, %v1726_v11  ;;  %v1939_v4 = vsel %vm11089_vm7, %v1718_v8, %v1938_v44  ;;  %v1740_v0 = vrot.slane %v1738_v54, 7  ;;  %v1098_v16 = vadd.f32 %v14632_v34, %v1022_v15  ;;  %v14635_v11 = vld [vmem:[#allocation47_spill] sm:$0xff]  ;;  %v11391_v44 = vpop.permute.xlu1 %1110  ;;  %v14640_v8 = vld [vmem:[#allocation114_spill] sm:$0xff] }
 0x196   : > { %1940 = vst [vmem:[#allocation2 + $0x84] sm:$0xf] %v1939_v4  ;;  %1941 = vst.msk [vmem:[#allocation2 + $0x88] sm:$0xf] %vm197_vm1, %v1727_v29  ;;  %v1730_v27 = vshrl.u32 %v9011_v6, 16  ;;  %v1733_v41 = vshll.u32 %v9011_v6, 16  ;;  %v1025_v23 = vadd.f32 %v14633_v28, %v946_v47  ;;  %v1254_v38 = vadd.f32 %v14634_v50, %v1175_v35 }
 0x197   : > { %v1743_v17 = vor.u32 %v1741_v21, %v1740_v0  ;;  %v1745_v45 = vrot.slane %v1740_v0, 4  ;;  %v1404_v46 = vadd.f32 %v1372_v7, %v1328_v2  ;;  %v1327_v33 = vadd.f32 %v14635_v11, %v1251_v51  ;;  %v14642_v29 = vld [vmem:[#allocation132_spill] sm:$0xff]  ;;  %v14643_v0 = vld [vmem:[#allocation133_spill] sm:$0xff] }
 0x198   : > { %v1732_v24 = vrot.slane %v1730_v27, 7  ;;  %v913_v62 = vmul.f32 %v14516_v55, %v11302_v9  ;;  %v1142_v39 = vmul.f32 %v14532_v58, %v11302_v9  ;;  %v1371_v32 = vmul.f32 %v14538_v20, %v11302_v9  ;;  %v1956_v28 = vld [vmem:[#allocation2 + $0xa4] sm:$0x1] }
 0x199   : > { %v1950_v49 = vsel %vm11073_vm5, %v1745_v45, %v1949_v53  ;;  %v1436_v31 = vmax.f32 %v1404_v46, 0.0  ;;  %v1101_v52 = vadd.f32 %v14636_v22, %v1025_v23  ;;  %v1330_v15 = vadd.f32 %v14637_v13, %v1254_v38  ;;  %v14644_v38 = vld [vmem:[#allocation37_spill] sm:$0xff] }
 0x19a   : > { %1951 = vst [vmem:[#allocation2 + $0x98] sm:$0x1] %v1950_v49  ;;  %v1735_v30 = vor.u32 %v1733_v41, %v1732_v24  ;;  %v1736_v37 = vrot.slane %v1732_v24, 4  ;;  %v945_v60 = vadd.f32 %v913_v62, %v14638_v63  ;;  %v1174_v1 = vadd.f32 %v1142_v39, %v1098_v16  ;;  %v1190_v62 = vpop.permute.xlu1 %1189 }
 0x19b   : > { %v9014_v48 = vpack.c.bf16 %v1436_v31, %v1436_v31  ;;  %v1403_v3 = vadd.f32 %v1371_v32, %v1327_v33  ;;  %v916_v9 = vmul.f32 %v14516_v55, %v11322_v5  ;;  %v1145_v2 = vmul.f32 %v14532_v58, %v11322_v5  ;;  %v14646_v32 = vld [vmem:[#allocation33_spill] sm:$0xff] }
 0x19c   : > { %v1744_v51 = vsel %vm11081_vm6, %v1736_v37, %v1743_v17  ;;  %v1946_v19 = vsel %vm11089_vm7, %v1735_v30, %v1945_v61  ;;  %v1024_v42 = vadd.f32 %v14639_v10, %v945_v60  ;;  %v1253_v26 = vadd.f32 %v14640_v8, %v1174_v1  ;;  %v14645_v17 = vld [vmem:[#allocation45_spill] sm:$0xff] }
 0x19d   : > { %1947 = vst [vmem:[#allocation2 + $0x90] sm:$0xf] %v1946_v19  ;;  %1948 = vst.msk [vmem:[#allocation2 + $0x94] sm:$0xf] %vm197_vm1, %v1744_v51  ;;  %v1755_v54 = vshrl.u32 %v9014_v48, 16  ;;  %v1758_v21 = vshll.u32 %v9014_v48, 16  ;;  %v948_v47 = vadd.f32 %v916_v9, %v14641_v36  ;;  %v1177_v35 = vadd.f32 %v1145_v2, %v1101_v52 }
 0x19e   : > { %v1435_v6 = vmax.f32 %v1403_v3, 0.0  ;;  %v1374_v7 = vmul.f32 %v14538_v20, %v11322_v5  ;;  %v1100_v4 = vadd.f32 %v14642_v29, %v1024_v42  ;;  %v1329_v34 = vadd.f32 %v14643_v0, %v1253_v26  ;;  %v14647_v48 = vld [vmem:[#allocation40_spill] sm:$0xff]  ;;  %v14648_v9 = vld [vmem:[#allocation41_spill] sm:$0xff] }
 0x19f   : > { %v1757_v16 = vrot.slane %v1755_v54, 7  ;;  %v915_v27 = vmul.f32 %v14516_v55, %v11324_v43  ;;  %v1144_v41 = vmul.f32 %v14532_v58, %v11324_v43  ;;  %v1373_v50 = vmul.f32 %v14538_v20, %v11324_v43  ;;  %v1186_v55 = vpop.permute.xlu0 %1185 }
 0x1a0   : > { %v9013_v53 = vpack.c.bf16 %v1435_v6, %v1435_v6  ;;  %v1406_v23 = vadd.f32 %v1374_v7, %v1330_v15  ;;  %v995_v5 = vmul.f32 %v14644_v38, %v11346_v56  ;;  %v1224_v45 = vmul.f32 %v14645_v17, %v11346_v56  ;;  %v1952_v15 = vld [vmem:[#allocation2 + $0x9c] sm:$0xf]  ;;  %v1963_v7 = vld [vmem:[#allocation2 + $0xb0] sm:$0x1] }
 0x1a1   : > { %v1760_v46 = vor.u32 %v1758_v21, %v1757_v16  ;;  %v1762_v11 = vrot.slane %v1757_v16, 4  ;;  %v947_v49 = vadd.f32 %v915_v27, %v14646_v32  ;;  %v1176_v61 = vadd.f32 %v1144_v41, %v1100_v4  ;;  %v1266_v21 = vpop.permute.xlu1 %1265 }
 0x1a2   : > { %v1747_v33 = vshrl.u32 %v9013_v53, 16  ;;  %v1750_v24 = vshll.u32 %v9013_v53, 16  ;;  %v1438_v39 = vmax.f32 %v1406_v23, 0.0  ;;  %v1405_v31 = vadd.f32 %v1373_v50, %v1329_v34 }
 0x1a3   : > { %v1957_v43 = vsel %vm11073_vm5, %v1762_v11, %v1956_v28  ;;  %v1027_v52 = vadd.f32 %v995_v5, %v948_v47  ;;  %v1256_v13 = vadd.f32 %v1224_v45, %v1177_v35  ;;  %v994_v37 = vmul.f32 %v14644_v38, %v11348_v18  ;;  %v1262_v6 = vpop.permute.xlu0 %1261  ;;  %v1959_v28 = vld [vmem:[#allocation2 + $0xa8] sm:$0xf] }
 0x1a4   : > { %v1749_v22 = vrot.slane %v1747_v33, 7  ;;  %1958 = vst [vmem:[#allocation2 + $0xa4] sm:$0x1] %v1957_v43  ;;  %v9016_v56 = vpack.c.bf16 %v1438_v39, %v1438_v39  ;;  %v1437_v30 = vmax.f32 %v1405_v31, 0.0  ;;  %v1223_v63 = vmul.f32 %v14645_v17, %v11348_v18 }
 0x1a5   : > { %v1071_v3 = vmul.f32 %v14647_v48, %v11368_v59  ;;  %v1300_v2 = vmul.f32 %v14648_v9, %v11368_v59  ;;  %v1026_v42 = vadd.f32 %v994_v37, %v947_v49  ;;  %v1070_v29 = vmul.f32 %v14647_v48, %v11370_v25  ;;  %v1342_v39 = vpop.permute.xlu1 %1341  ;;  %v1970_v48 = vld [vmem:[#allocation2 + $0xbc] sm:$0x1] }
 0x1a6   : > { %v1752_v60 = vor.u32 %v1750_v24, %v1749_v22  ;;  %v1753_v1 = vrot.slane %v1749_v22, 4  ;;  %v1772_v51 = vshrl.u32 %v9016_v56, 16  ;;  %v1775_v19 = vshll.u32 %v9016_v56, 16 }
 0x1a7   : > { %v9015_v10 = vpack.c.bf16 %v1437_v30, %v1437_v30  ;;  %v1255_v54 = vadd.f32 %v1223_v63, %v1176_v61  ;;  %v1103_v18 = vadd.f32 %v1071_v3, %v1027_v52  ;;  %v1332_v35 = vadd.f32 %v1300_v2, %v1256_v13  ;;  %v1338_v32 = vpop.permute.xlu0 %1337 }
 0x1a8   : > { %v1761_v8 = vsel %vm11081_vm6, %v1753_v1, %v1760_v46  ;;  %v1953_v26 = vsel %vm11089_vm7, %v1752_v60, %v1952_v15  ;;  %v1774_v36 = vrot.slane %v1772_v51, 7  ;;  %v1299_v4 = vmul.f32 %v14648_v9, %v11370_v25 }
 0x1a9   : > { %1954 = vst [vmem:[#allocation2 + $0x9c] sm:$0xf] %v1953_v26  ;;  %1955 = vst.msk [vmem:[#allocation2 + $0xa0] sm:$0xf] %vm197_vm1, %v1761_v8  ;;  %v1764_v47 = vshrl.u32 %v9015_v10, 16  ;;  %v1767_v59 = vshll.u32 %v9015_v10, 16  ;;  %v1147_v0 = vmul.f32 %v14532_v58, %v11391_v44  ;;  %v1376_v34 = vmul.f32 %v14538_v20, %v11391_v44 }
 0x1aa   : > { %v1777_v16 = vor.u32 %v1775_v19, %v1774_v36  ;;  %v1779_v53 = vrot.slane %v1774_v36, 4  ;;  %v1146_v41 = vmul.f32 %v14532_v58, %v11393_v12  ;;  %v1102_v23 = vadd.f32 %v1070_v29, %v1026_v42 }
 0x1ab   : > { %v1766_v27 = vrot.slane %v1764_v47, 7  ;;  %v1331_v50 = vadd.f32 %v1299_v4, %v1255_v54  ;;  %v1179_v38 = vadd.f32 %v1147_v0, %v1103_v18  ;;  %v1408_v5 = vadd.f32 %v1376_v34, %v1332_v35  ;;  %v1977_v34 = vld [vmem:[#allocation2 + $0xc8] sm:$0x1] }
 0x1ac   : > { %v1964_v25 = vsel %vm11073_vm5, %v1779_v53, %v1963_v7  ;;  %v1375_v11 = vmul.f32 %v14538_v20, %v11393_v12  ;;  %v1178_v33 = vadd.f32 %v1146_v41, %v1102_v23  ;;  %v1226_v24 = vmul.f32 %v14645_v17, %v1190_v62 }
 0x1ad   : > { %v1769_v45 = vor.u32 %v1767_v59, %v1766_v27  ;;  %v1770_v46 = vrot.slane %v1766_v27, 4  ;;  %1965 = vst [vmem:[#allocation2 + $0xb0] sm:$0x1] %v1964_v25  ;;  %v1440_v44 = vmax.f32 %v1408_v5, 0.0  ;;  %v1225_v58 = vmul.f32 %v14645_v17, %v1186_v55 }
 0x1ae   : > { %v1407_v31 = vadd.f32 %v1375_v11, %v1331_v50  ;;  %v1302_v43 = vmul.f32 %v14648_v9, %v1266_v21  ;;  %v1258_v22 = vadd.f32 %v1226_v24, %v1179_v38  ;;  %v1301_v62 = vmul.f32 %v14648_v9, %v1262_v6 }
 0x1af   : > { %v1778_v49 = vsel %vm11081_vm6, %v1770_v46, %v1777_v16  ;;  %v1960_v61 = vsel %vm11089_vm7, %v1769_v45, %v1959_v28  ;;  %v9018_v12 = vpack.c.bf16 %v1440_v44, %v1440_v44  ;;  %v1257_v52 = vadd.f32 %v1225_v58, %v1178_v33  ;;  %v1973_v16 = vld [vmem:[#allocation2 + $0xc0] sm:$0xf] }
 0x1b0   : > { %1961 = vst [vmem:[#allocation2 + $0xa8] sm:$0xf] %v1960_v61  ;;  %1962 = vst.msk [vmem:[#allocation2 + $0xac] sm:$0xf] %vm197_vm1, %v1778_v49  ;;  %v1439_v17 = vmax.f32 %v1407_v31, 0.0  ;;  %v1378_v55 = vmul.f32 %v14538_v20, %v1342_v39  ;;  %v1377_v13 = vmul.f32 %v14538_v20, %v1338_v32  ;;  %v1334_v56 = vadd.f32 %v1302_v43, %v1258_v22 }
 0x1b1   : > { %v1789_v15 = vshrl.u32 %v9018_v12, 16  ;;  %v1333_v30 = vadd.f32 %v1301_v62, %v1257_v52  ;;  %v1792_v3 = vshll.u32 %v9018_v12, 16  ;;  %v1966_v20 = vld [vmem:[#allocation2 + $0xb4] sm:$0xf] }
 0x1b2   : > { %v9017_v37 = vpack.c.bf16 %v1439_v17, %v1439_v17  ;;  %v1410_v60 = vadd.f32 %v1378_v55, %v1334_v56 }
 0x1b3   : > { %v1791_v63 = vrot.slane %v1789_v15, 7  ;;  %v1409_v1 = vadd.f32 %v1377_v13, %v1333_v30 }
 0x1b4   : > { %v1781_v2 = vshrl.u32 %v9017_v37, 16  ;;  %v1442_v19 = vmax.f32 %v1410_v60, 0.0  ;;  %v1784_v8 = vshll.u32 %v9017_v37, 16 }
 0x1b5   : > { %v1796_v51 = vrot.slane %v1791_v63, 4  ;;  %v1441_v10 = vmax.f32 %v1409_v1, 0.0  ;;  %v1794_v42 = vor.u32 %v1792_v3, %v1791_v63 }
 0x1b6   : > { %v1783_v9 = vrot.slane %v1781_v2, 7  ;;  %v9020_v54 = vpack.c.bf16 %v1442_v19, %v1442_v19 }
 0x1b7   : > { %v1971_v26 = vsel %vm11073_vm5, %v1796_v51, %v1970_v48  ;;  %v9019_v18 = vpack.c.bf16 %v1441_v10, %v1441_v10 }
 0x1b8   : > { %1972 = vst [vmem:[#allocation2 + $0xbc] sm:$0x1] %v1971_v26  ;;  %v1786_v21 = vor.u32 %v1784_v8, %v1783_v9  ;;  %v1787_v6 = vrot.slane %v1783_v9, 4  ;;  %v1806_v36 = vshrl.u32 %v9020_v54, 16  ;;  %v1809_v29 = vshll.u32 %v9020_v54, 16 }
 0x1b9   : > { %v1798_v47 = vshrl.u32 %v9019_v18, 16  ;;  %v1801_v0 = vshll.u32 %v9019_v18, 16 }
 0x1ba   : > { %v1795_v59 = vsel %vm11081_vm6, %v1787_v6, %v1794_v42  ;;  %v1967_v35 = vsel %vm11089_vm7, %v1786_v21, %v1966_v20  ;;  %v1808_v7 = vrot.slane %v1806_v36, 7 }
 0x1bb   : > { %1968 = vst [vmem:[#allocation2 + $0xb4] sm:$0xf] %v1967_v35  ;;  %1969 = vst.msk [vmem:[#allocation2 + $0xb8] sm:$0xf] %vm197_vm1, %v1795_v59  ;;  %v1800_v4 = vrot.slane %v1798_v47, 7 }
 0x1bc   : > { %v1811_v53 = vor.u32 %v1809_v29, %v1808_v7  ;;  %v1813_v27 = vrot.slane %v1808_v7, 4 }
 0x1bd   : > { %v1803_v41 = vor.u32 %v1801_v0, %v1800_v4  ;;  %v1804_v28 = vrot.slane %v1800_v4, 4 }
 0x1be   : > { %v1978_v23 = vsel %vm11073_vm5, %v1813_v27, %v1977_v34 }
 0x1bf   : > { %v1812_v50 = vsel %vm11081_vm6, %v1804_v28, %v1811_v53  ;;  %v1974_v38 = vsel %vm11089_vm7, %v1803_v41, %v1973_v16  ;;  %1979 = vst [vmem:[#allocation2 + $0xc8] sm:$0x1] %v1978_v23 }
 0x1c0   : > { %1975 = vst [vmem:[#allocation2 + $0xc0] sm:$0xf] %v1974_v38  ;;  %1976 = vst.msk [vmem:[#allocation2 + $0xc4] sm:$0xf] %vm197_vm1, %v1812_v50 }
 0x1c1 LB: >> { %v11480_v5 = vld [vmem:[#allocation2 + $0xc] sm:$0xff]   ;;  %v11482_v25 = vld [vmem:[#allocation2 + $0x14] ss:$0 sps:$4 sm:$0x11]   ;;  %vm2168_vm8 = vsmask.f32 7424  ;;  %s9660_s20 = sphi %s11475_s20, %s1985_s20  }
 0x1c2   : >> { %v11484_v45 = vld [vmem:[#allocation2 + $0x18] sm:$0xff]   ;;  %v2182_v46 = vshrl.u32 %v11480_v5, 16  ;;  %v2184_v11 = vshll.u32 %v11480_v5, 16  ;;  %v2189_v44 = vshll.u32 %v11482_v25, 16  ;;  %v11489_v33 = vld [vmem:[#allocation2 + $0x24] sm:$0xff]   ;;  %v11495_v32 = vld [vmem:[#allocation2 + $0x30] sm:$0xff]  }
 0x1c3   : >> { %v11491_v24 = vld [vmem:[#allocation2 + $0x20] ss:$0 sps:$4 sm:$0x11]   ;;  %v2194_v58 = vshrl.u32 %v11484_v45, 16  ;;  %v2196_v39 = vshll.u32 %v11484_v45, 16  ;;  %v2206_v12 = vshrl.u32 %v11489_v33, 16 }
 0x1c4   : >> { %v2186_v49 = vrot.slane %v2184_v11, 1  ;;  %v2191_v61 = vrot.slane %v2189_v44, 1  ;;  %v2201_v43 = vshll.u32 %v11491_v24, 16  ;;  %v2208_v22 = vshll.u32 %v11489_v33, 16  ;;  %v11508_v60 = vld [vmem:[#allocation2 + $0x3c] sm:$0xff]   ;;  %s9663_s22 = smov 64  }
 0x1c5   : >> { %v2198_v31 = vrot.slane %v2196_v39, 1  ;;  %v11500_v62 = vld [vmem:[#allocation2 + $0x2c] ss:$0 sps:$4 sm:$0x11]   ;;  %v2218_v17 = vshrl.u32 %v11495_v32, 16  ;;  %v2220_v63 = vshll.u32 %v11495_v32, 16 }
 0x1c6   : >> { %v2187_v52 = vor.u32 %v2186_v49, %v2182_v46  ;;  %v2203_v13 = vrot.slane %v2201_v43, 1  ;;  %v2210_v15 = vrot.slane %v2208_v22, 1  ;;  %v2213_v30 = vshll.u32 %v11500_v62, 16  ;;  %v11505_v37 = vld [vmem:[#allocation2 + $0x38] ss:$0 sps:$4 sm:$0x11]  }
 0x1c7   : >> { %v2199_v55 = vor.u32 %v2198_v31, %v2194_v58  ;;  %v2222_v2 = vrot.slane %v2220_v63, 1  ;;  %v2225_v51 = vshll.u32 %v11505_v37, 16  ;;  %v11513_v19 = vld [vmem:[#allocation2 + $0x44] ss:$0 sps:$4 sm:$0x11]   ;;  %v2230_v10 = vshrl.u32 %v11508_v60, 16 }
 0x1c8   : >> { %v2192_v56 = vsel %vm2168_vm8, %v2187_v52, %v2191_v61  ;;  %v2211_v1 = vor.u32 %v2210_v15, %v2206_v12  ;;  %v2215_v3 = vrot.slane %v2213_v30, 1  ;;  %v2232_v42 = vshll.u32 %v11508_v60, 16  ;;  %v11519_v54 = vld [vmem:[#allocation2 + $0x48] sm:$0xff]   ;;  %v11521_v18 = vld [vmem:[#allocation2 + $0x54] sm:$0xff]   ;;  %v11530_v7 = vld [vmem:[#allocation2 + $0x60] sm:$0xff]   ;;  %s9021_s23 = smul.u32 576, %s9660_s20 }
 0x1c9   : >> { %2363 = vrot.lane.b32.xlu0 %v2192_v56, %s9663_s22  ;;  %v2204_v48 = vsel %vm2168_vm8, %v2199_v55, %v2203_v13  ;;  %v2223_v8 = vor.u32 %v2222_v2, %v2218_v17  ;;  %v2227_v26 = vrot.slane %v2225_v51, 1  ;;  %v2237_v20 = vshll.u32 %v11513_v19, 16  ;;  %v11525_v6 = vld [vmem:[#allocation2 + $0x50] ss:$0 sps:$4 sm:$0x11]   ;;  %v11551_v12 = vld [vmem:[#allocation2 + $0x78] sm:$0xff]  }
 0x1ca   : >> { %v2216_v9 = vsel %vm2168_vm8, %v2211_v1, %v2215_v3  ;;  %v2234_v21 = vrot.slane %v2232_v42, 1  ;;  %v2242_v59 = vshrl.u32 %v11519_v54, 16  ;;  %v2244_v35 = vshll.u32 %v11519_v54, 16  ;;  %v11533_v0 = vld [vmem:[#allocation2 + $0x5c] ss:$0 sps:$4 sm:$0x11]   ;;  %s11563_s29 = scalar_lea.vmem %s14297_s2, %s9021_s23 }
 0x1cb   : >> { %2367 = vrot.lane.b32.xlu1 %v2216_v9, %s9663_s22  ;;  %v2228_v36 = vsel %vm2168_vm8, %v2223_v8, %v2227_v26  ;;  %v2239_v47 = vrot.slane %v2237_v20, 1  ;;  %v2249_v4 = vshll.u32 %v11525_v6, 16  ;;  %v2254_v16 = vshrl.u32 %v11521_v18, 16  ;;  %v11542_v46 = vld [vmem:[#allocation2 + $0x68] ss:$0 sps:$4 sm:$0x11]  }
 0x1cc   : >> { %v2235_v29 = vor.u32 %v2234_v21, %v2230_v10  ;;  %v2246_v34 = vrot.slane %v2244_v35, 1  ;;  %v2256_v53 = vshll.u32 %v11521_v18, 16  ;;  %v2266_v27 = vshrl.u32 %v11530_v7, 16  ;;  %v11545_v44 = vld [vmem:[#allocation2 + $0x6c] sm:$0xff]   ;;  %v11568_v1 = vld [vmem:[#allocation2 + $0x84] sm:$0xff]   ;;  %s1985_s20 = sadd.s32 1, %s9660_s20  }
 0x1cd   : >> { %2365 = vrot.lane.b32.xlu0 %v2204_v48, %s9663_s22  ;;  %v2251_v28 = vrot.slane %v2249_v4, 1  ;;  %v2261_v23 = vshll.u32 %v11533_v0, 16  ;;  %v2268_v11 = vshll.u32 %v11530_v7, 16  ;;  %v2273_v31 = vshll.u32 %v11542_v46, 16  ;;  %v9458_v3 = vld [vmem:[%s11563_s29 + $0x60] sm:$0xff]   ;;  %v9461_v8 = vld [vmem:[%s11563_s29 + $0x68] sm:$0xff]  }
 0x1ce   : >> { %v2240_v41 = vsel %vm2168_vm8, %v2235_v29, %v2239_v47  ;;  %v2247_v50 = vor.u32 %v2246_v34, %v2242_v59  ;;  %v2258_v38 = vrot.slane %v2256_v53, 1  ;;  %v9664_v43 = vmov 0   ;;  %v11555_v22 = vld [vmem:[#allocation2 + $0x74] ss:$0 sps:$4 sm:$0x11]   ;;  %p1982_p11 = scmp.ge.s32.totalorder %s1985_s20, 9  }
 0x1cf   : >> { %2369 = vrot.lane.b32.xlu1 %v2228_v36, %s9663_s22  ;;  %v2263_v58 = vrot.slane %v2261_v23, 1  ;;  %v2270_v61 = vrot.slane %v2268_v11, 1  ;;  %2695 = vmatprep.subr.bf16.mxu0 %v9664_v43  ;;  %v2278_v52 = vshrl.u32 %v11545_v44, 16  ;;  %v2280_v17 = vshll.u32 %v11545_v44, 16  ;;  %v9462_v29 = vld [vmem:[%s11563_s29 + $0x70] sm:$0xff]   ;;  %s9086_s10 = sshll.u32 (%p1982_p11), %s9714_s19, 8 }
 0x1d0   : >> { %v2252_v39 = vsel %vm2168_vm8, %v2247_v50, %v2251_v28  ;;  %v2259_v49 = vor.u32 %v2258_v38, %v2254_v16  ;;  %4685 = vmatprep.subr.bf16.mxu1 %v9664_v43  ;;  %v2275_v15 = vrot.slane %v2273_v31, 1  ;;  %v2290_v56 = vshrl.u32 %v11551_v12, 16  ;;  %v11572_v2 = vld [vmem:[#allocation2 + $0x80] ss:$0 sps:$4 sm:$0x11]   ;;  %2696 = vmatpush1.bf16.msra.mxu0 %v9458_v3  ;;  %v9465_v28 = vld [vmem:[%s11563_s29 + $0x78] sm:$0xff]   ;;  %s14243_s20 = scalar_lea.hbm (%p1982_p11), %s14299_s4, %s9086_s10 }
 0x1d1   : >> { %2371 = vrot.lane.b32.xlu0 %v2240_v41, %s9663_s22  ;;  %v2271_v13 = vor.u32 %v2270_v61, %v2266_v27  ;;  %v2282_v30 = vrot.slane %v2280_v17, 1  ;;  %v2285_v63 = vshll.u32 %v11555_v22, 16  ;;  %v2292_v42 = vshll.u32 %v11551_v12, 16  ;;  %2697 = vmatprep.subr.bf16.mxu0 %v9664_v43  ;;  %v11581_v36 = vld [vmem:[#allocation2 + $0x8c] ss:$0 sps:$4 sm:$0x11]  }
 0x1d2   : >> { %v2264_v55 = vsel %vm2168_vm8, %v2259_v49, %v2263_v58  ;;  %v2297_v9 = vshll.u32 %v11572_v2, 16  ;;  %v2302_v59 = vshrl.u32 %v11568_v1, 16  ;;  %v2304_v35 = vshll.u32 %v11568_v1, 16  ;;  %v11590_v27 = vld [vmem:[#allocation2 + $0x90] sm:$0xff]   ;;  %v11601_v49 = vld [vmem:[#allocation2 + $0x9c] sm:$0xff]   ;;  %s8419_s11 = sshll.u32 (%p1982_p11), %s11473_s14, 4  ;;  %s14245_s11 = int_to_ptr.vmem [resolvable:$true] %s8419_s11 }
 0x1d3   : >> { %2373 = vrot.lane.b32.xlu1 %v2252_v39, %s9663_s22  ;;  %v2276_v48 = vsel %vm2168_vm8, %v2271_v13, %v2275_v15  ;;  %v2283_v51 = vor.u32 %v2282_v30, %v2278_v52  ;;  %v2287_v10 = vrot.slane %v2285_v63, 1  ;;  %v2294_v20 = vrot.slane %v2292_v42, 1  ;;  %v11593_v23 = vld [vmem:[#allocation2 + $0x98] ss:$0 sps:$4 sm:$0x11]   ;;  %v9466_v52 = vld [vmem:[%s11563_s29 + $0x80] sm:$0xff]  }
 0x1d4   : >> { %v2299_v21 = vrot.slane %v2297_v9, 1  ;;  %2698 = vmatpush1.bf16.msra.mxu0 %v9461_v8  ;;  %v2309_v4 = vshll.u32 %v11581_v36, 16  ;;  %v2306_v16 = vrot.slane %v2304_v35, 1  ;;  %v2314_v50 = vshrl.u32 %v11590_v27, 16  ;;  %v9469_v63 = vld [vmem:[%s11563_s29 + $0x88] sm:$0xff]   ;;  %v14652_v14 = vld [vmem:[#allocation11_spill] sm:$0xff] (%p1982_p11) }
 0x1d5   : >> { %2375 = vrot.lane.b32.xlu0 %v2264_v55, %s9663_s22  ;;  %v2288_v26 = vsel %vm2168_vm8, %v2283_v51, %v2287_v10  ;;  %v2295_v47 = vor.u32 %v2294_v20, %v2290_v56  ;;  %2699 = vmatprep.subr.bf16.mxu0 %v9664_v43  ;;  %v2316_v38 = vshll.u32 %v11590_v27, 16  ;;  %v2321_v58 = vshll.u32 %v11593_v23, 16  ;;  %v11603_v31 = vld [vmem:[#allocation2 + $0xa4] ss:$0 sps:$4 sm:$0x11]   ;;  %v11610_v56 = vld [vmem:[#allocation2 + $0xa8] sm:$0xff]  }
 0x1d6   : >> { %v2311_v53 = vrot.slane %v2309_v4, 1  ;;  %v2307_v41 = vor.u32 %v2306_v16, %v2302_v59  ;;  %v2326_v55 = vshrl.u32 %v11601_v49, 16  ;;  %v2328_v13 = vshll.u32 %v11601_v49, 16  ;;  %v11615_v51 = vld [vmem:[#allocation2 + $0xb0] ss:$0 sps:$4 sm:$0x11]  }
 0x1d7   : >> { %2377 = vrot.lane.b32.xlu1 %v2276_v48, %s9663_s22  ;;  %v2300_v34 = vsel %vm2168_vm8, %v2295_v47, %v2299_v21  ;;  %v2318_v39 = vrot.slane %v2316_v38, 1  ;;  %v2323_v61 = vrot.slane %v2321_v58, 1  ;;  %v2333_v15 = vshll.u32 %v11603_v31, 16  ;;  %v11621_v20 = vld [vmem:[#allocation2 + $0xb4] sm:$0xff]   ;;  %v11636_v58 = vld [vmem:[#allocation2 + $0xc0] sm:$0xff]   ;;  %s9590_s23 = scalar_lea.vmem (%p1982_p11), %s14245_s11, 256 }
 0x1d8   : >> { %2700 = vmatpush1.bf16.msra.mxu0 %v9462_v29  ;;  %v2312_v11 = vsel %vm2168_vm8, %v2307_v41, %v2311_v53  ;;  %v2330_v48 = vrot.slane %v2328_v13, 1  ;;  %v2338_v10 = vshrl.u32 %v11610_v56, 16  ;;  %v2340_v42 = vshll.u32 %v11610_v56, 16  ;;  %v11625_v35 = vld [vmem:[#allocation2 + $0xbc] ss:$0 sps:$4 sm:$0x11]   ;;  %p9591_p12 = scmp.ne.s32.totalorder (%p1982_p11), %s14245_s11, %s9590_s23 }
 0x1d9   : >> { %2379 = vrot.lane.b32.xlu0 %v2288_v26, %s9663_s22  ;;  %2701 = vmatprep.subr.bf16.mxu0 %v9664_v43  ;;  %v2319_v17 = vor.u32 %v2318_v39, %v2314_v50  ;;  %v2335_v3 = vrot.slane %v2333_v15, 1  ;;  %v2345_v26 = vshll.u32 %v11615_v51, 16  ;;  %v2350_v29 = vshrl.u32 %v11621_v20, 16  ;;  %v9473_v39 = vld [vmem:[%s11563_s29 + $0x98] sm:$0xff]   ;;  %v11652_v15 = vld [vmem:[#allocation2] sm:$0xff]   ;;  %s9665_s27 = smov (%p1982_p11), [#allocation4]  }
 0x1da   : >> { %v2331_v9 = vor.u32 %v2330_v48, %v2326_v55  ;;  %v2342_v8 = vrot.slane %v2340_v42, 1  ;;  %v2352_v4 = vshll.u32 %v11621_v20, 16  ;;  %vm2393_vm9 = vcmask 1046528   ;;  %v9474_v48 = vld [vmem:[%s11563_s29 + $0xa0] sm:$0xff]   ;;  %p9592_p13 = pnand (%p1982_p11), %p9591_p12, %p9731_p5  ;;  %s9594_s28 = sshll.u32 (%p1982_p11), %s9665_s27, 4  ;;  %s9595_s28 = int_to_ptr.vmem [resolvable:$false] %s9594_s28 }
 0x1db   : >> { %2381 = vrot.lane.b32.xlu1 %v2300_v34, %s9663_s22  ;;  %v2324_v30 = vsel %vm2168_vm8, %v2319_v17, %v2323_v61  ;;  %v2347_v59 = vrot.slane %v2345_v26, 1  ;;  %v9470_v34 = vld [vmem:[%s11563_s29 + $0x90] sm:$0xff]   ;;  %v2357_v41 = vshll.u32 %v11625_v35, 16  ;;  %v2398_v50 = vrot.slane %v11482_v25, 1  ;;  %p9597_p1 = scmp.lt.s32.totalorder (%p1982_p11), %s14245_s11, %s9595_s28 }
 0x1dc   : >> { %2702 = vmatpush1.bf16.msra.mxu0 %v9465_v28  ;;  %v2336_v21 = vsel %vm2168_vm8, %v2331_v9, %v2335_v3  ;;  %v2343_v47 = vor.u32 %v2342_v8, %v2338_v10  ;;  %v2354_v53 = vrot.slane %v2352_v4, 1  ;;  %v2397_v28 = vrot.slane %v11480_v5, 1  ;;  %p9593_p0 = pneg (%p1982_p11), %p9592_p13 }
 0x1dd   : >> { %2383 = vrot.lane.b32.xlu0 %v2312_v11, %s9663_s22  ;;  %2703 = vmatprep.subr.bf16.mxu0 %v9664_v43  ;;  %vm2442_vm10 = vcmask 523264   ;;  %v2359_v11 = vrot.slane %v2357_v41, 1  ;;  %v2528_v25 = vshrl.u32 %v11636_v58, 16  ;;  %v2530_v55 = vshll.u32 %v11636_v58, 16 }
 0x1de   : >> { %v2348_v16 = vsel %vm2168_vm8, %v2343_v47, %v2347_v59  ;;  %v2355_v38 = vor.u32 %v2354_v53, %v2350_v29  ;;  %v11640_v61 = vsel %vm2393_vm9, %v2397_v28, %v2398_v50  ;;  %v2170_v10 = vshrl.u32 %v11652_v15, 16  ;;  %v9477_v59 = vld [vmem:[%s11563_s29 + $0xa8] sm:$0xff]   ;;  %v9482_v28 = vld [vmem:[%s11563_s29] sm:$0xff]  }
 0x1df   : >> { %2385 = vrot.lane.b32.xlu1 %v2324_v30, %s9663_s22  ;;  %8621 = vmatprep.mubr.msk.bf16.mxu0 %vm2442_vm10, %v11640_v61  ;;  %v2532_v30 = vrot.slane %v2530_v55, 1  ;;  %v2172_v42 = vshll.u32 %v11652_v15, 16  ;;  %v2400_v53 = vrot.slane %v11484_v45, 1  ;;  %v2401_v41 = vrot.slane %v11491_v24, 1  ;;  %v9488_v55 = vld [vmem:[%s11563_s29 + $0x10] sm:$0xff]  }
 0x1e0   : >> { %2704 = vmatpush1.bf16.msra.mxu0 %v9466_v52  ;;  %v11642_v52 = vld [vmem:[#allocation2 + $0xc8] ss:$0 sps:$4 sm:$0x11]   ;;  %v2360_v17 = vsel %vm2168_vm8, %v2355_v38, %v2359_v11  ;;  %v2403_v24 = vrot.slane %v11489_v33, 1  ;;  %vm6490_vm11 = vcmask (%p1982_p11), 1045504   ;;  %vm8242_vm12 = vcmask (%p1982_p11), 130112  }
 0x1e1   : >> { %2705 = vmatprep.subr.bf16.mxu0 %v9664_v43  ;;  %2387 = vrot.lane.b32.xlu0 %v2336_v21, %s9663_s22  ;;  %v2535_v13 = vshll.u32 %v11642_v52, 16  ;;  %v2533_v9 = vor.u32 %v2532_v30, %v2528_v25  ;;  %v2174_v26 = vrot.slane %v2172_v42, 1  ;;  %v11676_v38 = vsel %vm2393_vm9, %v2400_v53, %v2401_v41 }
 0x1e2   : >> { %v2404_v25 = vrot.slane %v11500_v62, 1  ;;  %v9489_v62 = vld [vmem:[%s11563_s29 + $0x18] sm:$0xff]   ;;  %v2415_v41 = vrot.slane %v11521_v18, 1  ;;  %vm8379_vm13 = vcmask (%p1982_p11), 1041409   ;;  %vm8381_vm14 = vcmask (%p1982_p11), 1042434  }
 0x1e3   : >> { %2389 = vrot.lane.b32.xlu1 %v2348_v16, %s9663_s22  ;;  %v2537_v3 = vrot.slane %v2535_v13, 1  ;;  %v2175_v29 = vor.u32 %v2174_v26, %v2170_v10  ;;  %v9481_v16 = vld [vmem:[%s11563_s29 + $0xb8] sm:$0xff]   ;;  %v9490_v10 = vld [vmem:[%s11563_s29 + $0x20] sm:$0xff]   ;;  %vm8383_vm15 = vcmask (%p1982_p11), 1043459   ;;  %vm8385_vm0 = vcmask (%p1982_p11), 1044484  }
 0x1e4   : >> { %2706 = vmatpush1.bf16.msra.mxu0 %v9469_v63  ;;  %v11654_v63 = vld [vmem:[#allocation2 + $0x8] ss:$0 sps:$4 sm:$0x11]   ;;  %v11695_v13 = vsel %vm2393_vm9, %v2403_v24, %v2404_v25  ;;  %v2418_v24 = vrot.slane %v11530_v7, 1  ;;  %vm8389_vm2 = vcmask (%p1982_p11), 1046534   ;;  %vm8391_vm3 = vcmask (%p1982_p11), 1047559  }
 0x1e5   : >> { %2707 = vmatprep.subr.bf16.mxu0 %v9664_v43  ;;  %2391 = vrot.lane.b32.xlu0 %v2360_v17, %s9663_s22  ;;  %v2177_v8 = vshll.u32 %v11654_v63, 16  ;;  %v2538_v21 = vsel %vm2168_vm8, %v2533_v9, %v2537_v3  ;;  %vm8402_vm4 = vcmask (%p1982_p11), 130048  }
 0x1e7   : >> { %v2179_v47 = vrot.slane %v2177_v8, 1  ;;  %2539 = vrot.lane.b32.xlu1 %v2538_v21, %s9663_s22  ;;  %v2409_v8 = vrot.slane %v11508_v60, 1  ;;  %v9492_v21 = vld [vmem:[%s11563_s29 + $0x30] sm:$0xff]  }
 0x1e8   : >> { %2708 = vmatpush1.bf16.msra.mxu0 %v9470_v34  ;;  %v9478_v34 = vld [vmem:[%s11563_s29 + $0xb0] sm:$0xff]  }
 0x1e9   : >> { %2709 = vmatprep.subr.bf16.mxu0 %v9664_v43  ;;  %v2180_v4 = vsel %vm2168_vm8, %v2175_v29, %v2179_v47  ;;  %v2412_v29 = vrot.slane %v11519_v54, 1 }
 0x1ea   : >> { %2361 = vrot.lane.b32.xlu0 %v2180_v4, %s9663_s22 }
 0x1ec   : >> { %2710 = vmatpush1.bf16.msra.mxu0 %v9473_v39  ;;  %v9485_v39 = vld [vmem:[%s11563_s29 + $0x8] sm:$0xff]  }
 0x1ed   : >> { %2711 = vmatprep.subr.bf16.mxu0 %v9664_v43 }
 0x1f0   : >> { %2712 = vmatpush1.bf16.msra.mxu0 %v9474_v48  ;;  %v2406_v48 = vrot.slane %v11495_v32, 1 }
 0x1f1   : >> { %2713 = vmatprep.subr.bf16.mxu0 %v9664_v43 }
 0x1f4   : >> { %2714 = vmatpush1.bf16.msra.mxu0 %v9477_v59 }
 0x1f5   : >> { %2715 = vmatprep.subr.bf16.mxu0 %v9664_v43 }
 0x1f8   : >> { %2716 = vmatpush1.bf16.msra.mxu0 %v9478_v34  ;;  %v9494_v34 = vld [vmem:[%s11563_s29 + $0x40] sm:$0xff]  }
 0x1f9   : >> { %2717 = vmatprep.subr.bf16.mxu0 %v9664_v43 }
 0x1fc   : >> { %2718 = vmatpush1.bf16.msra.mxu0 %v9481_v16 }
 0x1fd   : >> { %2931 = vmatprep.subr.bf16.mxu0 %v9664_v43 }
 0x23b   : >> { %v2364_v50 = vpop.permute.xlu0 %2363 }
 0x23c   : >> { %v11680_v11 = vsel %vm2442_vm10, %v11480_v5, %v2364_v50  ;;  %v9496_v50 = vld [vmem:[%s11563_s29 + $0x50] sm:$0xff]  }
 0x23d   : >> { %2728 = vmatmul.mubr.bf16.vlgmr.msra.gmra.mrb[0].mxu0 %v11680_v11  ;;  %v2368_v30 = vpop.permute.xlu1 %2367 }
 0x23e   : >> { %2932 = vmatpush1.bf16.msra.mxu0 %v9482_v28  ;;  %8622 = vmatprep.mubr.msk.bf16.mxu0 %vm2442_vm10, %v11676_v38  ;;  %v11707_v3 = vsel %vm2442_vm10, %v11489_v33, %v2368_v30  ;;  %v2410_v33 = vrot.slane %v11513_v19, 1  ;;  %v9493_v19 = vld [vmem:[%s11563_s29 + $0x38] sm:$0xff]   ;;  %v2422_v30 = vrot.slane %v11555_v22, 1 }
 0x23f   : >> { %v2366_v17 = vpop.permute.xlu0 %2365  ;;  %2933 = vmatprep.subr.bf16.mxu0 %v9664_v43 }
 0x240   : >> { %v11691_v5 = vsel %vm2442_vm10, %v11484_v45, %v2366_v17  ;;  %v2407_v45 = vrot.slane %v11505_v37, 1  ;;  %v9491_v37 = vld [vmem:[%s11563_s29 + $0x28] sm:$0xff]   ;;  %v11727_v47 = vsel %vm2393_vm9, %v2409_v8, %v2410_v33  ;;  %v2427_v8 = vrot.slane %v11568_v1, 1 }
 0x241   : >> { %v2370_v9 = vpop.permute.xlu1 %2369  ;;  %v2428_v33 = vrot.slane %v11581_v36, 1 }
 0x242   : >> { %2934 = vmatpush1.bf16.msra.mxu0 %v9485_v39  ;;  %v11711_v42 = vsel %vm2393_vm9, %v2406_v48, %v2407_v45  ;;  %v11723_v26 = vsel %vm2442_vm10, %v11495_v32, %v2370_v9  ;;  %v2413_v32 = vrot.slane %v11525_v6, 1  ;;  %v9495_v6 = vld [vmem:[%s11563_s29 + $0x48] sm:$0xff]  }
 0x243   : >> { %2935 = vmatprep.subr.bf16.mxu0 %v9664_v43  ;;  %v2372_v59 = vpop.permute.xlu0 %2371 }
 0x244   : >> { %v11739_v4 = vsel %vm2442_vm10, %v11508_v60, %v2372_v59  ;;  %v11743_v16 = vsel %vm2393_vm9, %v2412_v29, %v2413_v32  ;;  %v2416_v60 = vrot.slane %v11533_v0, 1  ;;  %v9497_v0 = vld [vmem:[%s11563_s29 + $0x58] sm:$0xff]   ;;  %v2431_v59 = vrot.slane %v11593_v23, 1 }
 0x245   : >> { %2736 = vmatmul.mubr.bf16.gmra.mrb[4].mxu0 %v11691_v5  ;;  %v2374_v53 = vpop.permute.xlu1 %2373  ;;  %v2433_v32 = vrot.slane %v11601_v49, 1 }
 0x246   : >> { %8623 = vmatprep.mubr.msk.bf16.mxu0 %vm2442_vm10, %v11695_v13  ;;  %2936 = vmatpush1.bf16.msra.mxu0 %v9488_v55  ;;  %v11755_v28 = vsel %vm2442_vm10, %v11519_v54, %v2374_v53  ;;  %v11759_v39 = vsel %vm2393_vm9, %v2415_v41, %v2416_v60  ;;  %v2419_v54 = vrot.slane %v11542_v46, 1  ;;  %v2421_v46 = vrot.slane %v11545_v44, 1 }
 0x247   : >> { %2937 = vmatprep.subr.bf16.mxu0 %v9664_v43  ;;  %v2376_v17 = vpop.permute.xlu0 %2375  ;;  %v2436_v53 = vrot.slane %v11610_v56, 1  ;;  %v2437_v41 = vrot.slane %v11615_v51, 1 }
 0x248   : >> { %v11771_v25 = vsel %vm2442_vm10, %v11521_v18, %v2376_v17  ;;  %v11774_v55 = vsel %vm2393_vm9, %v2418_v24, %v2419_v54  ;;  %v11787_v48 = vsel %vm2393_vm9, %v2421_v46, %v2422_v30  ;;  %v2541_v24 = vrot.slane %v11636_v58, 1 }
 0x249   : >> { %v2542_v54 = vrot.slane %v11642_v52, 1  ;;  %v2394_v46 = vrot.slane %v11652_v15, 1  ;;  %v2395_v30 = vrot.slane %v11654_v63, 1  ;;  %v11890_v63 = vld [vmem:[#allocation2 + $0xd4] ss:$0 sps:$4 sm:$0x11]  }
 0x24a   : >> { %2938 = vmatpush1.bf16.msra.mxu0 %v9489_v62  ;;  %v2378_v62 = vpop.permute.xlu1 %2377 }
 0x24b   : >> { %2939 = vmatprep.subr.bf16.mxu0 %v9664_v43  ;;  %v11784_v18 = vsel %vm2442_vm10, %v11530_v7, %v2378_v62  ;;  %v2380_v45 = vpop.permute.xlu0 %2379 }
 0x24c   : >> { %v11796_v22 = vsel %vm2442_vm10, %v11545_v44, %v2380_v45  ;;  %v11811_v44 = vsel %vm2393_vm9, %v2427_v8, %v2428_v33 }
 0x24d   : >> { %2744 = vmatmul.mubr.bf16.gmra.mrb[8].mxu0 %v11707_v3 }
 0x24e   : >> { %8624 = vmatprep.mubr.msk.bf16.mxu0 %vm2442_vm10, %v11711_v42  ;;  %2940 = vmatpush1.bf16.msra.mxu0 %v9490_v10  ;;  %v2424_v10 = vrot.slane %v11551_v12, 1  ;;  %v2382_v9 = vpop.permute.xlu1 %2381 }
 0x24f   : >> { %2941 = vmatprep.subr.bf16.mxu0 %v9664_v43 }
 0x252   : >> { %2942 = vmatpush1.bf16.msra.mxu0 %v9491_v37  ;;  %v2425_v37 = vrot.slane %v11572_v2, 1  ;;  %v11808_v2 = vsel %vm2442_vm10, %v11551_v12, %v2382_v9  ;;  %v2386_v29 = vpop.permute.xlu1 %2385  ;;  %v9498_v9 = vld [vmem:[%s11563_s29 + $0xc0] sm:$0xff]  }
 0x253   : >> { %2943 = vmatprep.subr.bf16.mxu0 %v9664_v43  ;;  %v11832_v23 = vsel %vm2442_vm10, %v11590_v27, %v2386_v29 }
 0x254   : >> { %v11799_v7 = vsel %vm2393_vm9, %v2424_v10, %v2425_v37  ;;  %v11885_v10 = vld [vmem:[#allocation2 + $0xcc] sm:$0xff]  }
 0x255   : >> { %2752 = vmatmul.mubr.bf16.gmra.mrb[12].mxu0 %v11723_v26  ;;  %v3101_v8 = vshrl.u32 %v11885_v10, 16 }
 0x256   : >> { %8625 = vmatprep.mubr.msk.bf16.mxu0 %vm2442_vm10, %v11727_v47  ;;  %2944 = vmatpush1.bf16.msra.mxu0 %v9492_v21  ;;  %v2384_v21 = vpop.permute.xlu0 %2383  ;;  %v2390_v60 = vpop.permute.xlu1 %2389 }
 0x257   : >> { %2945 = vmatprep.subr.bf16.mxu0 %v9664_v43  ;;  %v11820_v36 = vsel %vm2442_vm10, %v11568_v1, %v2384_v21  ;;  %v11856_v51 = vsel %vm2442_vm10, %v11610_v56, %v2390_v60  ;;  %v11871_v56 = vsel %vm2393_vm9, %v2541_v24, %v2542_v54  ;;  %v3108_v21 = vshll.u32 %v11890_v63, 16  ;;  %v9507_v60 = vld [vmem:[%s11563_s29 + $0x108] sm:$0xff]  }
 0x25a   : >> { %2946 = vmatpush1.bf16.msra.mxu0 %v9493_v19  ;;  %v2430_v19 = vrot.slane %v11590_v27, 1  ;;  %v11847_v27 = vsel %vm2393_vm9, %v2436_v53, %v2437_v41  ;;  %v2540_v62 = vpop.permute.xlu1 %2539  ;;  %v9505_v53 = vld [vmem:[%s11563_s29 + $0xf8] sm:$0xff]   ;;  %v9506_v41 = vld [vmem:[%s11563_s29 + $0x100] sm:$0xff]  }
 0x25b   : >> { %2947 = vmatprep.subr.bf16.mxu0 %v9664_v43  ;;  %v11880_v52 = vsel %vm2442_vm10, %v11636_v58, %v2540_v62  ;;  %v3103_v58 = vshll.u32 %v11885_v10, 16 }
 0x25c   : >> { %v11823_v12 = vsel %vm2393_vm9, %v2430_v19, %v2431_v59  ;;  %v9499_v19 = vld [vmem:[%s11563_s29 + $0xc8] sm:$0xff]   ;;  %v3110_v59 = vrot.slane %v3108_v21, 1 }
 0x25d   : >> { %2760 = vmatmul.mubr.bf16.gmra.mrb[16].mxu0 %v11739_v4  ;;  %v3105_v33 = vrot.slane %v3103_v58, 1 }
 0x25e   : >> { %8626 = vmatprep.mubr.msk.bf16.mxu0 %vm2442_vm10, %v11743_v16  ;;  %2948 = vmatpush1.bf16.msra.mxu0 %v9494_v34  ;;  %v2434_v34 = vrot.slane %v11603_v31, 1 }
 0x25f   : >> { %2949 = vmatprep.subr.bf16.mxu0 %v9664_v43 }
 0x260   : >> { %v11835_v1 = vsel %vm2393_vm9, %v2433_v32, %v2434_v34  ;;  %v9500_v32 = vld [vmem:[%s11563_s29 + $0xd0] sm:$0xff]   ;;  %v9502_v34 = vld [vmem:[%s11563_s29 + $0xe0] sm:$0xff]  }
 0x262   : >> { %2950 = vmatpush1.bf16.msra.mxu0 %v9495_v6  ;;  %v2388_v6 = vpop.permute.xlu0 %2387 }
 0x263   : >> { %2951 = vmatprep.subr.bf16.mxu0 %v9664_v43  ;;  %v11844_v31 = vsel %vm2442_vm10, %v11601_v49, %v2388_v6  ;;  %v9504_v6 = vld [vmem:[%s11563_s29 + $0xf0] sm:$0xff]  }
 0x265   : >> { %2768 = vmatmul.mubr.bf16.gmra.mrb[20].mxu0 %v11755_v28 }
 0x266   : >> { %8627 = vmatprep.mubr.msk.bf16.mxu0 %vm2442_vm10, %v11759_v39  ;;  %2952 = vmatpush1.bf16.msra.mxu0 %v9496_v50  ;;  %v2439_v50 = vrot.slane %v11621_v20, 1  ;;  %v2392_v17 = vpop.permute.xlu0 %2391 }
 0x267   : >> { %2953 = vmatprep.subr.bf16.mxu0 %v9664_v43 }
 0x26a   : >> { %2954 = vmatpush1.bf16.msra.mxu0 %v9497_v0  ;;  %v2440_v0 = vrot.slane %v11625_v35, 1  ;;  %v11868_v35 = vsel %vm2442_vm10, %v11621_v20, %v2392_v17  ;;  %v2396_v20 = vsel %vm2393_vm9, %v2394_v46, %v2395_v30  ;;  %v2362_v45 = vpop.permute.xlu0 %2361  ;;  %v3865_v17 = vld [vmem:[#allocation3 + $0xc] sm:$0xf] }
 0x26b   : >> { %3223 = vmatprep.subr.bf16.mxu0 %v9664_v43  ;;  %v2444_v37 = vsel %vm2442_vm10, %v11652_v15, %v2362_v45  ;;  %v3106_v15 = vor.u32 %v3105_v33, %v3101_v8  ;;  %v9550_v45 = vld [vmem:[%s11563_s29 + $0x1d0] sm:$0xff]  }
 0x26c   : >> { %v11859_v49 = vsel %vm2393_vm9, %v2439_v50, %v2440_v0  ;;  %v9508_v50 = vld [vmem:[%s11563_s29 + $0x110] sm:$0xff]   ;;  %v9509_v0 = vld [vmem:[%s11563_s29 + $0x118] sm:$0xff]  }
 0x26d   : >> { %2776 = vmatmul.mubr.bf16.gmra.mrb[24].mxu0 %v11771_v25  ;;  %v3111_v29 = vsel %vm2168_vm8, %v3106_v15, %v3110_v59  ;;  %v9551_v59 = vld [vmem:[%s11563_s29 + $0x1d8] sm:$0xff]  }
 0x26e   : >> { %8628 = vmatprep.mubr.msk.bf16.mxu0 %vm2442_vm10, %v11774_v55  ;;  %3112 = vrot.lane.b32.xlu1 %v3111_v29, %s9663_s22 }
 0x275   : >> { %2784 = vmatmul.mubr.bf16.gmra.mrb[28].mxu0 %v11784_v18 }
 0x276   : >> { %8629 = vmatprep.mubr.msk.bf16.mxu0 %vm2442_vm10, %v11787_v48 }
 0x27d   : >> { %2792 = vmatmul.mubr.bf16.gmra.mrb[32].mxu0 %v11796_v22 }
 0x27e   : >> { %8630 = vmatprep.mubr.msk.bf16.mxu0 %vm2442_vm10, %v11799_v7 }
 0x285   : >> { %2800 = vmatmul.mubr.bf16.gmra.mrb[36].mxu0 %v11808_v2 }
 0x286   : >> { %8631 = vmatprep.mubr.msk.bf16.mxu0 %vm2442_vm10, %v11811_v44 }
 0x28d   : >> { %2808 = vmatmul.mubr.bf16.gmra.mrb[40].mxu0 %v11820_v36 }
 0x28e   : >> { %8632 = vmatprep.mubr.msk.bf16.mxu0 %vm2442_vm10, %v11823_v12 }
 0x295   : >> { %2816 = vmatmul.mubr.bf16.gmra.mrb[44].mxu0 %v11832_v23 }
 0x296   : >> { %8633 = vmatprep.mubr.msk.bf16.mxu0 %vm2442_vm10, %v11835_v1 }
 0x29d   : >> { %2824 = vmatmul.mubr.bf16.gmra.mrb[48].mxu0 %v11844_v31 }
 0x29e   : >> { %8634 = vmatprep.mubr.msk.bf16.mxu0 %vm2442_vm10, %v11847_v27 }
 0x2a5   : >> { %2832 = vmatmul.mubr.bf16.gmra.mrb[52].mxu0 %v11856_v51 }
 0x2a6   : >> { %8635 = vmatprep.mubr.msk.bf16.mxu0 %vm2442_vm10, %v11859_v49 }
 0x2ad   : >> { %2840 = vmatmul.mubr.bf16.gmra.mrb[56].mxu0 %v11868_v35 }
 0x2ae   : >> { %8636 = vmatprep.mubr.msk.bf16.mxu0 %vm2442_vm10, %v11871_v56 }
 0x2b5   : >> { %2848 = vmatmul.mubr.bf16.gmra.mrb[60].mxu0 %v11880_v52 }
 0x2b6   : >> { %8649 = vmatprep.mubr.msk.bf16.mxu0 %vm2442_vm10, %v2396_v20 }
 0x2bd   : >> { %2964 = vmatmul.mubr.bf16.vlgmr.msra.gmra.mrb[0].mxu0 %v2444_v37 }
 0x2be   : >> { %3224 = vmatpush1.bf16.msra.mxu0 %v9498_v9  ;;  %8650 = vmatprep.mubr.msk.bf16.mxu0 %vm2442_vm10, %v11640_v61  ;;  %v9501_v61 = vld [vmem:[%s11563_s29 + $0xd8] sm:$0xff]  }
 0x2bf   : >> { %3225 = vmatprep.subr.bf16.mxu0 %v9664_v43 }
 0x2c2   : >> { %3226 = vmatpush1.bf16.msra.mxu0 %v9499_v19 }
 0x2c3   : >> { %3227 = vmatprep.subr.bf16.mxu0 %v9664_v43 }
 0x2c5   : >> { %2972 = vmatmul.mubr.bf16.gmra.mrb[4].mxu0 %v11680_v11  ;;  %v9503_v11 = vld [vmem:[%s11563_s29 + $0xe8] sm:$0xff]  }
 0x2c6   : >> { %8651 = vmatprep.mubr.msk.bf16.mxu0 %vm2442_vm10, %v11676_v38  ;;  %3228 = vmatpush1.bf16.msra.mxu0 %v9500_v32 }
 0x2c7   : >> { %3229 = vmatprep.subr.bf16.mxu0 %v9664_v43 }
 0x2ca   : >> { %3230 = vmatpush1.bf16.msra.mxu0 %v9501_v61  ;;  %v3872_v61 = vld [vmem:[#allocation3 + $0x18] sm:$0xf] }
 0x2cb   : >> { %3231 = vmatprep.subr.bf16.mxu0 %v9664_v43 }
 0x2cd   : >> { %2980 = vmatmul.mubr.bf16.gmra.mrb[8].mxu0 %v11691_v5 }
 0x2ce   : >> { %8652 = vmatprep.mubr.msk.bf16.mxu0 %vm2442_vm10, %v11695_v13  ;;  %3232 = vmatpush1.bf16.msra.mxu0 %v9502_v34 }
 0x2cf   : >> { %3233 = vmatprep.subr.bf16.mxu0 %v9664_v43 }
 0x2d2   : >> { %3234 = vmatpush1.bf16.msra.mxu0 %v9503_v11 }
 0x2d3   : >> { %3235 = vmatprep.subr.bf16.mxu0 %v9664_v43 }
 0x2d5   : >> { %2988 = vmatmul.mubr.bf16.gmra.mrb[12].mxu0 %v11707_v3 }
 0x2d6   : >> { %8653 = vmatprep.mubr.msk.bf16.mxu0 %vm2442_vm10, %v11711_v42  ;;  %3236 = vmatpush1.bf16.msra.mxu0 %v9504_v6 }
 0x2d7   : >> { %3237 = vmatprep.subr.bf16.mxu0 %v9664_v43 }
 0x2da   : >> { %3238 = vmatpush1.bf16.msra.mxu0 %v9505_v53 }
 0x2db   : >> { %3239 = vmatprep.subr.bf16.mxu0 %v9664_v43 }
 0x2dd   : >> { %2996 = vmatmul.mubr.bf16.gmra.mrb[16].mxu0 %v11723_v26 }
 0x2de   : >> { %8654 = vmatprep.mubr.msk.bf16.mxu0 %vm2442_vm10, %v11727_v47  ;;  %3240 = vmatpush1.bf16.msra.mxu0 %v9506_v41 }
 0x2df   : >> { %3241 = vmatprep.subr.bf16.mxu0 %v9664_v43 }
 0x2e2   : >> { %3242 = vmatpush1.bf16.msra.mxu0 %v9507_v60 }
 0x2e3   : >> { %3243 = vmatprep.subr.bf16.mxu0 %v9664_v43 }
 0x2e5   : >> { %3004 = vmatmul.mubr.bf16.gmra.mrb[20].mxu0 %v11739_v4 }
 0x2e6   : >> { %8655 = vmatprep.mubr.msk.bf16.mxu0 %vm2442_vm10, %v11743_v16  ;;  %3244 = vmatpush1.bf16.msra.mxu0 %v9508_v50 }
 0x2e7   : >> { %3245 = vmatprep.subr.bf16.mxu0 %v9664_v43 }
 0x2ea   : >> { %3246 = vmatpush1.bf16.msra.mxu0 %v9509_v0 }
 0x2ed   : >> { %3012 = vmatmul.mubr.bf16.gmra.mrb[24].mxu0 %v11755_v28 }
 0x2ee   : >> { %8656 = vmatprep.mubr.msk.bf16.mxu0 %vm2442_vm10, %v11759_v39 }
 0x2f5   : >> { %3020 = vmatmul.mubr.bf16.gmra.mrb[28].mxu0 %v11771_v25 }
 0x2f6   : >> { %8657 = vmatprep.mubr.msk.bf16.mxu0 %vm2442_vm10, %v11774_v55 }
 0x2fd   : >> { %3028 = vmatmul.mubr.bf16.gmra.mrb[32].mxu0 %v11784_v18 }
 0x2fe   : >> { %8658 = vmatprep.mubr.msk.bf16.mxu0 %vm2442_vm10, %v11787_v48 }
 0x305   : >> { %3036 = vmatmul.mubr.bf16.gmra.mrb[36].mxu0 %v11796_v22 }
 0x306   : >> { %8659 = vmatprep.mubr.msk.bf16.mxu0 %vm2442_vm10, %v11799_v7 }
 0x30d   : >> { %3044 = vmatmul.mubr.bf16.gmra.mrb[40].mxu0 %v11808_v2 }
 0x30e   : >> { %8660 = vmatprep.mubr.msk.bf16.mxu0 %vm2442_vm10, %v11811_v44 }
 0x315   : >> { %3052 = vmatmul.mubr.bf16.gmra.mrb[44].mxu0 %v11820_v36 }
 0x316   : >> { %8661 = vmatprep.mubr.msk.bf16.mxu0 %vm2442_vm10, %v11823_v12 }
 0x31d   : >> { %3060 = vmatmul.mubr.bf16.gmra.mrb[48].mxu0 %v11832_v23 }
 0x31e   : >> { %8662 = vmatprep.mubr.msk.bf16.mxu0 %vm2442_vm10, %v11835_v1 }
 0x325   : >> { %3068 = vmatmul.mubr.bf16.gmra.mrb[52].mxu0 %v11844_v31 }
 0x326   : >> { %8663 = vmatprep.mubr.msk.bf16.mxu0 %vm2442_vm10, %v11847_v27 }
 0x32d   : >> { %3076 = vmatmul.mubr.bf16.gmra.mrb[56].mxu0 %v11856_v51 }
 0x32e   : >> { %8664 = vmatprep.mubr.msk.bf16.mxu0 %vm2442_vm10, %v11859_v49 }
 0x335   : >> { %3084 = vmatmul.mubr.bf16.gmra.mrb[60].mxu0 %v11868_v35 }
 0x336   : >> { %8704 = vmatprep.mubr.msk.bf16.mxu0 %vm2442_vm10, %v11676_v38  ;;  %v3114_v38 = vrot.slane %v11885_v10, 1 }
 0x33d   : >> { %3256 = vmatmul.mubr.bf16.vlgmr.msra.gmra.mrb[0].mxu0 %v11691_v5  ;;  %v3115_v5 = vrot.slane %v11890_v63, 1 }
 0x33e   : >> { %8705 = vmatprep.mubr.msk.bf16.mxu0 %vm2442_vm10, %v11695_v13 }
 0x33f   : >> { %v3116_v13 = vsel %vm2393_vm9, %v3114_v38, %v3115_v5  ;;  %v3876_v5 = vld [vmem:[#allocation3 + $0x20] sm:$0x1] }
 0x345   : >> { %3264 = vmatmul.mubr.bf16.gmra.mrb[4].mxu0 %v11707_v3  ;;  %v3113_v3 = vpop.permute.xlu1 %3112 }
 0x346   : >> { %8706 = vmatprep.mubr.msk.bf16.mxu0 %vm2442_vm10, %v11711_v42  ;;  %v3118_v42 = vsel %vm2442_vm10, %v11885_v10, %v3113_v3 }
 0x34d   : >> { %3272 = vmatmul.mubr.bf16.gmra.mrb[8].mxu0 %v11723_v26  ;;  %v9530_v26 = vld [vmem:[%s11563_s29 + $0x180] sm:$0xff]  }
 0x34e   : >> { %8707 = vmatprep.mubr.msk.bf16.mxu0 %vm2442_vm10, %v11727_v47  ;;  %4686 = vmatpush1.bf16.msra.mxu1 %v9530_v26  ;;  %v9531_v47 = vld [vmem:[%s11563_s29 + $0x188] sm:$0xff]  }
 0x34f   : >> { %4687 = vmatprep.subr.bf16.mxu1 %v9664_v43 }
 0x352   : >> { %4688 = vmatpush1.bf16.msra.mxu1 %v9531_v47 }
 0x353   : >> { %4689 = vmatprep.subr.bf16.mxu1 %v9664_v43 }
 0x355   : >> { %3280 = vmatmul.mubr.bf16.gmra.mrb[12].mxu0 %v11739_v4  ;;  %v9534_v4 = vld [vmem:[%s11563_s29 + $0x190] sm:$0xff]  }
 0x356   : >> { %8708 = vmatprep.mubr.msk.bf16.mxu0 %vm2442_vm10, %v11743_v16  ;;  %4690 = vmatpush1.bf16.msra.mxu1 %v9534_v4  ;;  %v9535_v16 = vld [vmem:[%s11563_s29 + $0x198] sm:$0xff]  }
 0x357   : >> { %4691 = vmatprep.subr.bf16.mxu1 %v9664_v43 }
 0x35a   : >> { %4692 = vmatpush1.bf16.msra.mxu1 %v9535_v16 }
 0x35b   : >> { %4693 = vmatprep.subr.bf16.mxu1 %v9664_v43 }
 0x35d   : >> { %3288 = vmatmul.mubr.bf16.gmra.mrb[16].mxu0 %v11755_v28  ;;  %v9538_v28 = vld [vmem:[%s11563_s29 + $0x1a0] sm:$0xff]  }
 0x35e   : >> { %8709 = vmatprep.mubr.msk.bf16.mxu0 %vm2442_vm10, %v11759_v39  ;;  %4694 = vmatpush1.bf16.msra.mxu1 %v9538_v28  ;;  %v9539_v39 = vld [vmem:[%s11563_s29 + $0x1a8] sm:$0xff]  }
 0x35f   : >> { %4695 = vmatprep.subr.bf16.mxu1 %v9664_v43 }
 0x362   : >> { %4696 = vmatpush1.bf16.msra.mxu1 %v9539_v39 }
 0x363   : >> { %4697 = vmatprep.subr.bf16.mxu1 %v9664_v43 }
 0x365   : >> { %3296 = vmatmul.mubr.bf16.gmra.mrb[20].mxu0 %v11771_v25  ;;  %v9542_v25 = vld [vmem:[%s11563_s29 + $0x1b0] sm:$0xff]  }
 0x366   : >> { %8710 = vmatprep.mubr.msk.bf16.mxu0 %vm2442_vm10, %v11774_v55  ;;  %4698 = vmatpush1.bf16.msra.mxu1 %v9542_v25 }
 0x367   : >> { %4699 = vmatprep.subr.bf16.mxu1 %v9664_v43 }
 0x36d   : >> { %3304 = vmatmul.mubr.bf16.gmra.mrb[24].mxu0 %v11784_v18  ;;  %v9543_v18 = vld [vmem:[%s11563_s29 + $0x1b8] sm:$0xff]  }
 0x36e   : >> { %8711 = vmatprep.mubr.msk.bf16.mxu0 %vm2442_vm10, %v11787_v48  ;;  %4700 = vmatpush1.bf16.msra.mxu1 %v9543_v18 }
 0x36f   : >> { %4701 = vmatprep.subr.bf16.mxu1 %v9664_v43 }
 0x375   : >> { %3312 = vmatmul.mubr.bf16.gmra.mrb[28].mxu0 %v11796_v22 }
 0x376   : >> { %8712 = vmatprep.mubr.msk.bf16.mxu0 %vm2442_vm10, %v11799_v7 }
 0x37d   : >> { %3320 = vmatmul.mubr.bf16.gmra.mrb[32].mxu0 %v11808_v2 }
 0x37e   : >> { %8713 = vmatprep.mubr.msk.bf16.mxu0 %vm2442_vm10, %v11811_v44 }
 0x385   : >> { %3328 = vmatmul.mubr.bf16.gmra.mrb[36].mxu0 %v11820_v36 }
 0x386   : >> { %8714 = vmatprep.mubr.msk.bf16.mxu0 %vm2442_vm10, %v11823_v12  ;;  %v9546_v12 = vld [vmem:[%s11563_s29 + $0x1c0] sm:$0xff]  }
 0x387   : >> { %4702 = vmatpush1.bf16.msra.mxu1 %v9546_v12 }
 0x388   : >> { %4703 = vmatprep.subr.bf16.mxu1 %v9664_v43 }
 0x38d   : >> { %3336 = vmatmul.mubr.bf16.gmra.mrb[40].mxu0 %v11832_v23 }
 0x38e   : >> { %8715 = vmatprep.mubr.msk.bf16.mxu0 %vm2442_vm10, %v11835_v1 }
 0x395   : >> { %3344 = vmatmul.mubr.bf16.gmra.mrb[44].mxu0 %v11844_v31 }
 0x396   : >> { %8716 = vmatprep.mubr.msk.bf16.mxu0 %vm2442_vm10, %v11847_v27 }
 0x39d   : >> { %3352 = vmatmul.mubr.bf16.gmra.mrb[48].mxu0 %v11856_v51 }
 0x39e   : >> { %8717 = vmatprep.mubr.msk.bf16.mxu0 %vm2442_vm10, %v11859_v49  ;;  %v9547_v49 = vld [vmem:[%s11563_s29 + $0x1c8] sm:$0xff]  }
 0x39f   : >> { %4704 = vmatpush1.bf16.msra.mxu1 %v9547_v49 }
 0x3a0   : >> { %4705 = vmatprep.subr.bf16.mxu1 %v9664_v43 }
 0x3a3   : >> { %4706 = vmatpush1.bf16.msra.mxu1 %v9550_v45 }
 0x3a4   : >> { %4707 = vmatprep.subr.bf16.mxu1 %v9664_v43 }
 0x3a5   : >> { %3360 = vmatmul.mubr.bf16.gmra.mrb[52].mxu0 %v11868_v35 }
 0x3a6   : >> { %8718 = vmatprep.mubr.msk.bf16.mxu0 %vm2442_vm10, %v11871_v56 }
 0x3a7   : >> { %4708 = vmatpush1.bf16.msra.mxu1 %v9551_v59 }
 0x3a8   : >> { %4921 = vmatprep.subr.bf16.mxu1 %v9664_v43 }
 0x3ad   : >> { %3368 = vmatmul.mubr.bf16.gmra.mrb[56].mxu0 %v11880_v52  ;;  %v3869_v52 = vld [vmem:[#allocation3 + $0x14] sm:$0x1] }
 0x3ae   : >> { %8719 = vmatprep.mubr.msk.bf16.mxu0 %vm2442_vm10, %v3116_v13 }
 0x3b5   : >> { %3376 = vmatmul.mubr.bf16.gmra.mrb[60].mxu0 %v3118_v42 }
 0x410   : >> { %v3257_v55 = vpop.f32.mrb[0].mxu0 }
 0x411   : >> { %v3416_v48 = vmax.f32 %v3257_v55, 0.0  ;;  %v3259_v22 = vpop.f32.mrb[1].mxu0 }
 0x412   : >> { %v3260_v7 = vpop.f32.mrb[2].mxu0 }
 0x413   : >> { %v9022_v2 = vpack.c.bf16 %v3416_v48, %v3416_v48  ;;  %v3417_v44 = vmax.f32 %v3260_v7, 0.0  ;;  %v3262_v36 = vpop.f32.mrb[3].mxu0  ;;  %v3879_v7 = vld [vmem:[#allocation3 + $0x24] sm:$0xf] }
 0x415   : >> { %v3545_v23 = vshrl.u32 %v9022_v2, 16  ;;  %v9023_v1 = vpack.c.bf16 %v3417_v44, %v3417_v44  ;;  %v3548_v27 = vshll.u32 %v9022_v2, 16 }
 0x417   : >> { %v3547_v31 = vrot.slane %v3545_v23, 7  ;;  %v3553_v51 = vshrl.u32 %v9023_v1, 16  ;;  %v3556_v56 = vshll.u32 %v9023_v1, 16 }
 0x418   : >> { %v3265_v24 = vpop.f32.mrb[4].mxu0 }
 0x419   : >> { %v3550_v54 = vor.u32 %v3548_v27, %v3547_v31  ;;  %v3555_v35 = vrot.slane %v3553_v51, 7  ;;  %v3418_v62 = vmax.f32 %v3265_v24, 0.0  ;;  %v3267_v46 = vpop.f32.mrb[5].mxu0  ;;  %v3551_v30 = vrot.slane %v3547_v31, 4 }
 0x41a   : >> { %v3268_v20 = vpop.f32.mrb[6].mxu0 }
 0x41b   : >> { %v3866_v10 = vsel %vm11089_vm7, %v3550_v54, %v3865_v17  ;;  %v3558_v37 = vor.u32 %v3556_v56, %v3555_v35  ;;  %v3560_v9 = vrot.slane %v3555_v35, 4  ;;  %v9024_v63 = vpack.c.bf16 %v3418_v62, %v3418_v62  ;;  %v3270_v58 = vpop.f32.mrb[7].mxu0  ;;  %v3883_v54 = vld [vmem:[#allocation3 + $0x2c] sm:$0x1] }
 0x41c   : >> { %3867 = vst [vmem:[#allocation3 + $0xc] sm:$0xf] %v3866_v10  ;;  %v3419_v8 = vmax.f32 %v3268_v20, 0.0 }
 0x41d   : >> { %v3559_v33 = vsel %vm11081_vm6, %v3551_v30, %v3558_v37  ;;  %v3870_v21 = vsel %vm11073_vm5, %v3560_v9, %v3869_v52  ;;  %v3562_v19 = vshrl.u32 %v9024_v63, 16  ;;  %v3565_v32 = vshll.u32 %v9024_v63, 16 }
 0x41e   : >> { %3868 = vst.msk [vmem:[#allocation3 + $0x10] sm:$0xf] %vm197_vm1, %v3559_v33  ;;  %3871 = vst [vmem:[#allocation3 + $0x14] sm:$0x1] %v3870_v21  ;;  %v9025_v15 = vpack.c.bf16 %v3419_v8, %v3419_v8 }
 0x41f   : >> { %v3564_v29 = vrot.slane %v3562_v19, 7 }
 0x420   : >> { %v3570_v34 = vshrl.u32 %v9025_v15, 16  ;;  %v3273_v11 = vpop.f32.mrb[8].mxu0  ;;  %v3573_v50 = vshll.u32 %v9025_v15, 16 }
 0x421   : >> { %v3567_v6 = vor.u32 %v3565_v32, %v3564_v29  ;;  %v3420_v53 = vmax.f32 %v3273_v11, 0.0  ;;  %v3275_v41 = vpop.f32.mrb[9].mxu0  ;;  %v3568_v26 = vrot.slane %v3564_v29, 4 }
 0x422   : >> { %v3572_v60 = vrot.slane %v3570_v34, 7  ;;  %v3276_v0 = vpop.f32.mrb[10].mxu0  ;;  %v3890_v41 = vld [vmem:[#allocation3 + $0x38] sm:$0x1] }
 0x423   : >> { %v3873_v38 = vsel %vm11089_vm7, %v3567_v6, %v3872_v61  ;;  %v9026_v13 = vpack.c.bf16 %v3420_v53, %v3420_v53  ;;  %v3421_v3 = vmax.f32 %v3276_v0, 0.0  ;;  %v3278_v42 = vpop.f32.mrb[11].mxu0  ;;  %v3886_v61 = vld [vmem:[#allocation3 + $0x30] sm:$0xf] }
 0x424   : >> { %3874 = vst [vmem:[#allocation3 + $0x18] sm:$0xf] %v3873_v38  ;;  %v3575_v47 = vor.u32 %v3573_v50, %v3572_v60  ;;  %v3577_v4 = vrot.slane %v3572_v60, 4 }
 0x425   : >> { %v3579_v16 = vshrl.u32 %v9026_v13, 16  ;;  %v9027_v28 = vpack.c.bf16 %v3421_v3, %v3421_v3  ;;  %v9512_v55 = vld [vmem:[#allocation3 + $0xc] sm:$0xff]   ;;  %v9513_v18 = vld [vmem:[#allocation3 + $0x14] ss:$0 sps:$4 sm:$0x11]   ;;  %v3582_v22 = vshll.u32 %v9026_v13, 16 }
 0x426   : >> { %v3576_v39 = vsel %vm11081_vm6, %v3568_v26, %v3575_v47  ;;  %v3877_v25 = vsel %vm11073_vm5, %v3577_v4, %v3876_v5  ;;  %v4388_v12 = vrot.slane %v9512_v55, 1  ;;  %v4389_v23 = vrot.slane %v9513_v18, 1 }
 0x427   : >> { %3875 = vst.msk [vmem:[#allocation3 + $0x1c] sm:$0xf] %vm197_vm1, %v3576_v39  ;;  %3878 = vst [vmem:[#allocation3 + $0x20] sm:$0x1] %v3877_v25  ;;  %v3581_v48 = vrot.slane %v3579_v16, 7  ;;  %v3587_v2 = vshrl.u32 %v9027_v28, 16 }
 0x428   : >> { %v3590_v44 = vshll.u32 %v9027_v28, 16  ;;  %v3281_v36 = vpop.f32.mrb[12].mxu0  ;;  %v4176_v1 = vshll.u32 %v9512_v55, 16  ;;  %v4174_v17 = vshrl.u32 %v9512_v55, 16  ;;  %v12054_v56 = vsel %vm2393_vm9, %v4388_v12, %v4389_v23 }
 0x429   : >> { %v3584_v31 = vor.u32 %v3582_v22, %v3581_v48  ;;  %v3589_v27 = vrot.slane %v3587_v2, 7  ;;  %v3422_v51 = vmax.f32 %v3281_v36, 0.0  ;;  %v3283_v49 = vpop.f32.mrb[13].mxu0  ;;  %v3585_v24 = vrot.slane %v3581_v48, 4  ;;  %8851 = vmatprep.mubr.msk.bf16.mxu1 %vm2442_vm10, %v12054_v56 }
 0x42a   : >> { %v3284_v35 = vpop.f32.mrb[14].mxu0  ;;  %v4178_v62 = vrot.slane %v4176_v1, 1  ;;  %v4181_v46 = vshll.u32 %v9513_v18, 16 }
 0x42b   : >> { %v3880_v30 = vsel %vm11089_vm7, %v3584_v31, %v3879_v7  ;;  %v3592_v52 = vor.u32 %v3590_v44, %v3589_v27  ;;  %v3594_v20 = vrot.slane %v3589_v27, 4  ;;  %v9028_v45 = vpack.c.bf16 %v3422_v51, %v3422_v51  ;;  %v3286_v10 = vpop.f32.mrb[15].mxu0  ;;  %v3893_v27 = vld [vmem:[#allocation3 + $0x3c] sm:$0xf] }
 0x42c   : >> { %3881 = vst [vmem:[#allocation3 + $0x24] sm:$0xf] %v3880_v30  ;;  %v3423_v37 = vmax.f32 %v3284_v35, 0.0  ;;  %v4179_v9 = vor.u32 %v4178_v62, %v4174_v17  ;;  %v4183_v63 = vrot.slane %v4181_v46, 1 }
 0x42d   : >> { %v3593_v58 = vsel %vm11081_vm6, %v3585_v24, %v3592_v52  ;;  %v3884_v8 = vsel %vm11073_vm5, %v3594_v20, %v3883_v54  ;;  %v3596_v33 = vshrl.u32 %v9028_v45, 16  ;;  %v3599_v29 = vshll.u32 %v9028_v45, 16  ;;  %v3897_v52 = vld [vmem:[#allocation3 + $0x44] sm:$0x1] }
 0x42e   : >> { %3882 = vst.msk [vmem:[#allocation3 + $0x28] sm:$0xf] %vm197_vm1, %v3593_v58  ;;  %3885 = vst [vmem:[#allocation3 + $0x2c] sm:$0x1] %v3884_v8  ;;  %v9029_v21 = vpack.c.bf16 %v3423_v37, %v3423_v37  ;;  %v4184_v19 = vsel %vm2168_vm8, %v4179_v9, %v4183_v63  ;;  %v9514_v15 = vld [vmem:[#allocation3 + $0x18] sm:$0xff]  }
 0x42f   : >> { %v3598_v59 = vrot.slane %v3596_v33, 7  ;;  %4355 = vrot.lane.b32.xlu0 %v4184_v19, %s9663_s22  ;;  %v9515_v32 = vld [vmem:[#allocation3 + $0x20] ss:$0 sps:$4 sm:$0x11]   ;;  %v4188_v6 = vshll.u32 %v9514_v15, 16  ;;  %v4186_v3 = vshrl.u32 %v9514_v15, 16 }
 0x430   : >> { %v3604_v34 = vshrl.u32 %v9029_v21, 16  ;;  %v3289_v11 = vpop.f32.mrb[16].mxu0  ;;  %v4193_v0 = vshll.u32 %v9515_v32, 16  ;;  %v3607_v5 = vshll.u32 %v9029_v21, 16 }
 0x431   : >> { %v3601_v53 = vor.u32 %v3599_v29, %v3598_v59  ;;  %v3424_v60 = vmax.f32 %v3289_v11, 0.0  ;;  %v3291_v50 = vpop.f32.mrb[17].mxu0  ;;  %v4190_v42 = vrot.slane %v4188_v6, 1  ;;  %v3602_v26 = vrot.slane %v3598_v59, 4 }
 0x432   : >> { %v3606_v38 = vrot.slane %v3604_v34, 7  ;;  %v3292_v13 = vpop.f32.mrb[18].mxu0  ;;  %v4195_v18 = vrot.slane %v4193_v0, 1 }
 0x433   : >> { %v3887_v47 = vsel %vm11089_vm7, %v3601_v53, %v3886_v61  ;;  %v9030_v4 = vpack.c.bf16 %v3424_v60, %v3424_v60  ;;  %v3425_v16 = vmax.f32 %v3292_v13, 0.0  ;;  %v3294_v28 = vpop.f32.mrb[19].mxu0  ;;  %v4191_v55 = vor.u32 %v4190_v42, %v4186_v3 }
 0x434   : >> { %3888 = vst [vmem:[#allocation3 + $0x30] sm:$0xf] %v3887_v47  ;;  %v3609_v39 = vor.u32 %v3607_v5, %v3606_v38  ;;  %v3611_v25 = vrot.slane %v3606_v38, 4  ;;  %v3904_v5 = vld [vmem:[#allocation3 + $0x50] sm:$0x1] }
 0x435   : >> { %v3613_v48 = vshrl.u32 %v9030_v4, 16  ;;  %v9031_v22 = vpack.c.bf16 %v3425_v16, %v3425_v16  ;;  %v4196_v44 = vsel %vm2168_vm8, %v4191_v55, %v4195_v18  ;;  %v12074_v36 = vld [vmem:[#allocation3 + $0x24] sm:$0xff]   ;;  %v12076_v12 = vld [vmem:[#allocation3 + $0x2c] ss:$0 sps:$4 sm:$0x11]   ;;  %v3616_v1 = vshll.u32 %v9030_v4, 16 }
 0x436   : >> { %v3610_v7 = vsel %vm11081_vm6, %v3602_v26, %v3609_v39  ;;  %v3891_v2 = vsel %vm11073_vm5, %v3611_v25, %v3890_v41  ;;  %4357 = vrot.lane.b32.xlu1 %v4196_v44, %s9663_s22  ;;  %v4200_v49 = vshll.u32 %v12074_v36, 16  ;;  %v4205_v17 = vshll.u32 %v12076_v12, 16  ;;  %v3900_v41 = vld [vmem:[#allocation3 + $0x48] sm:$0xf] }
 0x437   : >> { %3889 = vst.msk [vmem:[#allocation3 + $0x34] sm:$0xf] %vm197_vm1, %v3610_v7  ;;  %3892 = vst [vmem:[#allocation3 + $0x38] sm:$0x1] %v3891_v2  ;;  %v3615_v23 = vrot.slane %v3613_v48, 7  ;;  %v3621_v31 = vshrl.u32 %v9031_v22, 16 }
 0x438   : >> { %v3297_v51 = vpop.f32.mrb[20].mxu0  ;;  %v3624_v35 = vshll.u32 %v9031_v22, 16  ;;  %v4198_v45 = vshrl.u32 %v12074_v36, 16  ;;  %v4202_v10 = vrot.slane %v4200_v49, 1  ;;  %v4207_v19 = vrot.slane %v4205_v17, 1 }
 0x439   : >> { %v3618_v24 = vor.u32 %v3616_v1, %v3615_v23  ;;  %v3623_v54 = vrot.slane %v3621_v31, 7  ;;  %v3426_v62 = vmax.f32 %v3297_v51, 0.0  ;;  %v3299_v46 = vpop.f32.mrb[21].mxu0  ;;  %v3619_v30 = vrot.slane %v3615_v23, 4 }
 0x43a   : >> { %v3300_v20 = vpop.f32.mrb[22].mxu0  ;;  %v4203_v21 = vor.u32 %v4202_v10, %v4198_v45 }
 0x43b   : >> { %v3894_v37 = vsel %vm11089_vm7, %v3618_v24, %v3893_v27  ;;  %v3626_v9 = vor.u32 %v3624_v35, %v3623_v54  ;;  %v3628_v63 = vrot.slane %v3623_v54, 4  ;;  %v9032_v58 = vpack.c.bf16 %v3426_v62, %v3426_v62  ;;  %v3302_v8 = vpop.f32.mrb[23].mxu0  ;;  %v3907_v62 = vld [vmem:[#allocation3 + $0x54] sm:$0xf] }
 0x43c   : >> { %3895 = vst [vmem:[#allocation3 + $0x3c] sm:$0xf] %v3894_v37  ;;  %v3427_v33 = vmax.f32 %v3300_v20, 0.0  ;;  %v4208_v61 = vsel %vm2168_vm8, %v4203_v21, %v4207_v19 }
 0x43d   : >> { %v3627_v15 = vsel %vm11081_vm6, %v3619_v30, %v3626_v9  ;;  %v3898_v59 = vsel %vm11073_vm5, %v3628_v63, %v3897_v52  ;;  %v3630_v29 = vshrl.u32 %v9032_v58, 16  ;;  %v3633_v6 = vshll.u32 %v9032_v58, 16  ;;  %4359 = vrot.lane.b32.xlu0 %v4208_v61, %s9663_s22  ;;  %v3911_v58 = vld [vmem:[#allocation3 + $0x5c] sm:$0x1] }
 0x43e   : >> { %3896 = vst.msk [vmem:[#allocation3 + $0x40] sm:$0xf] %vm197_vm1, %v3627_v15  ;;  %3899 = vst [vmem:[#allocation3 + $0x44] sm:$0x1] %v3898_v59  ;;  %v9033_v32 = vpack.c.bf16 %v3427_v33, %v3427_v33  ;;  %v12091_v34 = vld [vmem:[#allocation3 + $0x30] sm:$0xff]  }
 0x43f   : >> { %v3632_v11 = vrot.slane %v3630_v29, 7  ;;  %v12094_v53 = vld [vmem:[#allocation3 + $0x38] ss:$0 sps:$4 sm:$0x11]   ;;  %v4212_v0 = vshll.u32 %v12091_v34, 16  ;;  %v4210_v16 = vshrl.u32 %v12091_v34, 16 }
 0x440   : >> { %v3638_v60 = vshrl.u32 %v9033_v32, 16  ;;  %v3305_v50 = vpop.f32.mrb[24].mxu0  ;;  %v4217_v42 = vshll.u32 %v12094_v53, 16  ;;  %v3641_v47 = vshll.u32 %v9033_v32, 16 }
 0x441   : >> { %v3635_v38 = vor.u32 %v3633_v6, %v3632_v11  ;;  %v3428_v13 = vmax.f32 %v3305_v50, 0.0  ;;  %v3307_v3 = vpop.f32.mrb[25].mxu0  ;;  %v4214_v28 = vrot.slane %v4212_v0, 1  ;;  %v3636_v39 = vrot.slane %v3632_v11, 4 }
 0x442   : >> { %v3640_v26 = vrot.slane %v3638_v60, 7  ;;  %v3308_v4 = vpop.f32.mrb[26].mxu0  ;;  %v4219_v44 = vrot.slane %v4217_v42, 1 }
 0x443   : >> { %v3901_v25 = vsel %vm11089_vm7, %v3635_v38, %v3900_v41  ;;  %v9034_v55 = vpack.c.bf16 %v3428_v13, %v3428_v13  ;;  %v3429_v18 = vmax.f32 %v3308_v4, 0.0  ;;  %v3310_v48 = vpop.f32.mrb[27].mxu0  ;;  %v4215_v2 = vor.u32 %v4214_v28, %v4210_v16 }
 0x444   : >> { %3902 = vst [vmem:[#allocation3 + $0x48] sm:$0xf] %v3901_v25  ;;  %v3643_v22 = vor.u32 %v3641_v47, %v3640_v26  ;;  %v3645_v7 = vrot.slane %v3640_v26, 4  ;;  %v3914_v26 = vld [vmem:[#allocation3 + $0x60] sm:$0xf] }
 0x445   : >> { %v3647_v23 = vshrl.u32 %v9034_v55, 16  ;;  %v9035_v1 = vpack.c.bf16 %v3429_v18, %v3429_v18  ;;  %v4220_v51 = vsel %vm2168_vm8, %v4215_v2, %v4219_v44  ;;  %v12106_v49 = vld [vmem:[#allocation3 + $0x3c] sm:$0xff]   ;;  %v12108_v17 = vld [vmem:[#allocation3 + $0x44] ss:$0 sps:$4 sm:$0x11]   ;;  %v3650_v54 = vshll.u32 %v9034_v55, 16 }
 0x446   : >> { %v3644_v31 = vsel %vm11081_vm6, %v3636_v39, %v3643_v22  ;;  %v3905_v27 = vsel %vm11073_vm5, %v3645_v7, %v3904_v5  ;;  %4361 = vrot.lane.b32.xlu1 %v4220_v51, %s9663_s22  ;;  %v4224_v30 = vshll.u32 %v12106_v49, 16  ;;  %v4229_v52 = vshll.u32 %v12108_v17, 16  ;;  %v3918_v39 = vld [vmem:[#allocation3 + $0x68] sm:$0x1] }
 0x447   : >> { %3903 = vst.msk [vmem:[#allocation3 + $0x4c] sm:$0xf] %vm197_vm1, %v3644_v31  ;;  %3906 = vst [vmem:[#allocation3 + $0x50] sm:$0x1] %v3905_v27  ;;  %v3649_v24 = vrot.slane %v3647_v23, 7  ;;  %v3655_v35 = vshrl.u32 %v9035_v1, 16 }
 0x448   : >> { %v3313_v46 = vpop.f32.mrb[28].mxu0  ;;  %v3658_v10 = vshll.u32 %v9035_v1, 16  ;;  %v4222_v33 = vshrl.u32 %v12106_v49, 16  ;;  %v4226_v21 = vrot.slane %v4224_v30, 1  ;;  %v4231_v6 = vrot.slane %v4229_v52, 1 }
 0x449   : >> { %v3652_v20 = vor.u32 %v3650_v54, %v3649_v24  ;;  %v3657_v45 = vrot.slane %v3655_v35, 7  ;;  %v3430_v37 = vmax.f32 %v3313_v46, 0.0  ;;  %v3315_v9 = vpop.f32.mrb[29].mxu0  ;;  %v3653_v63 = vrot.slane %v3649_v24, 4 }
 0x44a   : >> { %v3316_v8 = vpop.f32.mrb[30].mxu0  ;;  %v4227_v11 = vor.u32 %v4226_v21, %v4222_v33 }
 0x44b   : >> { %v3908_v19 = vsel %vm11089_vm7, %v3652_v20, %v3907_v62  ;;  %v3660_v15 = vor.u32 %v3658_v10, %v3657_v45  ;;  %v3662_v59 = vrot.slane %v3657_v45, 4  ;;  %v9036_v29 = vpack.c.bf16 %v3430_v37, %v3430_v37  ;;  %v3318_v32 = vpop.f32.mrb[31].mxu0 }
 0x44c   : >> { %3909 = vst [vmem:[#allocation3 + $0x54] sm:$0xf] %v3908_v19  ;;  %v3431_v61 = vmax.f32 %v3316_v8, 0.0  ;;  %v4232_v38 = vsel %vm2168_vm8, %v4227_v11, %v4231_v6  ;;  %v3921_v8 = vld [vmem:[#allocation3 + $0x6c] sm:$0xf] }
 0x44d   : >> { %v3661_v41 = vsel %vm11081_vm6, %v3653_v63, %v3660_v15  ;;  %v3912_v60 = vsel %vm11073_vm5, %v3662_v59, %v3911_v58  ;;  %v3664_v50 = vshrl.u32 %v9036_v29, 16  ;;  %v3667_v3 = vshll.u32 %v9036_v29, 16  ;;  %4363 = vrot.lane.b32.xlu0 %v4232_v38, %s9663_s22  ;;  %v3925_v6 = vld [vmem:[#allocation3 + $0x74] sm:$0x1] }
 0x44e   : >> { %3910 = vst.msk [vmem:[#allocation3 + $0x58] sm:$0xf] %vm197_vm1, %v3661_v41  ;;  %3913 = vst [vmem:[#allocation3 + $0x5c] sm:$0x1] %v3912_v60  ;;  %v9037_v0 = vpack.c.bf16 %v3431_v61, %v3431_v61  ;;  %v12123_v5 = vld [vmem:[#allocation3 + $0x48] sm:$0xff]  }
 0x44f   : >> { %v3666_v13 = vrot.slane %v3664_v50, 7  ;;  %v12126_v42 = vld [vmem:[#allocation3 + $0x50] ss:$0 sps:$4 sm:$0x11]   ;;  %v4236_v16 = vshll.u32 %v12123_v5, 16  ;;  %v4234_v2 = vshrl.u32 %v12123_v5, 16 }
 0x450   : >> { %v3672_v47 = vshrl.u32 %v9037_v0, 16  ;;  %v3321_v4 = vpop.f32.mrb[32].mxu0  ;;  %v4241_v18 = vshll.u32 %v12126_v42, 16  ;;  %v3675_v22 = vshll.u32 %v9037_v0, 16 }
 0x451   : >> { %v3669_v28 = vor.u32 %v3667_v3, %v3666_v13  ;;  %v3432_v25 = vmax.f32 %v3321_v4, 0.0  ;;  %v3323_v55 = vpop.f32.mrb[33].mxu0  ;;  %v4238_v44 = vrot.slane %v4236_v16, 1  ;;  %v3670_v23 = vrot.slane %v3666_v13, 4 }
 0x452   : >> { %v3674_v48 = vrot.slane %v3672_v47, 7  ;;  %v3324_v7 = vpop.f32.mrb[34].mxu0  ;;  %v4243_v62 = vrot.slane %v4241_v18, 1 }
 0x453   : >> { %v3915_v1 = vsel %vm11089_vm7, %v3669_v28, %v3914_v26  ;;  %v9038_v31 = vpack.c.bf16 %v3432_v25, %v3432_v25  ;;  %v3433_v27 = vmax.f32 %v3324_v7, 0.0  ;;  %v3326_v51 = vpop.f32.mrb[35].mxu0  ;;  %v4239_v35 = vor.u32 %v4238_v44, %v4234_v2  ;;  %v3928_v44 = vld [vmem:[#allocation3 + $0x78] sm:$0xf] }
 0x454   : >> { %3916 = vst [vmem:[#allocation3 + $0x60] sm:$0xf] %v3915_v1  ;;  %v3677_v24 = vor.u32 %v3675_v22, %v3674_v48  ;;  %v3679_v54 = vrot.slane %v3674_v48, 4  ;;  %v3932_v51 = vld [vmem:[#allocation3 + $0x80] sm:$0x1] }
 0x455   : >> { %v3681_v46 = vshrl.u32 %v9038_v31, 16  ;;  %v9039_v30 = vpack.c.bf16 %v3433_v27, %v3433_v27  ;;  %v4244_v45 = vsel %vm2168_vm8, %v4239_v35, %v4243_v62  ;;  %v12138_v10 = vld [vmem:[#allocation3 + $0x54] sm:$0xff]   ;;  %v12140_v37 = vld [vmem:[#allocation3 + $0x5c] ss:$0 sps:$4 sm:$0x11]   ;;  %v3684_v63 = vshll.u32 %v9038_v31, 16 }
 0x456   : >> { %v3678_v52 = vsel %vm11081_vm6, %v3670_v23, %v3677_v24  ;;  %v3919_v20 = vsel %vm11073_vm5, %v3679_v54, %v3918_v39  ;;  %4365 = vrot.lane.b32.xlu1 %v4244_v45, %s9663_s22  ;;  %v4248_v21 = vshll.u32 %v12138_v10, 16  ;;  %v4253_v19 = vshll.u32 %v12140_v37, 16 }
 0x457   : >> { %3917 = vst.msk [vmem:[#allocation3 + $0x64] sm:$0xf] %vm197_vm1, %v3678_v52  ;;  %3920 = vst [vmem:[#allocation3 + $0x68] sm:$0x1] %v3919_v20  ;;  %v3683_v9 = vrot.slane %v3681_v46, 7  ;;  %v3689_v58 = vshrl.u32 %v9039_v30, 16 }
 0x458   : >> { %v3329_v33 = vpop.f32.mrb[36].mxu0  ;;  %v3692_v29 = vshll.u32 %v9039_v30, 16  ;;  %v4246_v60 = vshrl.u32 %v12138_v10, 16  ;;  %v4250_v50 = vrot.slane %v4248_v21, 1  ;;  %v4255_v16 = vrot.slane %v4253_v19, 1 }
 0x459   : >> { %v3686_v15 = vor.u32 %v3684_v63, %v3683_v9  ;;  %v3691_v59 = vrot.slane %v3689_v58, 7  ;;  %v3434_v32 = vmax.f32 %v3329_v33, 0.0  ;;  %v3331_v61 = vpop.f32.mrb[37].mxu0  ;;  %v3687_v11 = vrot.slane %v3683_v9, 4 }
 0x45a   : >> { %v3332_v41 = vpop.f32.mrb[38].mxu0  ;;  %v4251_v4 = vor.u32 %v4250_v50, %v4246_v60 }
 0x45b   : >> { %v3922_v0 = vsel %vm11089_vm7, %v3686_v15, %v3921_v8  ;;  %v3694_v38 = vor.u32 %v3692_v29, %v3691_v59  ;;  %v3696_v13 = vrot.slane %v3691_v59, 4  ;;  %v9040_v3 = vpack.c.bf16 %v3434_v32, %v3434_v32  ;;  %v3334_v26 = vpop.f32.mrb[39].mxu0 }
 0x45c   : >> { %3923 = vst [vmem:[#allocation3 + $0x6c] sm:$0xf] %v3922_v0  ;;  %v3435_v47 = vmax.f32 %v3332_v41, 0.0  ;;  %v4256_v18 = vsel %vm2168_vm8, %v4251_v4, %v4255_v16 }
 0x45d   : >> { %v3695_v28 = vsel %vm11081_vm6, %v3687_v11, %v3694_v38  ;;  %v3926_v39 = vsel %vm11073_vm5, %v3696_v13, %v3925_v6  ;;  %v3698_v25 = vshrl.u32 %v9040_v3, 16  ;;  %v3701_v7 = vshll.u32 %v9040_v3, 16  ;;  %4367 = vrot.lane.b32.xlu0 %v4256_v18, %s9663_s22  ;;  %v3935_v38 = vld [vmem:[#allocation3 + $0x84] sm:$0xf] }
 0x45e   : >> { %3924 = vst.msk [vmem:[#allocation3 + $0x70] sm:$0xf] %vm197_vm1, %v3695_v28  ;;  %3927 = vst [vmem:[#allocation3 + $0x74] sm:$0x1] %v3926_v39  ;;  %v9041_v55 = vpack.c.bf16 %v3435_v47, %v3435_v47  ;;  %v12155_v48 = vld [vmem:[#allocation3 + $0x60] sm:$0xff]  }
 0x45f   : >> { %v3700_v22 = vrot.slane %v3698_v25, 7  ;;  %v12158_v2 = vld [vmem:[#allocation3 + $0x68] ss:$0 sps:$4 sm:$0x11]   ;;  %v4260_v31 = vshll.u32 %v12155_v48, 16  ;;  %v4258_v52 = vshrl.u32 %v12155_v48, 16 }
 0x460   : >> { %v3706_v23 = vshrl.u32 %v9041_v55, 16  ;;  %v3337_v1 = vpop.f32.mrb[40].mxu0  ;;  %v4265_v35 = vshll.u32 %v12158_v2, 16  ;;  %v3709_v46 = vshll.u32 %v9041_v55, 16  ;;  %v3939_v55 = vld [vmem:[#allocation3 + $0x8c] sm:$0x1] }
 0x461   : >> { %v3703_v27 = vor.u32 %v3701_v7, %v3700_v22  ;;  %v3436_v24 = vmax.f32 %v3337_v1, 0.0  ;;  %v3339_v54 = vpop.f32.mrb[41].mxu0  ;;  %v4262_v20 = vrot.slane %v4260_v31, 1  ;;  %v3704_v45 = vrot.slane %v3700_v22, 4 }
 0x462   : >> { %v3708_v62 = vrot.slane %v3706_v23, 7  ;;  %v3340_v30 = vpop.f32.mrb[42].mxu0  ;;  %v4267_v15 = vrot.slane %v4265_v35, 1 }
 0x463   : >> { %v3929_v9 = vsel %vm11089_vm7, %v3703_v27, %v3928_v44  ;;  %v9042_v63 = vpack.c.bf16 %v3436_v24, %v3436_v24  ;;  %v3437_v58 = vmax.f32 %v3340_v30, 0.0  ;;  %v3342_v8 = vpop.f32.mrb[43].mxu0  ;;  %v4263_v19 = vor.u32 %v4262_v20, %v4258_v52 }
 0x464   : >> { %3930 = vst [vmem:[#allocation3 + $0x78] sm:$0xf] %v3929_v9  ;;  %v3711_v33 = vor.u32 %v3709_v46, %v3708_v62  ;;  %v3713_v21 = vrot.slane %v3708_v62, 4 }
 0x465   : >> { %v3715_v59 = vshrl.u32 %v9042_v63, 16  ;;  %v9043_v29 = vpack.c.bf16 %v3437_v58, %v3437_v58  ;;  %v4268_v11 = vsel %vm2168_vm8, %v4263_v19, %v4267_v15  ;;  %v12170_v6 = vld [vmem:[#allocation3 + $0x6c] sm:$0xff]   ;;  %v12172_v41 = vld [vmem:[#allocation3 + $0x74] ss:$0 sps:$4 sm:$0x11]   ;;  %v3718_v50 = vshll.u32 %v9042_v63, 16 }
 0x466   : >> { %v3712_v32 = vsel %vm11081_vm6, %v3704_v45, %v3711_v33  ;;  %v3933_v61 = vsel %vm11073_vm5, %v3713_v21, %v3932_v51  ;;  %4369 = vrot.lane.b32.xlu1 %v4268_v11, %s9663_s22  ;;  %v4272_v3 = vshll.u32 %v12170_v6, 16  ;;  %v4277_v26 = vshll.u32 %v12172_v41, 16  ;;  %v3942_v58 = vld [vmem:[#allocation3 + $0x90] sm:$0xf]  ;;  %v3946_v15 = vld [vmem:[#allocation3 + $0x98] sm:$0x1] }
 0x467   : >> { %3931 = vst.msk [vmem:[#allocation3 + $0x7c] sm:$0xf] %vm197_vm1, %v3712_v32  ;;  %3934 = vst [vmem:[#allocation3 + $0x80] sm:$0x1] %v3933_v61  ;;  %v3717_v60 = vrot.slane %v3715_v59, 7  ;;  %v3723_v0 = vshrl.u32 %v9043_v29, 16 }
 0x468   : >> { %v3345_v13 = vpop.f32.mrb[44].mxu0  ;;  %v3726_v16 = vshll.u32 %v9043_v29, 16  ;;  %v4270_v22 = vshrl.u32 %v12170_v6, 16  ;;  %v4274_v7 = vrot.slane %v4272_v3, 1  ;;  %v4279_v54 = vrot.slane %v4277_v26, 1 }
 0x469   : >> { %v3720_v47 = vor.u32 %v3718_v50, %v3717_v60  ;;  %v3725_v4 = vrot.slane %v3723_v0, 7  ;;  %v3438_v28 = vmax.f32 %v3345_v13, 0.0  ;;  %v3347_v39 = vpop.f32.mrb[45].mxu0  ;;  %v3721_v25 = vrot.slane %v3717_v60, 4 }
 0x46a   : >> { %v3348_v18 = vpop.f32.mrb[46].mxu0  ;;  %v4275_v24 = vor.u32 %v4274_v7, %v4270_v22 }
 0x46b   : >> { %v3936_v44 = vsel %vm11089_vm7, %v3720_v47, %v3935_v38  ;;  %v3728_v23 = vor.u32 %v3726_v16, %v3725_v4  ;;  %v3730_v1 = vrot.slane %v3725_v4, 4  ;;  %v9044_v31 = vpack.c.bf16 %v3438_v28, %v3438_v28  ;;  %v3350_v27 = vpop.f32.mrb[47].mxu0 }
 0x46c   : >> { %3937 = vst [vmem:[#allocation3 + $0x84] sm:$0xf] %v3936_v44  ;;  %v3439_v51 = vmax.f32 %v3348_v18, 0.0  ;;  %v4280_v52 = vsel %vm2168_vm8, %v4275_v24, %v4279_v54 }
 0x46d   : >> { %v3729_v35 = vsel %vm11081_vm6, %v3721_v25, %v3728_v23  ;;  %v3940_v62 = vsel %vm11073_vm5, %v3730_v1, %v3939_v55  ;;  %v3732_v46 = vshrl.u32 %v9044_v31, 16  ;;  %v3735_v9 = vshll.u32 %v9044_v31, 16  ;;  %4371 = vrot.lane.b32.xlu0 %v4280_v52, %s9663_s22 }
 0x46e   : >> { %3938 = vst.msk [vmem:[#allocation3 + $0x88] sm:$0xf] %vm197_vm1, %v3729_v35  ;;  %3941 = vst [vmem:[#allocation3 + $0x8c] sm:$0x1] %v3940_v62  ;;  %v9045_v30 = vpack.c.bf16 %v3439_v51, %v3439_v51  ;;  %v12187_v20 = vld [vmem:[#allocation3 + $0x78] sm:$0xff]  }
 0x46f   : >> { %v3734_v45 = vrot.slane %v3732_v46, 7  ;;  %v12190_v63 = vld [vmem:[#allocation3 + $0x80] ss:$0 sps:$4 sm:$0x11]   ;;  %v4284_v21 = vshll.u32 %v12187_v20, 16  ;;  %v4282_v50 = vshrl.u32 %v12187_v20, 16 }
 0x470   : >> { %v3740_v8 = vshrl.u32 %v9045_v30, 16  ;;  %v3353_v33 = vpop.f32.mrb[48].mxu0  ;;  %v4289_v32 = vshll.u32 %v12190_v63, 16  ;;  %v3743_v11 = vshll.u32 %v9045_v30, 16  ;;  %v3949_v51 = vld [vmem:[#allocation3 + $0x9c] sm:$0xf] }
 0x471   : >> { %v3737_v19 = vor.u32 %v3735_v9, %v3734_v45  ;;  %v3440_v59 = vmax.f32 %v3353_v33, 0.0  ;;  %v3355_v29 = vpop.f32.mrb[49].mxu0  ;;  %v4286_v0 = vrot.slane %v4284_v21, 1  ;;  %v3738_v38 = vrot.slane %v3734_v45, 4 }
 0x472   : >> { %v3742_v61 = vrot.slane %v3740_v8, 7  ;;  %v3356_v60 = vpop.f32.mrb[50].mxu0  ;;  %v4291_v39 = vrot.slane %v4289_v32, 1 }
 0x473   : >> { %v3943_v13 = vsel %vm11089_vm7, %v3737_v19, %v3942_v58  ;;  %v9046_v3 = vpack.c.bf16 %v3440_v59, %v3440_v59  ;;  %v3441_v26 = vmax.f32 %v3356_v60, 0.0  ;;  %v3358_v47 = vpop.f32.mrb[51].mxu0  ;;  %v4287_v28 = vor.u32 %v4286_v0, %v4282_v50  ;;  %v3953_v58 = vld [vmem:[#allocation3 + $0xa4] sm:$0x1] }
 0x474   : >> { %3944 = vst [vmem:[#allocation3 + $0x90] sm:$0xf] %v3943_v13  ;;  %v3745_v4 = vor.u32 %v3743_v11, %v3742_v61  ;;  %v3747_v16 = vrot.slane %v3742_v61, 4 }
 0x475   : >> { %v3749_v25 = vshrl.u32 %v9046_v3, 16  ;;  %v9047_v55 = vpack.c.bf16 %v3441_v26, %v3441_v26  ;;  %v4292_v7 = vsel %vm2168_vm8, %v4287_v28, %v4291_v39  ;;  %v12202_v44 = vld [vmem:[#allocation3 + $0x84] sm:$0xff]   ;;  %v12204_v23 = vld [vmem:[#allocation3 + $0x8c] ss:$0 sps:$4 sm:$0x11]   ;;  %v3752_v31 = vshll.u32 %v9046_v3, 16 }
 0x476   : >> { %v3746_v18 = vsel %vm11081_vm6, %v3738_v38, %v3745_v4  ;;  %v3947_v22 = vsel %vm11073_vm5, %v3747_v16, %v3946_v15  ;;  %4373 = vrot.lane.b32.xlu1 %v4292_v7, %s9663_s22  ;;  %v4296_v54 = vshll.u32 %v12202_v44, 16  ;;  %v4301_v35 = vshll.u32 %v12204_v23, 16  ;;  %v3956_v28 = vld [vmem:[#allocation3 + $0xa8] sm:$0xf] }
 0x477   : >> { %3945 = vst.msk [vmem:[#allocation3 + $0x94] sm:$0xf] %vm197_vm1, %v3746_v18  ;;  %3948 = vst [vmem:[#allocation3 + $0x98] sm:$0x1] %v3947_v22  ;;  %v3751_v1 = vrot.slane %v3749_v25, 7  ;;  %v3757_v27 = vshrl.u32 %v9047_v55, 16 }
 0x478   : >> { %v3361_v24 = vpop.f32.mrb[52].mxu0  ;;  %v3760_v30 = vshll.u32 %v9047_v55, 16  ;;  %v4294_v33 = vshrl.u32 %v12202_v44, 16  ;;  %v4298_v21 = vrot.slane %v4296_v54, 1  ;;  %v4303_v60 = vrot.slane %v4301_v35, 1 }
 0x479   : >> { %v3754_v62 = vor.u32 %v3752_v31, %v3751_v1  ;;  %v3759_v46 = vrot.slane %v3757_v27, 7  ;;  %v3442_v52 = vmax.f32 %v3361_v24, 0.0  ;;  %v3363_v45 = vpop.f32.mrb[53].mxu0  ;;  %v3755_v9 = vrot.slane %v3751_v1, 4  ;;  %v3960_v22 = vld [vmem:[#allocation3 + $0xb0] sm:$0x1] }
 0x47a   : >> { %v3364_v8 = vpop.f32.mrb[54].mxu0  ;;  %v4299_v11 = vor.u32 %v4298_v21, %v4294_v33 }
 0x47b   : >> { %v3950_v19 = vsel %vm11089_vm7, %v3754_v62, %v3949_v51  ;;  %v3762_v15 = vor.u32 %v3760_v30, %v3759_v46  ;;  %v3764_v59 = vrot.slane %v3759_v46, 4  ;;  %v9048_v29 = vpack.c.bf16 %v3442_v52, %v3442_v52  ;;  %v3366_v32 = vpop.f32.mrb[55].mxu0 }
 0x47c   : >> { %3951 = vst [vmem:[#allocation3 + $0x9c] sm:$0xf] %v3950_v19  ;;  %v3443_v61 = vmax.f32 %v3364_v8, 0.0  ;;  %v4304_v3 = vsel %vm2168_vm8, %v4299_v11, %v4303_v60 }
 0x47d   : >> { %v3763_v50 = vsel %vm11081_vm6, %v3755_v9, %v3762_v15  ;;  %v3954_v0 = vsel %vm11073_vm5, %v3764_v59, %v3953_v58  ;;  %v3766_v38 = vshrl.u32 %v9048_v29, 16  ;;  %v3769_v4 = vshll.u32 %v9048_v29, 16  ;;  %4375 = vrot.lane.b32.xlu0 %v4304_v3, %s9663_s22 }
 0x47e   : >> { %3952 = vst.msk [vmem:[#allocation3 + $0xa0] sm:$0xf] %vm197_vm1, %v3763_v50  ;;  %3955 = vst [vmem:[#allocation3 + $0xa4] sm:$0x1] %v3954_v0  ;;  %v9049_v13 = vpack.c.bf16 %v3443_v61, %v3443_v61  ;;  %v12219_v26 = vld [vmem:[#allocation3 + $0x90] sm:$0xff]  }
 0x47f   : >> { %v3768_v47 = vrot.slane %v3766_v38, 7  ;;  %v12222_v16 = vld [vmem:[#allocation3 + $0x98] ss:$0 sps:$4 sm:$0x11]   ;;  %v4308_v55 = vshll.u32 %v12219_v26, 16  ;;  %v4306_v54 = vshrl.u32 %v12219_v26, 16 }
 0x480   : >> { %v3774_v39 = vshrl.u32 %v9049_v13, 16  ;;  %v3369_v25 = vpop.f32.mrb[56].mxu0  ;;  %v4313_v31 = vshll.u32 %v12222_v16, 16  ;;  %v3777_v51 = vshll.u32 %v9049_v13, 16  ;;  %v3963_v0 = vld [vmem:[#allocation3 + $0xb4] sm:$0xf] }
 0x481   : >> { %v3771_v18 = vor.u32 %v3769_v4, %v3768_v47  ;;  %v3444_v7 = vmax.f32 %v3369_v25, 0.0  ;;  %v3371_v1 = vpop.f32.mrb[57].mxu0  ;;  %v4310_v35 = vrot.slane %v4308_v55, 1  ;;  %v3772_v62 = vrot.slane %v3768_v47, 4 }
 0x482   : >> { %v3776_v27 = vrot.slane %v3774_v39, 7  ;;  %v3372_v24 = vpop.f32.mrb[58].mxu0  ;;  %v4315_v33 = vrot.slane %v4313_v31, 1 }
 0x483   : >> { %v3957_v46 = vsel %vm11089_vm7, %v3771_v18, %v3956_v28  ;;  %v9050_v30 = vpack.c.bf16 %v3444_v7, %v3444_v7  ;;  %v3445_v52 = vmax.f32 %v3372_v24, 0.0  ;;  %v3374_v45 = vpop.f32.mrb[59].mxu0  ;;  %v4311_v8 = vor.u32 %v4310_v35, %v4306_v54  ;;  %v3967_v18 = vld [vmem:[#allocation3 + $0xbc] sm:$0x1] }
 0x484   : >> { %3958 = vst [vmem:[#allocation3 + $0xa8] sm:$0xf] %v3957_v46  ;;  %v3779_v9 = vor.u32 %v3777_v51, %v3776_v27  ;;  %v3781_v58 = vrot.slane %v3776_v27, 4 }
 0x485   : >> { %v3783_v21 = vshrl.u32 %v9050_v30, 16  ;;  %v9051_v19 = vpack.c.bf16 %v3445_v52, %v3445_v52  ;;  %v4316_v29 = vsel %vm2168_vm8, %v4311_v8, %v4315_v33  ;;  %v12234_v32 = vld [vmem:[#allocation3 + $0x9c] sm:$0xff]   ;;  %v12236_v61 = vld [vmem:[#allocation3 + $0xa4] ss:$0 sps:$4 sm:$0x11]   ;;  %v3786_v60 = vshll.u32 %v9050_v30, 16 }
 0x486   : >> { %v3780_v15 = vsel %vm11081_vm6, %v3772_v62, %v3779_v9  ;;  %v3961_v59 = vsel %vm11073_vm5, %v3781_v58, %v3960_v22  ;;  %4377 = vrot.lane.b32.xlu1 %v4316_v29, %s9663_s22  ;;  %v4320_v13 = vshll.u32 %v12234_v32, 16  ;;  %v4325_v3 = vshll.u32 %v12236_v61, 16 }
 0x487   : >> { %3959 = vst.msk [vmem:[#allocation3 + $0xac] sm:$0xf] %vm197_vm1, %v3780_v15  ;;  %3962 = vst [vmem:[#allocation3 + $0xb0] sm:$0x1] %v3961_v59  ;;  %v3785_v11 = vrot.slane %v3783_v21, 7  ;;  %v3791_v50 = vshrl.u32 %v9051_v19, 16 }
 0x488   : >> { %v3377_v38 = vpop.f32.mrb[60].mxu0  ;;  %v3794_v28 = vshll.u32 %v9051_v19, 16  ;;  %v4318_v7 = vshrl.u32 %v12234_v32, 16  ;;  %v4322_v1 = vrot.slane %v4320_v13, 1  ;;  %v4327_v46 = vrot.slane %v4325_v3, 1  ;;  %v12256_v15 = vld [vmem:[#allocation3] sm:$0xff]  }
 0x489   : >> { %v3788_v47 = vor.u32 %v3786_v60, %v3785_v11  ;;  %v3793_v4 = vrot.slane %v3791_v50, 7  ;;  %v3446_v39 = vmax.f32 %v3377_v38, 0.0  ;;  %v3379_v25 = vpop.f32.mrb[61].mxu0  ;;  %v3789_v55 = vrot.slane %v3785_v11, 4  ;;  %v3970_v59 = vld [vmem:[#allocation3 + $0xc0] sm:$0xf] }
 0x48a   : >> { %v3380_v22 = vpop.f32.mrb[62].mxu0  ;;  %v4323_v62 = vor.u32 %v4322_v1, %v4318_v7  ;;  %v4164_v25 = vshll.u32 %v12256_v15, 16 }
 0x48b   : >> { %v3964_v31 = vsel %vm11089_vm7, %v3788_v47, %v3963_v0  ;;  %v3796_v27 = vor.u32 %v3794_v28, %v3793_v4  ;;  %v3798_v51 = vrot.slane %v3793_v4, 4  ;;  %v9052_v24 = vpack.c.bf16 %v3446_v39, %v3446_v39  ;;  %v3382_v54 = vpop.f32.mrb[63].mxu0  ;;  %v12260_v0 = vld [vmem:[#allocation3 + $0x8] ss:$0 sps:$4 sm:$0x11]  }
 0x48c   : >> { %3965 = vst [vmem:[#allocation3 + $0xb4] sm:$0xf] %v3964_v31  ;;  %v3447_v35 = vmax.f32 %v3380_v22, 0.0  ;;  %v4328_v58 = vsel %vm2168_vm8, %v4323_v62, %v4327_v46  ;;  %v3974_v39 = vld [vmem:[#allocation3 + $0xc8] sm:$0x1]  ;;  %v4166_v62 = vrot.slane %v4164_v25, 1 }
 0x48d   : >> { %v3797_v30 = vsel %vm11081_vm6, %v3789_v55, %v3796_v27  ;;  %v3968_v52 = vsel %vm11073_vm5, %v3798_v51, %v3967_v18  ;;  %v3800_v45 = vshrl.u32 %v9052_v24, 16  ;;  %v3803_v21 = vshll.u32 %v9052_v24, 16  ;;  %4379 = vrot.lane.b32.xlu0 %v4328_v58, %s9663_s22  ;;  %v9586_v25 = vld [vmem:[#allocation3 + $0xc] sm:$0xff]  }
 0x48e   : >> { %3966 = vst.msk [vmem:[#allocation3 + $0xb8] sm:$0xf] %vm197_vm1, %v3797_v30  ;;  %3969 = vst [vmem:[#allocation3 + $0xbc] sm:$0x1] %v3968_v52  ;;  %v9053_v9 = vpack.c.bf16 %v3447_v35, %v3447_v35  ;;  %v12251_v8 = vld [vmem:[#allocation3 + $0xa8] sm:$0xff]   ;;  %v4162_v35 = vshrl.u32 %v12256_v15, 16 }
 0x48f   : >> { %v3802_v33 = vrot.slane %v3800_v45, 7  ;;  %v12254_v19 = vld [vmem:[#allocation3 + $0xb0] ss:$0 sps:$4 sm:$0x11]   ;;  %v4332_v11 = vshll.u32 %v12251_v8, 16  ;;  %v4330_v3 = vshrl.u32 %v12251_v8, 16 }
 0x490   : >> { %v3808_v29 = vshrl.u32 %v9053_v9, 16  ;;  %v4337_v50 = vshll.u32 %v12254_v19, 16  ;;  %v3811_v13 = vshll.u32 %v9053_v9, 16  ;;  %v4169_v46 = vshll.u32 %v12260_v0, 16 }
 0x491   : >> { %v3805_v60 = vor.u32 %v3803_v21, %v3802_v33  ;;  %v4334_v47 = vrot.slane %v4332_v11, 1  ;;  %v3806_v4 = vrot.slane %v3802_v33, 4  ;;  %v4167_v33 = vor.u32 %v4166_v62, %v4162_v35  ;;  %v9584_v11 = vld [vmem:[#allocation3 + $0x18] sm:$0xff]  }
 0x492   : >> { %v3810_v38 = vrot.slane %v3808_v29, 7  ;;  %v4339_v7 = vrot.slane %v4337_v50, 1  ;;  %v4171_v21 = vrot.slane %v4169_v46, 1  ;;  %v9585_v50 = vld [vmem:[#allocation3 + $0x20] ss:$0 sps:$4 sm:$0x11]  }
 0x493   : >> { %v3971_v28 = vsel %vm11089_vm7, %v3805_v60, %v3970_v59  ;;  %v4335_v22 = vor.u32 %v4334_v47, %v4330_v3  ;;  %v4391_v60 = vrot.slane %v9584_v11, 1  ;;  %v9554_v47 = vld [vmem:[%s11563_s29 + $0x120] sm:$0xff]   ;;  %v4394_v35 = vrot.slane %v12074_v36, 1  ;;  %v9560_v46 = vld [vmem:[%s11563_s29 + $0x130] sm:$0xff]   ;;  %v9561_v36 = vld [vmem:[%s11563_s29 + $0x138] sm:$0xff]  }
 0x494   : >> { %3972 = vst [vmem:[#allocation3 + $0xc0] sm:$0xf] %v3971_v28  ;;  %v3813_v55 = vor.u32 %v3811_v13, %v3810_v38  ;;  %v3815_v18 = vrot.slane %v3810_v38, 4  ;;  %v4392_v38 = vrot.slane %v9585_v50, 1  ;;  %v4172_v3 = vsel %vm2168_vm8, %v4167_v33, %v4171_v21  ;;  %v9587_v21 = vld [vmem:[#allocation3 + $0x24] sm:$0xff]  }
 0x495   : >> { %v12266_v1 = vld [vmem:[#allocation3 + $0xb4] sm:$0xff]   ;;  %v4340_v51 = vsel %vm2168_vm8, %v4335_v22, %v4339_v7  ;;  %v12273_v24 = vld [vmem:[#allocation3 + $0xbc] ss:$0 sps:$4 sm:$0x11]   ;;  %v4395_v62 = vrot.slane %v12076_v12, 1  ;;  %v4397_v12 = vrot.slane %v12091_v34, 1 }
 0x496   : >> { %v3814_v31 = vsel %vm11081_vm6, %v3806_v4, %v3813_v55  ;;  %v3975_v27 = vsel %vm11073_vm5, %v3815_v18, %v3974_v39  ;;  %4381 = vrot.lane.b32.xlu1 %v4340_v51, %s9663_s22  ;;  %v4344_v54 = vshll.u32 %v12266_v1, 16  ;;  %v4349_v30 = vshll.u32 %v12273_v24, 16  ;;  %v9557_v51 = vld [vmem:[%s11563_s29 + $0x128] sm:$0xff]  }
 0x497   : >> { %3973 = vst.msk [vmem:[#allocation3 + $0xc4] sm:$0xf] %vm197_vm1, %v3814_v31  ;;  %3976 = vst [vmem:[#allocation3 + $0xc8] sm:$0x1] %v3975_v27  ;;  %v4342_v52 = vshrl.u32 %v12266_v1, 16  ;;  %v12299_v7 = vsel %vm2393_vm9, %v4391_v60, %v4392_v38  ;;  %v4400_v60 = vrot.slane %v12106_v49, 1 }
 0x498   : >> { %v4346_v45 = vrot.slane %v4344_v54, 1  ;;  %v4351_v58 = vrot.slane %v4349_v30, 1  ;;  %v4401_v50 = vrot.slane %v12108_v17, 1  ;;  %v9564_v38 = vld [vmem:[%s11563_s29 + $0x150] sm:$0xff]   ;;  %v9565_v17 = vld [vmem:[%s11563_s29 + $0x158] sm:$0xff]  }
 0x49a   : >> { %v4347_v9 = vor.u32 %v4346_v45, %v4342_v52  ;;  %v12316_v45 = vsel %vm2393_vm9, %v4394_v35, %v4395_v62  ;;  %v9569_v62 = vld [vmem:[%s11563_s29 + $0x178] sm:$0xff]  }
 0x49c   : >> { %v4352_v59 = vsel %vm2168_vm8, %v4347_v9, %v4351_v58  ;;  %v4398_v9 = vrot.slane %v12094_v53, 1  ;;  %v9562_v58 = vld [vmem:[%s11563_s29 + $0x140] sm:$0xff]   ;;  %v9563_v53 = vld [vmem:[%s11563_s29 + $0x148] sm:$0xff]  }
 0x49d   : >> { %4383 = vrot.lane.b32.xlu0 %v4352_v59, %s9663_s22 }
 0x49e   : >> { %v12284_v29 = vld [vmem:[#allocation3 + $0xc0] sm:$0xff]   ;;  %v12286_v13 = vld [vmem:[#allocation3 + $0xc8] ss:$0 sps:$4 sm:$0x11]  }
 0x49f   : >> { %v4520_v4 = vshll.u32 %v12284_v29, 16  ;;  %v4525_v39 = vshll.u32 %v12286_v13, 16  ;;  %v4518_v18 = vshrl.u32 %v12284_v29, 16 }
 0x4a1   : >> { %v4356_v28 = vpop.permute.xlu0 %4355  ;;  %v4522_v22 = vrot.slane %v4520_v4, 1  ;;  %4353 = vrot.lane.b32.xlu0 %v4172_v3, %s9663_s22  ;;  %v4527_v27 = vrot.slane %v4525_v39, 1  ;;  %v12347_v4 = vsel %vm2393_vm9, %v4400_v60, %v4401_v50  ;;  %v4404_v39 = vrot.slane %v12126_v42, 1  ;;  %v9567_v42 = vld [vmem:[%s11563_s29 + $0x168] sm:$0xff]  }
 0x4a2   : >> { %v12293_v55 = vsel %vm2442_vm10, %v9586_v25, %v4356_v28  ;;  %v4403_v28 = vrot.slane %v12123_v5, 1  ;;  %v4418_v60 = vrot.slane %v12202_v44, 1  ;;  %v4419_v50 = vrot.slane %v12204_v23, 1 }
 0x4a3   : >> { %4718 = vmatmul.mubr.bf16.vlgmr.msra.gmra.mrb[0].mxu1 %v12293_v55  ;;  %v4523_v31 = vor.u32 %v4522_v22, %v4518_v18 }
 0x4a4   : >> { %4922 = vmatpush1.bf16.msra.mxu1 %v9554_v47  ;;  %8852 = vmatprep.mubr.msk.bf16.mxu1 %vm2442_vm10, %v12299_v7  ;;  %v12363_v22 = vsel %vm2393_vm9, %v4403_v28, %v4404_v39  ;;  %v4424_v39 = vrot.slane %v12234_v32, 1 }
 0x4a5   : >> { %4923 = vmatprep.subr.bf16.mxu1 %v9664_v43  ;;  %v4528_v54 = vsel %vm2168_vm8, %v4523_v31, %v4527_v27  ;;  %v4406_v31 = vrot.slane %v12138_v10, 1  ;;  %v4407_v27 = vrot.slane %v12140_v37, 1  ;;  %v4409_v37 = vrot.slane %v12155_v48, 1 }
 0x4a6   : >> { %4529 = vrot.lane.b32.xlu1 %v4528_v54, %s9663_s22 }
 0x4a7   : >> { %v12379_v35 = vsel %vm2393_vm9, %v4406_v31, %v4407_v27  ;;  %v4428_v31 = vrot.slane %v12254_v19, 1 }
 0x4a8   : >> { %4924 = vmatpush1.bf16.msra.mxu1 %v9557_v51  ;;  %v4358_v30 = vpop.permute.xlu1 %4357 }
 0x4a9   : >> { %4925 = vmatprep.subr.bf16.mxu1 %v9664_v43  ;;  %v12312_v52 = vsel %vm2442_vm10, %v9584_v11, %v4358_v30  ;;  %v12331_v11 = vsel %vm2393_vm9, %v4397_v12, %v4398_v9  ;;  %v4412_v12 = vrot.slane %v12170_v6, 1 }
 0x4ab   : >> { %4726 = vmatmul.mubr.bf16.gmra.mrb[4].mxu1 %v12312_v52 }
 0x4ac   : >> { %8853 = vmatprep.mubr.msk.bf16.mxu1 %vm2442_vm10, %v12316_v45  ;;  %4926 = vmatpush1.bf16.msra.mxu1 %v9560_v46  ;;  %v4410_v46 = vrot.slane %v12158_v2, 1  ;;  %v4413_v2 = vrot.slane %v12172_v41, 1 }
 0x4ad   : >> { %4927 = vmatprep.subr.bf16.mxu1 %v9664_v43 }
 0x4af   : >> { %v4360_v33 = vpop.permute.xlu0 %4359 }
 0x4b0   : >> { %4928 = vmatpush1.bf16.msra.mxu1 %v9561_v36  ;;  %v12327_v59 = vsel %vm2442_vm10, %v9587_v21, %v4360_v33  ;;  %v12394_v36 = vsel %vm2393_vm9, %v4409_v37, %v4410_v46  ;;  %v4415_v33 = vrot.slane %v12187_v20, 1  ;;  %v4416_v21 = vrot.slane %v12190_v63, 1 }
 0x4b1   : >> { %4929 = vmatprep.subr.bf16.mxu1 %v9664_v43  ;;  %v4531_v37 = vrot.slane %v12284_v29, 1  ;;  %v4532_v46 = vrot.slane %v12286_v13, 1 }
 0x4b3   : >> { %4734 = vmatmul.mubr.bf16.gmra.mrb[8].mxu1 %v12327_v59 }
 0x4b4   : >> { %8854 = vmatprep.mubr.msk.bf16.mxu1 %vm2442_vm10, %v12331_v11  ;;  %4930 = vmatpush1.bf16.msra.mxu1 %v9562_v58 }
 0x4b5   : >> { %4931 = vmatprep.subr.bf16.mxu1 %v9664_v43 }
 0x4b8   : >> { %4932 = vmatpush1.bf16.msra.mxu1 %v9563_v53  ;;  %v4362_v3 = vpop.permute.xlu1 %4361 }
 0x4b9   : >> { %4933 = vmatprep.subr.bf16.mxu1 %v9664_v43  ;;  %v12343_v47 = vsel %vm2442_vm10, %v12091_v34, %v4362_v3  ;;  %v9566_v34 = vld [vmem:[%s11563_s29 + $0x160] sm:$0xff]   ;;  %v4421_v3 = vrot.slane %v12219_v26, 1 }
 0x4bb   : >> { %4742 = vmatmul.mubr.bf16.gmra.mrb[12].mxu1 %v12343_v47 }
 0x4bc   : >> { %8855 = vmatprep.mubr.msk.bf16.mxu1 %vm2442_vm10, %v12347_v4  ;;  %4934 = vmatpush1.bf16.msra.mxu1 %v9564_v38 }
 0x4bd   : >> { %4935 = vmatprep.subr.bf16.mxu1 %v9664_v43 }
 0x4bf   : >> { %v4364_v25 = vpop.permute.xlu0 %4363 }
 0x4c0   : >> { %4936 = vmatpush1.bf16.msra.mxu1 %v9565_v17  ;;  %v12359_v18 = vsel %vm2442_vm10, %v12106_v49, %v4364_v25  ;;  %v9568_v49 = vld [vmem:[%s11563_s29 + $0x170] sm:$0xff]   ;;  %v4422_v17 = vrot.slane %v12222_v16, 1 }
 0x4c1   : >> { %4937 = vmatprep.subr.bf16.mxu1 %v9664_v43 }
 0x4c3   : >> { %4750 = vmatmul.mubr.bf16.gmra.mrb[16].mxu1 %v12359_v18 }
 0x4c4   : >> { %8856 = vmatprep.mubr.msk.bf16.mxu1 %vm2442_vm10, %v12363_v22  ;;  %4938 = vmatpush1.bf16.msra.mxu1 %v9566_v34  ;;  %v4425_v34 = vrot.slane %v12236_v61, 1 }
 0x4c5   : >> { %4939 = vmatprep.subr.bf16.mxu1 %v9664_v43 }
 0x4c8   : >> { %4940 = vmatpush1.bf16.msra.mxu1 %v9567_v42  ;;  %v4366_v51 = vpop.permute.xlu1 %4365  ;;  %v4427_v42 = vrot.slane %v12251_v8, 1 }
 0x4c9   : >> { %4941 = vmatprep.subr.bf16.mxu1 %v9664_v43  ;;  %v12375_v54 = vsel %vm2442_vm10, %v12123_v5, %v4366_v51  ;;  %v4431_v51 = vrot.slane %v12273_v24, 1 }
 0x4cb   : >> { %4758 = vmatmul.mubr.bf16.gmra.mrb[20].mxu1 %v12375_v54 }
 0x4cc   : >> { %8857 = vmatprep.mubr.msk.bf16.mxu1 %vm2442_vm10, %v12379_v35  ;;  %4942 = vmatpush1.bf16.msra.mxu1 %v9568_v49  ;;  %v4430_v49 = vrot.slane %v12266_v1, 1 }
 0x4cd   : >> { %4943 = vmatprep.subr.bf16.mxu1 %v9664_v43 }
 0x4cf   : >> { %v4368_v30 = vpop.permute.xlu0 %4367 }
 0x4d0   : >> { %4944 = vmatpush1.bf16.msra.mxu1 %v9569_v62  ;;  %v12390_v5 = vsel %vm2442_vm10, %v12138_v10, %v4368_v30  ;;  %v12406_v10 = vsel %vm2393_vm9, %v4412_v12, %v4413_v2  ;;  %v4385_v12 = vrot.slane %v12256_v15, 1  ;;  %v4386_v2 = vrot.slane %v12260_v0, 1  ;;  %v12508_v0 = vld [vmem:[#allocation3 + $0xd4] ss:$0 sps:$4 sm:$0x11]  }
 0x4d1   : >> { %5213 = vmatprep.subr.bf16.mxu1 %v9664_v43 }
 0x4d2   : >> { %v4387_v13 = vsel %vm2393_vm9, %v4385_v12, %v4386_v2 }
 0x4d3   : >> { %4766 = vmatmul.mubr.bf16.gmra.mrb[24].mxu1 %v12390_v5 }
 0x4d4   : >> { %8858 = vmatprep.mubr.msk.bf16.mxu1 %vm2442_vm10, %v12394_v36 }
 0x4d8   : >> { %v4370_v9 = vpop.permute.xlu1 %4369 }
 0x4d9   : >> { %v12402_v58 = vsel %vm2442_vm10, %v12155_v48, %v4370_v9  ;;  %v12418_v48 = vsel %vm2393_vm9, %v4415_v33, %v4416_v21 }
 0x4db   : >> { %4774 = vmatmul.mubr.bf16.gmra.mrb[28].mxu1 %v12402_v58 }
 0x4dc   : >> { %8859 = vmatprep.mubr.msk.bf16.mxu1 %vm2442_vm10, %v12406_v10 }
 0x4df   : >> { %v4372_v53 = vpop.permute.xlu0 %4371 }
 0x4e0   : >> { %v12414_v41 = vsel %vm2442_vm10, %v12170_v6, %v4372_v53  ;;  %v12430_v6 = vsel %vm2393_vm9, %v4418_v60, %v4419_v50  ;;  %v9570_v53 = vld [vmem:[%s11563_s29 + $0x1e0] sm:$0xff]  }
 0x4e1   : >> { %v12506_v60 = vld [vmem:[#allocation3 + $0xcc] sm:$0xff]  }
 0x4e2   : >> { %v5093_v50 = vshll.u32 %v12506_v60, 16 }
 0x4e3   : >> { %4782 = vmatmul.mubr.bf16.gmra.mrb[32].mxu1 %v12414_v41 }
 0x4e4   : >> { %8860 = vmatprep.mubr.msk.bf16.mxu1 %vm2442_vm10, %v12418_v48 }
 0x4e8   : >> { %v4374_v38 = vpop.permute.xlu1 %4373 }
 0x4e9   : >> { %v12426_v63 = vsel %vm2442_vm10, %v12187_v20, %v4374_v38  ;;  %v12442_v20 = vsel %vm2393_vm9, %v4421_v3, %v4422_v17  ;;  %v5091_v38 = vshrl.u32 %v12506_v60, 16  ;;  %v5095_v3 = vrot.slane %v5093_v50, 1 }
 0x4eb   : >> { %4790 = vmatmul.mubr.bf16.gmra.mrb[36].mxu1 %v12426_v63  ;;  %v5096_v17 = vor.u32 %v5095_v3, %v5091_v38 }
 0x4ec   : >> { %8861 = vmatprep.mubr.msk.bf16.mxu1 %vm2442_vm10, %v12430_v6 }
 0x4ef   : >> { %v4376_v28 = vpop.permute.xlu0 %4375 }
 0x4f0   : >> { %v12438_v23 = vsel %vm2442_vm10, %v12202_v44, %v4376_v28  ;;  %v12454_v44 = vsel %vm2393_vm9, %v4424_v39, %v4425_v34  ;;  %v9572_v39 = vld [vmem:[%s11563_s29 + $0x1f0] sm:$0xff]  }
 0x4f3   : >> { %4798 = vmatmul.mubr.bf16.gmra.mrb[40].mxu1 %v12438_v23 }
 0x4f4   : >> { %8862 = vmatprep.mubr.msk.bf16.mxu1 %vm2442_vm10, %v12442_v20 }
 0x4f8   : >> { %v4378_v25 = vpop.permute.xlu1 %4377 }
 0x4f9   : >> { %v12450_v16 = vsel %vm2442_vm10, %v12219_v26, %v4378_v25  ;;  %v12466_v26 = vsel %vm2393_vm9, %v4427_v42, %v4428_v31  ;;  %v9574_v25 = vld [vmem:[%s11563_s29 + $0x200] sm:$0xff]   ;;  %v9576_v42 = vld [vmem:[%s11563_s29 + $0x210] sm:$0xff]   ;;  %v9577_v31 = vld [vmem:[%s11563_s29 + $0x218] sm:$0xff]  }
 0x4fb   : >> { %4806 = vmatmul.mubr.bf16.gmra.mrb[44].mxu1 %v12450_v16 }
 0x4fc   : >> { %8863 = vmatprep.mubr.msk.bf16.mxu1 %vm2442_vm10, %v12454_v44 }
 0x4ff   : >> { %v4380_v27 = vpop.permute.xlu0 %4379 }
 0x500   : >> { %v12462_v61 = vsel %vm2442_vm10, %v12234_v32, %v4380_v27  ;;  %v12478_v32 = vsel %vm2393_vm9, %v4430_v49, %v4431_v51  ;;  %v9578_v27 = vld [vmem:[%s11563_s29 + $0x220] sm:$0xff]   ;;  %v9579_v49 = vld [vmem:[%s11563_s29 + $0x228] sm:$0xff]   ;;  %v9580_v51 = vld [vmem:[%s11563_s29 + $0x230] sm:$0xff]  }
 0x503   : >> { %4814 = vmatmul.mubr.bf16.gmra.mrb[48].mxu1 %v12462_v61 }
 0x504   : >> { %8864 = vmatprep.mubr.msk.bf16.mxu1 %vm2442_vm10, %v12466_v26 }
 0x508   : >> { %v4382_v62 = vpop.permute.xlu1 %4381 }
 0x509   : >> { %v12474_v19 = vsel %vm2442_vm10, %v12251_v8, %v4382_v62  ;;  %v12490_v8 = vsel %vm2393_vm9, %v4531_v37, %v4532_v46  ;;  %v9581_v62 = vld [vmem:[%s11563_s29 + $0x238] sm:$0xff]  }
 0x50b   : >> { %4822 = vmatmul.mubr.bf16.gmra.mrb[52].mxu1 %v12474_v19 }
 0x50c   : >> { %8865 = vmatprep.mubr.msk.bf16.mxu1 %vm2442_vm10, %v12478_v32 }
 0x50f   : >> { %v4384_v30 = vpop.permute.xlu0 %4383 }
 0x510   : >> { %v12486_v24 = vsel %vm2442_vm10, %v12266_v1, %v4384_v30 }
 0x513   : >> { %4830 = vmatmul.mubr.bf16.gmra.mrb[56].mxu1 %v12486_v24  ;;  %v4354_v33 = vpop.permute.xlu0 %4353 }
 0x514   : >> { %8866 = vmatprep.mubr.msk.bf16.mxu1 %vm2442_vm10, %v12490_v8  ;;  %v4434_v21 = vsel %vm2442_vm10, %v12256_v15, %v4354_v33  ;;  %v5098_v15 = vshll.u32 %v12508_v0, 16 }
 0x516   : >> { %v5100_v28 = vrot.slane %v5098_v15, 1 }
 0x518   : >> { %v4530_v9 = vpop.permute.xlu1 %4529  ;;  %v5101_v34 = vsel %vm2168_vm8, %v5096_v17, %v5100_v28  ;;  %v5865_v28 = vld [vmem:[#allocation2 + $0x20] sm:$0x1] }
 0x519   : >> { %v12499_v1 = vsel %vm2442_vm10, %v12284_v29, %v4530_v9  ;;  %v9571_v29 = vld [vmem:[%s11563_s29 + $0x1e8] sm:$0xff]   ;;  %5102 = vrot.lane.b32.xlu1 %v5101_v34, %s9663_s22  ;;  %s14254_s22 = scalar_lea.sflag (%p1982_p11), [#allocation5], %s188_s12 }
 0x51b   : >> { %4838 = vmatmul.mubr.bf16.gmra.mrb[60].mxu1 %v12499_v1 }
 0x51c   : >> { %8879 = vmatprep.mubr.msk.bf16.mxu1 %vm2442_vm10, %v4387_v13 }
 0x523   : >> { %4954 = vmatmul.mubr.bf16.vlgmr.msra.gmra.mrb[0].mxu1 %v4434_v21  ;;  %v5861_v21 = vld [vmem:[#allocation2 + $0x18] sm:$0xf] }
 0x524   : >> { %5214 = vmatpush1.bf16.msra.mxu1 %v9570_v53  ;;  %8880 = vmatprep.mubr.msk.bf16.mxu1 %vm2442_vm10, %v12054_v56  ;;  %v9573_v56 = vld [vmem:[%s11563_s29 + $0x1f8] sm:$0xff]  }
 0x525   : >> { %5215 = vmatprep.subr.bf16.mxu1 %v9664_v43 }
 0x528   : >> { %5216 = vmatpush1.bf16.msra.mxu1 %v9571_v29 }
 0x529   : >> { %5217 = vmatprep.subr.bf16.mxu1 %v9664_v43 }
 0x52b   : >> { %4962 = vmatmul.mubr.bf16.gmra.mrb[4].mxu1 %v12293_v55  ;;  %v9575_v55 = vld [vmem:[%s11563_s29 + $0x208] sm:$0xff]   ;;  %s9596_s29 = scalar_lea.vmem (%p1982_p11), %s9595_s28, 512 }
 0x52c   : >> { %8881 = vmatprep.mubr.msk.bf16.mxu1 %vm2442_vm10, %v12299_v7  ;;  %5218 = vmatpush1.bf16.msra.mxu1 %v9572_v39  ;;  %p9598_p2 = scmp.lt.s32.totalorder (%p1982_p11), %s9596_s29, %s9590_s23 }
 0x52d   : >> { %5219 = vmatprep.subr.bf16.mxu1 %v9664_v43 }
 0x52e   : > { %p9599_p3 = por (%p1982_p11), %p9598_p2, %p9597_p1 }
 0x530   : >> { %5220 = vmatpush1.bf16.msra.mxu1 %v9573_v56  ;;  %p9600_p4 = pnand (%p1982_p11), %p9599_p3, %p9593_p0 }
 0x531   : >> { %5221 = vmatprep.subr.bf16.mxu1 %v9664_v43 }
 0x533   : >> { %4970 = vmatmul.mubr.bf16.gmra.mrb[8].mxu1 %v12312_v52 }
 0x534   : >> { %8882 = vmatprep.mubr.msk.bf16.mxu1 %vm2442_vm10, %v12316_v45  ;;  %5222 = vmatpush1.bf16.msra.mxu1 %v9574_v25 }
 0x535   : >> { %5223 = vmatprep.subr.bf16.mxu1 %v9664_v43 }
 0x538   : >> { %5224 = vmatpush1.bf16.msra.mxu1 %v9575_v55 }
 0x539   : >> { %5225 = vmatprep.subr.bf16.mxu1 %v9664_v43 }
 0x53b   : >> { %4978 = vmatmul.mubr.bf16.gmra.mrb[12].mxu1 %v12327_v59 }
 0x53c   : >> { %8883 = vmatprep.mubr.msk.bf16.mxu1 %vm2442_vm10, %v12331_v11  ;;  %5226 = vmatpush1.bf16.msra.mxu1 %v9576_v42 }
 0x53d   : >> { %5227 = vmatprep.subr.bf16.mxu1 %v9664_v43 }
 0x540   : >> { %5228 = vmatpush1.bf16.msra.mxu1 %v9577_v31 }
 0x541   : >> { %5229 = vmatprep.subr.bf16.mxu1 %v9664_v43 }
 0x543   : >> { %4986 = vmatmul.mubr.bf16.gmra.mrb[16].mxu1 %v12343_v47 }
 0x544   : >> { %8884 = vmatprep.mubr.msk.bf16.mxu1 %vm2442_vm10, %v12347_v4  ;;  %5230 = vmatpush1.bf16.msra.mxu1 %v9578_v27 }
 0x545   : >> { %5231 = vmatprep.subr.bf16.mxu1 %v9664_v43 }
 0x548   : >> { %5232 = vmatpush1.bf16.msra.mxu1 %v9579_v49 }
 0x549   : >> { %5233 = vmatprep.subr.bf16.mxu1 %v9664_v43 }
 0x54b   : >> { %4994 = vmatmul.mubr.bf16.gmra.mrb[20].mxu1 %v12359_v18 }
 0x54c   : >> { %8885 = vmatprep.mubr.msk.bf16.mxu1 %vm2442_vm10, %v12363_v22  ;;  %5234 = vmatpush1.bf16.msra.mxu1 %v9580_v51 }
 0x54d   : >> { %5235 = vmatprep.subr.bf16.mxu1 %v9664_v43  ;;  %v5104_v43 = vrot.slane %v12506_v60, 1 }
 0x550   : >> { %5236 = vmatpush1.bf16.msra.mxu1 %v9581_v62 }
 0x553   : >> { %5002 = vmatmul.mubr.bf16.gmra.mrb[24].mxu1 %v12375_v54 }
 0x554   : >> { %8886 = vmatprep.mubr.msk.bf16.mxu1 %vm2442_vm10, %v12379_v35 }
 0x55b   : >> { %5010 = vmatmul.mubr.bf16.gmra.mrb[28].mxu1 %v12390_v5 }
 0x55c   : >> { %8887 = vmatprep.mubr.msk.bf16.mxu1 %vm2442_vm10, %v12394_v36 }
 0x563   : >> { %5018 = vmatmul.mubr.bf16.gmra.mrb[32].mxu1 %v12402_v58 }
 0x564   : >> { %8888 = vmatprep.mubr.msk.bf16.mxu1 %vm2442_vm10, %v12406_v10 }
 0x56b   : >> { %5026 = vmatmul.mubr.bf16.gmra.mrb[36].mxu1 %v12414_v41 }
 0x56c   : >> { %8889 = vmatprep.mubr.msk.bf16.mxu1 %vm2442_vm10, %v12418_v48 }
 0x573   : >> { %5034 = vmatmul.mubr.bf16.gmra.mrb[40].mxu1 %v12426_v63 }
 0x574   : >> { %8890 = vmatprep.mubr.msk.bf16.mxu1 %vm2442_vm10, %v12430_v6 }
 0x57b   : >> { %5042 = vmatmul.mubr.bf16.gmra.mrb[44].mxu1 %v12438_v23 }
 0x57c   : >> { %8891 = vmatprep.mubr.msk.bf16.mxu1 %vm2442_vm10, %v12442_v20 }
 0x583   : >> { %5050 = vmatmul.mubr.bf16.gmra.mrb[48].mxu1 %v12450_v16 }
 0x584   : >> { %8892 = vmatprep.mubr.msk.bf16.mxu1 %vm2442_vm10, %v12454_v44 }
 0x58b   : >> { %5058 = vmatmul.mubr.bf16.gmra.mrb[52].mxu1 %v12462_v61 }
 0x58c   : >> { %8893 = vmatprep.mubr.msk.bf16.mxu1 %vm2442_vm10, %v12466_v26 }
 0x593   : >> { %5066 = vmatmul.mubr.bf16.gmra.mrb[56].mxu1 %v12474_v19 }
 0x594   : >> { %8894 = vmatprep.mubr.msk.bf16.mxu1 %vm2442_vm10, %v12478_v32 }
 0x59b   : >> { %5074 = vmatmul.mubr.bf16.gmra.mrb[60].mxu1 %v12486_v24 }
 0x59c   : >> { %8936 = vmatprep.mubr.msk.bf16.mxu1 %vm2442_vm10, %v12299_v7  ;;  %v5105_v7 = vrot.slane %v12508_v0, 1 }
 0x5a3   : >> { %5246 = vmatmul.mubr.bf16.vlgmr.msra.gmra.mrb[0].mxu1 %v12312_v52  ;;  %v5106_v52 = vsel %vm2393_vm9, %v5104_v43, %v5105_v7 }
 0x5a4   : >> { %8937 = vmatprep.mubr.msk.bf16.mxu1 %vm2442_vm10, %v12316_v45  ;;  %v5103_v45 = vpop.permute.xlu1 %5102 }
 0x5ab   : >> { %5254 = vmatmul.mubr.bf16.gmra.mrb[4].mxu1 %v12327_v59  ;;  %v5108_v59 = vsel %vm2442_vm10, %v12506_v60, %v5103_v45 }
 0x5ac   : >> { %8938 = vmatprep.mubr.msk.bf16.mxu1 %vm2442_vm10, %v12331_v11 }
 0x5b3   : >> { %5262 = vmatmul.mubr.bf16.gmra.mrb[8].mxu1 %v12343_v47 }
 0x5b4   : >> { %8939 = vmatprep.mubr.msk.bf16.mxu1 %vm2442_vm10, %v12347_v4 }
 0x5bb   : >> { %5270 = vmatmul.mubr.bf16.gmra.mrb[12].mxu1 %v12359_v18 }
 0x5bc   : >> { %8940 = vmatprep.mubr.msk.bf16.mxu1 %vm2442_vm10, %v12363_v22 }
 0x5c3   : >> { %5278 = vmatmul.mubr.bf16.gmra.mrb[16].mxu1 %v12375_v54 }
 0x5c4   : >> { %8941 = vmatprep.mubr.msk.bf16.mxu1 %vm2442_vm10, %v12379_v35 }
 0x5cb   : >> { %5286 = vmatmul.mubr.bf16.gmra.mrb[20].mxu1 %v12390_v5 }
 0x5cc   : >> { %8942 = vmatprep.mubr.msk.bf16.mxu1 %vm2442_vm10, %v12394_v36 }
 0x5d3   : >> { %5294 = vmatmul.mubr.bf16.gmra.mrb[24].mxu1 %v12402_v58 }
 0x5d4   : >> { %8943 = vmatprep.mubr.msk.bf16.mxu1 %vm2442_vm10, %v12406_v10 }
 0x5db   : >> { %5302 = vmatmul.mubr.bf16.gmra.mrb[28].mxu1 %v12414_v41 }
 0x5dc   : >> { %8944 = vmatprep.mubr.msk.bf16.mxu1 %vm2442_vm10, %v12418_v48  ;;  %v5854_v48 = vld [vmem:[#allocation2 + $0xc] sm:$0xf] }
 0x5e3   : >> { %5310 = vmatmul.mubr.bf16.gmra.mrb[32].mxu1 %v12426_v63 }
 0x5e4   : >> { %8945 = vmatprep.mubr.msk.bf16.mxu1 %vm2442_vm10, %v12430_v6 }
 0x5eb   : >> { %5318 = vmatmul.mubr.bf16.gmra.mrb[36].mxu1 %v12438_v23 }
 0x5ec   : >> { %8946 = vmatprep.mubr.msk.bf16.mxu1 %vm2442_vm10, %v12442_v20 }
 0x5f3   : >> { %5326 = vmatmul.mubr.bf16.gmra.mrb[40].mxu1 %v12450_v16 }
 0x5f4   : >> { %8947 = vmatprep.mubr.msk.bf16.mxu1 %vm2442_vm10, %v12454_v44 }
 0x5fb   : >> { %5334 = vmatmul.mubr.bf16.gmra.mrb[44].mxu1 %v12462_v61 }
 0x5fc   : >> { %8948 = vmatprep.mubr.msk.bf16.mxu1 %vm2442_vm10, %v12466_v26  ;;  %v5858_v26 = vld [vmem:[#allocation2 + $0x14] sm:$0x1] }
 0x603   : >> { %5342 = vmatmul.mubr.bf16.gmra.mrb[48].mxu1 %v12474_v19 }
 0x604   : >> { %8949 = vmatprep.mubr.msk.bf16.mxu1 %vm2442_vm10, %v12478_v32 }
 0x60b   : >> { %5350 = vmatmul.mubr.bf16.gmra.mrb[52].mxu1 %v12486_v24 }
 0x60c   : >> { %8950 = vmatprep.mubr.msk.bf16.mxu1 %vm2442_vm10, %v12490_v8 }
 0x613   : >> { %5358 = vmatmul.mubr.bf16.gmra.mrb[56].mxu1 %v12499_v1 }
 0x614   : >> { %8951 = vmatprep.mubr.msk.bf16.mxu1 %vm2442_vm10, %v5106_v52  ;;  %v5868_v52 = vld [vmem:[#allocation2 + $0x24] sm:$0xf] }
 0x61b   : >> { %5366 = vmatmul.mubr.bf16.gmra.mrb[60].mxu1 %v5108_v59 }
 0x676   : >> { %v5247_v11 = vpop.f32.mrb[0].mxu1 }
 0x677   : >> { %v5406_v47 = vmax.f32 %v5247_v11, 0.0  ;;  %v5249_v4 = vpop.f32.mrb[1].mxu1 }
 0x678   : >> { %v5250_v18 = vpop.f32.mrb[2].mxu1 }
 0x679   : >> { %v9054_v22 = vpack.c.bf16 %v5406_v47, %v5406_v47  ;;  %v5407_v54 = vmax.f32 %v5250_v18, 0.0  ;;  %v5252_v35 = vpop.f32.mrb[3].mxu1 }
 0x67b   : >> { %v5535_v5 = vshrl.u32 %v9054_v22, 16  ;;  %v9055_v36 = vpack.c.bf16 %v5407_v54, %v5407_v54  ;;  %v5538_v10 = vshll.u32 %v9054_v22, 16  ;;  %v5872_v54 = vld [vmem:[#allocation2 + $0x2c] sm:$0x1] }
 0x67d   : >> { %v5537_v58 = vrot.slane %v5535_v5, 7  ;;  %v5543_v41 = vshrl.u32 %v9055_v36, 16  ;;  %v5546_v20 = vshll.u32 %v9055_v36, 16 }
 0x67e   : >> { %v5255_v63 = vpop.f32.mrb[4].mxu1 }
 0x67f   : >> { %v5540_v6 = vor.u32 %v5538_v10, %v5537_v58  ;;  %v5545_v23 = vrot.slane %v5543_v41, 7  ;;  %v5408_v16 = vmax.f32 %v5255_v63, 0.0  ;;  %v5257_v44 = vpop.f32.mrb[5].mxu1  ;;  %v5541_v61 = vrot.slane %v5537_v58, 4 }
 0x680   : >> { %v5258_v19 = vpop.f32.mrb[6].mxu1 }
 0x681   : >> { %v5855_v32 = vsel %vm11089_vm7, %v5540_v6, %v5854_v48  ;;  %v5548_v37 = vor.u32 %v5546_v20, %v5545_v23  ;;  %v5550_v46 = vrot.slane %v5545_v23, 4  ;;  %v9056_v30 = vpack.c.bf16 %v5408_v16, %v5408_v16  ;;  %v5260_v24 = vpop.f32.mrb[7].mxu1 }
 0x682   : >> { %5856 = vst [vmem:[#allocation2 + $0xc] sm:$0xf] %v5855_v32  ;;  %v5409_v8 = vmax.f32 %v5258_v19, 0.0 }
 0x683   : >> { %v5549_v12 = vsel %vm11081_vm6, %v5541_v61, %v5548_v37  ;;  %v5859_v2 = vsel %vm11073_vm5, %v5550_v46, %v5858_v26  ;;  %v5552_v9 = vshrl.u32 %v9056_v30, 16  ;;  %v5555_v33 = vshll.u32 %v9056_v30, 16  ;;  %v5875_v61 = vld [vmem:[#allocation2 + $0x30] sm:$0xf] }
 0x684   : >> { %5857 = vst.msk [vmem:[#allocation2 + $0x10] sm:$0xf] %vm197_vm1, %v5549_v12  ;;  %5860 = vst [vmem:[#allocation2 + $0x14] sm:$0x1] %v5859_v2  ;;  %v9057_v13 = vpack.c.bf16 %v5409_v8, %v5409_v8  ;;  %v5879_v2 = vld [vmem:[#allocation2 + $0x38] sm:$0x1] }
 0x685   : >> { %v5554_v1 = vrot.slane %v5552_v9, 7 }
 0x686   : >> { %v5560_v53 = vshrl.u32 %v9057_v13, 16  ;;  %v5263_v60 = vpop.f32.mrb[8].mxu1  ;;  %v5563_v3 = vshll.u32 %v9057_v13, 16 }
 0x687   : >> { %v5557_v0 = vor.u32 %v5555_v33, %v5554_v1  ;;  %v5410_v50 = vmax.f32 %v5263_v60, 0.0  ;;  %v5265_v29 = vpop.f32.mrb[9].mxu1  ;;  %v5558_v25 = vrot.slane %v5554_v1, 4 }
 0x688   : >> { %v5562_v38 = vrot.slane %v5560_v53, 7  ;;  %v5266_v15 = vpop.f32.mrb[10].mxu1 }
 0x689   : >> { %v5862_v17 = vsel %vm11089_vm7, %v5557_v0, %v5861_v21  ;;  %v9058_v39 = vpack.c.bf16 %v5410_v50, %v5410_v50  ;;  %v5411_v34 = vmax.f32 %v5266_v15, 0.0  ;;  %v5268_v56 = vpop.f32.mrb[11].mxu1 }
 0x68a   : >> { %5863 = vst [vmem:[#allocation2 + $0x18] sm:$0xf] %v5862_v17  ;;  %v5565_v55 = vor.u32 %v5563_v3, %v5562_v38  ;;  %v5567_v42 = vrot.slane %v5562_v38, 4  ;;  %v5882_v17 = vld [vmem:[#allocation2 + $0x3c] sm:$0xf] }
 0x68b   : >> { %v5569_v31 = vshrl.u32 %v9058_v39, 16  ;;  %v9059_v27 = vpack.c.bf16 %v5411_v34, %v5411_v34  ;;  %v5572_v43 = vshll.u32 %v9058_v39, 16 }
 0x68c   : >> { %v5566_v49 = vsel %vm11081_vm6, %v5558_v25, %v5565_v55  ;;  %v5866_v51 = vsel %vm11073_vm5, %v5567_v42, %v5865_v28 }
 0x68d   : >> { %5864 = vst.msk [vmem:[#allocation2 + $0x1c] sm:$0xf] %vm197_vm1, %v5566_v49  ;;  %5867 = vst [vmem:[#allocation2 + $0x20] sm:$0x1] %v5866_v51  ;;  %v5571_v62 = vrot.slane %v5569_v31, 7  ;;  %v5577_v7 = vshrl.u32 %v9059_v27, 16 }
 0x68e   : >> { %v5271_v45 = vpop.f32.mrb[12].mxu1  ;;  %v5580_v47 = vshll.u32 %v9059_v27, 16  ;;  %v5886_v31 = vld [vmem:[#allocation2 + $0x44] sm:$0x1] }
 0x68f   : >> { %v5574_v59 = vor.u32 %v5572_v43, %v5571_v62  ;;  %v5579_v11 = vrot.slane %v5577_v7, 7  ;;  %v5412_v4 = vmax.f32 %v5271_v45, 0.0  ;;  %v5273_v18 = vpop.f32.mrb[13].mxu1  ;;  %v5575_v22 = vrot.slane %v5571_v62, 4 }
 0x690   : >> { %v5274_v35 = vpop.f32.mrb[14].mxu1 }
 0x691   : >> { %v5869_v5 = vsel %vm11089_vm7, %v5574_v59, %v5868_v52  ;;  %v5582_v36 = vor.u32 %v5580_v47, %v5579_v11  ;;  %v5584_v58 = vrot.slane %v5579_v11, 4  ;;  %v9060_v10 = vpack.c.bf16 %v5412_v4, %v5412_v4  ;;  %v5276_v41 = vpop.f32.mrb[15].mxu1 }
 0x692   : >> { %5870 = vst [vmem:[#allocation2 + $0x24] sm:$0xf] %v5869_v5  ;;  %v5413_v48 = vmax.f32 %v5274_v35, 0.0 }
 0x693   : >> { %v5583_v63 = vsel %vm11081_vm6, %v5575_v22, %v5582_v36  ;;  %v5873_v6 = vsel %vm11073_vm5, %v5584_v58, %v5872_v54  ;;  %v5586_v23 = vshrl.u32 %v9060_v10, 16  ;;  %v5589_v44 = vshll.u32 %v9060_v10, 16  ;;  %v5889_v22 = vld [vmem:[#allocation2 + $0x48] sm:$0xf] }
 0x694   : >> { %5871 = vst.msk [vmem:[#allocation2 + $0x28] sm:$0xf] %vm197_vm1, %v5583_v63  ;;  %5874 = vst [vmem:[#allocation2 + $0x2c] sm:$0x1] %v5873_v6  ;;  %v9061_v20 = vpack.c.bf16 %v5413_v48, %v5413_v48  ;;  %v5893_v6 = vld [vmem:[#allocation2 + $0x50] sm:$0x1] }
 0x695   : >> { %v5588_v16 = vrot.slane %v5586_v23, 7 }
 0x696   : >> { %v5594_v26 = vshrl.u32 %v9061_v20, 16  ;;  %v5279_v19 = vpop.f32.mrb[16].mxu1  ;;  %v5597_v24 = vshll.u32 %v9061_v20, 16 }
 0x697   : >> { %v5591_v32 = vor.u32 %v5589_v44, %v5588_v16  ;;  %v5414_v37 = vmax.f32 %v5279_v19, 0.0  ;;  %v5281_v46 = vpop.f32.mrb[17].mxu1  ;;  %v5592_v33 = vrot.slane %v5588_v16, 4 }
 0x698   : >> { %v5596_v30 = vrot.slane %v5594_v26, 7  ;;  %v5282_v8 = vpop.f32.mrb[18].mxu1 }
 0x699   : >> { %v5876_v12 = vsel %vm11089_vm7, %v5591_v32, %v5875_v61  ;;  %v9062_v9 = vpack.c.bf16 %v5414_v37, %v5414_v37  ;;  %v5415_v13 = vmax.f32 %v5282_v8, 0.0  ;;  %v5284_v1 = vpop.f32.mrb[19].mxu1 }
 0x69a   : >> { %5877 = vst [vmem:[#allocation2 + $0x30] sm:$0xf] %v5876_v12  ;;  %v5599_v21 = vor.u32 %v5597_v24, %v5596_v30  ;;  %v5601_v53 = vrot.slane %v5596_v30, 4  ;;  %v5896_v12 = vld [vmem:[#allocation2 + $0x54] sm:$0xf] }
 0x69b   : >> { %v5603_v60 = vshrl.u32 %v9062_v9, 16  ;;  %v9063_v0 = vpack.c.bf16 %v5415_v13, %v5415_v13  ;;  %v5606_v3 = vshll.u32 %v9062_v9, 16 }
 0x69c   : >> { %v5600_v50 = vsel %vm11081_vm6, %v5592_v33, %v5599_v21  ;;  %v5880_v29 = vsel %vm11073_vm5, %v5601_v53, %v5879_v2 }
 0x69d   : >> { %5878 = vst.msk [vmem:[#allocation2 + $0x34] sm:$0xf] %vm197_vm1, %v5600_v50  ;;  %5881 = vst [vmem:[#allocation2 + $0x38] sm:$0x1] %v5880_v29  ;;  %v5605_v38 = vrot.slane %v5603_v60, 7  ;;  %v5611_v15 = vshrl.u32 %v9063_v0, 16 }
 0x69e   : >> { %v5287_v28 = vpop.f32.mrb[20].mxu1  ;;  %v5614_v56 = vshll.u32 %v9063_v0, 16  ;;  %v5900_v60 = vld [vmem:[#allocation2 + $0x5c] sm:$0x1] }
 0x69f   : >> { %v5608_v39 = vor.u32 %v5606_v3, %v5605_v38  ;;  %v5613_v34 = vrot.slane %v5611_v15, 7  ;;  %v5416_v25 = vmax.f32 %v5287_v28, 0.0  ;;  %v5289_v55 = vpop.f32.mrb[21].mxu1  ;;  %v5609_v42 = vrot.slane %v5605_v38, 4 }
 0x6a0   : >> { %v5290_v27 = vpop.f32.mrb[22].mxu1 }
 0x6a1   : >> { %v5883_v49 = vsel %vm11089_vm7, %v5608_v39, %v5882_v17  ;;  %v5616_v51 = vor.u32 %v5614_v56, %v5613_v34  ;;  %v5618_v62 = vrot.slane %v5613_v34, 4  ;;  %v9064_v43 = vpack.c.bf16 %v5416_v25, %v5416_v25  ;;  %v5292_v7 = vpop.f32.mrb[23].mxu1 }
 0x6a2   : >> { %5884 = vst [vmem:[#allocation2 + $0x3c] sm:$0xf] %v5883_v49  ;;  %v5417_v52 = vmax.f32 %v5290_v27, 0.0 }
 0x6a3   : >> { %v5617_v45 = vsel %vm11081_vm6, %v5609_v42, %v5616_v51  ;;  %v5887_v59 = vsel %vm11073_vm5, %v5618_v62, %v5886_v31  ;;  %v5620_v11 = vshrl.u32 %v9064_v43, 16  ;;  %v5623_v18 = vshll.u32 %v9064_v43, 16  ;;  %v5903_v42 = vld [vmem:[#allocation2 + $0x60] sm:$0xf] }
 0x6a4   : >> { %5885 = vst.msk [vmem:[#allocation2 + $0x40] sm:$0xf] %vm197_vm1, %v5617_v45  ;;  %5888 = vst [vmem:[#allocation2 + $0x44] sm:$0x1] %v5887_v59  ;;  %v9065_v47 = vpack.c.bf16 %v5417_v52, %v5417_v52  ;;  %v5907_v59 = vld [vmem:[#allocation2 + $0x68] sm:$0x1] }
 0x6a5   : >> { %v5622_v4 = vrot.slane %v5620_v11, 7 }
 0x6a6   : >> { %v5628_v54 = vshrl.u32 %v9065_v47, 16  ;;  %v5295_v35 = vpop.f32.mrb[24].mxu1  ;;  %v5631_v41 = vshll.u32 %v9065_v47, 16 }
 0x6a7   : >> { %v5625_v5 = vor.u32 %v5623_v18, %v5622_v4  ;;  %v5418_v36 = vmax.f32 %v5295_v35, 0.0  ;;  %v5297_v58 = vpop.f32.mrb[25].mxu1  ;;  %v5626_v44 = vrot.slane %v5622_v4, 4 }
 0x6a8   : >> { %v5630_v10 = vrot.slane %v5628_v54, 7  ;;  %v5298_v48 = vpop.f32.mrb[26].mxu1 }
 0x6a9   : >> { %v5890_v63 = vsel %vm11089_vm7, %v5625_v5, %v5889_v22  ;;  %v9066_v23 = vpack.c.bf16 %v5418_v36, %v5418_v36  ;;  %v5419_v20 = vmax.f32 %v5298_v48, 0.0  ;;  %v5300_v16 = vpop.f32.mrb[27].mxu1 }
 0x6aa   : >> { %5891 = vst [vmem:[#allocation2 + $0x48] sm:$0xf] %v5890_v63  ;;  %v5633_v61 = vor.u32 %v5631_v41, %v5630_v10  ;;  %v5635_v26 = vrot.slane %v5630_v10, 4  ;;  %v5910_v63 = vld [vmem:[#allocation2 + $0x6c] sm:$0xf] }
 0x6ab   : >> { %v5637_v19 = vshrl.u32 %v9066_v23, 16  ;;  %v9067_v32 = vpack.c.bf16 %v5419_v20, %v5419_v20  ;;  %v5640_v24 = vshll.u32 %v9066_v23, 16 }
 0x6ac   : >> { %v5634_v37 = vsel %vm11081_vm6, %v5626_v44, %v5633_v61  ;;  %v5894_v46 = vsel %vm11073_vm5, %v5635_v26, %v5893_v6 }
 0x6ad   : >> { %5892 = vst.msk [vmem:[#allocation2 + $0x4c] sm:$0xf] %vm197_vm1, %v5634_v37  ;;  %5895 = vst [vmem:[#allocation2 + $0x50] sm:$0x1] %v5894_v46  ;;  %v5639_v30 = vrot.slane %v5637_v19, 7  ;;  %v5645_v8 = vshrl.u32 %v9067_v32, 16 }
 0x6ae   : >> { %v5303_v2 = vpop.f32.mrb[28].mxu1  ;;  %v5648_v1 = vshll.u32 %v9067_v32, 16  ;;  %v5914_v19 = vld [vmem:[#allocation2 + $0x74] sm:$0x1] }
 0x6af   : >> { %v5642_v9 = vor.u32 %v5640_v24, %v5639_v30  ;;  %v5647_v13 = vrot.slane %v5645_v8, 7  ;;  %v5420_v33 = vmax.f32 %v5303_v2, 0.0  ;;  %v5305_v21 = vpop.f32.mrb[29].mxu1  ;;  %v5643_v53 = vrot.slane %v5639_v30, 4 }
 0x6b0   : >> { %v5306_v0 = vpop.f32.mrb[30].mxu1 }
 0x6b1   : >> { %v5897_v50 = vsel %vm11089_vm7, %v5642_v9, %v5896_v12  ;;  %v5650_v29 = vor.u32 %v5648_v1, %v5647_v13  ;;  %v5652_v38 = vrot.slane %v5647_v13, 4  ;;  %v9068_v3 = vpack.c.bf16 %v5420_v33, %v5420_v33  ;;  %v5308_v15 = vpop.f32.mrb[31].mxu1 }
 0x6b2   : >> { %5898 = vst [vmem:[#allocation2 + $0x54] sm:$0xf] %v5897_v50  ;;  %v5421_v17 = vmax.f32 %v5306_v0, 0.0 }
 0x6b3   : >> { %v5651_v28 = vsel %vm11081_vm6, %v5643_v53, %v5650_v29  ;;  %v5901_v39 = vsel %vm11073_vm5, %v5652_v38, %v5900_v60  ;;  %v5654_v34 = vshrl.u32 %v9068_v3, 16  ;;  %v5657_v55 = vshll.u32 %v9068_v3, 16  ;;  %v5917_v53 = vld [vmem:[#allocation2 + $0x78] sm:$0xf] }
 0x6b4   : >> { %5899 = vst.msk [vmem:[#allocation2 + $0x58] sm:$0xf] %vm197_vm1, %v5651_v28  ;;  %5902 = vst [vmem:[#allocation2 + $0x5c] sm:$0x1] %v5901_v39  ;;  %v9069_v56 = vpack.c.bf16 %v5421_v17, %v5421_v17  ;;  %v5921_v39 = vld [vmem:[#allocation2 + $0x80] sm:$0x1] }
 0x6b5   : >> { %v5656_v25 = vrot.slane %v5654_v34, 7 }
 0x6b6   : >> { %v5662_v31 = vshrl.u32 %v9069_v56, 16  ;;  %v5311_v27 = vpop.f32.mrb[32].mxu1  ;;  %v5665_v7 = vshll.u32 %v9069_v56, 16 }
 0x6b7   : >> { %v5659_v49 = vor.u32 %v5657_v55, %v5656_v25  ;;  %v5422_v51 = vmax.f32 %v5311_v27, 0.0  ;;  %v5313_v62 = vpop.f32.mrb[33].mxu1  ;;  %v5660_v18 = vrot.slane %v5656_v25, 4 }
 0x6b8   : >> { %v5664_v43 = vrot.slane %v5662_v31, 7  ;;  %v5314_v52 = vpop.f32.mrb[34].mxu1 }
 0x6b9   : >> { %v5904_v45 = vsel %vm11089_vm7, %v5659_v49, %v5903_v42  ;;  %v9070_v11 = vpack.c.bf16 %v5422_v51, %v5422_v51  ;;  %v5423_v47 = vmax.f32 %v5314_v52, 0.0  ;;  %v5316_v4 = vpop.f32.mrb[35].mxu1 }
 0x6ba   : >> { %5905 = vst [vmem:[#allocation2 + $0x60] sm:$0xf] %v5904_v45  ;;  %v5667_v22 = vor.u32 %v5665_v7, %v5664_v43  ;;  %v5669_v54 = vrot.slane %v5664_v43, 4  ;;  %v5924_v45 = vld [vmem:[#allocation2 + $0x84] sm:$0xf] }
 0x6bb   : >> { %v5671_v35 = vshrl.u32 %v9070_v11, 16  ;;  %v9071_v5 = vpack.c.bf16 %v5423_v47, %v5423_v47  ;;  %v5674_v41 = vshll.u32 %v9070_v11, 16 }
 0x6bc   : >> { %v5668_v36 = vsel %vm11081_vm6, %v5660_v18, %v5667_v22  ;;  %v5908_v58 = vsel %vm11073_vm5, %v5669_v54, %v5907_v59 }
 0x6bd   : >> { %5906 = vst.msk [vmem:[#allocation2 + $0x64] sm:$0xf] %vm197_vm1, %v5668_v36  ;;  %5909 = vst [vmem:[#allocation2 + $0x68] sm:$0x1] %v5908_v58  ;;  %v5673_v10 = vrot.slane %v5671_v35, 7  ;;  %v5679_v48 = vshrl.u32 %v9071_v5, 16 }
 0x6be   : >> { %v5319_v6 = vpop.f32.mrb[36].mxu1  ;;  %v5682_v16 = vshll.u32 %v9071_v5, 16  ;;  %v5928_v35 = vld [vmem:[#allocation2 + $0x8c] sm:$0x1] }
 0x6bf   : >> { %v5676_v23 = vor.u32 %v5674_v41, %v5673_v10  ;;  %v5681_v20 = vrot.slane %v5679_v48, 7  ;;  %v5424_v44 = vmax.f32 %v5319_v6, 0.0  ;;  %v5321_v61 = vpop.f32.mrb[37].mxu1  ;;  %v5677_v26 = vrot.slane %v5673_v10, 4 }
 0x6c0   : >> { %v5322_v32 = vpop.f32.mrb[38].mxu1 }
 0x6c1   : >> { %v5911_v37 = vsel %vm11089_vm7, %v5676_v23, %v5910_v63  ;;  %v5684_v46 = vor.u32 %v5682_v16, %v5681_v20  ;;  %v5686_v30 = vrot.slane %v5681_v20, 4  ;;  %v9072_v24 = vpack.c.bf16 %v5424_v44, %v5424_v44  ;;  %v5324_v8 = vpop.f32.mrb[39].mxu1 }
 0x6c2   : >> { %5912 = vst [vmem:[#allocation2 + $0x6c] sm:$0xf] %v5911_v37  ;;  %v5425_v12 = vmax.f32 %v5322_v32, 0.0 }
 0x6c3   : >> { %v5685_v2 = vsel %vm11081_vm6, %v5677_v26, %v5684_v46  ;;  %v5915_v9 = vsel %vm11073_vm5, %v5686_v30, %v5914_v19  ;;  %v5688_v13 = vshrl.u32 %v9072_v24, 16  ;;  %v5691_v21 = vshll.u32 %v9072_v24, 16  ;;  %v5931_v26 = vld [vmem:[#allocation2 + $0x90] sm:$0xf] }
 0x6c4   : >> { %5913 = vst.msk [vmem:[#allocation2 + $0x70] sm:$0xf] %vm197_vm1, %v5685_v2  ;;  %5916 = vst [vmem:[#allocation2 + $0x74] sm:$0x1] %v5915_v9  ;;  %v9073_v1 = vpack.c.bf16 %v5425_v12, %v5425_v12  ;;  %v5935_v9 = vld [vmem:[#allocation2 + $0x98] sm:$0x1] }
 0x6c5   : >> { %v5690_v33 = vrot.slane %v5688_v13, 7 }
 0x6c6   : >> { %v5696_v60 = vshrl.u32 %v9073_v1, 16  ;;  %v5327_v0 = vpop.f32.mrb[40].mxu1  ;;  %v5699_v15 = vshll.u32 %v9073_v1, 16 }
 0x6c7   : >> { %v5693_v50 = vor.u32 %v5691_v21, %v5690_v33  ;;  %v5426_v29 = vmax.f32 %v5327_v0, 0.0  ;;  %v5329_v38 = vpop.f32.mrb[41].mxu1  ;;  %v5694_v55 = vrot.slane %v5690_v33, 4 }
 0x6c8   : >> { %v5698_v3 = vrot.slane %v5696_v60, 7  ;;  %v5330_v17 = vpop.f32.mrb[42].mxu1 }
 0x6c9   : >> { %v5918_v28 = vsel %vm11089_vm7, %v5693_v50, %v5917_v53  ;;  %v9074_v34 = vpack.c.bf16 %v5426_v29, %v5426_v29  ;;  %v5427_v56 = vmax.f32 %v5330_v17, 0.0  ;;  %v5332_v25 = vpop.f32.mrb[43].mxu1 }
 0x6ca   : >> { %5919 = vst [vmem:[#allocation2 + $0x78] sm:$0xf] %v5918_v28  ;;  %v5701_v42 = vor.u32 %v5699_v15, %v5698_v3  ;;  %v5703_v31 = vrot.slane %v5698_v3, 4  ;;  %v5938_v28 = vld [vmem:[#allocation2 + $0x9c] sm:$0xf] }
 0x6cb   : >> { %v5705_v27 = vshrl.u32 %v9074_v34, 16  ;;  %v9075_v49 = vpack.c.bf16 %v5427_v56, %v5427_v56  ;;  %v5708_v7 = vshll.u32 %v9074_v34, 16 }
 0x6cc   : >> { %v5702_v51 = vsel %vm11081_vm6, %v5694_v55, %v5701_v42  ;;  %v5922_v62 = vsel %vm11073_vm5, %v5703_v31, %v5921_v39 }
 0x6cd   : >> { %5920 = vst.msk [vmem:[#allocation2 + $0x7c] sm:$0xf] %vm197_vm1, %v5702_v51  ;;  %5923 = vst [vmem:[#allocation2 + $0x80] sm:$0x1] %v5922_v62  ;;  %v5707_v43 = vrot.slane %v5705_v27, 7  ;;  %v5713_v52 = vshrl.u32 %v9075_v49, 16 }
 0x6ce   : >> { %v5335_v59 = vpop.f32.mrb[44].mxu1  ;;  %v5716_v4 = vshll.u32 %v9075_v49, 16  ;;  %v5942_v27 = vld [vmem:[#allocation2 + $0xa4] sm:$0x1] }
 0x6cf   : >> { %v5710_v11 = vor.u32 %v5708_v7, %v5707_v43  ;;  %v5715_v47 = vrot.slane %v5713_v52, 7  ;;  %v5428_v18 = vmax.f32 %v5335_v59, 0.0  ;;  %v5337_v22 = vpop.f32.mrb[45].mxu1  ;;  %v5711_v54 = vrot.slane %v5707_v43, 4 }
 0x6d0   : >> { %v5338_v5 = vpop.f32.mrb[46].mxu1 }
 0x6d1   : >> { %v5925_v36 = vsel %vm11089_vm7, %v5710_v11, %v5924_v45  ;;  %v5718_v58 = vor.u32 %v5716_v4, %v5715_v47  ;;  %v5720_v10 = vrot.slane %v5715_v47, 4  ;;  %v9076_v41 = vpack.c.bf16 %v5428_v18, %v5428_v18  ;;  %v5340_v48 = vpop.f32.mrb[47].mxu1 }
 0x6d2   : >> { %5926 = vst [vmem:[#allocation2 + $0x84] sm:$0xf] %v5925_v36  ;;  %v5429_v63 = vmax.f32 %v5338_v5, 0.0 }
 0x6d3   : >> { %v5719_v6 = vsel %vm11081_vm6, %v5711_v54, %v5718_v58  ;;  %v5929_v23 = vsel %vm11073_vm5, %v5720_v10, %v5928_v35  ;;  %v5722_v20 = vshrl.u32 %v9076_v41, 16  ;;  %v5725_v61 = vshll.u32 %v9076_v41, 16  ;;  %v5945_v54 = vld [vmem:[#allocation2 + $0xa8] sm:$0xf] }
 0x6d4   : >> { %5927 = vst.msk [vmem:[#allocation2 + $0x88] sm:$0xf] %vm197_vm1, %v5719_v6  ;;  %5930 = vst [vmem:[#allocation2 + $0x8c] sm:$0x1] %v5929_v23  ;;  %v9077_v16 = vpack.c.bf16 %v5429_v63, %v5429_v63  ;;  %v5949_v23 = vld [vmem:[#allocation2 + $0xb0] sm:$0x1] }
 0x6d5   : >> { %v5724_v44 = vrot.slane %v5722_v20, 7 }
 0x6d6   : >> { %v5730_v19 = vshrl.u32 %v9077_v16, 16  ;;  %v5343_v32 = vpop.f32.mrb[48].mxu1  ;;  %v5733_v8 = vshll.u32 %v9077_v16, 16 }
 0x6d7   : >> { %v5727_v37 = vor.u32 %v5725_v61, %v5724_v44  ;;  %v5430_v46 = vmax.f32 %v5343_v32, 0.0  ;;  %v5345_v30 = vpop.f32.mrb[49].mxu1  ;;  %v5728_v21 = vrot.slane %v5724_v44, 4 }
 0x6d8   : >> { %v5732_v24 = vrot.slane %v5730_v19, 7  ;;  %v5346_v12 = vpop.f32.mrb[50].mxu1 }
 0x6d9   : >> { %v5932_v2 = vsel %vm11089_vm7, %v5727_v37, %v5931_v26  ;;  %v9078_v13 = vpack.c.bf16 %v5430_v46, %v5430_v46  ;;  %v5431_v1 = vmax.f32 %v5346_v12, 0.0  ;;  %v5348_v33 = vpop.f32.mrb[51].mxu1 }
 0x6da   : >> { %5933 = vst [vmem:[#allocation2 + $0x90] sm:$0xf] %v5932_v2  ;;  %v5735_v53 = vor.u32 %v5733_v8, %v5732_v24  ;;  %v5737_v60 = vrot.slane %v5732_v24, 4  ;;  %v5952_v2 = vld [vmem:[#allocation2 + $0xb4] sm:$0xf] }
 0x6db   : >> { %v5739_v0 = vshrl.u32 %v9078_v13, 16  ;;  %v9079_v50 = vpack.c.bf16 %v5431_v1, %v5431_v1  ;;  %v5742_v15 = vshll.u32 %v9078_v13, 16 }
 0x6dc   : >> { %v5736_v29 = vsel %vm11081_vm6, %v5728_v21, %v5735_v53  ;;  %v5936_v38 = vsel %vm11073_vm5, %v5737_v60, %v5935_v9 }
 0x6dd   : >> { %5934 = vst.msk [vmem:[#allocation2 + $0x94] sm:$0xf] %vm197_vm1, %v5736_v29  ;;  %5937 = vst [vmem:[#allocation2 + $0x98] sm:$0x1] %v5936_v38  ;;  %v5741_v3 = vrot.slane %v5739_v0, 7  ;;  %v5747_v17 = vshrl.u32 %v9079_v50, 16 }
 0x6de   : >> { %v5351_v39 = vpop.f32.mrb[52].mxu1  ;;  %v5750_v25 = vshll.u32 %v9079_v50, 16  ;;  %v5956_v0 = vld [vmem:[#allocation2 + $0xbc] sm:$0x1] }
 0x6df   : >> { %v5744_v34 = vor.u32 %v5742_v15, %v5741_v3  ;;  %v5749_v56 = vrot.slane %v5747_v17, 7  ;;  %v5432_v55 = vmax.f32 %v5351_v39, 0.0  ;;  %v5353_v42 = vpop.f32.mrb[53].mxu1  ;;  %v5745_v31 = vrot.slane %v5741_v3, 4 }
 0x6e0   : >> { %v5354_v49 = vpop.f32.mrb[54].mxu1 }
 0x6e1   : >> { %v5939_v51 = vsel %vm11089_vm7, %v5744_v34, %v5938_v28  ;;  %v5752_v62 = vor.u32 %v5750_v25, %v5749_v56  ;;  %v5754_v43 = vrot.slane %v5749_v56, 4  ;;  %v9080_v7 = vpack.c.bf16 %v5432_v55, %v5432_v55  ;;  %v5356_v52 = vpop.f32.mrb[55].mxu1 }
 0x6e2   : >> { %5940 = vst [vmem:[#allocation2 + $0x9c] sm:$0xf] %v5939_v51  ;;  %v5433_v45 = vmax.f32 %v5354_v49, 0.0 }
 0x6e3   : >> { %v5753_v59 = vsel %vm11081_vm6, %v5745_v31, %v5752_v62  ;;  %v5943_v11 = vsel %vm11073_vm5, %v5754_v43, %v5942_v27  ;;  %v5756_v47 = vshrl.u32 %v9080_v7, 16  ;;  %v5759_v22 = vshll.u32 %v9080_v7, 16  ;;  %v5959_v31 = vld [vmem:[#allocation2 + $0xc0] sm:$0xf]  ;;  %v5963_v7 = vld [vmem:[#allocation2 + $0xc8] sm:$0x1] }
 0x6e4   : >> { %5941 = vst.msk [vmem:[#allocation2 + $0xa0] sm:$0xf] %vm197_vm1, %v5753_v59  ;;  %5944 = vst [vmem:[#allocation2 + $0xa4] sm:$0x1] %v5943_v11  ;;  %v9081_v4 = vpack.c.bf16 %v5433_v45, %v5433_v45 }
 0x6e5   : >> { %v5758_v18 = vrot.slane %v5756_v47, 7 }
 0x6e6   : >> { %v5764_v35 = vshrl.u32 %v9081_v4, 16  ;;  %v5359_v5 = vpop.f32.mrb[56].mxu1  ;;  %v5767_v48 = vshll.u32 %v9081_v4, 16  ;;  %v5966_v4 = vld [vmem:[%s14298_s3] sm:$0x7] (%p1982_p11) }
 0x6e7   : >> { %v5761_v36 = vor.u32 %v5759_v22, %v5758_v18  ;;  %v5434_v58 = vmax.f32 %v5359_v5, 0.0  ;;  %v5361_v10 = vpop.f32.mrb[57].mxu1  ;;  %v5762_v61 = vrot.slane %v5758_v18, 4  ;;  %v5967_v18 = vld [vmem:[%s14298_s3 + $0x4] sm:$0x7] (%p1982_p11)  ;;  %v14649_v22 = vmov (%p1982_p11), 0  }
 0x6e8   : >> { %v5766_v41 = vrot.slane %v5764_v35, 7  ;;  %v5362_v63 = vpop.f32.mrb[58].mxu1  ;;  %9589 = vset.pattern.permute.xlu1 (%p1982_p11), %v14649_v22  ;;  %9588 = vset.pattern.permute.xlu0 (%p1982_p11), %v14649_v22  ;;  %v9123_v35 = vld [vmem:[#allocation2 + $0x18] sm:$0xff] (%p1982_p11)   ;;  %v5978_v5 = vld [vmem:[#allocation2 + $0x24] sm:$0xff] (%p1982_p11)   ;;  %v12763_v57 = vrot.slane (%p1982_p11), %v5966_v4, %v14652_v14 }
 0x6e9   : >> { %v5946_v6 = vsel %vm11089_vm7, %v5761_v36, %v5945_v54  ;;  %v9082_v20 = vpack.c.bf16 %v5434_v58, %v5434_v58  ;;  %v5435_v16 = vmax.f32 %v5362_v63, 0.0  ;;  %v5364_v44 = vpop.f32.mrb[59].mxu1  ;;  %v5972_v54 = vld [vmem:[#allocation2 + $0xc] sm:$0xff] (%p1982_p11)   ;;  %v14650_v36 = vld [vmem:[#allocation9_spill] sm:$0xff] (%p1982_p11)  ;;  %v14651_v10 = vld [vmem:[#allocation8_spill] sm:$0xff] (%p1982_p11)  ;;  %v12765_v40 = vunpack.c.l.bf16 (%p1982_p11), %v9123_v35 }
 0x6ea   : >> { %5947 = vst [vmem:[#allocation2 + $0xa8] sm:$0xf] %v5946_v6  ;;  %v5769_v26 = vor.u32 %v5767_v48, %v5766_v41  ;;  %v5771_v19 = vrot.slane %v5766_v41, 4  ;;  %v12757_v58 = vrot.slane (%p1982_p11), %v5966_v4, %v14650_v36  ;;  %v12760_v41 = vrot.slane (%p1982_p11), %v5966_v4, %v14651_v10  ;;  %v5968_v44 = vld [vmem:[%s14298_s3 + $0x8] sm:$0x7] (%p1982_p11) }
 0x6eb   : >> { %v5773_v32 = vshrl.u32 %v9082_v20, 16  ;;  %v9083_v37 = vpack.c.bf16 %v5435_v16, %v5435_v16  ;;  %v5776_v8 = vshll.u32 %v9082_v20, 16  ;;  %v12767_v48 = vunpack.c.h.bf16 (%p1982_p11), %v9123_v35 }
 0x6ec   : >> { %v5770_v46 = vsel %vm11081_vm6, %v5762_v61, %v5769_v26  ;;  %v5950_v30 = vsel %vm11073_vm5, %v5771_v19, %v5949_v23  ;;  %v12769_v63 = vunpack.c.l.bf16 (%p1982_p11), %v5972_v54  ;;  %v12771_v6 = vunpack.c.h.bf16 (%p1982_p11), %v5972_v54 }
 0x6ed   : >> { %5948 = vst.msk [vmem:[#allocation2 + $0xac] sm:$0xf] %vm197_vm1, %v5770_v46  ;;  %5951 = vst [vmem:[#allocation2 + $0xb0] sm:$0x1] %v5950_v30  ;;  %v5775_v24 = vrot.slane %v5773_v32, 7  ;;  %v5781_v12 = vshrl.u32 %v9083_v37, 16  ;;  %v12773_v23 = vunpack.c.l.bf16 (%p1982_p11), %v5978_v5  ;;  %v12775_v20 = vunpack.c.h.bf16 (%p1982_p11), %v5978_v5 }
 0x6ee   : >> { %v5367_v9 = vpop.f32.mrb[60].mxu1  ;;  %v5784_v33 = vshll.u32 %v9083_v37, 16  ;;  %v12778_v16 = vrot.slane (%p1982_p11), %v5967_v18, %v14651_v10  ;;  %v6152_v61 = vmul.f32 (%p1982_p11), %v12760_v41, %v12769_v63  ;;  %v12787_v26 = vmul.f32 (%p1982_p11), %v12760_v41, %v12771_v6 }
 0x6ef   : >> { %v5778_v13 = vor.u32 %v5776_v8, %v5775_v24  ;;  %v5783_v1 = vrot.slane %v5781_v12, 7  ;;  %v5436_v21 = vmax.f32 %v5367_v9, 0.0  ;;  %v5369_v53 = vpop.f32.mrb[61].mxu1  ;;  %v5779_v60 = vrot.slane %v5775_v24, 4 }
 0x6f0   : >> { %v5370_v50 = vpop.f32.mrb[62].mxu1  ;;  %v6397_v19 = vmul.f32 (%p1982_p11), %v12763_v57, %v12769_v63  ;;  %v12792_v32 = vrot.slane (%p1982_p11), %v5967_v18, %v14650_v36  ;;  %v6083_v37 = vmul.f32 (%p1982_p11), %v12757_v58, %v12769_v63  ;;  %v12798_v46 = vmul.f32 (%p1982_p11), %v12763_v57, %v12771_v6 }
 0x6f1   : >> { %v5953_v29 = vsel %vm11089_vm7, %v5778_v13, %v5952_v2  ;;  %v5786_v38 = vor.u32 %v5784_v33, %v5783_v1  ;;  %v5788_v3 = vrot.slane %v5783_v1, 4  ;;  %v9084_v15 = vpack.c.bf16 %v5436_v21, %v5436_v21  ;;  %v5372_v17 = vpop.f32.mrb[63].mxu1 }
 0x6f2   : >> { %5954 = vst [vmem:[#allocation2 + $0xb4] sm:$0xf] %v5953_v29  ;;  %v5437_v28 = vmax.f32 %v5370_v50, 0.0  ;;  %v6710_v30 = vmul.f32 (%p1982_p11), %v12765_v40, %v12778_v16  ;;  %v12804_v24 = vmul.f32 (%p1982_p11), %v12767_v48, %v12778_v16  ;;  %v6251_v8 = vrot.slane (%p1982_p11), %v6152_v61, 1  ;;  %v9088_v29 = vld [vmem:[#allocation2] sm:$0xff] (%p1982_p11)  }
 0x6f3   : >> { %v5787_v39 = vsel %vm11081_vm6, %v5779_v60, %v5786_v38  ;;  %v5957_v34 = vsel %vm11073_vm5, %v5788_v3, %v5956_v0  ;;  %v5790_v56 = vshrl.u32 %v9084_v15, 16  ;;  %v5793_v42 = vshll.u32 %v9084_v15, 16 }
 0x6f4   : >> { %5955 = vst.msk [vmem:[#allocation2 + $0xb8] sm:$0xf] %vm197_vm1, %v5787_v39  ;;  %5958 = vst [vmem:[#allocation2 + $0xbc] sm:$0x1] %v5957_v34  ;;  %v9085_v25 = vpack.c.bf16 %v5437_v28, %v5437_v28  ;;  %v6252_v12 = vrot.slane (%p1982_p11), %v12787_v26, 1  ;;  %v6496_v2 = vrot.slane (%p1982_p11), %v6397_v19, 2  ;;  %v12808_v9 = vrot.slane (%p1982_p11), %v5967_v18, %v14652_v14 }
 0x6f5   : >> { %v5792_v55 = vrot.slane %v5790_v56, 7  ;;  %v6497_v13 = vrot.slane (%p1982_p11), %v12798_v46, 2  ;;  %v6808_v1 = vrot.slane (%p1982_p11), %v6710_v30, 1  ;;  %v6809_v33 = vrot.slane (%p1982_p11), %v12804_v24, 1 }
 0x6f6   : >> { %v5798_v27 = vshrl.u32 %v9085_v25, 16  ;;  %v5801_v62 = vshll.u32 %v9085_v25, 16  ;;  %v12813_v21 = vrot.slane (%p1982_p11), %v5968_v44, %v14650_v36  ;;  %v6253_v53 = vsel (%p1982_p11), %vm2393_vm9, %v6251_v8, %v6252_v12 }
 0x6f7   : >> { %v5795_v49 = vor.u32 %v5793_v42, %v5792_v55  ;;  %v5796_v52 = vrot.slane %v5792_v55, 4  ;;  %1984 = sbr.rel (!%p1982_p11) target bundleno = 449 (0x1c1), region = 86  ;;  %v6954_v60 = vmul.f32 (%p1982_p11), %v12765_v40, %v12808_v9  ;;  %v12822_v0 = vmul.f32 (%p1982_p11), %v12767_v48, %v12808_v9 }
 0x6f8   : >> { %v5800_v51 = vrot.slane %v5798_v27, 7  ;;  %v12825_v50 = vrot.slane (%p1982_p11), %v5968_v44, %v14651_v10  ;;  %v6360_v38 = vadd.f32 (%p1982_p11), %v6253_v53, %v6083_v37  ;;  %v6498_v3 = vsel (%p1982_p11), %vm6490_vm11, %v6496_v2, %v6497_v13 }
 0x6f9   : >> { %v5960_v43 = vsel %vm11089_vm7, %v5795_v49, %v5959_v31  ;;  %v6641_v15 = vmul.f32 (%p1982_p11), %v12765_v40, %v12792_v32  ;;  %v6810_v17 = vsel (%p1982_p11), %vm2393_vm9, %v6808_v1, %v6809_v33  ;;  %v7052_v28 = vrot.slane (%p1982_p11), %v6954_v60, 2 }
 0x6fa   : >> { %5961 = vst [vmem:[#allocation2 + $0xc0] sm:$0xf] %v5960_v43  ;;  %v5803_v45 = vor.u32 %v5801_v62, %v5800_v51  ;;  %v5805_v59 = vrot.slane %v5800_v51, 4  ;;  %v7053_v39 = vrot.slane (%p1982_p11), %v12822_v0, 2  ;;  %v7266_v34 = vmul.f32 (%p1982_p11), %v12825_v50, %v12773_v23 }
 0x6fb   : > { %v12840_v56 = vmul.f32 (%p1982_p11), %v12825_v50, %v12775_v20  ;;  %v6605_v25 = vadd.f32 (%p1982_p11), %v6498_v3, %v6360_v38  ;;  %v12843_v55 = vrot.slane (%p1982_p11), %v5968_v44, %v14652_v14  ;;  %v9089_v42 = vunpack.c.l.bf16 (%p1982_p11), %v9088_v29 }
 0x6fc   : >> { %v5804_v11 = vsel %vm11081_vm6, %v5796_v52, %v5803_v45  ;;  %v5964_v47 = vsel %vm11073_vm5, %v5805_v59, %v5963_v7  ;;  %v12845_v31 = vunpack.c.h.bf16 (%p1982_p11), %v9088_v29  ;;  %v7054_v27 = vsel (%p1982_p11), %vm6490_vm11, %v7052_v28, %v7053_v39  ;;  %v5974_v28 = vld [vmem:[#allocation2 + $0x14] sm:$0x1] (%p1982_p11) }
 0x6fd   : >> { %5962 = vst.msk [vmem:[#allocation2 + $0xc4] sm:$0xf] %vm197_vm1, %v5804_v11  ;;  %5965 = vst [vmem:[#allocation2 + $0xc8] sm:$0x1] %v5964_v47  ;;  %v7197_v49 = vmul.f32 (%p1982_p11), %v12813_v21, %v12773_v23  ;;  %v7364_v51 = vrot.slane (%p1982_p11), %v7266_v34, 1  ;;  %v7365_v62 = vrot.slane (%p1982_p11), %v12840_v56, 1  ;;  %v6673_v43 = vadd.f32 (%p1982_p11), %v6641_v15, %v6605_v25 }
 0x6fe   : > { %v7510_v7 = vmul.f32 %v12843_v55, %v12773_v23  ;;  %v12857_v52 = vmul.f32 %v12843_v55, %v12775_v20  ;;  %v6639_v45 = vmul.f32 %v12792_v32, %v12769_v63  ;;  %v6081_v59 = vmul.f32 %v9089_v42, %v12757_v58 }
 0x6ff   : > { %v6149_v11 = vmul.f32 %v9089_v42, %v12760_v41  ;;  %v12865_v47 = vmul.f32 %v12845_v31, %v12760_v41  ;;  %v6394_v4 = vmul.f32 %v9089_v42, %v12763_v57  ;;  %v6917_v18 = vadd.f32 %v6810_v17, %v6673_v43 }
 0x700   : > { %v7608_v22 = vrot.slane %v7510_v7, 2  ;;  %v7609_v54 = vrot.slane %v12857_v52, 2  ;;  %v12871_v35 = vmul.f32 %v12845_v31, %v12763_v57  ;;  %v6707_v14 = vmul.f32 %v12778_v16, %v12769_v63 }
 0x701   : > { %v6246_v5 = vrot.slane %v6149_v11, 1  ;;  %v6247_v36 = vrot.slane %v12865_v47, 1  ;;  %v6491_v10 = vrot.slane %v6394_v4, 2  ;;  %v7161_v44 = vadd.f32 %v7054_v27, %v6917_v18  ;;  %v5980_v11 = vld [vmem:[#allocation2 + $0x2c] sm:$0x1] }
 0x702   : > { %v7366_v61 = vsel %vm2393_vm9, %v7364_v51, %v7365_v62  ;;  %v6492_v19 = vrot.slane %v12871_v35, 2  ;;  %v12882_v37 = vmul.f32 %v12778_v16, %v12771_v6  ;;  %v6803_v8 = vrot.slane %v6707_v14, 1 }
 0x703   : > { %v6248_v30 = vsel %vm2393_vm9, %v6246_v5, %v6247_v36  ;;  %v6951_v2 = vmul.f32 %v12808_v9, %v12769_v63  ;;  %v12891_v1 = vmul.f32 %v12808_v9, %v12771_v6  ;;  %v7229_v53 = vadd.f32 %v7197_v49, %v7161_v44  ;;  %v5977_v49 = vld [vmem:[#allocation2 + $0x20] sm:$0x1] }
 0x704   : > { %v6358_v60 = vadd.f32 %v6248_v30, %v6081_v59  ;;  %v6493_v29 = vsel %vm6490_vm11, %v6491_v10, %v6492_v19  ;;  %v6804_v38 = vrot.slane %v12882_v37, 1  ;;  %v7610_v3 = vsel %vm6490_vm11, %v7608_v22, %v7609_v54 }
 0x705   : > { %v7047_v15 = vrot.slane %v6951_v2, 2  ;;  %v7048_v17 = vrot.slane %v12891_v1, 2  ;;  %v7263_v63 = vmul.f32 %v12765_v40, %v12825_v50  ;;  %v7473_v34 = vadd.f32 %v7366_v61, %v7229_v53 }
 0x706   : > { %v6603_v25 = vadd.f32 %v6493_v29, %v6358_v60  ;;  %v7195_v42 = vmul.f32 %v12765_v40, %v12813_v21  ;;  %v12907_v27 = vmul.f32 %v12767_v48, %v12825_v50  ;;  %v6805_v51 = vsel %vm2393_vm9, %v6803_v8, %v6804_v38 }
 0x707   : > { %v7359_v43 = vrot.slane %v7263_v63, 1  ;;  %v7507_v7 = vmul.f32 %v12765_v40, %v12843_v55  ;;  %v12916_v59 = vmul.f32 %v12767_v48, %v12843_v55  ;;  %v7717_v4 = vadd.f32 %v7610_v3, %v7473_v34 }
 0x708   : > { %v6671_v18 = vadd.f32 %v6639_v45, %v6603_v25  ;;  %v14365_v22 = vrot.slane %v12907_v27, 1  ;;  %v6028_v5 = vunpack.c.l.bf16 %v5974_v28  ;;  %v7049_v10 = vsel %vm6490_vm11, %v7047_v15, %v7048_v17  ;;  %v5971_v15 = vld [vmem:[#allocation2 + $0x8] sm:$0x1] }
 0x709   : > { %v7603_v14 = vrot.slane %v7507_v7, 2  ;;  %v14364_v44 = vrot.slane %v12916_v59, 2  ;;  %v12923_v61 = vunpack.c.l.bf16 %v5977_v49  ;;  %v7754_v30 = vsel %vm2442_vm10, %v7717_v4, 0.0 }
 0x70a   : > { %v6915_v8 = vadd.f32 %v6805_v51, %v6671_v18  ;;  %v7361_v2 = vsel %vm2393_vm9, %v7359_v43, %v14365_v22  ;;  %v12929_v45 = vunpack.c.l.bf16 %v5980_v11  ;;  %7755 = vadd.xlane.f32.xlu1 %v7754_v30  ;;  %v6084_v60 = vmul.f32 %v12757_v58, %v12771_v6 }
 0x70b   : > { %v7605_v53 = vsel %vm6490_vm11, %v7603_v14, %v14364_v44  ;;  %v6154_v29 = vmul.f32 %v12760_v41, %v6028_v5  ;;  %v6399_v3 = vmul.f32 %v12763_v57, %v6028_v5  ;;  %v6642_v28 = vmul.f32 %v12767_v48, %v12792_v32 }
 0x70c   : > { %v7159_v63 = vadd.f32 %v7049_v10, %v6915_v8  ;;  %v6712_v34 = vmul.f32 %v12778_v16, %v12923_v61  ;;  %v6956_v25 = vmul.f32 %v12808_v9, %v12923_v61  ;;  %v7268_v43 = vmul.f32 %v12825_v50, %v12929_v45 }
 0x70d   : > { %v6254_v49 = vrot.slane %v6154_v29, 1  ;;  %v6499_v51 = vrot.slane %v6399_v3, 2  ;;  %v7512_v7 = vmul.f32 %v12843_v55, %v12929_v45  ;;  %v6025_v10 = vunpack.c.l.bf16 %v5971_v15 }
 0x70e   : > { %v7227_v11 = vadd.f32 %v7195_v42, %v7159_v63  ;;  %v6811_v4 = vrot.slane %v6712_v34, 1  ;;  %v7055_v18 = vrot.slane %v6956_v25, 2  ;;  %v7367_v8 = vrot.slane %v7268_v43, 1  ;;  %v9124_v34 = vld [vmem:[#allocation2 + $0x30] sm:$0xff]  }
 0x70f   : > { %v6255_v14 = vsel %vm2393_vm9, %v6252_v12, %v6254_v49  ;;  %v6500_v30 = vsel %vm6490_vm11, %v6497_v13, %v6499_v51  ;;  %v7611_v29 = vrot.slane %v7512_v7, 2  ;;  %v7198_v42 = vmul.f32 %v12813_v21, %v12775_v20  ;;  %v5983_v51 = vld [vmem:[#allocation2 + $0x38] sm:$0x1] }
 0x710   : > { %v7471_v3 = vadd.f32 %v7361_v2, %v7227_v11  ;;  %v6361_v44 = vadd.f32 %v6255_v14, %v6084_v60  ;;  %v6812_v22 = vsel %vm2393_vm9, %v6809_v33, %v6811_v4  ;;  %v7056_v26 = vsel %vm6490_vm11, %v7053_v39, %v7055_v18 }
 0x711   : > { %v7368_v46 = vsel %vm2393_vm9, %v7365_v62, %v7367_v8  ;;  %v7612_v12 = vsel %vm6490_vm11, %v7609_v54, %v7611_v29  ;;  %v6151_v13 = vmul.f32 %v12760_v41, %v6025_v10  ;;  %v6082_v33 = vmul.f32 %v12845_v31, %v12757_v58 }
 0x712   : > { %v7715_v24 = vadd.f32 %v7605_v53, %v7471_v3  ;;  %v6606_v2 = vadd.f32 %v6500_v30, %v6361_v44  ;;  %v6396_v60 = vmul.f32 %v12763_v57, %v6025_v10  ;;  %v6640_v39 = vmul.f32 %v12792_v32, %v12771_v6 }
 0x713   : > { %v6249_v0 = vrot.slane %v6151_v13, 1  ;;  %v6709_v56 = vmul.f32 %v12778_v16, %v6028_v5  ;;  %v6953_v62 = vmul.f32 %v12808_v9, %v6028_v5  ;;  %v7265_v44 = vmul.f32 %v12825_v50, %v12923_v61 }
 0x714   : > { %v7748_v52 = vsel %vm2442_vm10, %v7715_v24, 0.0  ;;  %v6674_v54 = vadd.f32 %v6642_v28, %v6606_v2  ;;  %v6494_v15 = vrot.slane %v6396_v60, 2  ;;  %v7509_v6 = vmul.f32 %v12843_v55, %v12923_v61 }
 0x715   : > { %7749 = vadd.xlane.f32.xlu0 %v7748_v52  ;;  %v6250_v31 = vsel %vm2393_vm9, %v6247_v36, %v6249_v0  ;;  %v6806_v53 = vrot.slane %v6709_v56, 1  ;;  %v7050_v63 = vrot.slane %v6953_v62, 2  ;;  %v7362_v49 = vrot.slane %v7265_v44, 1 }
 0x716   : > { %v6918_v25 = vadd.f32 %v6812_v22, %v6674_v54  ;;  %v6359_v5 = vadd.f32 %v6250_v31, %v6082_v33  ;;  %v6495_v28 = vsel %vm6490_vm11, %v6492_v19, %v6494_v15  ;;  %v7196_v43 = vmul.f32 %v12767_v48, %v12813_v21 }
 0x717   : > { %v6807_v47 = vsel %vm2393_vm9, %v6804_v38, %v6806_v53  ;;  %v7051_v36 = vsel %vm6490_vm11, %v7048_v17, %v7050_v63  ;;  %v7606_v7 = vrot.slane %v7509_v6, 2  ;;  %v14653_v35 = vrot.slane %v12907_v27, 1 }
 0x718   : > { %v7162_v22 = vadd.f32 %v7056_v26, %v6918_v25  ;;  %v6604_v11 = vadd.f32 %v6495_v28, %v6359_v5  ;;  %v12998_v4 = vunpack.c.h.bf16 %v9124_v34  ;;  %v13000_v18 = vunpack.c.l.bf16 %v5983_v51 }
 0x719   : > { %v7363_v19 = vsel %vm2393_vm9, %v14653_v35, %v7362_v49  ;;  %v6086_v37 = vmul.f32 %v12767_v48, %v12757_v58  ;;  %v13006_v1 = vmul.f32 %v12767_v48, %v12760_v41  ;;  %v6157_v38 = vmul.f32 %v12760_v41, %v12923_v61 }
 0x71a   : > { %v7230_v17 = vadd.f32 %v7198_v42, %v7162_v22  ;;  %v6672_v10 = vadd.f32 %v6640_v39, %v6604_v11  ;;  %v13012_v27 = vmul.f32 %v12767_v48, %v12763_v57  ;;  %v6402_v14 = vmul.f32 %v12763_v57, %v12923_v61 }
 0x71b   : > { %v6257_v30 = vrot.slane %v13006_v1, 1  ;;  %v6259_v8 = vrot.slane %v6157_v38, 1  ;;  %v6644_v29 = vmul.f32 %v12792_v32, %v12775_v20  ;;  %v13021_v3 = vmul.f32 %v12778_v16, %v12775_v20 }
 0x71c   : > { %v7474_v26 = vadd.f32 %v7368_v46, %v7230_v17  ;;  %v6916_v42 = vadd.f32 %v6807_v47, %v6672_v10  ;;  %v6502_v13 = vrot.slane %v13012_v27, 2  ;;  %v6504_v24 = vrot.slane %v6402_v14, 2 }
 0x71d   : > { %v6260_v48 = vsel %vm2393_vm9, %v6257_v30, %v6259_v8  ;;  %v6715_v61 = vmul.f32 %v12778_v16, %v12929_v45  ;;  %v6814_v2 = vrot.slane %v13021_v3, 1  ;;  %v6958_v33 = vmul.f32 %v12808_v9, %v12775_v20 }
 0x71e   : > { %v7718_v60 = vadd.f32 %v7612_v12, %v7474_v26  ;;  %v7160_v0 = vadd.f32 %v7051_v36, %v6916_v42  ;;  %v6363_v39 = vadd.f32 %v6260_v48, %v6086_v37  ;;  %v6505_v56 = vsel %vm6490_vm11, %v6502_v13, %v6504_v24  ;;  %v13066_v42 = vld [vmem:[#allocation2 + $0x3c] sm:$0xff]  }
 0x71f   : > { %v14654_v46 = vrot.slane %v12916_v59, 2  ;;  %v6816_v52 = vrot.slane %v6715_v61, 1  ;;  %v6959_v54 = vmul.f32 %v12808_v9, %v12929_v45  ;;  %v7058_v15 = vrot.slane %v6958_v33, 2  ;;  %v5986_v33 = vld [vmem:[#allocation2 + $0x44] sm:$0x1] }
 0x720   : > { %v7757_v44 = vsel %vm2442_vm10, %v7718_v60, 0.0  ;;  %v7228_v31 = vadd.f32 %v7196_v43, %v7160_v0  ;;  %v6608_v53 = vadd.f32 %v6505_v56, %v6363_v39  ;;  %v7270_v12 = vmul.f32 %v12998_v4, %v12825_v50 }
 0x721   : > { %v7607_v62 = vsel %vm6490_vm11, %v14654_v46, %v7606_v7  ;;  %7758 = vadd.xlane.f32.xlu1 %v7757_v44  ;;  %v6817_v63 = vsel %vm2393_vm9, %v6814_v2, %v6816_v52  ;;  %v7060_v6 = vrot.slane %v6959_v54, 2  ;;  %v7271_v59 = vmul.f32 %v12825_v50, %v13000_v18 }
 0x722   : > { %v7514_v25 = vmul.f32 %v12998_v4, %v12843_v55  ;;  %v7472_v5 = vadd.f32 %v7363_v19, %v7228_v31  ;;  %v6676_v28 = vadd.f32 %v6644_v29, %v6608_v53  ;;  %v7370_v49 = vrot.slane %v7270_v12, 1 }
 0x723   : > { %v7515_v51 = vmul.f32 %v12843_v55, %v13000_v18  ;;  %v7061_v47 = vsel %vm6490_vm11, %v7058_v15, %v7060_v6  ;;  %v7200_v36 = vmul.f32 %v12998_v4, %v12813_v21  ;;  %v7372_v43 = vrot.slane %v7271_v59, 1 }
 0x724   : > { %v7614_v7 = vrot.slane %v7514_v25, 2  ;;  %v7716_v22 = vadd.f32 %v7607_v62, %v7472_v5  ;;  %v6920_v11 = vadd.f32 %v6817_v63, %v6676_v28  ;;  %v13049_v37 = vunpack.c.l.bf16 %v9124_v34 }
 0x725   : > { %v7616_v35 = vrot.slane %v7515_v51, 2  ;;  %v7373_v1 = vsel %vm2393_vm9, %v7370_v49, %v7372_v43  ;;  %v6085_v19 = vmul.f32 %v12765_v40, %v12757_v58  ;;  %v6155_v38 = vmul.f32 %v12765_v40, %v12760_v41 }
 0x726   : > { %v6400_v17 = vmul.f32 %v12765_v40, %v12763_v57  ;;  %v7751_v10 = vsel %vm2442_vm10, %v7716_v22, 0.0  ;;  %v7164_v27 = vadd.f32 %v7061_v47, %v6920_v11  ;;  %v6643_v14 = vmul.f32 %v12792_v32, %v12773_v23 }
 0x727   : > { %v6713_v34 = vmul.f32 %v12778_v16, %v12773_v23  ;;  %7752 = vadd.xlane.f32.xlu0 %v7751_v10  ;;  %v7617_v8 = vsel %vm6490_vm11, %v7614_v7, %v7616_v35  ;;  %v6256_v29 = vrot.slane %v6155_v38, 1  ;;  %v6957_v26 = vmul.f32 %v12808_v9, %v12773_v23 }
 0x728   : > { %v6501_v3 = vrot.slane %v6400_v17, 2  ;;  %v7232_v40 = vadd.f32 %v7200_v36, %v7164_v27  ;;  %v7269_v48 = vmul.f32 %v13049_v37, %v12825_v50  ;;  %v7513_v61 = vmul.f32 %v13049_v37, %v12843_v55 }
 0x729   : > { %v6813_v24 = vrot.slane %v6713_v34, 1  ;;  %v6258_v60 = vsel %vm2393_vm9, %v6256_v29, %v6257_v30  ;;  %v7057_v39 = vrot.slane %v6957_v26, 2  ;;  %v7199_v56 = vmul.f32 %v13049_v37, %v12813_v21 }
 0x72a   : > { %v6503_v0 = vsel %vm6490_vm11, %v6501_v3, %v6502_v13  ;;  %v7476_v46 = vadd.f32 %v7373_v1, %v7232_v40  ;;  %v6362_v62 = vadd.f32 %v6258_v60, %v6085_v19  ;;  %v7369_v52 = vrot.slane %v7269_v48, 1 }
 0x72b   : > { %v13077_v54 = vunpack.c.h.bf16 %v13066_v42  ;;  %v6815_v44 = vsel %vm2393_vm9, %v6813_v24, %v6814_v2  ;;  %v7059_v31 = vsel %vm6490_vm11, %v7057_v39, %v7058_v15  ;;  %v7613_v53 = vrot.slane %v7513_v61, 2 }
 0x72c   : > { %v13081_v12 = vunpack.c.l.bf16 %v5986_v33  ;;  %v7720_v30 = vadd.f32 %v7617_v8, %v7476_v46  ;;  %v6607_v63 = vadd.f32 %v6503_v0, %v6362_v62  ;;  %v6088_v13 = vmul.f32 %v12757_v58, %v12775_v20 }
 0x72d   : > { %v6159_v6 = vmul.f32 %v12760_v41, %v12775_v20  ;;  %v7371_v59 = vsel %vm2393_vm9, %v7369_v52, %v7370_v49  ;;  %v6160_v25 = vmul.f32 %v12760_v41, %v12929_v45  ;;  %v6404_v2 = vmul.f32 %v12763_v57, %v12775_v20 }
 0x72e   : > { %v6405_v15 = vmul.f32 %v12763_v57, %v12929_v45  ;;  %v7763_v5 = vsel %vm2442_vm10, %v7720_v30, 0.0  ;;  %v6675_v28 = vadd.f32 %v6643_v14, %v6607_v63  ;;  %v7615_v51 = vsel %vm6490_vm11, %v7613_v53, %v7614_v7 }
 0x72f   : > { %v6262_v47 = vrot.slane %v6159_v6, 1  ;;  %7764 = vadd.xlane.f32.xlu1 %v7763_v5  ;;  %v6264_v36 = vrot.slane %v6160_v25, 1  ;;  %v6507_v43 = vrot.slane %v6404_v2, 2  ;;  %v6717_v49 = vmul.f32 %v12998_v4, %v12778_v16 }
 0x730   : > { %v6509_v22 = vrot.slane %v6405_v15, 2  ;;  %v6919_v11 = vadd.f32 %v6815_v44, %v6675_v28  ;;  %v6718_v20 = vmul.f32 %v12778_v16, %v13000_v18  ;;  %v6961_v45 = vmul.f32 %v12998_v4, %v12808_v9 }
 0x731   : > { %v6962_v35 = vmul.f32 %v12808_v9, %v13000_v18  ;;  %v6265_v7 = vsel %vm2393_vm9, %v6262_v47, %v6264_v36  ;;  %v6646_v19 = vmul.f32 %v12998_v4, %v12792_v32  ;;  %v6819_v38 = vrot.slane %v6717_v49, 1  ;;  %v9125_v36 = vld [vmem:[#allocation2 + $0x48] sm:$0xff]  }
 0x732   : > { %v6510_v1 = vsel %vm6490_vm11, %v6507_v43, %v6509_v22  ;;  %v7163_v17 = vadd.f32 %v7059_v31, %v6919_v11  ;;  %v6365_v10 = vadd.f32 %v6265_v7, %v6088_v13  ;;  %v6821_v27 = vrot.slane %v6718_v20, 1  ;;  %v5989_v20 = vld [vmem:[#allocation2 + $0x50] sm:$0x1] }
 0x733   : > { %v7063_v14 = vrot.slane %v6961_v45, 2  ;;  %v7065_v34 = vrot.slane %v6962_v35, 2  ;;  %v7273_v8 = vmul.f32 %v12825_v50, %v13077_v54  ;;  %v7274_v29 = vmul.f32 %v12825_v50, %v13081_v12 }
 0x734   : > { %v13114_v3 = vmul.f32 %v12843_v55, %v13077_v54  ;;  %v7231_v26 = vadd.f32 %v7199_v56, %v7163_v17  ;;  %v6610_v40 = vadd.f32 %v6510_v1, %v6365_v10  ;;  %v7202_v24 = vmul.f32 %v12813_v21, %v13077_v54 }
 0x735   : > { %v7518_v48 = vmul.f32 %v12843_v55, %v13081_v12  ;;  %v6822_v61 = vsel %vm2393_vm9, %v6819_v38, %v6821_v27  ;;  %v7375_v33 = vrot.slane %v7273_v8, 1  ;;  %v7377_v60 = vrot.slane %v7274_v29, 1 }
 0x736   : > { %v7619_v0 = vrot.slane %v13114_v3, 2  ;;  %v7475_v39 = vadd.f32 %v7371_v59, %v7231_v26  ;;  %v6678_v46 = vadd.f32 %v6646_v19, %v6610_v40  ;;  %v7066_v62 = vsel %vm6490_vm11, %v7063_v14, %v7065_v34 }
 0x737   : > { %v7621_v52 = vrot.slane %v7518_v48, 2  ;;  %v7378_v56 = vsel %vm2393_vm9, %v7375_v33, %v7377_v60  ;;  %v13125_v44 = vunpack.c.l.bf16 %v13066_v42  ;;  %v6158_v31 = vmul.f32 %v12760_v41, %v12773_v23 }
 0x738   : > { %v6403_v53 = vmul.f32 %v12763_v57, %v12773_v23  ;;  %v7719_v30 = vadd.f32 %v7615_v51, %v7475_v39  ;;  %v6922_v63 = vadd.f32 %v6822_v61, %v6678_v46  ;;  %v6087_v6 = vmul.f32 %v12757_v58, %v12773_v23 }
 0x739   : > { %v7622_v13 = vsel %vm6490_vm11, %v7619_v0, %v7621_v52  ;;  %v6261_v59 = vrot.slane %v6158_v31, 1  ;;  %v6716_v42 = vmul.f32 %v13049_v37, %v12778_v16  ;;  %v6960_v2 = vmul.f32 %v13049_v37, %v12808_v9 }
 0x73a   : > { %v6506_v25 = vrot.slane %v6403_v53, 2  ;;  %v7760_v15 = vsel %vm2442_vm10, %v7719_v30, 0.0  ;;  %v7166_v5 = vadd.f32 %v7066_v62, %v6922_v63  ;;  %v6645_v28 = vmul.f32 %v13049_v37, %v12792_v32 }
 0x73b   : > { %v7272_v51 = vmul.f32 %v12825_v50, %v13125_v44  ;;  %7761 = vadd.xlane.f32.xlu0 %v7760_v15  ;;  %v6263_v23 = vsel %vm2393_vm9, %v6261_v59, %v6262_v47  ;;  %v6818_v49 = vrot.slane %v6716_v42, 1  ;;  %v7062_v11 = vrot.slane %v6960_v2, 2 }
 0x73c   : > { %v6508_v22 = vsel %vm6490_vm11, %v6506_v25, %v6507_v43  ;;  %v7234_v45 = vadd.f32 %v7202_v24, %v7166_v5  ;;  %v6364_v35 = vadd.f32 %v6263_v23, %v6087_v6  ;;  %v7516_v1 = vmul.f32 %v12843_v55, %v13125_v44 }
 0x73d   : > { %v7374_v7 = vrot.slane %v7272_v51, 1  ;;  %v6820_v19 = vsel %vm2393_vm9, %v6818_v49, %v6819_v38  ;;  %v7064_v17 = vsel %vm6490_vm11, %v7062_v11, %v7063_v14  ;;  %v7201_v10 = vmul.f32 %v12813_v21, %v13125_v44 }
 0x73e   : > { %v13153_v27 = vunpack.c.h.bf16 %v9125_v36  ;;  %v7478_v47 = vadd.f32 %v7378_v56, %v7234_v45  ;;  %v6609_v43 = vadd.f32 %v6508_v22, %v6364_v35  ;;  %v13156_v8 = vunpack.c.l.bf16 %v5989_v20 }
 0x73f   : > { %v7376_v34 = vsel %vm2393_vm9, %v7374_v7, %v7375_v33  ;;  %v7618_v29 = vrot.slane %v7516_v1, 2  ;;  %v13160_v26 = vmul.f32 %v12998_v4, %v12760_v41  ;;  %v6163_v38 = vmul.f32 %v12760_v41, %v13000_v18 }
 0x740   : > { %v13166_v14 = vmul.f32 %v12998_v4, %v12763_v57  ;;  %v7722_v40 = vadd.f32 %v7622_v13, %v7478_v47  ;;  %v6677_v24 = vadd.f32 %v6645_v28, %v6609_v43  ;;  %v6090_v48 = vmul.f32 %v12998_v4, %v12757_v58 }
 0x741   : > { %v6408_v61 = vmul.f32 %v12763_v57, %v13000_v18  ;;  %v6267_v33 = vrot.slane %v13160_v26, 1  ;;  %v6269_v60 = vrot.slane %v6163_v38, 1  ;;  %v6648_v46 = vmul.f32 %v12792_v32, %v13077_v54 }
 0x742   : > { %v6512_v39 = vrot.slane %v13166_v14, 2  ;;  %v7769_v62 = vsel %vm2442_vm10, %v7722_v40, 0.0  ;;  %v6921_v52 = vadd.f32 %v6820_v19, %v6677_v24  ;;  %v6720_v31 = vmul.f32 %v12778_v16, %v13077_v54 }
 0x743   : > { %v6514_v56 = vrot.slane %v6408_v61, 2  ;;  %7770 = vadd.xlane.f32.xlu1 %v7769_v62  ;;  %v6270_v4 = vsel %vm2393_vm9, %v6267_v33, %v6269_v60  ;;  %v6721_v18 = vmul.f32 %v12778_v16, %v13081_v12  ;;  %v6964_v53 = vmul.f32 %v12808_v9, %v13077_v54 }
 0x744   : > { %v6965_v30 = vmul.f32 %v12808_v9, %v13081_v12  ;;  %v7165_v63 = vadd.f32 %v7064_v17, %v6921_v52  ;;  %v6367_v13 = vadd.f32 %v6270_v4, %v6090_v48  ;;  %v6824_v59 = vrot.slane %v6720_v31, 1  ;;  %v5991_v4 = vld [vmem:[#allocation2 + $0x54] sm:$0xff]  }
 0x745   : > { %v6515_v6 = vsel %vm6490_vm11, %v6512_v39, %v6514_v56  ;;  %v7620_v25 = vsel %vm6490_vm11, %v7618_v29, %v7619_v0  ;;  %v6826_v42 = vrot.slane %v6721_v18, 1  ;;  %v7068_v2 = vrot.slane %v6964_v53, 2  ;;  %v5992_v18 = vld [vmem:[#allocation2 + $0x5c] sm:$0x1] }
 0x746   : > { %v7070_v15 = vrot.slane %v6965_v30, 2  ;;  %v7233_v5 = vadd.f32 %v7201_v10, %v7165_v63  ;;  %v6612_v28 = vadd.f32 %v6515_v6, %v6367_v13  ;;  %v7276_v51 = vmul.f32 %v13153_v27, %v12825_v50 }
 0x747   : > { %v7277_v23 = vmul.f32 %v12825_v50, %v13156_v8  ;;  %v6827_v22 = vsel %vm2393_vm9, %v6824_v59, %v6826_v42  ;;  %v7204_v49 = vmul.f32 %v13153_v27, %v12813_v21  ;;  %v13199_v3 = vmul.f32 %v13153_v27, %v12843_v55 }
 0x748   : > { %v7521_v0 = vmul.f32 %v12843_v55, %v13156_v8  ;;  %v7477_v11 = vadd.f32 %v7376_v34, %v7233_v5  ;;  %v6680_v20 = vadd.f32 %v6648_v46, %v6612_v28  ;;  %v7380_v45 = vrot.slane %v7276_v51, 1 }
 0x749   : > { %v7382_v35 = vrot.slane %v7277_v23, 1  ;;  %v7071_v7 = vsel %vm6490_vm11, %v7068_v2, %v7070_v15  ;;  %v7624_v1 = vrot.slane %v13199_v3, 2  ;;  %v13205_v17 = vunpack.c.l.bf16 %v9125_v36 }
 0x74a   : > { %v7626_v19 = vrot.slane %v7521_v0, 2  ;;  %v7721_v10 = vadd.f32 %v7620_v25, %v7477_v11  ;;  %v6924_v47 = vadd.f32 %v6827_v22, %v6680_v20  ;;  %v6089_v43 = vmul.f32 %v13049_v37, %v12757_v58 }
 0x74b   : > { %v6161_v29 = vmul.f32 %v13049_v37, %v12760_v41  ;;  %v7383_v34 = vsel %vm2393_vm9, %v7380_v45, %v7382_v35  ;;  %v6406_v38 = vmul.f32 %v13049_v37, %v12763_v57  ;;  %v6719_v36 = vmul.f32 %v12778_v16, %v13125_v44 }
 0x74c   : > { %v7627_v26 = vsel %vm6490_vm11, %v7624_v1, %v7626_v19  ;;  %v7766_v14 = vsel %vm2442_vm10, %v7721_v10, 0.0  ;;  %v7168_v40 = vadd.f32 %v7071_v7, %v6924_v47  ;;  %v6963_v48 = vmul.f32 %v12808_v9, %v13125_v44 }
 0x74d   : > { %v6266_v24 = vrot.slane %v6161_v29, 1  ;;  %7767 = vadd.xlane.f32.xlu0 %v7766_v14  ;;  %v6511_v61 = vrot.slane %v6406_v38, 2  ;;  %v6647_v60 = vmul.f32 %v12792_v32, %v13125_v44  ;;  %v6823_v46 = vrot.slane %v6719_v36, 1 }
 0x74e   : > { %v7275_v62 = vmul.f32 %v13205_v17, %v12825_v50  ;;  %v7236_v37 = vadd.f32 %v7204_v49, %v7168_v40  ;;  %v7067_v56 = vrot.slane %v6963_v48, 2  ;;  %v7519_v31 = vmul.f32 %v13205_v17, %v12843_v55 }
 0x74f   : > { %v6268_v52 = vsel %vm2393_vm9, %v6266_v24, %v6267_v33  ;;  %v6513_v30 = vsel %vm6490_vm11, %v6511_v61, %v6512_v39  ;;  %v7203_v63 = vmul.f32 %v13205_v17, %v12813_v21  ;;  %v6825_v25 = vsel %vm2393_vm9, %v6823_v46, %v6824_v59 }
 0x750   : > { %v6366_v53 = vadd.f32 %v6268_v52, %v6089_v43  ;;  %v7379_v13 = vrot.slane %v7275_v62, 1  ;;  %v7480_v6 = vadd.f32 %v7383_v34, %v7236_v37  ;;  %v7069_v42 = vsel %vm6490_vm11, %v7067_v56, %v7068_v2 }
 0x751   : > { %v7623_v15 = vrot.slane %v7519_v31, 2  ;;  %v13235_v28 = vunpack.c.h.bf16 %v5991_v4  ;;  %v13237_v51 = vunpack.c.l.bf16 %v5992_v18  ;;  %v6092_v39 = vmul.f32 %v12757_v58, %v13077_v54 }
 0x752   : > { %v6611_v33 = vadd.f32 %v6513_v30, %v6366_v53  ;;  %v7381_v5 = vsel %vm2393_vm9, %v7379_v13, %v7380_v45  ;;  %v7724_v23 = vadd.f32 %v7627_v26, %v7480_v6  ;;  %v6165_v22 = vmul.f32 %v12760_v41, %v13077_v54 }
 0x753   : > { %v6166_v59 = vmul.f32 %v12760_v41, %v13081_v12  ;;  %v6410_v2 = vmul.f32 %v12763_v57, %v13077_v54  ;;  %v6411_v0 = vmul.f32 %v12763_v57, %v13081_v12  ;;  %v6650_v11 = vmul.f32 %v13153_v27, %v12792_v32 }
 0x754   : > { %v6679_v49 = vadd.f32 %v6647_v60, %v6611_v33  ;;  %v7775_v20 = vsel %vm2442_vm10, %v7724_v23, 0.0  ;;  %v6272_v45 = vrot.slane %v6165_v22, 1  ;;  %v6723_v7 = vmul.f32 %v13153_v27, %v12778_v16 }
 0x755   : > { %v6274_v35 = vrot.slane %v6166_v59, 1  ;;  %7776 = vadd.xlane.f32.xlu1 %v7775_v20  ;;  %v6517_v10 = vrot.slane %v6410_v2, 2  ;;  %v6519_v47 = vrot.slane %v6411_v0, 2  ;;  %v6724_v54 = vmul.f32 %v12778_v16, %v13156_v8 }
 0x756   : > { %v6923_v19 = vadd.f32 %v6825_v25, %v6679_v49  ;;  %v6829_v12 = vrot.slane %v6723_v7, 1  ;;  %v6967_v29 = vmul.f32 %v13153_v27, %v12808_v9  ;;  %v6968_v34 = vmul.f32 %v12808_v9, %v13156_v8  ;;  %v9126_v7 = vld [vmem:[#allocation2 + $0x60] sm:$0xff]  }
 0x757   : > { %v6275_v43 = vsel %vm2393_vm9, %v6272_v45, %v6274_v35  ;;  %v6520_v36 = vsel %vm6490_vm11, %v6517_v10, %v6519_v47  ;;  %v6831_v14 = vrot.slane %v6724_v54, 1  ;;  %v7625_v40 = vsel %vm6490_vm11, %v7623_v15, %v7624_v1 }
 0x758   : > { %v7167_v26 = vadd.f32 %v7069_v42, %v6923_v19  ;;  %v6369_v38 = vadd.f32 %v6275_v43, %v6092_v39  ;;  %v7073_v24 = vrot.slane %v6967_v29, 2  ;;  %v7075_v48 = vrot.slane %v6968_v34, 2  ;;  %v5995_v29 = vld [vmem:[#allocation2 + $0x68] sm:$0x1] }
 0x759   : > { %v7279_v61 = vmul.f32 %v12825_v50, %v13235_v28  ;;  %v7206_v62 = vmul.f32 %v12813_v21, %v13235_v28  ;;  %v7280_v37 = vmul.f32 %v12825_v50, %v13237_v51  ;;  %v6832_v52 = vsel %vm2393_vm9, %v6829_v12, %v6831_v14 }
 0x75a   : > { %v7235_v60 = vadd.f32 %v7203_v63, %v7167_v26  ;;  %v6614_v46 = vadd.f32 %v6520_v36, %v6369_v38  ;;  %v7523_v3 = vmul.f32 %v12843_v55, %v13235_v28  ;;  %v7524_v1 = vmul.f32 %v12843_v55, %v13237_v51 }
 0x75b   : > { %v7385_v56 = vrot.slane %v7279_v61, 1  ;;  %v7076_v53 = vsel %vm6490_vm11, %v7073_v24, %v7075_v48  ;;  %v7387_v30 = vrot.slane %v7280_v37, 1  ;;  %v13277_v6 = vunpack.c.l.bf16 %v5991_v4 }
 0x75c   : > { %v7479_v31 = vadd.f32 %v7381_v5, %v7235_v60  ;;  %v6682_v18 = vadd.f32 %v6650_v11, %v6614_v46  ;;  %v7629_v63 = vrot.slane %v7523_v3, 2  ;;  %v7631_v13 = vrot.slane %v7524_v1, 2 }
 0x75d   : > { %v6164_v25 = vmul.f32 %v12760_v41, %v13125_v44  ;;  %v6091_v33 = vmul.f32 %v12757_v58, %v13125_v44  ;;  %v6409_v23 = vmul.f32 %v12763_v57, %v13125_v44  ;;  %v7388_v5 = vsel %vm2393_vm9, %v7385_v56, %v7387_v30 }
 0x75e   : > { %v7723_v42 = vadd.f32 %v7625_v40, %v7479_v31  ;;  %v6926_v15 = vadd.f32 %v6832_v52, %v6682_v18  ;;  %v7632_v39 = vsel %vm6490_vm11, %v7629_v63, %v7631_v13  ;;  %v6722_v4 = vmul.f32 %v13205_v17, %v12778_v16 }
 0x75f   : > { %v6271_v22 = vrot.slane %v6164_v25, 1  ;;  %v6516_v2 = vrot.slane %v6409_v23, 2  ;;  %v6966_v0 = vmul.f32 %v13205_v17, %v12808_v9  ;;  %v6649_v44 = vmul.f32 %v13205_v17, %v12792_v32 }
 0x760   : > { %v7772_v59 = vsel %vm2442_vm10, %v7723_v42, 0.0  ;;  %v7170_v49 = vadd.f32 %v7076_v53, %v6926_v15  ;;  %v6828_v20 = vrot.slane %v6722_v4, 1  ;;  %v7278_v35 = vmul.f32 %v12825_v50, %v13277_v6 }
 0x761   : > { %7773 = vadd.xlane.f32.xlu0 %v7772_v59  ;;  %v6273_v11 = vsel %vm2393_vm9, %v6271_v22, %v6272_v45  ;;  %v6518_v54 = vsel %vm6490_vm11, %v6516_v2, %v6517_v10  ;;  %v7072_v43 = vrot.slane %v6966_v0, 2  ;;  %v7205_v26 = vmul.f32 %v12813_v21, %v13277_v6 }
 0x762   : > { %v7238_v19 = vadd.f32 %v7206_v62, %v7170_v49  ;;  %v6368_v47 = vadd.f32 %v6273_v11, %v6091_v33  ;;  %v6830_v34 = vsel %vm2393_vm9, %v6828_v20, %v6829_v12  ;;  %v7384_v45 = vrot.slane %v7278_v35, 1 }
 0x763   : > { %v7522_v38 = vmul.f32 %v12843_v55, %v13277_v6  ;;  %v7074_v40 = vsel %vm6490_vm11, %v7072_v43, %v7073_v24  ;;  %v13304_v48 = vunpack.c.h.bf16 %v9126_v7  ;;  %v13307_v60 = vunpack.c.l.bf16 %v5995_v29 }
 0x764   : > { %v7482_v36 = vadd.f32 %v7388_v5, %v7238_v19  ;;  %v6613_v14 = vadd.f32 %v6518_v54, %v6368_v47  ;;  %v7386_v61 = vsel %vm2393_vm9, %v7384_v45, %v7385_v56  ;;  %v6168_v12 = vmul.f32 %v13153_v27, %v12760_v41 }
 0x765   : > { %v7628_v10 = vrot.slane %v7522_v38, 2  ;;  %v6169_v37 = vmul.f32 %v12760_v41, %v13156_v8  ;;  %v13315_v52 = vmul.f32 %v13153_v27, %v12763_v57  ;;  %v6094_v56 = vmul.f32 %v13153_v27, %v12757_v58 }
 0x766   : > { %v7726_v46 = vadd.f32 %v7632_v39, %v7482_v36  ;;  %v6681_v62 = vadd.f32 %v6649_v44, %v6613_v14  ;;  %v6277_v3 = vrot.slane %v6168_v12, 1  ;;  %v6414_v1 = vmul.f32 %v12763_v57, %v13156_v8 }
 0x767   : > { %v7630_v24 = vsel %vm6490_vm11, %v7628_v10, %v7629_v63  ;;  %v6279_v53 = vrot.slane %v6169_v37, 1  ;;  %v6522_v30 = vrot.slane %v13315_v52, 2  ;;  %v6726_v25 = vmul.f32 %v12778_v16, %v13235_v28 }
 0x768   : > { %v7781_v31 = vsel %vm2442_vm10, %v7726_v46, 0.0  ;;  %v6925_v18 = vadd.f32 %v6830_v34, %v6681_v62  ;;  %v6524_v13 = vrot.slane %v6414_v1, 2  ;;  %v6727_v63 = vmul.f32 %v12778_v16, %v13237_v51 }
 0x769   : > { %7782 = vadd.xlane.f32.xlu1 %v7781_v31  ;;  %v6970_v27 = vmul.f32 %v12808_v9, %v13235_v28  ;;  %v6280_v8 = vsel %vm2393_vm9, %v6277_v3, %v6279_v53  ;;  %v6652_v15 = vmul.f32 %v12792_v32, %v13235_v28  ;;  %v6971_v33 = vmul.f32 %v12808_v9, %v13237_v51 }
 0x76a   : > { %v7169_v42 = vadd.f32 %v7074_v40, %v6925_v18  ;;  %v6371_v23 = vadd.f32 %v6280_v8, %v6094_v56  ;;  %v6525_v5 = vsel %vm6490_vm11, %v6522_v30, %v6524_v13  ;;  %v6834_v39 = vrot.slane %v6726_v25, 1  ;;  %v5997_v13 = vld [vmem:[#allocation2 + $0x6c] sm:$0xff]   ;;  %v5998_v8 = vld [vmem:[#allocation2 + $0x74] sm:$0x1] }
 0x76b   : > { %v6836_v22 = vrot.slane %v6727_v63, 1  ;;  %v7078_v59 = vrot.slane %v6970_v27, 2  ;;  %v7080_v49 = vrot.slane %v6971_v33, 2  ;;  %v7282_v2 = vmul.f32 %v13304_v48, %v12825_v50 }
 0x76c   : > { %v7237_v4 = vadd.f32 %v7205_v26, %v7169_v42  ;;  %v6616_v0 = vadd.f32 %v6525_v5, %v6371_v23  ;;  %v7208_v11 = vmul.f32 %v13304_v48, %v12813_v21  ;;  %v7283_v44 = vmul.f32 %v12825_v50, %v13307_v60 }
 0x76d   : > { %v7526_v20 = vmul.f32 %v13304_v48, %v12843_v55  ;;  %v6837_v19 = vsel %vm2393_vm9, %v6834_v39, %v6836_v22  ;;  %v7390_v47 = vrot.slane %v7282_v2, 1  ;;  %v7527_v54 = vmul.f32 %v12843_v55, %v13307_v60 }
 0x76e   : > { %v7481_v35 = vadd.f32 %v7386_v61, %v7237_v4  ;;  %v6684_v43 = vadd.f32 %v6652_v15, %v6616_v0  ;;  %v7081_v29 = vsel %vm6490_vm11, %v7078_v59, %v7080_v49  ;;  %v7392_v34 = vrot.slane %v7283_v44, 1 }
 0x76f   : > { %v7634_v26 = vrot.slane %v7526_v20, 2  ;;  %v7636_v38 = vrot.slane %v7527_v54, 2  ;;  %v13348_v36 = vunpack.c.l.bf16 %v9126_v7  ;;  %v6167_v14 = vmul.f32 %v13205_v17, %v12760_v41 }
 0x770   : > { %v7725_v45 = vadd.f32 %v7630_v24, %v7481_v35  ;;  %v6928_v40 = vadd.f32 %v6837_v19, %v6684_v43  ;;  %v7393_v61 = vsel %vm2393_vm9, %v7390_v47, %v7392_v34  ;;  %v6093_v10 = vmul.f32 %v13205_v17, %v12757_v58 }
 0x771   : > { %v6412_v12 = vmul.f32 %v13205_v17, %v12763_v57  ;;  %v6276_v62 = vrot.slane %v6167_v14, 1  ;;  %v6651_v37 = vmul.f32 %v12792_v32, %v13277_v6  ;;  %v6725_v7 = vmul.f32 %v12778_v16, %v13277_v6 }
 0x772   : > { %v7778_v46 = vsel %vm2442_vm10, %v7725_v45, 0.0  ;;  %v7172_v52 = vadd.f32 %v7081_v29, %v6928_v40  ;;  %v7637_v24 = vsel %vm6490_vm11, %v7634_v26, %v7636_v38  ;;  %v6969_v1 = vmul.f32 %v12808_v9, %v13277_v6 }
 0x773   : > { %7779 = vadd.xlane.f32.xlu0 %v7778_v46  ;;  %v6521_v56 = vrot.slane %v6412_v12, 2  ;;  %v6278_v31 = vsel %vm2393_vm9, %v6276_v62, %v6277_v3  ;;  %v6833_v17 = vrot.slane %v6725_v7, 1  ;;  %v7281_v18 = vmul.f32 %v13348_v36, %v12825_v50 }
 0x774   : > { %v7525_v53 = vmul.f32 %v13348_v36, %v12843_v55  ;;  %v7240_v25 = vadd.f32 %v7208_v11, %v7172_v52  ;;  %v6370_v63 = vadd.f32 %v6278_v31, %v6093_v10  ;;  %v7077_v42 = vrot.slane %v6969_v1, 2 }
 0x775   : > { %v6523_v27 = vsel %vm6490_vm11, %v6521_v56, %v6522_v30  ;;  %v6835_v15 = vsel %vm2393_vm9, %v6833_v17, %v6834_v39  ;;  %v7207_v33 = vmul.f32 %v13348_v36, %v12813_v21  ;;  %v7389_v3 = vrot.slane %v7281_v18, 1 }
 0x776   : > { %v7633_v23 = vrot.slane %v7525_v53, 2  ;;  %v7484_v5 = vadd.f32 %v7393_v61, %v7240_v25  ;;  %v6615_v22 = vadd.f32 %v6523_v27, %v6370_v63  ;;  %v7079_v4 = vsel %vm6490_vm11, %v7077_v42, %v7078_v59 }
 0x777   : > { %v13375_v49 = vunpack.c.h.bf16 %v5997_v13  ;;  %v7391_v2 = vsel %vm2393_vm9, %v7389_v3, %v7390_v47  ;;  %v13379_v30 = vunpack.c.l.bf16 %v5998_v8  ;;  %v6171_v39 = vmul.f32 %v12760_v41, %v13235_v28 }
 0x778   : > { %v7635_v0 = vsel %vm6490_vm11, %v7633_v23, %v7634_v26  ;;  %v7728_v11 = vadd.f32 %v7637_v24, %v7484_v5  ;;  %v6683_v44 = vadd.f32 %v6651_v37, %v6615_v22  ;;  %v6172_v20 = vmul.f32 %v12760_v41, %v13237_v51 }
 0x779   : > { %v13387_v35 = vmul.f32 %v12763_v57, %v13235_v28  ;;  %v6096_v59 = vmul.f32 %v12757_v58, %v13235_v28  ;;  %v6282_v19 = vrot.slane %v6171_v39, 1  ;;  %v6417_v47 = vmul.f32 %v12763_v57, %v13237_v51 }
 0x77a   : > { %v13395_v54 = vmul.f32 %v13304_v48, %v12778_v16  ;;  %v7787_v43 = vsel %vm2442_vm10, %v7728_v11, 0.0  ;;  %v6927_v29 = vadd.f32 %v6835_v15, %v6683_v44  ;;  %v6284_v34 = vrot.slane %v6172_v20, 1 }
 0x77b   : > { %v6527_v26 = vrot.slane %v13387_v35, 2  ;;  %7788 = vadd.xlane.f32.xlu1 %v7787_v43  ;;  %v6529_v45 = vrot.slane %v6417_v47, 2  ;;  %v6654_v38 = vmul.f32 %v13304_v48, %v12792_v32  ;;  %v6730_v28 = vmul.f32 %v12778_v16, %v13307_v60 }
 0x77c   : > { %v6973_v51 = vmul.f32 %v13304_v48, %v12808_v9  ;;  %v7171_v14 = vadd.f32 %v7079_v4, %v6927_v29  ;;  %v6285_v40 = vsel %vm2393_vm9, %v6282_v19, %v6284_v34  ;;  %v6839_v61 = vrot.slane %v13395_v54, 1 }
 0x77d   : > { %v6974_v10 = vmul.f32 %v12808_v9, %v13307_v60  ;;  %v6373_v12 = vadd.f32 %v6285_v40, %v6096_v59  ;;  %v6530_v46 = vsel %vm6490_vm11, %v6527_v26, %v6529_v45  ;;  %v6841_v62 = vrot.slane %v6730_v28, 1  ;;  %v9127_v45 = vld [vmem:[#allocation2 + $0x78] sm:$0xff]   ;;  %v6001_v40 = vld [vmem:[#allocation2 + $0x80] sm:$0x1] }
 0x77e   : > { %v7083_v37 = vrot.slane %v6973_v51, 2  ;;  %v7239_v7 = vadd.f32 %v7207_v33, %v7171_v14  ;;  %v7285_v24 = vmul.f32 %v12825_v50, %v13375_v49  ;;  %v7286_v56 = vmul.f32 %v12825_v50, %v13379_v30 }
 0x77f   : > { %v7085_v52 = vrot.slane %v6974_v10, 2  ;;  %v6618_v1 = vadd.f32 %v6530_v46, %v6373_v12  ;;  %v7210_v31 = vmul.f32 %v12813_v21, %v13375_v49  ;;  %v13418_v17 = vmul.f32 %v12843_v55, %v13375_v49 }
 0x780   : > { %v7530_v18 = vmul.f32 %v12843_v55, %v13379_v30  ;;  %v7483_v53 = vadd.f32 %v7391_v2, %v7239_v7  ;;  %v6842_v25 = vsel %vm2393_vm9, %v6839_v61, %v6841_v62  ;;  %v7395_v63 = vrot.slane %v7285_v24, 1 }
 0x781   : > { %v7397_v27 = vrot.slane %v7286_v56, 1  ;;  %v6686_v42 = vadd.f32 %v6654_v38, %v6618_v1  ;;  %v7086_v8 = vsel %vm6490_vm11, %v7083_v37, %v7085_v52  ;;  %v7639_v15 = vrot.slane %v13418_v17, 2 }
 0x782   : > { %v7641_v33 = vrot.slane %v7530_v18, 2  ;;  %v7727_v3 = vadd.f32 %v7635_v0, %v7483_v53  ;;  %v13426_v5 = vunpack.c.l.bf16 %v5997_v13  ;;  %v6170_v22 = vmul.f32 %v12760_v41, %v13277_v6 }
 0x783   : > { %v7398_v23 = vsel %vm2393_vm9, %v7395_v63, %v7397_v27  ;;  %v6930_v4 = vadd.f32 %v6842_v25, %v6686_v42  ;;  %v6095_v39 = vmul.f32 %v12757_v58, %v13277_v6  ;;  %v6415_v11 = vmul.f32 %v12763_v57, %v13277_v6 }
 0x784   : > { %v7642_v2 = vsel %vm6490_vm11, %v7639_v15, %v7641_v33  ;;  %v7784_v0 = vsel %vm2442_vm10, %v7727_v3, 0.0  ;;  %v6281_v44 = vrot.slane %v6170_v22, 1  ;;  %v6728_v13 = vmul.f32 %v13348_v36, %v12778_v16 }
 0x785   : > { %v6972_v20 = vmul.f32 %v13348_v36, %v12808_v9  ;;  %7785 = vadd.xlane.f32.xlu0 %v7784_v0  ;;  %v7174_v35 = vadd.f32 %v7086_v8, %v6930_v4  ;;  %v6526_v59 = vrot.slane %v6415_v11, 2  ;;  %v6653_v47 = vmul.f32 %v13348_v36, %v12792_v32 }
 0x786   : > { %v7284_v54 = vmul.f32 %v12825_v50, %v13426_v5  ;;  %v6283_v6 = vsel %vm2393_vm9, %v6281_v44, %v6282_v19  ;;  %v6838_v43 = vrot.slane %v6728_v13, 1  ;;  %v7528_v34 = vmul.f32 %v12843_v55, %v13426_v5 }
 0x787   : > { %v7082_v29 = vrot.slane %v6972_v20, 2  ;;  %v7242_v38 = vadd.f32 %v7210_v31, %v7174_v35  ;;  %v6372_v28 = vadd.f32 %v6283_v6, %v6095_v39  ;;  %v6528_v51 = vsel %vm6490_vm11, %v6526_v59, %v6527_v26 }
 0x788   : > { %v7394_v14 = vrot.slane %v7284_v54, 1  ;;  %v6840_v10 = vsel %vm2393_vm9, %v6838_v43, %v6839_v61  ;;  %v7209_v46 = vmul.f32 %v12813_v21, %v13426_v5  ;;  %v7638_v19 = vrot.slane %v7528_v34, 2 }
 0x789   : > { %v7084_v12 = vsel %vm6490_vm11, %v7082_v29, %v7083_v37  ;;  %v7486_v62 = vadd.f32 %v7398_v23, %v7242_v38  ;;  %v6617_v7 = vadd.f32 %v6528_v51, %v6372_v28  ;;  %v13455_v24 = vunpack.c.h.bf16 %v9127_v45 }
 0x78a   : > { %v7396_v52 = vsel %vm2393_vm9, %v7394_v14, %v7395_v63  ;;  %v13457_v56 = vunpack.c.l.bf16 %v6001_v40  ;;  %v6098_v26 = vmul.f32 %v13304_v48, %v12757_v58  ;;  %v13463_v61 = vmul.f32 %v13304_v48, %v12760_v41 }
 0x78b   : > { %v6175_v37 = vmul.f32 %v12760_v41, %v13307_v60  ;;  %v7730_v1 = vadd.f32 %v7642_v2, %v7486_v62  ;;  %v6685_v31 = vadd.f32 %v6653_v47, %v6617_v7  ;;  %v13469_v18 = vmul.f32 %v13304_v48, %v12763_v57 }
 0x78c   : > { %v6420_v53 = vmul.f32 %v12763_v57, %v13307_v60  ;;  %v6287_v25 = vrot.slane %v13463_v61, 1  ;;  %v6656_v27 = vmul.f32 %v12792_v32, %v13375_v49  ;;  %v13478_v42 = vmul.f32 %v12778_v16, %v13375_v49 }
 0x78d   : > { %v6289_v63 = vrot.slane %v6175_v37, 1  ;;  %v7793_v8 = vsel %vm2442_vm10, %v7730_v1, 0.0  ;;  %v6929_v33 = vadd.f32 %v6840_v10, %v6685_v31  ;;  %v6532_v3 = vrot.slane %v13469_v18, 2 }
 0x78e   : > { %v6534_v48 = vrot.slane %v6420_v53, 2  ;;  %7794 = vadd.xlane.f32.xlu1 %v7793_v8  ;;  %v6733_v60 = vmul.f32 %v12778_v16, %v13379_v30  ;;  %v6844_v22 = vrot.slane %v13478_v42, 1  ;;  %v6976_v4 = vmul.f32 %v12808_v9, %v13375_v49 }
 0x78f   : > { %v6290_v23 = vsel %vm2393_vm9, %v6287_v25, %v6289_v63  ;;  %v7173_v2 = vadd.f32 %v7084_v12, %v6929_v33  ;;  %v6977_v0 = vmul.f32 %v12808_v9, %v13379_v30  ;;  %v7640_v44 = vsel %vm6490_vm11, %v7638_v19, %v7639_v15 }
 0x790   : > { %v6375_v39 = vadd.f32 %v6290_v23, %v6098_v26  ;;  %v6535_v11 = vsel %vm6490_vm11, %v6532_v3, %v6534_v48  ;;  %v6846_v13 = vrot.slane %v6733_v60, 1  ;;  %v7088_v20 = vrot.slane %v6976_v4, 2  ;;  %v6003_v23 = vld [vmem:[#allocation2 + $0x84] sm:$0xff]   ;;  %v6004_v60 = vld [vmem:[#allocation2 + $0x8c] sm:$0x1] }
 0x791   : > { %v7288_v35 = vmul.f32 %v13455_v24, %v12825_v50  ;;  %v7241_v59 = vadd.f32 %v7209_v46, %v7173_v2  ;;  %v7090_v54 = vrot.slane %v6977_v0, 2  ;;  %v7289_v6 = vmul.f32 %v12825_v50, %v13457_v56 }
 0x792   : > { %v6620_v47 = vadd.f32 %v6535_v11, %v6375_v39  ;;  %v6847_v43 = vsel %vm2393_vm9, %v6844_v22, %v6846_v13  ;;  %v13501_v34 = vmul.f32 %v13455_v24, %v12843_v55  ;;  %v7533_v17 = vmul.f32 %v12843_v55, %v13457_v56 }
 0x793   : > { %v7400_v29 = vrot.slane %v7288_v35, 1  ;;  %v7485_v15 = vadd.f32 %v7396_v52, %v7241_v59  ;;  %v7212_v28 = vmul.f32 %v13455_v24, %v12813_v21  ;;  %v7402_v51 = vrot.slane %v7289_v6, 1 }
 0x794   : > { %v6688_v38 = vadd.f32 %v6656_v27, %v6620_v47  ;;  %v7091_v14 = vsel %vm6490_vm11, %v7088_v20, %v7090_v54  ;;  %v7644_v40 = vrot.slane %v13501_v34, 2  ;;  %v7646_v10 = vrot.slane %v7533_v17, 2 }
 0x795   : > { %v13509_v12 = vunpack.c.l.bf16 %v9127_v45  ;;  %v7729_v46 = vadd.f32 %v7640_v44, %v7485_v15  ;;  %v6097_v62 = vmul.f32 %v13348_v36, %v12757_v58  ;;  %v6173_v7 = vmul.f32 %v13348_v36, %v12760_v41 }
 0x796   : > { %v6932_v19 = vadd.f32 %v6847_v43, %v6688_v38  ;;  %v7403_v52 = vsel %vm2393_vm9, %v7400_v29, %v7402_v51  ;;  %v7647_v26 = vsel %vm6490_vm11, %v7644_v40, %v7646_v10  ;;  %v6418_v61 = vmul.f32 %v13348_v36, %v12763_v57 }
 0x797   : > { %v6731_v45 = vmul.f32 %v12778_v16, %v13426_v5  ;;  %v7790_v37 = vsel %vm2442_vm10, %v7729_v46, 0.0  ;;  %v6286_v31 = vrot.slane %v6173_v7, 1  ;;  %v6975_v18 = vmul.f32 %v12808_v9, %v13426_v5 }
 0x798   : > { %v7176_v1 = vadd.f32 %v7091_v14, %v6932_v19  ;;  %7791 = vadd.xlane.f32.xlu0 %v7790_v37  ;;  %v6531_v53 = vrot.slane %v6418_v61, 2  ;;  %v6655_v63 = vmul.f32 %v12792_v32, %v13426_v5  ;;  %v7287_v42 = vmul.f32 %v13509_v12, %v12825_v50 }
 0x799   : > { %v6843_v27 = vrot.slane %v6731_v45, 1  ;;  %v6288_v8 = vsel %vm2393_vm9, %v6286_v31, %v6287_v25  ;;  %v7087_v33 = vrot.slane %v6975_v18, 2  ;;  %v7531_v48 = vmul.f32 %v13509_v12, %v12843_v55 }
 0x79a   : > { %v7244_v36 = vadd.f32 %v7212_v28, %v7176_v1  ;;  %v6374_v4 = vadd.f32 %v6288_v8, %v6097_v62  ;;  %v6533_v2 = vsel %vm6490_vm11, %v6531_v53, %v6532_v3  ;;  %v7211_v39 = vmul.f32 %v13509_v12, %v12813_v21 }
 0x79b   : > { %v7399_v11 = vrot.slane %v7287_v42, 1  ;;  %v6845_v44 = vsel %vm2393_vm9, %v6843_v27, %v6844_v22  ;;  %v7089_v13 = vsel %vm6490_vm11, %v7087_v33, %v7088_v20  ;;  %v7643_v35 = vrot.slane %v7531_v48, 2 }
 0x79c   : > { %v7488_v0 = vadd.f32 %v7403_v52, %v7244_v36  ;;  %v6619_v25 = vadd.f32 %v6533_v2, %v6374_v4  ;;  %v13539_v47 = vunpack.c.h.bf16 %v6003_v23  ;;  %v13541_v54 = vunpack.c.l.bf16 %v6004_v60 }
 0x79d   : > { %v7401_v59 = vsel %vm2393_vm9, %v7399_v11, %v7400_v29  ;;  %v6100_v3 = vmul.f32 %v12757_v58, %v13375_v49  ;;  %v6177_v43 = vmul.f32 %v12760_v41, %v13375_v49  ;;  %v6178_v22 = vmul.f32 %v12760_v41, %v13379_v30 }
 0x79e   : > { %v7732_v6 = vadd.f32 %v7647_v26, %v7488_v0  ;;  %v6687_v17 = vadd.f32 %v6655_v63, %v6619_v25  ;;  %v6422_v20 = vmul.f32 %v12763_v57, %v13375_v49  ;;  %v6423_v29 = vmul.f32 %v12763_v57, %v13379_v30 }
 0x79f   : > { %v6658_v15 = vmul.f32 %v13455_v24, %v12792_v32  ;;  %v6292_v28 = vrot.slane %v6177_v43, 1  ;;  %v6294_v51 = vrot.slane %v6178_v22, 1  ;;  %v6735_v14 = vmul.f32 %v13455_v24, %v12778_v16 }
 0x7a0   : > { %v7799_v38 = vsel %vm2442_vm10, %v7732_v6, 0.0  ;;  %v6931_v10 = vadd.f32 %v6845_v44, %v6687_v17  ;;  %v6537_v46 = vrot.slane %v6422_v20, 2  ;;  %v6539_v19 = vrot.slane %v6423_v29, 2 }
 0x7a1   : > { %7800 = vadd.xlane.f32.xlu1 %v7799_v38  ;;  %v6736_v49 = vmul.f32 %v12778_v16, %v13457_v56  ;;  %v6295_v62 = vsel %vm2393_vm9, %v6292_v28, %v6294_v51  ;;  %v6849_v30 = vrot.slane %v6735_v14, 1  ;;  %v6979_v7 = vmul.f32 %v13455_v24, %v12808_v9  ;;  %v9128_v14 = vld [vmem:[#allocation2 + $0x90] sm:$0xff]  }
 0x7a2   : > { %v6980_v52 = vmul.f32 %v12808_v9, %v13457_v56  ;;  %v7175_v26 = vadd.f32 %v7089_v13, %v6931_v10  ;;  %v6377_v61 = vadd.f32 %v6295_v62, %v6100_v3  ;;  %v6540_v45 = vsel %vm6490_vm11, %v6537_v46, %v6539_v19 }
 0x7a3   : > { %v6851_v37 = vrot.slane %v6736_v49, 1  ;;  %v7645_v1 = vsel %vm6490_vm11, %v7643_v35, %v7644_v40  ;;  %v7093_v31 = vrot.slane %v6979_v7, 2  ;;  %v7291_v53 = vmul.f32 %v12825_v50, %v13539_v47  ;;  %v6007_v7 = vld [vmem:[#allocation2 + $0x98] sm:$0x1] }
 0x7a4   : > { %v7095_v18 = vrot.slane %v6980_v52, 2  ;;  %v7243_v63 = vadd.f32 %v7211_v39, %v7175_v26  ;;  %v6622_v27 = vadd.f32 %v6540_v45, %v6377_v61  ;;  %v7214_v42 = vmul.f32 %v12813_v21, %v13539_v47 }
 0x7a5   : > { %v7292_v36 = vmul.f32 %v12825_v50, %v13541_v54  ;;  %v6852_v8 = vsel %vm2393_vm9, %v6849_v30, %v6851_v37  ;;  %v7405_v33 = vrot.slane %v7291_v53, 1  ;;  %v7535_v34 = vmul.f32 %v12843_v55, %v13539_v47 }
 0x7a6   : > { %v7536_v40 = vmul.f32 %v12843_v55, %v13541_v54  ;;  %v7487_v48 = vadd.f32 %v7401_v59, %v7243_v63  ;;  %v6690_v60 = vadd.f32 %v6658_v15, %v6622_v27  ;;  %v7096_v4 = vsel %vm6490_vm11, %v7093_v31, %v7095_v18 }
 0x7a7   : > { %v7407_v2 = vrot.slane %v7292_v36, 1  ;;  %v7649_v39 = vrot.slane %v7535_v34, 2  ;;  %v13581_v0 = vunpack.c.l.bf16 %v6003_v23  ;;  %v6176_v44 = vmul.f32 %v12760_v41, %v13426_v5 }
 0x7a8   : > { %v7651_v11 = vrot.slane %v7536_v40, 2  ;;  %v7731_v13 = vadd.f32 %v7645_v1, %v7487_v48  ;;  %v6934_v35 = vadd.f32 %v6852_v8, %v6690_v60  ;;  %v6099_v25 = vmul.f32 %v12757_v58, %v13426_v5 }
 0x7a9   : > { %v6421_v6 = vmul.f32 %v12763_v57, %v13426_v5  ;;  %v7408_v59 = vsel %vm2393_vm9, %v7405_v33, %v7407_v2  ;;  %v6291_v43 = vrot.slane %v6176_v44, 1  ;;  %v6734_v23 = vmul.f32 %v13509_v12, %v12778_v16 }
 0x7aa   : > { %v7652_v3 = vsel %vm6490_vm11, %v7649_v39, %v7651_v11  ;;  %v7796_v22 = vsel %vm2442_vm10, %v7731_v13, 0.0  ;;  %v7178_v17 = vadd.f32 %v7096_v4, %v6934_v35  ;;  %v6978_v29 = vmul.f32 %v13509_v12, %v12808_v9 }
 0x7ab   : > { %v6536_v20 = vrot.slane %v6421_v6, 2  ;;  %7797 = vadd.xlane.f32.xlu0 %v7796_v22  ;;  %v6293_v15 = vsel %vm2393_vm9, %v6291_v43, %v6292_v28  ;;  %v6657_v5 = vmul.f32 %v13509_v12, %v12792_v32  ;;  %v6848_v38 = vrot.slane %v6734_v23, 1 }
 0x7ac   : > { %v7290_v51 = vmul.f32 %v12825_v50, %v13581_v0  ;;  %v7246_v10 = vadd.f32 %v7214_v42, %v7178_v17  ;;  %v6376_v19 = vadd.f32 %v6293_v15, %v6099_v25  ;;  %v7092_v62 = vrot.slane %v6978_v29, 2 }
 0x7ad   : > { %v6538_v49 = vsel %vm6490_vm11, %v6536_v20, %v6537_v46  ;;  %v6850_v52 = vsel %vm2393_vm9, %v6848_v38, %v6849_v30  ;;  %v7213_v26 = vmul.f32 %v12813_v21, %v13581_v0  ;;  %v7534_v61 = vmul.f32 %v12843_v55, %v13581_v0 }
 0x7ae   : > { %v7404_v28 = vrot.slane %v7290_v51, 1  ;;  %v7490_v45 = vadd.f32 %v7408_v59, %v7246_v10  ;;  %v6621_v37 = vadd.f32 %v6538_v49, %v6376_v19  ;;  %v7094_v1 = vsel %vm6490_vm11, %v7092_v62, %v7093_v31 }
 0x7af   : > { %v13608_v18 = vunpack.c.h.bf16 %v9128_v14  ;;  %v7648_v46 = vrot.slane %v7534_v61, 2  ;;  %v13611_v63 = vunpack.c.l.bf16 %v6007_v7  ;;  %v6180_v30 = vmul.f32 %v13455_v24, %v12760_v41 }
 0x7b0   : > { %v7406_v53 = vsel %vm2393_vm9, %v7404_v28, %v7405_v33  ;;  %v7734_v27 = vadd.f32 %v7652_v3, %v7490_v45  ;;  %v6689_v42 = vadd.f32 %v6657_v5, %v6621_v37  ;;  %v6181_v36 = vmul.f32 %v12760_v41, %v13457_v56 }
 0x7b1   : > { %v13619_v8 = vmul.f32 %v13455_v24, %v12763_v57  ;;  %v7650_v31 = vsel %vm6490_vm11, %v7648_v46, %v7649_v39  ;;  %v6102_v33 = vmul.f32 %v13455_v24, %v12757_v58  ;;  %v6297_v34 = vrot.slane %v6180_v30, 1 }
 0x7b2   : > { %v6426_v40 = vmul.f32 %v12763_v57, %v13457_v56  ;;  %v7805_v48 = vsel %vm2442_vm10, %v7734_v27, 0.0  ;;  %v6933_v60 = vadd.f32 %v6850_v52, %v6689_v42  ;;  %v6299_v4 = vrot.slane %v6181_v36, 1 }
 0x7b3   : > { %v6542_v2 = vrot.slane %v13619_v8, 2  ;;  %7806 = vadd.xlane.f32.xlu1 %v7805_v48  ;;  %v6738_v44 = vmul.f32 %v12778_v16, %v13539_v47  ;;  %v6739_v39 = vmul.f32 %v12778_v16, %v13541_v54  ;;  %v6982_v24 = vmul.f32 %v12808_v9, %v13539_v47 }
 0x7b4   : > { %v6544_v11 = vrot.slane %v6426_v40, 2  ;;  %v7177_v13 = vadd.f32 %v7094_v1, %v6933_v60  ;;  %v6300_v56 = vsel %vm2393_vm9, %v6297_v34, %v6299_v4  ;;  %v6660_v35 = vmul.f32 %v12792_v32, %v13539_v47 }
 0x7b5   : > { %v6983_v25 = vmul.f32 %v12808_v9, %v13541_v54  ;;  %v6379_v6 = vadd.f32 %v6300_v56, %v6102_v33  ;;  %v6854_v3 = vrot.slane %v6738_v44, 1  ;;  %v6856_v43 = vrot.slane %v6739_v39, 1  ;;  %v6010_v56 = vld [vmem:[#allocation2 + $0xa4] sm:$0x1] }
 0x7b6   : > { %v6545_v59 = vsel %vm6490_vm11, %v6542_v2, %v6544_v11  ;;  %v7245_v23 = vadd.f32 %v7213_v26, %v7177_v13  ;;  %v7098_v22 = vrot.slane %v6982_v24, 2  ;;  %v7294_v20 = vmul.f32 %v13608_v18, %v12825_v50  ;;  %v6009_v11 = vld [vmem:[#allocation2 + $0x9c] sm:$0xff]  }
 0x7b7   : > { %v7100_v17 = vrot.slane %v6983_v25, 2  ;;  %v6624_v29 = vadd.f32 %v6545_v59, %v6379_v6  ;;  %v7216_v15 = vmul.f32 %v13608_v18, %v12813_v21  ;;  %v7295_v5 = vmul.f32 %v12825_v50, %v13611_v63 }
 0x7b8   : > { %v7538_v38 = vmul.f32 %v13608_v18, %v12843_v55  ;;  %v7489_v51 = vadd.f32 %v7406_v53, %v7245_v23  ;;  %v6857_v10 = vsel %vm2393_vm9, %v6854_v3, %v6856_v43  ;;  %v7410_v19 = vrot.slane %v7294_v20, 1 }
 0x7b9   : > { %v7539_v49 = vmul.f32 %v12843_v55, %v13611_v63  ;;  %v6692_v62 = vadd.f32 %v6660_v35, %v6624_v29  ;;  %v7101_v7 = vsel %vm6490_vm11, %v7098_v22, %v7100_v17  ;;  %v7412_v52 = vrot.slane %v7295_v5, 1 }
 0x7ba   : > { %v7654_v26 = vrot.slane %v7538_v38, 2  ;;  %v7733_v28 = vadd.f32 %v7650_v31, %v7489_v51  ;;  %v13652_v45 = vunpack.c.l.bf16 %v9128_v14  ;;  %v6179_v37 = vmul.f32 %v13509_v12, %v12760_v41 }
 0x7bb   : > { %v7656_v61 = vrot.slane %v7539_v49, 2  ;;  %v6936_v1 = vadd.f32 %v6857_v10, %v6692_v62  ;;  %v7413_v53 = vsel %vm2393_vm9, %v7410_v19, %v7412_v52  ;;  %v6101_v46 = vmul.f32 %v13509_v12, %v12757_v58 }
 0x7bc   : > { %v6424_v30 = vmul.f32 %v13509_v12, %v12763_v57  ;;  %v7802_v27 = vsel %vm2442_vm10, %v7733_v28, 0.0  ;;  %v6296_v42 = vrot.slane %v6179_v37, 1  ;;  %v6659_v36 = vmul.f32 %v12792_v32, %v13581_v0 }
 0x7bd   : > { %v6737_v14 = vmul.f32 %v12778_v16, %v13581_v0  ;;  %7803 = vadd.xlane.f32.xlu0 %v7802_v27  ;;  %v7180_v8 = vadd.f32 %v7101_v7, %v6936_v1  ;;  %v7657_v31 = vsel %vm6490_vm11, %v7654_v26, %v7656_v61  ;;  %v6981_v40 = vmul.f32 %v12808_v9, %v13581_v0 }
 0x7be   : > { %v6541_v33 = vrot.slane %v6424_v30, 2  ;;  %v6298_v48 = vsel %vm2393_vm9, %v6296_v42, %v6297_v34  ;;  %v7293_v60 = vmul.f32 %v13652_v45, %v12825_v50  ;;  %v7537_v4 = vmul.f32 %v13652_v45, %v12843_v55 }
 0x7bf   : > { %v6853_v12 = vrot.slane %v6737_v14, 1  ;;  %v7248_v44 = vadd.f32 %v7216_v15, %v7180_v8  ;;  %v6378_v39 = vadd.f32 %v6298_v48, %v6101_v46  ;;  %v7097_v13 = vrot.slane %v6981_v40, 2 }
 0x7c0   : > { %v6543_v24 = vsel %vm6490_vm11, %v6541_v33, %v6542_v2  ;;  %v7215_v25 = vmul.f32 %v13652_v45, %v12813_v21  ;;  %v7409_v34 = vrot.slane %v7293_v60, 1  ;;  %v7653_v6 = vrot.slane %v7537_v4, 2 }
 0x7c1   : > { %v6855_v35 = vsel %vm2393_vm9, %v6853_v12, %v6854_v3  ;;  %v7492_v59 = vadd.f32 %v7413_v53, %v7248_v44  ;;  %v6623_v43 = vadd.f32 %v6543_v24, %v6378_v39  ;;  %v7099_v23 = vsel %vm6490_vm11, %v7097_v13, %v7098_v22 }
 0x7c2   : > { %v13679_v17 = vunpack.c.h.bf16 %v6009_v11  ;;  %v7411_v20 = vsel %vm2393_vm9, %v7409_v34, %v7410_v19  ;;  %v7655_v29 = vsel %vm6490_vm11, %v7653_v6, %v7654_v26  ;;  %v13683_v2 = vunpack.c.l.bf16 %v6010_v56 }
 0x7c3   : > { %v6183_v3 = vmul.f32 %v12760_v41, %v13539_v47  ;;  %v7736_v15 = vadd.f32 %v7657_v31, %v7492_v59  ;;  %v6691_v5 = vadd.f32 %v6659_v36, %v6623_v43  ;;  %v6184_v38 = vmul.f32 %v12760_v41, %v13541_v54 }
 0x7c4   : > { %v13691_v51 = vmul.f32 %v12763_v57, %v13539_v47  ;;  %v6104_v22 = vmul.f32 %v12757_v58, %v13539_v47  ;;  %v6429_v19 = vmul.f32 %v12763_v57, %v13541_v54  ;;  %v13699_v49 = vmul.f32 %v13608_v18, %v12778_v16 }
 0x7c5   : > { %v6302_v10 = vrot.slane %v6183_v3, 1  ;;  %v7811_v62 = vsel %vm2442_vm10, %v7736_v15, 0.0  ;;  %v6935_v7 = vadd.f32 %v6855_v35, %v6691_v5  ;;  %v6304_v52 = vrot.slane %v6184_v38, 1 }
 0x7c6   : > { %v6547_v26 = vrot.slane %v13691_v51, 2  ;;  %7812 = vadd.xlane.f32.xlu1 %v7811_v62  ;;  %v6549_v28 = vrot.slane %v6429_v19, 2  ;;  %v6662_v61 = vmul.f32 %v13608_v18, %v12792_v32  ;;  %v6742_v47 = vmul.f32 %v12778_v16, %v13611_v63 }
 0x7c7   : > { %v6985_v54 = vmul.f32 %v13608_v18, %v12808_v9  ;;  %v7179_v37 = vadd.f32 %v7099_v23, %v6935_v7  ;;  %v6305_v1 = vsel %vm2393_vm9, %v6302_v10, %v6304_v52  ;;  %v6859_v53 = vrot.slane %v13699_v49, 1 }
 0x7c8   : > { %v6986_v46 = vmul.f32 %v12808_v9, %v13611_v63  ;;  %v6381_v30 = vadd.f32 %v6305_v1, %v6104_v22  ;;  %v6550_v27 = vsel %vm6490_vm11, %v6547_v26, %v6549_v28  ;;  %v6861_v42 = vrot.slane %v6742_v47, 1  ;;  %v9129_v28 = vld [vmem:[#allocation2 + $0xa8] sm:$0xff]   ;;  %v6013_v1 = vld [vmem:[#allocation2 + $0xb0] sm:$0x1] }
 0x7c9   : > { %v7103_v36 = vrot.slane %v6985_v54, 2  ;;  %v7247_v14 = vadd.f32 %v7215_v25, %v7179_v37  ;;  %v7297_v31 = vmul.f32 %v12825_v50, %v13679_v17  ;;  %v7298_v33 = vmul.f32 %v12825_v50, %v13683_v2 }
 0x7ca   : > { %v7105_v8 = vrot.slane %v6986_v46, 2  ;;  %v6626_v40 = vadd.f32 %v6550_v27, %v6381_v30  ;;  %v7218_v48 = vmul.f32 %v12813_v21, %v13679_v17  ;;  %v13722_v12 = vmul.f32 %v12843_v55, %v13679_v17 }
 0x7cb   : > { %v7542_v60 = vmul.f32 %v12843_v55, %v13683_v2  ;;  %v7491_v4 = vadd.f32 %v7411_v20, %v7247_v14  ;;  %v6862_v44 = vsel %vm2393_vm9, %v6859_v53, %v6861_v42  ;;  %v7415_v39 = vrot.slane %v7297_v31, 1 }
 0x7cc   : > { %v7417_v24 = vrot.slane %v7298_v33, 1  ;;  %v6694_v13 = vadd.f32 %v6662_v61, %v6626_v40  ;;  %v7106_v56 = vsel %vm6490_vm11, %v7103_v36, %v7105_v8  ;;  %v7659_v35 = vrot.slane %v13722_v12, 2 }
 0x7cd   : > { %v7661_v25 = vrot.slane %v7542_v60, 2  ;;  %v7735_v34 = vadd.f32 %v7655_v29, %v7491_v4  ;;  %v13730_v59 = vunpack.c.l.bf16 %v6009_v11  ;;  %v6182_v43 = vmul.f32 %v12760_v41, %v13581_v0 }
 0x7ce   : > { %v7418_v6 = vsel %vm2393_vm9, %v7415_v39, %v7417_v24  ;;  %v6938_v23 = vadd.f32 %v6862_v44, %v6694_v13  ;;  %v6103_v3 = vmul.f32 %v12757_v58, %v13581_v0  ;;  %v6427_v15 = vmul.f32 %v12763_v57, %v13581_v0 }
 0x7cf   : > { %v7662_v20 = vsel %vm6490_vm11, %v7659_v35, %v7661_v25  ;;  %v7808_v29 = vsel %vm2442_vm10, %v7735_v34, 0.0  ;;  %v6301_v5 = vrot.slane %v6182_v43, 1  ;;  %v6740_v11 = vmul.f32 %v13652_v45, %v12778_v16 }
 0x7d0   : > { %v6984_v38 = vmul.f32 %v13652_v45, %v12808_v9  ;;  %7809 = vadd.xlane.f32.xlu0 %v7808_v29  ;;  %v7182_v51 = vadd.f32 %v7106_v56, %v6938_v23  ;;  %v6546_v22 = vrot.slane %v6427_v15, 2  ;;  %v6661_v19 = vmul.f32 %v13652_v45, %v12792_v32 }
 0x7d1   : > { %v7296_v49 = vmul.f32 %v12825_v50, %v13730_v59  ;;  %v6303_v0 = vsel %vm2393_vm9, %v6301_v5, %v6302_v10  ;;  %v6858_v62 = vrot.slane %v6740_v11, 1  ;;  %v7540_v52 = vmul.f32 %v12843_v55, %v13730_v59 }
 0x7d2   : > { %v7102_v7 = vrot.slane %v6984_v38, 2  ;;  %v7250_v61 = vadd.f32 %v7218_v48, %v7182_v51  ;;  %v6380_v47 = vadd.f32 %v6303_v0, %v6103_v3  ;;  %v6548_v54 = vsel %vm6490_vm11, %v6546_v22, %v6547_v26 }
 0x7d3   : > { %v7414_v37 = vrot.slane %v7296_v49, 1  ;;  %v6860_v46 = vsel %vm2393_vm9, %v6858_v62, %v6859_v53  ;;  %v7217_v27 = vmul.f32 %v12813_v21, %v13730_v59  ;;  %v7658_v10 = vrot.slane %v7540_v52, 2 }
 0x7d4   : > { %v7104_v30 = vsel %vm6490_vm11, %v7102_v7, %v7103_v36  ;;  %v7494_v42 = vadd.f32 %v7418_v6, %v7250_v61  ;;  %v6625_v14 = vadd.f32 %v6548_v54, %v6380_v47  ;;  %v13759_v31 = vunpack.c.h.bf16 %v9129_v28 }
 0x7d5   : > { %v7416_v8 = vsel %vm2393_vm9, %v7414_v37, %v7415_v39  ;;  %v13761_v33 = vunpack.c.l.bf16 %v6013_v1  ;;  %v6106_v26 = vmul.f32 %v13608_v18, %v12757_v58  ;;  %v6186_v53 = vmul.f32 %v13608_v18, %v12760_v41 }
 0x7d6   : > { %v6187_v36 = vmul.f32 %v12760_v41, %v13611_v63  ;;  %v7738_v40 = vadd.f32 %v7662_v20, %v7494_v42  ;;  %v6693_v48 = vadd.f32 %v6661_v19, %v6625_v14  ;;  %v13771_v60 = vmul.f32 %v13608_v18, %v12763_v57 }
 0x7d7   : > { %v6432_v4 = vmul.f32 %v12763_v57, %v13611_v63  ;;  %v6307_v44 = vrot.slane %v6186_v53, 1  ;;  %v6664_v24 = vmul.f32 %v12792_v32, %v13679_v17  ;;  %v13779_v13 = vmul.f32 %v12778_v16, %v13679_v17 }
 0x7d8   : > { %v6309_v39 = vrot.slane %v6187_v36, 1  ;;  %v7817_v56 = vsel %vm2442_vm10, %v7738_v40, 0.0  ;;  %v6937_v25 = vadd.f32 %v6860_v46, %v6693_v48  ;;  %v6552_v34 = vrot.slane %v13771_v60, 2 }
 0x7d9   : > { %v6554_v6 = vrot.slane %v6432_v4, 2  ;;  %7818 = vadd.xlane.f32.xlu1 %v7817_v56  ;;  %v6745_v63 = vmul.f32 %v12778_v16, %v13683_v2  ;;  %v6864_v43 = vrot.slane %v13779_v13, 1  ;;  %v6988_v23 = vmul.f32 %v12808_v9, %v13679_v17 }
 0x7da   : > { %v6310_v18 = vsel %vm2393_vm9, %v6307_v44, %v6309_v39  ;;  %v7181_v20 = vadd.f32 %v7104_v30, %v6937_v25  ;;  %v6989_v29 = vmul.f32 %v12808_v9, %v13683_v2  ;;  %v7660_v5 = vsel %vm6490_vm11, %v7658_v10, %v7659_v35 }
 0x7db   : > { %v6383_v3 = vadd.f32 %v6310_v18, %v6106_v26  ;;  %v6555_v15 = vsel %vm6490_vm11, %v6552_v34, %v6554_v6  ;;  %v6866_v11 = vrot.slane %v6745_v63, 1  ;;  %v7108_v38 = vrot.slane %v6988_v23, 2  ;;  %v6015_v6 = vld [vmem:[#allocation2 + $0xb4] sm:$0xff]   ;;  %v6016_v18 = vld [vmem:[#allocation2 + $0xbc] sm:$0x1] }
 0x7dc   : > { %v13797_v51 = vmul.f32 %v13759_v31, %v12825_v50  ;;  %v7249_v22 = vadd.f32 %v7217_v27, %v7181_v20  ;;  %v7110_v49 = vrot.slane %v6989_v29, 2  ;;  %v7301_v0 = vmul.f32 %v12825_v50, %v13761_v33 }
 0x7dd   : > { %v6628_v19 = vadd.f32 %v6555_v15, %v6383_v3  ;;  %v6867_v62 = vsel %vm2393_vm9, %v6864_v43, %v6866_v11  ;;  %v13805_v12 = vmul.f32 %v13759_v31, %v12843_v55  ;;  %v7545_v35 = vmul.f32 %v12843_v55, %v13761_v33 }
 0x7de   : > { %v7420_v7 = vrot.slane %v13797_v51, 1  ;;  %v7493_v52 = vadd.f32 %v7416_v8, %v7249_v22  ;;  %v7422_v47 = vrot.slane %v7301_v0, 1  ;;  %v7111_v54 = vsel %vm6490_vm11, %v7108_v38, %v7110_v49 }
 0x7df   : > { %v6696_v61 = vadd.f32 %v6664_v24, %v6628_v19  ;;  %v7220_v37 = vmul.f32 %v13759_v31, %v12813_v21  ;;  %v7664_v1 = vrot.slane %v13805_v12, 2  ;;  %v7666_v46 = vrot.slane %v7545_v35, 2 }
 0x7e0   : > { %v7737_v30 = vadd.f32 %v7660_v5, %v7493_v52  ;;  %v13813_v10 = vunpack.c.l.bf16 %v9129_v28  ;;  %v6185_v42 = vmul.f32 %v13652_v45, %v12760_v41  ;;  %v7423_v14 = vsel %vm2393_vm9, %v7420_v7, %v7422_v47 }
 0x7e1   : > { %v6940_v27 = vadd.f32 %v6867_v62, %v6696_v61  ;;  %v6105_v8 = vmul.f32 %v13652_v45, %v12757_v58  ;;  %v6430_v26 = vmul.f32 %v13652_v45, %v12763_v57  ;;  %v6743_v53 = vmul.f32 %v12778_v16, %v13730_v59 }
 0x7e2   : > { %v7814_v36 = vsel %vm2442_vm10, %v7737_v30, 0.0  ;;  %v6306_v40 = vrot.slane %v6185_v42, 1  ;;  %v6987_v48 = vmul.f32 %v12808_v9, %v13730_v59  ;;  %v7667_v60 = vsel %vm6490_vm11, %v7664_v1, %v7666_v46 }
 0x7e3   : > { %v7184_v28 = vadd.f32 %v7111_v54, %v6940_v27  ;;  %7815 = vadd.xlane.f32.xlu0 %v7814_v36  ;;  %v6551_v4 = vrot.slane %v6430_v26, 2  ;;  %v6863_v39 = vrot.slane %v6743_v53, 1  ;;  %v7299_v45 = vmul.f32 %v13813_v10, %v12825_v50 }
 0x7e4   : > { %v6308_v13 = vsel %vm2393_vm9, %v6306_v40, %v6307_v44  ;;  %v7107_v56 = vrot.slane %v6987_v48, 2  ;;  %v7543_v25 = vmul.f32 %v13813_v10, %v12843_v55  ;;  %v6663_v20 = vmul.f32 %v12792_v32, %v13730_v59 }
 0x7e5   : > { %v7252_v24 = vadd.f32 %v7220_v37, %v7184_v28  ;;  %v6382_v63 = vadd.f32 %v6308_v13, %v6105_v8  ;;  %v6553_v23 = vsel %vm6490_vm11, %v6551_v4, %v6552_v34  ;;  %v7219_v3 = vmul.f32 %v13813_v10, %v12813_v21 }
 0x7e6   : > { %v6865_v29 = vsel %vm2393_vm9, %v6863_v39, %v6864_v43  ;;  %v7109_v44 = vsel %vm6490_vm11, %v7107_v56, %v7108_v38  ;;  %v7419_v5 = vrot.slane %v7299_v45, 1  ;;  %v7663_v22 = vrot.slane %v7543_v25, 2 }
 0x7e7   : > { %v7496_v15 = vadd.f32 %v7423_v14, %v7252_v24  ;;  %v6627_v11 = vadd.f32 %v6553_v23, %v6382_v63  ;;  %v13844_v19 = vunpack.c.h.bf16 %v6015_v6  ;;  %v13846_v49 = vunpack.c.l.bf16 %v6016_v18 }
 0x7e8   : > { %v6108_v34 = vmul.f32 %v12757_v58, %v13679_v17  ;;  %v6189_v62 = vmul.f32 %v12760_v41, %v13679_v17  ;;  %v6190_v35 = vmul.f32 %v12760_v41, %v13683_v2  ;;  %v6434_v38 = vmul.f32 %v12763_v57, %v13679_v17 }
 0x7e9   : > { %v7740_v0 = vadd.f32 %v7667_v60, %v7496_v15  ;;  %v6695_v43 = vadd.f32 %v6663_v20, %v6627_v11  ;;  %v6435_v52 = vmul.f32 %v12763_v57, %v13683_v2  ;;  %v6666_v61 = vmul.f32 %v13759_v31, %v12792_v32 }
 0x7ea   : > { %v6312_v54 = vrot.slane %v6189_v62, 1  ;;  %v6314_v37 = vrot.slane %v6190_v35, 1  ;;  %v13863_v46 = vmul.f32 %v13759_v31, %v12778_v16  ;;  %v6557_v27 = vrot.slane %v6434_v38, 2 }
 0x7eb   : > { %v7823_v47 = vsel %vm2442_vm10, %v7740_v0, 0.0  ;;  %v6939_v30 = vadd.f32 %v6865_v29, %v6695_v43  ;;  %v6559_v42 = vrot.slane %v6435_v52, 2  ;;  %v6748_v17 = vmul.f32 %v12778_v16, %v13761_v33 }
 0x7ec   : > { %7824 = vadd.xlane.f32.xlu1 %v7823_v47  ;;  %v6315_v2 = vsel %vm2393_vm9, %v6312_v54, %v6314_v37  ;;  %v6869_v14 = vrot.slane %v13863_v46, 1  ;;  %v6991_v8 = vmul.f32 %v13759_v31, %v12808_v9  ;;  %v6992_v26 = vmul.f32 %v12808_v9, %v13761_v33  ;;  %v9130_v46 = vld [vmem:[#allocation2 + $0xc0] sm:$0xff]  }
 0x7ed   : > { %v7183_v53 = vadd.f32 %v7109_v44, %v6939_v30  ;;  %v6385_v36 = vadd.f32 %v6315_v2, %v6108_v34  ;;  %v6560_v28 = vsel %vm6490_vm11, %v6557_v27, %v6559_v42  ;;  %v6871_v40 = vrot.slane %v6748_v17, 1 }
 0x7ee   : > { %v7421_v48 = vsel %vm2393_vm9, %v7419_v5, %v7420_v7  ;;  %v7113_v60 = vrot.slane %v6991_v8, 2  ;;  %v7115_v4 = vrot.slane %v6992_v26, 2  ;;  %v7303_v39 = vmul.f32 %v12825_v50, %v13844_v19  ;;  %v6019_v8 = vld [vmem:[#allocation2 + $0xc8] sm:$0x1] }
 0x7ef   : > { %v7251_v45 = vadd.f32 %v7219_v3, %v7183_v53  ;;  %v7665_v24 = vsel %vm6490_vm11, %v7663_v22, %v7664_v1  ;;  %v6630_v13 = vadd.f32 %v6560_v28, %v6385_v36  ;;  %v7304_v56 = vmul.f32 %v12825_v50, %v13846_v49 }
 0x7f0   : > { %v6872_v25 = vsel %vm2393_vm9, %v6869_v14, %v6871_v40  ;;  %v7425_v18 = vrot.slane %v7303_v39, 1  ;;  %v13887_v51 = vmul.f32 %v12843_v55, %v13844_v19  ;;  %v7548_v7 = vmul.f32 %v12843_v55, %v13846_v49 }
 0x7f1   : > { %v7495_v63 = vadd.f32 %v7421_v48, %v7251_v45  ;;  %v6698_v23 = vadd.f32 %v6666_v61, %v6630_v13  ;;  %v7222_v12 = vmul.f32 %v12813_v21, %v13844_v19  ;;  %v7427_v1 = vrot.slane %v7304_v56, 1 }
 0x7f2   : > { %v7116_v20 = vsel %vm6490_vm11, %v7113_v60, %v7115_v4  ;;  %v7669_v3 = vrot.slane %v13887_v51, 2  ;;  %v13895_v15 = vunpack.c.l.bf16 %v6015_v6  ;;  %v6188_v29 = vmul.f32 %v12760_v41, %v13730_v59 }
 0x7f3   : > { %v7739_v44 = vadd.f32 %v7665_v24, %v7495_v63  ;;  %v6942_v5 = vadd.f32 %v6872_v25, %v6698_v23  ;;  %v6107_v11 = vmul.f32 %v12757_v58, %v13730_v59  ;;  %v6433_v22 = vmul.f32 %v12763_v57, %v13730_v59 }
 0x7f4   : > { %v7428_v0 = vsel %vm2393_vm9, %v7425_v18, %v7427_v1  ;;  %v7671_v34 = vrot.slane %v7548_v7, 2  ;;  %v6311_v62 = vrot.slane %v6188_v29, 1  ;;  %v6746_v35 = vmul.f32 %v13813_v10, %v12778_v16 }
 0x7f5   : > { %v7820_v6 = vsel %vm2442_vm10, %v7739_v44, 0.0  ;;  %v7186_v43 = vadd.f32 %v7116_v20, %v6942_v5  ;;  %v6556_v38 = vrot.slane %v6433_v22, 2  ;;  %v6990_v52 = vmul.f32 %v13813_v10, %v12808_v9 }
 0x7f6   : > { %7821 = vadd.xlane.f32.xlu0 %v7820_v6  ;;  %v6313_v61 = vsel %vm2393_vm9, %v6311_v62, %v6312_v54  ;;  %v6665_v59 = vmul.f32 %v13813_v10, %v12792_v32  ;;  %v6868_v47 = vrot.slane %v6746_v35, 1  ;;  %v7302_v37 = vmul.f32 %v12825_v50, %v13895_v15 }
 0x7f7   : > { %v7254_v30 = vadd.f32 %v7222_v12, %v7186_v43  ;;  %v6384_v42 = vadd.f32 %v6313_v61, %v6107_v11  ;;  %v6558_v17 = vsel %vm6490_vm11, %v6556_v38, %v6557_v27  ;;  %v7112_v2 = vrot.slane %v6990_v52, 2 }
 0x7f8   : > { %v7672_v26 = vsel %vm6490_vm11, %v7669_v3, %v7671_v34  ;;  %v7221_v54 = vmul.f32 %v12813_v21, %v13895_v15  ;;  %v7424_v53 = vrot.slane %v7302_v37, 1  ;;  %v7546_v36 = vmul.f32 %v12843_v55, %v13895_v15 }
 0x7f9   : > { %v7498_v28 = vadd.f32 %v7428_v0, %v7254_v30  ;;  %v6629_v40 = vadd.f32 %v6558_v17, %v6384_v42  ;;  %v6870_v48 = vsel %vm2393_vm9, %v6868_v47, %v6869_v14  ;;  %v13923_v4 = vunpack.c.h.bf16 %v9130_v46 }
 0x7fa   : > { %v7114_v27 = vsel %vm6490_vm11, %v7112_v2, %v7113_v60  ;;  %v7426_v39 = vsel %vm2393_vm9, %v7424_v53, %v7425_v18  ;;  %v13927_v45 = vunpack.c.l.bf16 %v6019_v8  ;;  %v6192_v24 = vmul.f32 %v13759_v31, %v12760_v41 }
 0x7fb   : > { %v7742_v13 = vadd.f32 %v7672_v26, %v7498_v28  ;;  %v6697_v56 = vadd.f32 %v6665_v59, %v6629_v40  ;;  %v6193_v25 = vmul.f32 %v12760_v41, %v13761_v33  ;;  %v13935_v7 = vmul.f32 %v13759_v31, %v12763_v57 }
 0x7fc   : > { %v7668_v14 = vrot.slane %v7546_v36, 2  ;;  %v6110_v60 = vmul.f32 %v13759_v31, %v12757_v58  ;;  %v6317_v63 = vrot.slane %v6192_v24, 1  ;;  %v6438_v18 = vmul.f32 %v12763_v57, %v13761_v33 }
 0x7fd   : > { %v7829_v23 = vsel %vm2442_vm10, %v7742_v13, 0.0  ;;  %v6941_v12 = vadd.f32 %v6870_v48, %v6697_v56  ;;  %v6319_v1 = vrot.slane %v6193_v25, 1  ;;  %v6562_v20 = vrot.slane %v13935_v7, 2 }
 0x7fe   : > { %7830 = vadd.xlane.f32.xlu1 %v7829_v23  ;;  %v6564_v29 = vrot.slane %v6438_v18, 2  ;;  %v6750_v44 = vmul.f32 %v12778_v16, %v13844_v19  ;;  %v6751_v5 = vmul.f32 %v12778_v16, %v13846_v49  ;;  %v6994_v31 = vmul.f32 %v12808_v9, %v13844_v19 }
 0x7ff   : > { %v7185_v11 = vadd.f32 %v7114_v27, %v6941_v12  ;;  %v6320_v33 = vsel %vm2393_vm9, %v6317_v63, %v6319_v1  ;;  %v6668_v22 = vmul.f32 %v12792_v32, %v13844_v19  ;;  %v6995_v0 = vmul.f32 %v12808_v9, %v13846_v49 }
 0x800   : > { %v6387_v34 = vadd.f32 %v6320_v33, %v6110_v60  ;;  %v6565_v62 = vsel %vm6490_vm11, %v6562_v20, %v6564_v29  ;;  %v6874_v35 = vrot.slane %v6750_v44, 1  ;;  %v6876_v6 = vrot.slane %v6751_v5, 1  ;;  %v13994_v29 = vld [vmem:[#allocation2 + $0xcc] sm:$0xff]   ;;  %v6022_v33 = vld [vmem:[#allocation2 + $0xd4] sm:$0x1] }
 0x801   : > { %v7253_v43 = vadd.f32 %v7221_v54, %v7185_v11  ;;  %v7118_v38 = vrot.slane %v6994_v31, 2  ;;  %v7120_v52 = vrot.slane %v6995_v0, 2  ;;  %v7306_v61 = vmul.f32 %v13923_v4, %v12825_v50 }
 0x802   : > { %v7670_v59 = vsel %vm6490_vm11, %v7668_v14, %v7669_v3  ;;  %v6632_v47 = vadd.f32 %v6565_v62, %v6387_v34  ;;  %v7307_v37 = vmul.f32 %v12825_v50, %v13927_v45  ;;  %v13964_v30 = vmul.f32 %v13923_v4, %v12843_v55 }
 0x803   : > { %v7497_v42 = vadd.f32 %v7426_v39, %v7253_v43  ;;  %v6877_v17 = vsel %vm2393_vm9, %v6874_v35, %v6876_v6  ;;  %v7430_v2 = vrot.slane %v7306_v61, 1  ;;  %v7551_v8 = vmul.f32 %v12843_v55, %v13927_v45 }
 0x804   : > { %v6700_v26 = vadd.f32 %v6668_v22, %v6632_v47  ;;  %v7121_v51 = vsel %vm6490_vm11, %v7118_v38, %v7120_v52  ;;  %v7224_v3 = vmul.f32 %v13923_v4, %v12813_v21  ;;  %v7432_v54 = vrot.slane %v7307_v37, 1 }
 0x805   : > { %v7741_v53 = vadd.f32 %v7670_v59, %v7497_v42  ;;  %v7674_v36 = vrot.slane %v13964_v30, 2  ;;  %v13973_v28 = vunpack.c.l.bf16 %v9130_v46  ;;  %v6191_v40 = vmul.f32 %v13813_v10, %v12760_v41 }
 0x806   : > { %v6944_v48 = vadd.f32 %v6877_v17, %v6700_v26  ;;  %v7676_v27 = vrot.slane %v7551_v8, 2  ;;  %v6109_v39 = vmul.f32 %v13813_v10, %v12757_v58  ;;  %v6436_v24 = vmul.f32 %v13813_v10, %v12763_v57 }
 0x807   : > { %v7826_v13 = vsel %vm2442_vm10, %v7741_v53, 0.0  ;;  %v7433_v56 = vsel %vm2393_vm9, %v7430_v2, %v7432_v54  ;;  %v6316_v25 = vrot.slane %v6191_v40, 1  ;;  %v6749_v46 = vmul.f32 %v12778_v16, %v13895_v15 }
 0x808   : > { %7827 = vadd.xlane.f32.xlu0 %v7826_v13  ;;  %v7188_v7 = vadd.f32 %v7121_v51, %v6944_v48  ;;  %v6561_v14 = vrot.slane %v6436_v24, 2  ;;  %v6667_v60 = vmul.f32 %v12792_v32, %v13895_v15  ;;  %v6993_v18 = vmul.f32 %v12808_v9, %v13895_v15 }
 0x809   : > { %v6318_v23 = vsel %vm2393_vm9, %v6316_v25, %v6317_v63  ;;  %v6873_v10 = vrot.slane %v6749_v46, 1  ;;  %v7305_v12 = vmul.f32 %v13973_v28, %v12825_v50  ;;  %v7549_v1 = vmul.f32 %v13973_v28, %v12843_v55 }
 0x80a   : > { %v7256_v44 = vadd.f32 %v7224_v3, %v7188_v7  ;;  %v6386_v5 = vadd.f32 %v6318_v23, %v6109_v39  ;;  %v6563_v31 = vsel %vm6490_vm11, %v6561_v14, %v6562_v20  ;;  %v7117_v11 = vrot.slane %v6993_v18, 2 }
 0x80b   : > { %v7677_v22 = vsel %vm6490_vm11, %v7674_v36, %v7676_v27  ;;  %v6875_v63 = vsel %vm2393_vm9, %v6873_v10, %v6874_v35  ;;  %v7223_v0 = vmul.f32 %v13973_v28, %v12813_v21  ;;  %v7429_v34 = vrot.slane %v7305_v12, 1 }
 0x80c   : > { %v7500_v62 = vadd.f32 %v7433_v56, %v7256_v44  ;;  %v6631_v6 = vadd.f32 %v6563_v31, %v6386_v5  ;;  %v7673_v43 = vrot.slane %v7549_v1, 2  ;;  %v6075_v52 = vunpack.c.h.bf16 %v13994_v29 }
 0x80d   : > { %v7119_v61 = vsel %vm6490_vm11, %v7117_v11, %v7118_v38  ;;  %v7431_v20 = vsel %vm2393_vm9, %v7429_v34, %v7430_v2  ;;  %v6076_v59 = vunpack.c.l.bf16 %v6022_v33  ;;  %v6195_v47 = vmul.f32 %v12760_v41, %v13844_v19 }
 0x80e   : > { %v7744_v37 = vadd.f32 %v7677_v22, %v7500_v62  ;;  %v6699_v42 = vadd.f32 %v6667_v60, %v6631_v6  ;;  %v6196_v35 = vmul.f32 %v12760_v41, %v13846_v49  ;;  %v6440_v17 = vmul.f32 %v12763_v57, %v13844_v19 }
 0x80f   : > { %v6112_v8 = vmul.f32 %v12757_v58, %v13844_v19  ;;  %v6322_v26 = vrot.slane %v6195_v47, 1  ;;  %v6441_v38 = vmul.f32 %v12763_v57, %v13846_v49  ;;  %v6753_v2 = vmul.f32 %v13923_v4, %v12778_v16 }
 0x810   : > { %v7835_v51 = vsel %vm2442_vm10, %v7744_v37, 0.0  ;;  %v6943_v3 = vadd.f32 %v6875_v63, %v6699_v42  ;;  %v6324_v54 = vrot.slane %v6196_v35, 1  ;;  %v6567_v53 = vrot.slane %v6440_v17, 2 }
 0x811   : > { %7836 = vadd.xlane.f32.xlu1 %v7835_v51  ;;  %v6569_v40 = vrot.slane %v6441_v38, 2  ;;  %v6670_v48 = vmul.f32 %v13923_v4, %v12792_v32  ;;  %v6754_v19 = vmul.f32 %v12778_v16, %v13927_v45  ;;  %v6997_v27 = vmul.f32 %v13923_v4, %v12808_v9 }
 0x812   : > { %v7187_v49 = vadd.f32 %v7119_v61, %v6943_v3  ;;  %v6325_v39 = vsel %vm2393_vm9, %v6322_v26, %v6324_v54  ;;  %v6879_v24 = vrot.slane %v6753_v2, 1  ;;  %v6998_v13 = vmul.f32 %v12808_v9, %v13927_v45 }
 0x813   : > { %v6389_v56 = vadd.f32 %v6325_v39, %v6112_v8  ;;  %v6570_v25 = vsel %vm6490_vm11, %v6567_v53, %v6569_v40  ;;  %v6881_v46 = vrot.slane %v6754_v19, 1  ;;  %v7123_v7 = vrot.slane %v6997_v27, 2 }
 0x814   : > { %v7255_v14 = vadd.f32 %v7223_v0, %v7187_v49  ;;  %v7125_v60 = vrot.slane %v6998_v13, 2  ;;  %v7309_v18 = vmul.f32 %v12825_v50, %v6075_v52  ;;  %v7310_v23 = vmul.f32 %v12825_v50, %v6076_v59  ;;  %v14655_v13 = vld [vmem:[#allocation10_spill] sm:$0xff] }
 0x815   : > { %v7675_v4 = vsel %vm6490_vm11, %v7673_v43, %v7674_v36  ;;  %v6634_v10 = vadd.f32 %v6570_v25, %v6389_v56  ;;  %v7553_v12 = vmul.f32 %v12843_v55, %v6075_v52  ;;  %v7554_v45 = vmul.f32 %v12843_v55, %v6076_v59  ;;  %v14656_v56 = vld [vmem:[#allocation12_spill] sm:$0xff]  ;;  %v14658_v25 = vld [vmem:[#allocation14_spill] sm:$0xff] }
 0x816   : > { %v7499_v1 = vadd.f32 %v7431_v20, %v7255_v14  ;;  %v6882_v44 = vsel %vm2393_vm9, %v6879_v24, %v6881_v46  ;;  %v7226_v5 = vmul.f32 %v12813_v21, %v6075_v52  ;;  %v7126_v11 = vsel %vm6490_vm11, %v7123_v7, %v7125_v60  ;;  %v14659_v46 = vld [vmem:[#allocation15_spill] sm:$0xff]  ;;  %v14661_v14 = vld [vmem:[#allocation17_spill] sm:$0xff]  ;;  %v14662_v60 = vld [vmem:[#allocation18_spill] sm:$0xff] }
 0x817   : > { %v6702_v31 = vadd.f32 %v6670_v48, %v6634_v10  ;;  %v7435_v33 = vrot.slane %v7309_v18, 1  ;;  %v7437_v22 = vrot.slane %v7310_v23, 1  ;;  %v7679_v0 = vrot.slane %v7553_v12, 2  ;;  %v7756_v18 = vpop.xlane.xlu1 %7755  ;;  %v14663_v23 = vld [vmem:[#allocation19_spill] sm:$0xff]  ;;  %v14665_v12 = vld [vmem:[#allocation21_spill] sm:$0xff] }
 0x818   : > { %v7743_v63 = vadd.f32 %v7675_v4, %v7499_v1  ;;  %v7681_v30 = vrot.slane %v7554_v45, 2  ;;  %v6194_v36 = vmul.f32 %v12760_v41, %v13895_v15  ;;  %v6074_v62 = vunpack.c.l.bf16 %v13994_v29  ;;  %v14664_v4 = vld [vmem:[#allocation20_spill] sm:$0xff]  ;;  %v7750_v45 = vpop.xlane.xlu0 %7749 }
 0x819   : > { %v6946_v34 = vadd.f32 %v6882_v44, %v6702_v31  ;;  %v6111_v6 = vmul.f32 %v12757_v58, %v13895_v15  ;;  %v6439_v43 = vmul.f32 %v12763_v57, %v13895_v15  ;;  %v6752_v20 = vmul.f32 %v13973_v28, %v12778_v16  ;;  %v14666_v44 = vld [vmem:[#allocation22_spill] sm:$0xff]  ;;  %v14667_v31 = vld [vmem:[#allocation23_spill] sm:$0xff] }
 0x81a   : > { %v7832_v52 = vsel %vm2442_vm10, %v7743_v63, 0.0  ;;  %v6321_v61 = vrot.slane %v6194_v36, 1  ;;  %v6996_v59 = vmul.f32 %v13973_v28, %v12808_v9  ;;  %v7438_v29 = vsel %vm2393_vm9, %v7435_v33, %v7437_v22  ;;  %v14670_v36 = vld [vmem:[#allocation34_spill] sm:$0xff] }
 0x81b   : > { %7833 = vadd.xlane.f32.xlu0 %v7832_v52  ;;  %v7190_v41 = vadd.f32 %v7126_v11, %v6946_v34  ;;  %v6566_v47 = vrot.slane %v6439_v43, 2  ;;  %v6878_v58 = vrot.slane %v6752_v20, 1  ;;  %v6669_v15 = vmul.f32 %v13973_v28, %v12792_v32  ;;  %v7759_v10 = vpop.xlane.xlu1 %7758 }
 0x81c   : > { %v6323_v37 = vsel %vm2393_vm9, %v6321_v61, %v6322_v26  ;;  %v7682_v16 = vsel %vm6490_vm11, %v7679_v0, %v7681_v30  ;;  %v7122_v17 = vrot.slane %v6996_v59, 2  ;;  %v7308_v9 = vmul.f32 %v12825_v50, %v6074_v62 }
 0x81d   : > { %v7258_v42 = vadd.f32 %v7226_v5, %v7190_v41  ;;  %v6388_v35 = vadd.f32 %v6323_v37, %v6111_v6  ;;  %v6568_v57 = vsel %vm6490_vm11, %v6566_v47, %v6567_v53  ;;  %v6880_v2 = vsel %vm2393_vm9, %v6878_v58, %v6879_v24  ;;  %v7753_v5 = vpop.xlane.xlu0 %7752 }
 0x81e   : > { %v7552_v51 = vmul.f32 %v12843_v55, %v6074_v62  ;;  %v7124_v54 = vsel %vm6490_vm11, %v7122_v17, %v7123_v7  ;;  %v7434_v40 = vrot.slane %v7308_v9, 1  ;;  %v7225_v32 = vmul.f32 %v12813_v21, %v6074_v62  ;;  %v14657_v21 = vld [vmem:[#allocation13_spill] sm:$0xff]  ;;  %v14660_v7 = vld [vmem:[#allocation16_spill] sm:$0xff] }
 0x81f   : > { %v7502_v8 = vadd.f32 %v7438_v29, %v7258_v42  ;;  %v6633_v38 = vadd.f32 %v6568_v57, %v6388_v35  ;;  %v7765_v1 = vpop.xlane.xlu1 %7764  ;;  %vm8387_vm1 = vcmask 1045509  }
 0x820   : > { %v7678_v28 = vrot.slane %v7552_v51, 2  ;;  %v7436_v50 = vsel %vm2393_vm9, %v7434_v40, %v7435_v33  ;;  %v14668_v33 = vld [vmem:[#allocation24_spill] sm:$0xff] }
 0x821   : > { %v7746_v26 = vadd.f32 %v7682_v16, %v7502_v8  ;;  %v6701_v3 = vadd.f32 %v6669_v15, %v6633_v38  ;;  %v7762_v22 = vpop.xlane.xlu0 %7761 }
 0x822   : > { %v7680_v49 = vsel %vm6490_vm11, %v7678_v28, %v7679_v0  ;;  %v14669_v0 = vld [vmem:[#allocation25_spill] sm:$0xff] }
 0x823   : > { %v7841_v53 = vsel %vm2442_vm10, %v7746_v26, 0.0  ;;  %v6945_v48 = vadd.f32 %v6880_v2, %v6701_v3  ;;  %v7771_v11 = vpop.xlane.xlu1 %7770 }
 0x824   : > { %7842 = vadd.xlane.f32.xlu1 %v7841_v53 }
 0x825   : > { %v7189_v19 = vadd.f32 %v7124_v54, %v6945_v48  ;;  %v7768_v30 = vpop.xlane.xlu0 %7767 }
 0x827   : > { %v7257_v27 = vadd.f32 %v7225_v32, %v7189_v19  ;;  %v7777_v63 = vpop.xlane.xlu1 %7776 }
 0x829   : > { %v7501_v39 = vadd.f32 %v7436_v50, %v7257_v27  ;;  %v7774_v62 = vpop.xlane.xlu0 %7773 }
 0x82b   : > { %v7745_v55 = vadd.f32 %v7680_v49, %v7501_v39  ;;  %v7783_v34 = vpop.xlane.xlu1 %7782 }
 0x82d   : > { %v7838_v24 = vsel %vm2442_vm10, %v7745_v55, 0.0  ;;  %v7780_v43 = vpop.xlane.xlu0 %7779 }
 0x82e   : > { %7839 = vadd.xlane.f32.xlu0 %v7838_v24 }
 0x82f   : > { %v14097_v6 = vpop.xlane.xlu1 %7788 }
 0x831   : > { %v7786_v61 = vpop.xlane.xlu0 %7785 }
 0x833   : > { %v14100_v52 = vpop.xlane.xlu1 %7794 }
 0x835   : > { %7857 = vbcast.lane.b32.xlu1 %v14655_v13, 265  ;;  %v14102_v59 = vpop.xlane.xlu0 %7791 }
 0x837   : > { %v7801_v20 = vpop.xlane.xlu1 %7800 }
 0x839   : > { %7865 = vbcast.lane.b32.xlu1 %v14656_v56, 257  ;;  %v7798_v47 = vpop.xlane.xlu0 %7797 }
 0x83d   : > { %7869 = vbcast.lane.b32.xlu1 %v14656_v56, 265 }
 0x840   : > { %v14104_v41 = vpop.xlane.xlu1 %7806 }
 0x841   : > { %7881 = vbcast.lane.b32.xlu1 %v14657_v21, 265 }
 0x844   : > { %7853 = vbcast.lane.b32.xlu0 %v14655_v13, 257 }
 0x845   : > { %7893 = vbcast.lane.b32.xlu1 %v14658_v25, 265 }
 0x848   : > { %7877 = vbcast.lane.b32.xlu0 %v14657_v21, 257 }
 0x849   : > { %7905 = vbcast.lane.b32.xlu1 %v14659_v46, 265 }
 0x84a   : > { %v14108_v37 = vpop.xlane.xlu0 %7803 }
 0x84c   : > { %7889 = vbcast.lane.b32.xlu0 %v14658_v25, 257 }
 0x84d   : > { %7917 = vbcast.lane.b32.xlu1 %v14660_v7, 265 }
 0x850   : > { %7901 = vbcast.lane.b32.xlu0 %v14659_v46, 257 }
 0x851   : > { %7929 = vbcast.lane.b32.xlu1 %v14661_v14, 265 }
 0x853   : > { %v14106_v29 = vpop.xlane.xlu1 %7812 }
 0x854   : > { %7913 = vbcast.lane.b32.xlu0 %v14660_v7, 257 }
 0x855   : > { %7941 = vbcast.lane.b32.xlu1 %v14662_v60, 265 }
 0x858   : > { %7925 = vbcast.lane.b32.xlu0 %v14661_v14, 257 }
 0x859   : > { %7953 = vbcast.lane.b32.xlu1 %v14663_v23, 265 }
 0x85c   : > { %7937 = vbcast.lane.b32.xlu0 %v14662_v60, 257 }
 0x85d   : > { %7965 = vbcast.lane.b32.xlu1 %v14664_v4, 265  ;;  %v14112_v42 = vpop.xlane.xlu0 %7809 }
 0x860   : > { %7949 = vbcast.lane.b32.xlu0 %v14663_v23, 257 }
 0x861   : > { %7977 = vbcast.lane.b32.xlu1 %v14665_v12, 265 }
 0x864   : > { %7961 = vbcast.lane.b32.xlu0 %v14664_v4, 257 }
 0x865   : > { %7989 = vbcast.lane.b32.xlu1 %v14666_v44, 265 }
 0x866   : > { %v14110_v58 = vpop.xlane.xlu1 %7818 }
 0x868   : > { %7973 = vbcast.lane.b32.xlu0 %v14665_v12, 257 }
 0x869   : > { %8001 = vbcast.lane.b32.xlu1 %v14667_v31, 265 }
 0x86c   : > { %7985 = vbcast.lane.b32.xlu0 %v14666_v44, 257 }
 0x86d   : > { %8013 = vbcast.lane.b32.xlu1 %v14668_v33, 265 }
 0x870   : > { %7997 = vbcast.lane.b32.xlu0 %v14667_v31, 257  ;;  %v14116_v57 = vpop.xlane.xlu0 %7815 }
 0x871   : > { %8025 = vbcast.lane.b32.xlu1 %v14669_v0, 265 }
 0x874   : > { %8009 = vbcast.lane.b32.xlu0 %v14668_v33, 257 }
 0x875   : > { %8037 = vbcast.lane.b32.xlu1 %v14670_v36, 265 }
 0x878   : > { %8021 = vbcast.lane.b32.xlu0 %v14669_v0, 257 }
 0x879   : > { %v14114_v35 = vpop.xlane.xlu1 %7824 }
 0x87c   : > { %8033 = vbcast.lane.b32.xlu0 %v14670_v36, 257 }
 0x883   : > { %v14120_v16 = vpop.xlane.xlu0 %7821 }
 0x88b   : > { %v14118_v15 = vpop.xlane.xlu1 %7830 }
 0x895   : > { %v14124_v9 = vpop.xlane.xlu0 %7827 }
 0x89e   : > { %v14122_v17 = vpop.xlane.xlu1 %7836 }
 0x8a8   : > { %v14128_v38 = vpop.xlane.xlu0 %7833 }
 0x8b1   : > { %v14126_v8 = vpop.xlane.xlu1 %7842 }
 0x8b5   : > { %v7858_v2 = vpop.permute.xlu1 %7857 }
 0x8b6   : > { %v8072_v51 = vadd.f32 %v7858_v2, %v7753_v5 }
 0x8b8   : > { %8139 = vperm.xlu1 %9589, %v8072_v51  }
 0x8b9   : > { %v7866_v26 = vpop.permute.xlu1 %7865 }
 0x8ba   : > { %v8073_v3 = vadd.f32 %v7866_v26, %v7756_v18 }
 0x8bb   : > { %v14130_v54 = vpop.xlane.xlu0 %7839 }
 0x8bc   : > { %8142 = vperm.xlu1 %9589, %v8073_v3  }
 0x8bd   : > { %v7870_v40 = vpop.permute.xlu1 %7869 }
 0x8be   : > { %v8074_v28 = vadd.f32 %v7870_v40, %v7759_v10 }
 0x8bf   : > { %v7854_v53 = vpop.permute.xlu0 %7853 }
 0x8c0   : > { %v8071_v48 = vadd.f32 %v7854_v53, %v7750_v45 }
 0x8c1   : > { %v7882_v32 = vpop.permute.xlu1 %7881 }
 0x8c2   : > { %8136 = vperm.xlu0 %9588, %v8071_v48   ;;  %v8076_v49 = vadd.f32 %v7882_v32, %v7765_v1 }
 0x8c3   : > { %v7878_v19 = vpop.permute.xlu0 %7877 }
 0x8c4   : > { %v8075_v50 = vadd.f32 %v7878_v19, %v7762_v22 }
 0x8c5   : > { %v7894_v27 = vpop.permute.xlu1 %7893 }
 0x8c6   : > { %8145 = vperm.xlu0 %9588, %v8074_v28   ;;  %8148 = vperm.xlu1 %9589, %v8075_v50   ;;  %v8078_v13 = vadd.f32 %v7894_v27, %v7771_v11 }
 0x8c7   : > { %v7890_v39 = vpop.permute.xlu0 %7889 }
 0x8c8   : > { %v8077_v55 = vadd.f32 %v7890_v39, %v7768_v30 }
 0x8c9   : > { %v7906_v24 = vpop.permute.xlu1 %7905 }
 0x8ca   : > { %8151 = vperm.xlu0 %9588, %v8076_v49   ;;  %8154 = vperm.xlu1 %9589, %v8077_v55   ;;  %v8080_v46 = vadd.f32 %v7906_v24, %v7777_v63 }
 0x8cb   : > { %v7902_v56 = vpop.permute.xlu0 %7901 }
 0x8cc   : > { %v8079_v21 = vadd.f32 %v7902_v56, %v7774_v62 }
 0x8cd   : > { %v7918_v25 = vpop.permute.xlu1 %7917 }
 0x8ce   : > { %8157 = vperm.xlu0 %9588, %v8078_v13   ;;  %8160 = vperm.xlu1 %9589, %v8079_v21   ;;  %v8082_v18 = vadd.f32 %v7918_v25, %v7783_v34  ;;  %v14671_v21 = vlaneseq }
 0x8cf   : > { %v7914_v7 = vpop.permute.xlu0 %7913 }
 0x8d0   : > { %v8081_v14 = vadd.f32 %v7914_v7, %v7780_v43  ;;  %v8232_v25 = vand.u32 127, %v14671_v21 }
 0x8d1   : > { %v7930_v60 = vpop.permute.xlu1 %7929 }
 0x8d2   : > { %8163 = vperm.xlu0 %9588, %v8080_v46   ;;  %8166 = vperm.xlu1 %9589, %v8081_v14   ;;  %v8084_v26 = vadd.f32 %v7930_v60, %v14097_v6  ;;  %v8237_v14 = vadd.s32 4294967288, %v8232_v25 }
 0x8d3   : > { %v7926_v23 = vpop.permute.xlu0 %7925 }
 0x8d4   : > { %v8083_v4 = vadd.f32 %v7926_v23, %v7786_v61  ;;  %v14672_v23 = vld [vmem:[#allocation7_spill] sm:$0xff] }
 0x8d5   : > { %v7942_v10 = vpop.permute.xlu1 %7941 }
 0x8d6   : > { %8169 = vperm.xlu0 %9588, %v8082_v18   ;;  %8172 = vperm.xlu1 %9589, %v8083_v4   ;;  %v14161_v4 = vsub.s32 %v8237_v14, %v14672_v23 }
 0x8d7   : > { %v7938_v12 = vpop.permute.xlu0 %7937 }
 0x8d9   : > { %v7954_v45 = vpop.permute.xlu1 %7953 }
 0x8da   : > { %v8088_v1 = vadd.f32 %v7954_v45, %v7801_v20 }
 0x8db   : > { %v7950_v44 = vpop.permute.xlu0 %7949 }
 0x8dc   : > { %v8087_v5 = vadd.f32 %v7950_v44, %v7798_v47  ;;  %8187 = vperm.xlu1 %9589, %v8088_v1  }
 0x8dd   : > { %v7966_v31 = vpop.permute.xlu1 %7965 }
 0x8de   : > { %8184 = vperm.xlu0 %9588, %v8087_v5   ;;  %v8090_v11 = vadd.f32 %v7966_v31, %v14104_v41 }
 0x8df   : > { %v7962_v33 = vpop.permute.xlu0 %7961 }
 0x8e0   : > { %v8089_v22 = vadd.f32 %v7962_v33, %v14108_v37  ;;  %8193 = vperm.xlu1 %9589, %v8090_v11  }
 0x8e1   : > { %v7978_v63 = vpop.permute.xlu1 %7977 }
 0x8e2   : > { %8190 = vperm.xlu0 %9588, %v8089_v22   ;;  %v8092_v0 = vadd.f32 %v7978_v63, %v14106_v29 }
 0x8e3   : > { %v7974_v30 = vpop.permute.xlu0 %7973 }
 0x8e4   : > { %v8091_v36 = vadd.f32 %v7974_v30, %v14112_v42  ;;  %8199 = vperm.xlu1 %9589, %v8092_v0  }
 0x8e5   : > { %v7990_v34 = vpop.permute.xlu1 %7989 }
 0x8e6   : > { %8196 = vperm.xlu0 %9588, %v8091_v36   ;;  %v8094_v62 = vadd.f32 %v7990_v34, %v14110_v58 }
 0x8e7   : > { %v7986_v43 = vpop.permute.xlu0 %7985 }
 0x8e8   : > { %v8093_v61 = vadd.f32 %v7986_v43, %v14116_v57  ;;  %8205 = vperm.xlu1 %9589, %v8094_v62  }
 0x8e9   : > { %v8002_v20 = vpop.permute.xlu1 %8001 }
 0x8ea   : > { %8202 = vperm.xlu0 %9588, %v8093_v61   ;;  %v8096_v41 = vadd.f32 %v8002_v20, %v14114_v35 }
 0x8eb   : > { %v7998_v47 = vpop.permute.xlu0 %7997 }
 0x8ec   : > { %v8095_v37 = vadd.f32 %v7998_v47, %v14120_v16  ;;  %8211 = vperm.xlu1 %9589, %v8096_v41   ;;  %v8085_v16 = vadd.f32 %v7938_v12, %v14102_v59 }
 0x8ed   : > { %v8014_v29 = vpop.permute.xlu1 %8013 }
 0x8ee   : > { %8208 = vperm.xlu0 %9588, %v8095_v37   ;;  %v8098_v42 = vadd.f32 %v8014_v29, %v14118_v15  ;;  %v8086_v15 = vadd.f32 %v7942_v10, %v14100_v52  ;;  %v14164_v10 = vsub.s32 %v8232_v25, %v14672_v23 }
 0x8ef   : > { %v8010_v2 = vpop.permute.xlu0 %8009 }
 0x8f0   : > { %v8097_v51 = vadd.f32 %v8010_v2, %v14124_v9  ;;  %8217 = vperm.xlu1 %9589, %v8098_v42  }
 0x8f1   : > { %v8026_v57 = vpop.permute.xlu1 %8025 }
 0x8f2   : > { %8214 = vperm.xlu0 %9588, %v8097_v51   ;;  %v8100_v35 = vadd.f32 %v8026_v57, %v14122_v17 }
 0x8f3   : > { %v8022_v58 = vpop.permute.xlu0 %8021 }
 0x8f4   : > { %v8099_v3 = vadd.f32 %v8022_v58, %v14128_v38 }
 0x8f5   : > { %v8038_v53 = vpop.permute.xlu1 %8037 }
 0x8f6   : > { %8175 = vperm.xlu0 %9588, %v8084_v26   ;;  %8220 = vperm.xlu1 %9589, %v8099_v3   ;;  %v8102_v6 = vadd.f32 %v8038_v53, %v14126_v8 }
 0x8f7   : > { %v8034_v40 = vpop.permute.xlu0 %8033 }
 0x8f8   : > { %v8101_v9 = vadd.f32 %v8034_v40, %v14130_v54 }
 0x8fa   : > { %8223 = vperm.xlu0 %9588, %v8100_v35   ;;  %8178 = vperm.xlu1 %9589, %v8085_v16  }
 0x8fe   : > { %8181 = vperm.xlu0 %9588, %v8086_v15   ;;  %8226 = vperm.xlu1 %9589, %v8101_v9  }
 0x902   : > { %8229 = vperm.xlu0 %9588, %v8102_v6  }
 0x937   : > { %v8140_v38 = vpop.permute.xlu1 %8139 }
 0x938   : > { %v8241_v5 = vrot.slane %v8140_v38, %v14161_v4 }
 0x93b   : > { %v8143_v48 = vpop.permute.xlu1 %8142 }
 0x93c   : > { %v8247_v11 = vrot.slane %v8143_v48, %v14164_v10 }
 0x941   : > { %v8137_v32 = vpop.permute.xlu0 %8136 }
 0x942   : > { %v8236_v31 = vrot.slane %v8137_v32, %v14164_v10 }
 0x944   : > { %v8243_v62 = vsel %vm8242_vm12, %v8241_v5, %v8236_v31 }
 0x945   : > { %v8149_v17 = vpop.permute.xlu1 %8148  ;;  %v8146_v28 = vpop.permute.xlu0 %8145 }
 0x946   : > { %v8251_v45 = vrot.slane %v8146_v28, %v14161_v4  ;;  %v8256_v33 = vrot.slane %v8149_v17, %v14164_v10 }
 0x948   : > { %v8252_v0 = vsel %vm8242_vm12, %v8251_v45, %v8247_v11 }
 0x949   : > { %v8155_v19 = vpop.permute.xlu1 %8154  ;;  %v8152_v59 = vpop.permute.xlu0 %8151  ;;  %v8380_v43 = vsel %vm8379_vm13, %v8252_v0, %v8243_v62 }
 0x94a   : > { %v8260_v1 = vrot.slane %v8152_v59, %v14161_v4  ;;  %v8265_v30 = vrot.slane %v8155_v19, %v14164_v10 }
 0x94c   : > { %v8261_v36 = vsel %vm8242_vm12, %v8260_v1, %v8256_v33 }
 0x94d   : > { %v8161_v50 = vpop.permute.xlu1 %8160  ;;  %v8158_v27 = vpop.permute.xlu0 %8157  ;;  %v8382_v37 = vsel %vm8381_vm14, %v8261_v36, %v8380_v43 }
 0x94e   : > { %v8269_v22 = vrot.slane %v8158_v27, %v14161_v4  ;;  %v8274_v61 = vrot.slane %v8161_v50, %v14164_v10 }
 0x950   : > { %v8270_v20 = vsel %vm8242_vm12, %v8269_v22, %v8265_v30 }
 0x951   : > { %v14149_v49 = vpop.permute.xlu1 %8166  ;;  %v8164_v52 = vpop.permute.xlu0 %8163  ;;  %v8384_v58 = vsel %vm8383_vm15, %v8270_v20, %v8382_v37 }
 0x952   : > { %v8278_v34 = vrot.slane %v8164_v52, %v14161_v4  ;;  %v8283_v26 = vrot.slane %v14149_v49, %v14164_v10 }
 0x954   : > { %v8279_v29 = vsel %vm8242_vm12, %v8278_v34, %v8274_v61 }
 0x955   : > { %v14151_v39 = vpop.permute.xlu1 %8172  ;;  %v8170_v54 = vpop.permute.xlu0 %8169  ;;  %v8386_v9 = vsel %vm8385_vm0, %v8279_v29, %v8384_v58 }
 0x956   : > { %v8287_v42 = vrot.slane %v8170_v54, %v14161_v4  ;;  %v8292_v53 = vrot.slane %v14151_v39, %v14164_v10 }
 0x958   : > { %v8288_v48 = vsel %vm8242_vm12, %v8287_v42, %v8283_v26 }
 0x959   : > { %v8388_v25 = vsel %vm8387_vm1, %v8288_v48, %v8386_v9 }
 0x95b   : > { %v8188_v55 = vpop.permute.xlu1 %8187 }
 0x95c   : > { %v8314_v2 = vrot.slane %v8188_v55, %v14161_v4 }
 0x95d   : > { %v8185_v24 = vpop.permute.xlu0 %8184 }
 0x95e   : > { %v8310_v3 = vrot.slane %v8185_v24, %v14164_v10 }
 0x95f   : > { %v8194_v13 = vpop.permute.xlu1 %8193 }
 0x960   : > { %v8323_v51 = vrot.slane %v8194_v13, %v14161_v4  ;;  %v8315_v32 = vsel %vm8242_vm12, %v8314_v2, %v8310_v3 }
 0x961   : > { %v8191_v8 = vpop.permute.xlu0 %8190 }
 0x962   : > { %v8319_v35 = vrot.slane %v8191_v8, %v14164_v10 }
 0x963   : > { %v8200_v56 = vpop.permute.xlu1 %8199 }
 0x964   : > { %v8332_v57 = vrot.slane %v8200_v56, %v14161_v4  ;;  %v8324_v17 = vsel %vm8242_vm12, %v8323_v51, %v8319_v35 }
 0x965   : > { %v8197_v46 = vpop.permute.xlu0 %8196  ;;  %v8393_v13 = vsel %vm8379_vm13, %v8324_v17, %v8315_v32 }
 0x966   : > { %v8328_v6 = vrot.slane %v8197_v46, %v14164_v10 }
 0x967   : > { %v14154_v7 = vpop.permute.xlu1 %8205 }
 0x968   : > { %v8341_v38 = vrot.slane %v14154_v7, %v14161_v4  ;;  %v8333_v59 = vsel %vm8242_vm12, %v8332_v57, %v8328_v6 }
 0x969   : > { %v14156_v60 = vpop.permute.xlu0 %8202  ;;  %v8394_v46 = vsel %vm8381_vm14, %v8333_v59, %v8393_v13 }
 0x96a   : > { %v8337_v19 = vrot.slane %v14156_v60, %v14164_v10 }
 0x96b   : > { %v14158_v18 = vpop.permute.xlu1 %8211 }
 0x96c   : > { %v8350_v28 = vrot.slane %v14158_v18, %v14161_v4  ;;  %v8342_v8 = vsel %vm8242_vm12, %v8341_v38, %v8337_v19 }
 0x96d   : > { %v14166_v12 = vpop.permute.xlu0 %8208 }
 0x96e   : > { %v8346_v49 = vrot.slane %v14166_v12, %v14164_v10  ;;  %v8395_v12 = vsel %vm8383_vm15, %v8342_v8, %v8394_v46 }
 0x96f   : > { %v14170_v44 = vpop.permute.xlu1 %8217 }
 0x970   : > { %v8359_v50 = vrot.slane %v14170_v44, %v14161_v4  ;;  %v8351_v7 = vsel %vm8242_vm12, %v8350_v28, %v8346_v49 }
 0x971   : > { %v8215_v63 = vpop.permute.xlu0 %8214  ;;  %v8396_v5 = vsel %vm8385_vm0, %v8351_v7, %v8395_v12 }
 0x972   : > { %v8355_v56 = vrot.slane %v8215_v63, %v14164_v10 }
 0x974   : > { %v8360_v60 = vsel %vm8242_vm12, %v8359_v50, %v8355_v56 }
 0x975   : > { %v8176_v41 = vpop.permute.xlu0 %8175  ;;  %v8221_v47 = vpop.permute.xlu1 %8220 }
 0x976   : > { %v8296_v16 = vrot.slane %v8176_v41, %v14161_v4  ;;  %v8364_v39 = vrot.slane %v8221_v47, %v14164_v10 }
 0x978   : > { %v8297_v52 = vsel %vm8242_vm12, %v8296_v16, %v8292_v53 }
 0x979   : > { %v8224_v40 = vpop.permute.xlu0 %8223  ;;  %v8179_v15 = vpop.permute.xlu1 %8178  ;;  %v8390_v14 = vsel %vm8389_vm2, %v8297_v52, %v8388_v25 }
 0x97a   : > { %v8301_v27 = vrot.slane %v8179_v15, %v14164_v10  ;;  %v8368_v54 = vrot.slane %v8224_v40, %v14161_v4 }
 0x97c   : > { %v8369_v45 = vsel %vm8242_vm12, %v8368_v54, %v8364_v39 }
 0x97d   : > { %v8182_v55 = vpop.permute.xlu0 %8181  ;;  %v8227_v24 = vpop.permute.xlu1 %8226 }
 0x97e   : > { %v8305_v21 = vrot.slane %v8182_v55, %v14161_v4  ;;  %v8373_v23 = vrot.slane %v8227_v24, %v14164_v10  ;;  %v8397_v10 = vsel %vm8387_vm1, %v8360_v60, %v8396_v5 }
 0x97f   : > { %v8398_v11 = vsel %vm8389_vm2, %v8369_v45, %v8397_v10 }
 0x980   : > { %v8306_v18 = vsel %vm8242_vm12, %v8305_v21, %v8301_v27 }
 0x981   : > { %v8392_v1 = vsel %vm8391_vm3, %v8306_v18, %v8390_v14  ;;  %v8230_v44 = vpop.permute.xlu0 %8229 }
 0x982   : > { %8403 = vst.msk [vmem:[%s11473_s14] sm:$0xff] %vm8402_vm4, %v8392_v1  ;;  %v8377_v31 = vrot.slane %v8230_v44, %v14161_v4 }
 0x984   : > { %v8378_v33 = vsel %vm8242_vm12, %v8377_v31, %v8373_v23 }
 0x985   : > { %v8399_v22 = vsel %vm8391_vm3, %v8378_v33, %v8398_v11 }
 0x986   : > { %8404 = vst.msk [vmem:[%s11473_s14 + $0x8] sm:$0xff] %vm8402_vm4, %v8399_v22 }
 0x987   : > { %9603 = shalt.err (!%p9600_p4)
}
 0x988   : > { %s9604_s12 = scalar_lea.hbm %s14243_s20, 256  ;;  %s9608_s5 = scalar_lea.hbm %s14299_s4, 512 }
 0x989   : > { %p9605_p7 = scmp.ne.s32.totalorder %s14243_s20, %s9604_s12  ;;  %p9609_p10 = scmp.lt.u32.totalorder %s14243_s20, %s14299_s4 }
 0x98a   : > { %p9610_p11 = scmp.lt.u32.totalorder %s9608_s5, %s9604_s12  ;;  %p9612_p13 = scmp.lt.u32.totalorder %s9604_s12, %s14243_s20 }
 0x98b   : > { %p9606_p8 = pnand %p9605_p7, %p9731_p5 }
 0x98c   : > { %p9611_p12 = por %p9610_p11, %p9609_p10 }
 0x98d   : > { %p9607_p9 = pneg %p9606_p8 }
 0x98e   : > { %p9613_p0 = por %p9612_p13, %p9611_p12 }
 0x990   : > { %p9614_p1 = pnand %p9613_p0, %p9607_p9 }
 0x992   : > { %9617 = shalt.err (!%p9614_p1)
}
 0x993   : > { %s9666_s8 = smov 128   ;;  %s9667_s9 = smov 8  }
 0x994   : > { %9388 = dma.vmem_to_hbm [thread:$0]  (%p9731_p5), %s14245_s11, 256, %s14243_s20, %s14254_s22, %s9666_s8, %s9666_s8, %s9667_s9  }
 0x995 PF: > { %p9394_p2 = scmp.ge.s32.totalorder %s9656_s18, 2  ;;  %s8434_s10 = sand.u32 1, %s9644_s15  }
 0x996   : > { %s8435_s13 = scalar_lea.sflag [#allocation5], %s8434_s10 }
 0x997   : > { %p9391_p3 = pnand %p9394_p2, %p9735_p6 }
 0x999   : > { %9639 = dma.done.wait (!%p9391_p3), %s8435_s13, 256  }
 0x99a   : > { %9641 = vsyncadd (!%p9391_p3), %s8435_s13, 4294967040  ;;  %p14_p4 = scmp.ge.s32.totalorder %s9718_s21, 4   ;;  %s14673_s15 = smov %s9648_s16 }
 0x99b   : > { %s14674_s16 = smov %s9652_s17  ;;  %s14675_s17 = smov %s9729_s24 }
 0x99c   : > { %s14676_s18 = smov %s9718_s21  ;;  %16 = sbr.rel (!%p14_p4) target bundleno = 3 (0x3), region = 97 }
 0x9a3   :  { %8440 = vsyncpa [#allocation5], 1 }
 0x9a4   :  { %8442 = vsyncpa [#allocation5 + $0x1], 1 }

</bundles_post_ra>
